<compile_context>
chip_gen: v7x
topology: tpu7x:2x2x1
jax: 0.10.0
libtpu: 0.0.40
codegen_flags: <defaults>
</compile_context>

<pallas_src>
import functools

import jax
import jax.numpy as jnp
from jax.experimental import pallas as pl
from jax.experimental.pallas import tpu as pltpu


def _round_up(a, m):
    return ((a + m - 1) // m) * m


def _pad2(a, rows, cols):
    r, c = a.shape
    return jnp.pad(a, ((0, rows - r), (0, cols - c)))


def _nerf_rgb_kernel(D, skips, x_ref, wp_ref, wh_ref, b_ref, wout_ref, bout_ref,
                     out_ref):
    """One batch tile of the NeRF MLP (use_viewdirs=False).

    x_ref:    (bn, C)              f32   raw positional features (C = input_ch)
    wp_ref:   (n_wp, C, W_pad)     f32   layer-0 weight + pts-part of skip layers
    wh_ref:   (D-1, W_pad, W_pad)  bf16  hidden (h-part) weights, layers 1..D-1
    b_ref:    (D, W_pad)           f32   hidden biases
    wout_ref: (W_pad, OUT_pad)     bf16  output weight
    bout_ref: (1, OUT_pad)         f32   output bias
    out_ref:  (bn, OUT_pad)               lane-dense output tile
    """
    x = x_ref[...]                                   # (bn, C) f32
    n, C = x.shape
    Wp = wh_ref.shape[-1]
    x_cols = [x[:, c:c + 1] for c in range(C)]       # hoisted (bn,1) lane slices

    def add_pts(acc, wp):                            # wp: (C, Wp) f32 value
        # VPU outer-product: acc += x[:, c] * wp[c]; keeps the tiny C-wide
        # contraction off the MXU (would be >95% padding at C=3) and needs no
        # lane-padded pts operand.  Runs on VALU slots -> hidden under MXU work.
        for c in range(C):
            acc = acc + x_cols[c] * wp[c:c + 1, :]
        return acc

    h = None
    wp_idx = 0
    for i in range(D):
        if i == 0:
            acc = add_pts(jnp.zeros((n, Wp), jnp.float32), wp_ref[wp_idx])
            wp_idx += 1
        else:
            acc = jnp.dot(h, wh_ref[i - 1], preferred_element_type=jnp.float32)
            if (i - 1) in skips:
                # Layer consumes cat([pts, h]) -> split-weight form, no concat.
                acc = add_pts(acc, wp_ref[wp_idx])
                wp_idx += 1
        acc = acc + b_ref[i:i + 1, :]                            # f32 bias add
        h = jnp.maximum(acc, 0.0).astype(jnp.bfloat16)           # f32 ReLU -> bf16

    out = jnp.dot(h, wout_ref[...], preferred_element_type=jnp.float32) + bout_ref[...]
    out_ref[...] = out.astype(out_ref.dtype)


def _prep_params(params, *, D, W, input_ch, skips, W_pad, OUT_pad):
    """Pad / split / stack the logical parameters into the kernel's layout."""
    wp, wh, bs = [], [], []
    for i in range(D):
        w, b = params["pts"][i]                      # w: (in_i, W), b: (1, W)
        if i == 0:
            wp.append(_pad2(w, input_ch, W_pad).astype(jnp.float32))
        elif (i - 1) in skips:
            # PyTorch layer input is cat([pts, h]); rows [0:input_ch] hit pts,
            # rows [input_ch:] hit h.  Split and store each part separately.
            wp.append(_pad2(w[:input_ch], input_ch, W_pad).astype(jnp.float32))
            wh.append(_pad2(w[input_ch:], W_pad, W_pad).astype(jnp.bfloat16))
        else:
            wh.append(_pad2(w, W_pad, W_pad).astype(jnp.bfloat16))
        bs.append(jnp.pad(b.reshape(-1), (0, W_pad - W)).astype(jnp.float32))

    w_out, b_out = params["out"]                     # (W, output_ch), (1, output_ch)
    return (jnp.stack(wp),                           # (n_wp, input_ch, W_pad) f32
            jnp.stack(wh),                           # (D-1, W_pad, W_pad)     bf16
            jnp.stack(bs),                           # (D, W_pad)              f32
            _pad2(w_out, W_pad, OUT_pad).astype(jnp.bfloat16),
            _pad2(b_out, 1, OUT_pad).astype(jnp.float32))


def _estimate_vmem_bytes(bn, input_ch, W_pad, OUT_pad, D, n_wp):
    """Rough per-step VMEM footprint (double-buffered blocks + live activations)."""
    blocks = 2 * bn * input_ch * 4                            # x tile
    blocks += 2 * bn * OUT_pad * 4                            # out tile (worst case f32)
    blocks += 2 * ((D - 1) * W_pad * W_pad * 2 + W_pad * OUT_pad * 2)   # bf16 weights
    blocks += 2 * (D * W_pad * 4 + n_wp * input_ch * W_pad * 4 + OUT_pad * 4)
    act = 2 * bn * W_pad * (4 + 2)                            # acc f32 + h bf16 (+slack)
    return blocks + act


def nerf_rgb_forward(x, params, *, D, W, input_ch, input_ch_views, output_ch,
                     skips=(4,), block_n=2048, out_dtype=jnp.bfloat16):
    N, C = x.shape
    assert C == input_ch + input_ch_views
    assert D >= 2, "D >= 2 expected (module default is 8)"
    skips = tuple(skips)

    W_pad = _round_up(W, 128)            # lane-padded hidden width
    OUT_pad = _round_up(output_ch, 128)  # lane-dense output width (unmasked stores)

    # Batch tile: multiple of 16 (bf16 sublane packing); large by default to bury the
    # per-grid-step overhead; clamped so grid >= 2 steps (two v7x TensorCores busy).
    bn = _round_up(min(block_n, _round_up(N, 16)), 16)
    if N > 256 and _round_up(N, bn) // bn < 2:
        bn = _round_up((N + 1) // 2, 16)
    N_pad = _round_up(N, bn)
    grid = N_pad // bn

    # Only the pts slice feeds this path; keep it at its natural (N, input_ch) f32
    # width (no wrapper-side 128-lane pad), pad rows only to a tile multiple.
    pts = x[:, :input_ch].astype(jnp.float32)
    pts = jnp.pad(pts, ((0, N_pad - N), (0, 0)))

    wp, wh, b, w_out, b_out = _prep_params(
        params, D=D, W=W, input_ch=input_ch, skips=skips, W_pad=W_pad, OUT_pad=OUT_pad)

    in_specs = [
        pl.BlockSpec((bn, input_ch), lambda i: (i, 0)),     # tiled along the batch
        pl.BlockSpec(wp.shape, lambda i: (0, 0, 0)),        # small invariant weights
        pl.BlockSpec(wh.shape, lambda i: (0, 0, 0)),
        pl.BlockSpec(b.shape, lambda i: (0, 0)),
        pl.BlockSpec(w_out.shape, lambda i: (0, 0)),
        pl.BlockSpec(b_out.shape, lambda i: (0, 0)),
    ]

    compiler_kwargs = dict(dimension_semantics=("parallel",))
    vmem_est = _estimate_vmem_bytes(bn, input_ch, W_pad, OUT_pad, D, wp.shape[0])
    if vmem_est > (8 << 20):
        # Large tiles can trip the default scoped-VMEM limit (16 MiB on v5e); request
        # an explicit cap, kept <= 64 MiB so it stays within v7x physical VMEM too.
        compiler_kwargs["vmem_limit_bytes"] = min(int(1.5 * vmem_est) + (16 << 20),
                                                  64 * 1024 * 1024)

    kernel = functools.partial(_nerf_rgb_kernel, D, skips)
    out_pad = pl.pallas_call(
        kernel,
        out_shape=jax.ShapeDtypeStruct((N_pad, OUT_pad), out_dtype),
        grid=(grid,),
        in_specs=in_specs,
        out_specs=pl.BlockSpec((bn, OUT_pad), lambda i: (i, 0)),
        compiler_params=pltpu.CompilerParams(**compiler_kwargs),
    )(pts, wp, wh, b, w_out, b_out)

    # Slice the useful lanes / real rows; return f32 for module-interface parity.
    return out_pad[:N, :output_ch].astype(jnp.float32)


def init_nerf_rgb_params(key, *, D, W, input_ch, output_ch, skips=(4,),
                         dtype=jnp.float32):
    """Deterministic synthetic parameters. Weights stored as [in_features, out_features]."""
    params = {"pts": []}
    keys = jax.random.split(key, D + 1)

    # pts_linears: layer 0 is (input_ch -> W); layer j>=1 is (W + input_ch -> W) iff
    # (j-1) in skips else (W -> W)   [matches the nn.ModuleList construction].
    in_dims = [input_ch] + [
        (W + input_ch) if (j - 1) in skips else W for j in range(1, D)
    ]
    for j in range(D):
        fan_in = in_dims[j]
        kw, kb = jax.random.split(keys[j])
        w = jax.random.normal(kw, (fan_in, W), dtype) * (1.0 / jnp.sqrt(fan_in))
        b = jax.random.normal(kb, (1, W), dtype) * 0.01
        params["pts"].append((w, b))

    kw, kb = jax.random.split(keys[D])
    w_out = jax.random.normal(kw, (W, output_ch), dtype) * (1.0 / jnp.sqrt(W))
    b_out = jax.random.normal(kb, (1, output_ch), dtype) * 0.01
    params["out"] = (w_out, b_out)
    return params


def nerf_rgb_reference(x, params, *, D, input_ch, skips=(4,)):
    """Pure-JAX reference mirroring the PyTorch forward (use_viewdirs=False) with the
    same mixed precision the kernel uses (f32 pts path, bf16 hidden matmuls, f32 acc)."""
    skips = tuple(skips)
    pts = x[:, :input_ch].astype(jnp.float32)
    h = None
    for i in range(D):
        w, b = params["pts"][i]
        if i == 0:
            acc = jnp.dot(pts, w.astype(jnp.float32))
        elif (i - 1) in skips:
            w_pts, w_h = w[:input_ch], w[input_ch:]
            acc = jnp.dot(h, w_h.astype(jnp.bfloat16),
                          preferred_element_type=jnp.float32)
            acc = acc + jnp.dot(pts, w_pts.astype(jnp.float32))
        else:
            acc = jnp.dot(h, w.astype(jnp.bfloat16),
                          preferred_element_type=jnp.float32)
        acc = acc + b.astype(jnp.float32)
        h = jnp.maximum(acc, 0.0).astype(jnp.bfloat16)
    w_out, b_out = params["out"]
    return (jnp.dot(h, w_out.astype(jnp.bfloat16), preferred_element_type=jnp.float32)
            + b_out.astype(jnp.float32))


if __name__ == "__main__":
    # Small-shape config consistent with the module's forward.
    D = 8
    W = 32                  # hidden width (module default 256; small for test — padded to 128 internally)
    input_ch = 3
    input_ch_views = 3
    output_ch = 4
    skips = (4,)
    N = 1000                # ragged; bn auto-clamps to 512 -> grid = 2 (both v7x TCs busy)

    key = jax.random.PRNGKey(0)
    k_x, k_p = jax.random.split(key)

    x = jax.random.normal(k_x, (N, input_ch + input_ch_views), jnp.float32)
    params = init_nerf_rgb_params(
        k_p, D=D, W=W, input_ch=input_ch, output_ch=output_ch, skips=skips
    )

    out = nerf_rgb_forward(
        x, params, D=D, W=W, input_ch=input_ch, input_ch_views=input_ch_views,
        output_ch=output_ch, skips=skips,
    )
    out = jax.block_until_ready(out)

    ref = nerf_rgb_reference(x, params, D=D, input_ch=input_ch, skips=skips)
    assert out.shape == (N, output_ch)
    # Output is written back in bf16 (bandwidth); tolerance covers the ~0.4% rounding.
    assert jnp.allclose(out, ref, atol=3e-3, rtol=3e-3), "Pallas kernel mismatch vs reference"

    print("KERNEL_OK")
</pallas_src>

<mosaic_0001>
module attributes {stable_mosaic.version = 11 : i64} {
  func.func @_nerf_rgb_kernel(%arg0: i32, %arg1: memref<512x3xf32, #tpu.memory_space<vmem>>, %arg2: memref<2x3x128xf32, #tpu.memory_space<vmem>>, %arg3: memref<7x128x128xbf16, #tpu.memory_space<vmem>>, %arg4: memref<8x128xf32, #tpu.memory_space<vmem>>, %arg5: memref<128x128xbf16, #tpu.memory_space<vmem>>, %arg6: memref<1x128xf32, #tpu.memory_space<vmem>>, %arg7: memref<512x128xbf16, #tpu.memory_space<vmem>>) attributes {dimension_semantics = [#tpu.dimension_semantics<parallel>], iteration_bounds = array<i64: 2>, scalar_prefetch = 0 : i64, scratch_operands = 0 : i64, tpu.core_type = #tpu.core_type<tc>, window_params = [{transform_indices = @transform_0, window_bounds = array<i64: 512, 3>}, {pipeline_mode = #tpu.pipeline_mode<synchronous>, transform_indices = @transform_1, window_bounds = array<i64: 2, 3, 128>}, {pipeline_mode = #tpu.pipeline_mode<synchronous>, transform_indices = @transform_2, window_bounds = array<i64: 7, 128, 128>}, {pipeline_mode = #tpu.pipeline_mode<synchronous>, transform_indices = @transform_3, window_bounds = array<i64: 8, 128>}, {pipeline_mode = #tpu.pipeline_mode<synchronous>, transform_indices = @transform_4, window_bounds = array<i64: 128, 128>}, {pipeline_mode = #tpu.pipeline_mode<synchronous>, transform_indices = @transform_5, window_bounds = array<i64: 1, 128>}, {transform_indices = @transform_6, window_bounds = array<i64: 512, 128>}]} {
    %c0 = arith.constant 0 : index
    %c0_0 = arith.constant 0 : index
    %0 = vector.load %arg1[%c0, %c0_0] : memref<512x3xf32, #tpu.memory_space<vmem>>, vector<512x3xf32>
    %1 = vector.extract_strided_slice %0 {offsets = [0, 0], sizes = [512, 1], strides = [1, 1]} : vector<512x3xf32> to vector<512x1xf32>
    %2 = vector.extract_strided_slice %0 {offsets = [0, 1], sizes = [512, 1], strides = [1, 1]} : vector<512x3xf32> to vector<512x1xf32>
    %3 = vector.extract_strided_slice %0 {offsets = [0, 2], sizes = [512, 1], strides = [1, 1]} : vector<512x3xf32> to vector<512x1xf32>
    %cst = arith.constant 0.000000e+00 : f32
    %4 = vector.broadcast %cst : f32 to vector<512x128xf32>
    %c0_1 = arith.constant 0 : index
    %c0_2 = arith.constant 0 : index
    %c0_3 = arith.constant 0 : index
    %5 = vector.load %arg2[%c0_1, %c0_2, %c0_3] : memref<2x3x128xf32, #tpu.memory_space<vmem>>, vector<1x3x128xf32>
    %6 = vector.shape_cast %5 : vector<1x3x128xf32> to vector<3x128xf32>
    %7 = vector.extract_strided_slice %6 {offsets = [0, 0], sizes = [1, 128], strides = [1, 1]} : vector<3x128xf32> to vector<1x128xf32>
    %8 = vector.broadcast %1 : vector<512x1xf32> to vector<512x128xf32>
    %9 = vector.broadcast %7 : vector<1x128xf32> to vector<512x128xf32>
    %10 = arith.mulf %8, %9 : vector<512x128xf32>
    %11 = arith.addf %4, %10 : vector<512x128xf32>
    %12 = vector.extract_strided_slice %6 {offsets = [1, 0], sizes = [1, 128], strides = [1, 1]} : vector<3x128xf32> to vector<1x128xf32>
    %13 = vector.broadcast %2 : vector<512x1xf32> to vector<512x128xf32>
    %14 = vector.broadcast %12 : vector<1x128xf32> to vector<512x128xf32>
    %15 = arith.mulf %13, %14 : vector<512x128xf32>
    %16 = arith.addf %11, %15 : vector<512x128xf32>
    %17 = vector.extract_strided_slice %6 {offsets = [2, 0], sizes = [1, 128], strides = [1, 1]} : vector<3x128xf32> to vector<1x128xf32>
    %18 = vector.broadcast %3 : vector<512x1xf32> to vector<512x128xf32>
    %19 = vector.broadcast %17 : vector<1x128xf32> to vector<512x128xf32>
    %20 = arith.mulf %18, %19 : vector<512x128xf32>
    %21 = arith.addf %16, %20 : vector<512x128xf32>
    %c0_4 = arith.constant 0 : index
    %c0_5 = arith.constant 0 : index
    %22 = vector.load %arg4[%c0_4, %c0_5] : memref<8x128xf32, #tpu.memory_space<vmem>>, vector<1x128xf32>
    %23 = vector.broadcast %22 : vector<1x128xf32> to vector<512x128xf32>
    %24 = arith.addf %21, %23 : vector<512x128xf32>
    %cst_6 = arith.constant 0.000000e+00 : f32
    %25 = vector.broadcast %cst_6 : f32 to vector<512x128xf32>
    %26 = arith.maximumf %24, %25 : vector<512x128xf32>
    %27 = arith.truncf %26 : vector<512x128xf32> to vector<512x128xbf16>
    %c0_7 = arith.constant 0 : index
    %c0_8 = arith.constant 0 : index
    %c0_9 = arith.constant 0 : index
    %28 = vector.load %arg3[%c0_7, %c0_8, %c0_9] : memref<7x128x128xbf16, #tpu.memory_space<vmem>>, vector<1x128x128xbf16>
    %29 = vector.shape_cast %28 : vector<1x128x128xbf16> to vector<128x128xbf16>
    %cst_10 = arith.constant dense<0.000000e+00> : vector<512x128xf32>
    %30 = tpu.matmul %27, %29, %cst_10 {dimension_numbers = #tpu.dot_dimension_numbers<[1], [0], [0], [1], [0, 0, 1, 1], [], []>} : vector<512x128xbf16>, vector<128x128xbf16>, vector<512x128xf32> -> vector<512x128xf32>
    %c1 = arith.constant 1 : index
    %c0_11 = arith.constant 0 : index
    %31 = vector.load %arg4[%c1, %c0_11] : memref<8x128xf32, #tpu.memory_space<vmem>>, vector<1x128xf32>
    %32 = vector.broadcast %31 : vector<1x128xf32> to vector<512x128xf32>
    %33 = arith.addf %30, %32 : vector<512x128xf32>
    %cst_12 = arith.constant 0.000000e+00 : f32
    %34 = vector.broadcast %cst_12 : f32 to vector<512x128xf32>
    %35 = arith.maximumf %33, %34 : vector<512x128xf32>
    %36 = arith.truncf %35 : vector<512x128xf32> to vector<512x128xbf16>
    %c1_13 = arith.constant 1 : index
    %c0_14 = arith.constant 0 : index
    %c0_15 = arith.constant 0 : index
    %37 = vector.load %arg3[%c1_13, %c0_14, %c0_15] : memref<7x128x128xbf16, #tpu.memory_space<vmem>>, vector<1x128x128xbf16>
    %38 = vector.shape_cast %37 : vector<1x128x128xbf16> to vector<128x128xbf16>
    %cst_16 = arith.constant dense<0.000000e+00> : vector<512x128xf32>
    %39 = tpu.matmul %36, %38, %cst_16 {dimension_numbers = #tpu.dot_dimension_numbers<[1], [0], [0], [1], [0, 0, 1, 1], [], []>} : vector<512x128xbf16>, vector<128x128xbf16>, vector<512x128xf32> -> vector<512x128xf32>
    %c2 = arith.constant 2 : index
    %c0_17 = arith.constant 0 : index
    %40 = vector.load %arg4[%c2, %c0_17] : memref<8x128xf32, #tpu.memory_space<vmem>>, vector<1x128xf32>
    %41 = vector.broadcast %40 : vector<1x128xf32> to vector<512x128xf32>
    %42 = arith.addf %39, %41 : vector<512x128xf32>
    %cst_18 = arith.constant 0.000000e+00 : f32
    %43 = vector.broadcast %cst_18 : f32 to vector<512x128xf32>
    %44 = arith.maximumf %42, %43 : vector<512x128xf32>
    %45 = arith.truncf %44 : vector<512x128xf32> to vector<512x128xbf16>
    %c2_19 = arith.constant 2 : index
    %c0_20 = arith.constant 0 : index
    %c0_21 = arith.constant 0 : index
    %46 = vector.load %arg3[%c2_19, %c0_20, %c0_21] : memref<7x128x128xbf16, #tpu.memory_space<vmem>>, vector<1x128x128xbf16>
    %47 = vector.shape_cast %46 : vector<1x128x128xbf16> to vector<128x128xbf16>
    %cst_22 = arith.constant dense<0.000000e+00> : vector<512x128xf32>
    %48 = tpu.matmul %45, %47, %cst_22 {dimension_numbers = #tpu.dot_dimension_numbers<[1], [0], [0], [1], [0, 0, 1, 1], [], []>} : vector<512x128xbf16>, vector<128x128xbf16>, vector<512x128xf32> -> vector<512x128xf32>
    %c3 = arith.constant 3 : index
    %c0_23 = arith.constant 0 : index
    %49 = vector.load %arg4[%c3, %c0_23] : memref<8x128xf32, #tpu.memory_space<vmem>>, vector<1x128xf32>
    %50 = vector.broadcast %49 : vector<1x128xf32> to vector<512x128xf32>
    %51 = arith.addf %48, %50 : vector<512x128xf32>
    %cst_24 = arith.constant 0.000000e+00 : f32
    %52 = vector.broadcast %cst_24 : f32 to vector<512x128xf32>
    %53 = arith.maximumf %51, %52 : vector<512x128xf32>
    %54 = arith.truncf %53 : vector<512x128xf32> to vector<512x128xbf16>
    %c3_25 = arith.constant 3 : index
    %c0_26 = arith.constant 0 : index
    %c0_27 = arith.constant 0 : index
    %55 = vector.load %arg3[%c3_25, %c0_26, %c0_27] : memref<7x128x128xbf16, #tpu.memory_space<vmem>>, vector<1x128x128xbf16>
    %56 = vector.shape_cast %55 : vector<1x128x128xbf16> to vector<128x128xbf16>
    %cst_28 = arith.constant dense<0.000000e+00> : vector<512x128xf32>
    %57 = tpu.matmul %54, %56, %cst_28 {dimension_numbers = #tpu.dot_dimension_numbers<[1], [0], [0], [1], [0, 0, 1, 1], [], []>} : vector<512x128xbf16>, vector<128x128xbf16>, vector<512x128xf32> -> vector<512x128xf32>
    %c4 = arith.constant 4 : index
    %c0_29 = arith.constant 0 : index
    %58 = vector.load %arg4[%c4, %c0_29] : memref<8x128xf32, #tpu.memory_space<vmem>>, vector<1x128xf32>
    %59 = vector.broadcast %58 : vector<1x128xf32> to vector<512x128xf32>
    %60 = arith.addf %57, %59 : vector<512x128xf32>
    %cst_30 = arith.constant 0.000000e+00 : f32
    %61 = vector.broadcast %cst_30 : f32 to vector<512x128xf32>
    %62 = arith.maximumf %60, %61 : vector<512x128xf32>
    %63 = arith.truncf %62 : vector<512x128xf32> to vector<512x128xbf16>
    %c4_31 = arith.constant 4 : index
    %c0_32 = arith.constant 0 : index
    %c0_33 = arith.constant 0 : index
    %64 = vector.load %arg3[%c4_31, %c0_32, %c0_33] : memref<7x128x128xbf16, #tpu.memory_space<vmem>>, vector<1x128x128xbf16>
    %65 = vector.shape_cast %64 : vector<1x128x128xbf16> to vector<128x128xbf16>
    %cst_34 = arith.constant dense<0.000000e+00> : vector<512x128xf32>
    %66 = tpu.matmul %63, %65, %cst_34 {dimension_numbers = #tpu.dot_dimension_numbers<[1], [0], [0], [1], [0, 0, 1, 1], [], []>} : vector<512x128xbf16>, vector<128x128xbf16>, vector<512x128xf32> -> vector<512x128xf32>
    %c1_35 = arith.constant 1 : index
    %c0_36 = arith.constant 0 : index
    %c0_37 = arith.constant 0 : index
    %67 = vector.load %arg2[%c1_35, %c0_36, %c0_37] : memref<2x3x128xf32, #tpu.memory_space<vmem>>, vector<1x3x128xf32>
    %68 = vector.shape_cast %67 : vector<1x3x128xf32> to vector<3x128xf32>
    %69 = vector.extract_strided_slice %68 {offsets = [0, 0], sizes = [1, 128], strides = [1, 1]} : vector<3x128xf32> to vector<1x128xf32>
    %70 = vector.broadcast %1 : vector<512x1xf32> to vector<512x128xf32>
    %71 = vector.broadcast %69 : vector<1x128xf32> to vector<512x128xf32>
    %72 = arith.mulf %70, %71 : vector<512x128xf32>
    %73 = arith.addf %66, %72 : vector<512x128xf32>
    %74 = vector.extract_strided_slice %68 {offsets = [1, 0], sizes = [1, 128], strides = [1, 1]} : vector<3x128xf32> to vector<1x128xf32>
    %75 = vector.broadcast %2 : vector<512x1xf32> to vector<512x128xf32>
    %76 = vector.broadcast %74 : vector<1x128xf32> to vector<512x128xf32>
    %77 = arith.mulf %75, %76 : vector<512x128xf32>
    %78 = arith.addf %73, %77 : vector<512x128xf32>
    %79 = vector.extract_strided_slice %68 {offsets = [2, 0], sizes = [1, 128], strides = [1, 1]} : vector<3x128xf32> to vector<1x128xf32>
    %80 = vector.broadcast %3 : vector<512x1xf32> to vector<512x128xf32>
    %81 = vector.broadcast %79 : vector<1x128xf32> to vector<512x128xf32>
    %82 = arith.mulf %80, %81 : vector<512x128xf32>
    %83 = arith.addf %78, %82 : vector<512x128xf32>
    %c5 = arith.constant 5 : index
    %c0_38 = arith.constant 0 : index
    %84 = vector.load %arg4[%c5, %c0_38] : memref<8x128xf32, #tpu.memory_space<vmem>>, vector<1x128xf32>
    %85 = vector.broadcast %84 : vector<1x128xf32> to vector<512x128xf32>
    %86 = arith.addf %83, %85 : vector<512x128xf32>
    %cst_39 = arith.constant 0.000000e+00 : f32
    %87 = vector.broadcast %cst_39 : f32 to vector<512x128xf32>
    %88 = arith.maximumf %86, %87 : vector<512x128xf32>
    %89 = arith.truncf %88 : vector<512x128xf32> to vector<512x128xbf16>
    %c5_40 = arith.constant 5 : index
    %c0_41 = arith.constant 0 : index
    %c0_42 = arith.constant 0 : index
    %90 = vector.load %arg3[%c5_40, %c0_41, %c0_42] : memref<7x128x128xbf16, #tpu.memory_space<vmem>>, vector<1x128x128xbf16>
    %91 = vector.shape_cast %90 : vector<1x128x128xbf16> to vector<128x128xbf16>
    %cst_43 = arith.constant dense<0.000000e+00> : vector<512x128xf32>
    %92 = tpu.matmul %89, %91, %cst_43 {dimension_numbers = #tpu.dot_dimension_numbers<[1], [0], [0], [1], [0, 0, 1, 1], [], []>} : vector<512x128xbf16>, vector<128x128xbf16>, vector<512x128xf32> -> vector<512x128xf32>
    %c6 = arith.constant 6 : index
    %c0_44 = arith.constant 0 : index
    %93 = vector.load %arg4[%c6, %c0_44] : memref<8x128xf32, #tpu.memory_space<vmem>>, vector<1x128xf32>
    %94 = vector.broadcast %93 : vector<1x128xf32> to vector<512x128xf32>
    %95 = arith.addf %92, %94 : vector<512x128xf32>
    %cst_45 = arith.constant 0.000000e+00 : f32
    %96 = vector.broadcast %cst_45 : f32 to vector<512x128xf32>
    %97 = arith.maximumf %95, %96 : vector<512x128xf32>
    %98 = arith.truncf %97 : vector<512x128xf32> to vector<512x128xbf16>
    %c6_46 = arith.constant 6 : index
    %c0_47 = arith.constant 0 : index
    %c0_48 = arith.constant 0 : index
    %99 = vector.load %arg3[%c6_46, %c0_47, %c0_48] : memref<7x128x128xbf16, #tpu.memory_space<vmem>>, vector<1x128x128xbf16>
    %100 = vector.shape_cast %99 : vector<1x128x128xbf16> to vector<128x128xbf16>
    %cst_49 = arith.constant dense<0.000000e+00> : vector<512x128xf32>
    %101 = tpu.matmul %98, %100, %cst_49 {dimension_numbers = #tpu.dot_dimension_numbers<[1], [0], [0], [1], [0, 0, 1, 1], [], []>} : vector<512x128xbf16>, vector<128x128xbf16>, vector<512x128xf32> -> vector<512x128xf32>
    %c7 = arith.constant 7 : index
    %c0_50 = arith.constant 0 : index
    %102 = vector.load %arg4[%c7, %c0_50] : memref<8x128xf32, #tpu.memory_space<vmem>>, vector<1x128xf32>
    %103 = vector.broadcast %102 : vector<1x128xf32> to vector<512x128xf32>
    %104 = arith.addf %101, %103 : vector<512x128xf32>
    %cst_51 = arith.constant 0.000000e+00 : f32
    %105 = vector.broadcast %cst_51 : f32 to vector<512x128xf32>
    %106 = arith.maximumf %104, %105 : vector<512x128xf32>
    %107 = arith.truncf %106 : vector<512x128xf32> to vector<512x128xbf16>
    %c0_52 = arith.constant 0 : index
    %c0_53 = arith.constant 0 : index
    %108 = vector.load %arg5[%c0_52, %c0_53] : memref<128x128xbf16, #tpu.memory_space<vmem>>, vector<128x128xbf16>
    %cst_54 = arith.constant dense<0.000000e+00> : vector<512x128xf32>
    %109 = tpu.matmul %107, %108, %cst_54 {dimension_numbers = #tpu.dot_dimension_numbers<[1], [0], [0], [1], [0, 0, 1, 1], [], []>} : vector<512x128xbf16>, vector<128x128xbf16>, vector<512x128xf32> -> vector<512x128xf32>
    %c0_55 = arith.constant 0 : index
    %c0_56 = arith.constant 0 : index
    %110 = vector.load %arg6[%c0_55, %c0_56] : memref<1x128xf32, #tpu.memory_space<vmem>>, vector<1x128xf32>
    %111 = vector.broadcast %110 : vector<1x128xf32> to vector<512x128xf32>
    %112 = arith.addf %109, %111 : vector<512x128xf32>
    %113 = arith.truncf %112 : vector<512x128xf32> to vector<512x128xbf16>
    %c0_57 = arith.constant 0 : index
    %c0_58 = arith.constant 0 : index
    %114 = vector.load %arg7[%c0_57, %c0_58] : memref<512x128xbf16, #tpu.memory_space<vmem>>, vector<512x128xbf16>
    tpu.vector_store %arg7[%c0_57, %c0_58], %113 {strides = array<i32>} : memref<512x128xbf16, #tpu.memory_space<vmem>>, vector<512x128xbf16>,
    return
  }
  func.func @transform_0(%arg0: i32) -> (i32, i32) {
    %c0_i32 = arith.constant 0 : i32
    %c0_i32_0 = arith.constant 0 : i32
    return %arg0, %c0_i32 : i32, i32
  }
  func.func @transform_1(%arg0: i32) -> (i32, i32, i32) {
    %c0_i32 = arith.constant 0 : i32
    %c0_i32_0 = arith.constant 0 : i32
    %c0_i32_1 = arith.constant 0 : i32
    %c0_i32_2 = arith.constant 0 : i32
    return %c0_i32, %c0_i32_0, %c0_i32_1 : i32, i32, i32
  }
  func.func @transform_2(%arg0: i32) -> (i32, i32, i32) {
    %c0_i32 = arith.constant 0 : i32
    %c0_i32_0 = arith.constant 0 : i32
    %c0_i32_1 = arith.constant 0 : i32
    %c0_i32_2 = arith.constant 0 : i32
    return %c0_i32, %c0_i32_0, %c0_i32_1 : i32, i32, i32
  }
  func.func @transform_3(%arg0: i32) -> (i32, i32) {
    %c0_i32 = arith.constant 0 : i32
    %c0_i32_0 = arith.constant 0 : i32
    %c0_i32_1 = arith.constant 0 : i32
    return %c0_i32, %c0_i32_0 : i32, i32
  }
  func.func @transform_4(%arg0: i32) -> (i32, i32) {
    %c0_i32 = arith.constant 0 : i32
    %c0_i32_0 = arith.constant 0 : i32
    %c0_i32_1 = arith.constant 0 : i32
    return %c0_i32, %c0_i32_0 : i32, i32
  }
  func.func @transform_5(%arg0: i32) -> (i32, i32) {
    %c0_i32 = arith.constant 0 : i32
    %c0_i32_0 = arith.constant 0 : i32
    %c0_i32_1 = arith.constant 0 : i32
    return %c0_i32, %c0_i32_0 : i32, i32
  }
  func.func @transform_6(%arg0: i32) -> (i32, i32) {
    %c0_i32 = arith.constant 0 : i32
    %c0_i32_0 = arith.constant 0 : i32
    return %arg0, %c0_i32 : i32, i32
  }
}

</mosaic_0001>

<bundles_post_ra>
// kernel: tpu_custom_call.1
= control target key start
LH: loop header
LB: loop body
LE: loop exit
PB: predicated region body
PF: predicated region fallthrough
CT: control target
= control target key end

     0   :  { %11 = vsyncpa [#allocation3], 0  ;;  %s10451_s0 = inlined_call_operand.vmem [shape: f32[1024,3], index: 0, kind: input, shape index: {}]   ;;  %s10452_s1 = inlined_call_operand.vmem [shape: f32[2,3,128], index: 1, kind: input, shape index: {}]   ;;  %s10453_s2 = inlined_call_operand.vmem [shape: bf16[7,128,128], index: 2, kind: input, shape index: {}]   ;;  %s10454_s3 = inlined_call_operand.vmem [shape: f32[8,128], index: 3, kind: input, shape index: {}]   ;;  %s10455_s4 = inlined_call_operand.vmem [shape: bf16[128,128], index: 4, kind: input, shape index: {}]   ;;  %s10456_s5 = inlined_call_operand.vmem [shape: f32[1,128], index: 5, kind: input, shape index: {}]   ;;  %s10457_s6 = inlined_call_operand.hbm [shape: bf16[1024,128], index: 6, kind: output, shape index: {}]  }
   0x1   :  { %13 = vsyncpa [#allocation3 + $0x1], 0  ;;  %s7826_s21 = smov 0   ;;  %s7828_s22 = smov 0  }
   0x2   :  { %s7830_s23 = smov 0   ;;  %s7832_s24 = smov 0  }
   0x3 LB: > { %s7847_s25 = sadd.s32 4294967295, %s7783_s24   ;;  %s6050_s26 = sadd.s32 4294967294, %s7783_s24   ;;  %s7783_s24 = sphi %s7832_s24, %s11059_s24   ;;  %s7779_s23 = sphi %s7830_s23, %s11058_s23   ;;  %s7775_s22 = sphi %s7828_s22, %s11057_s22   ;;  %s7771_s21 = sphi %s7826_s21, %s11056_s21  }
   0x4   : > { %s7851_s27 = sadd.s32 1, %s7783_s24   ;;  %s157_s28 = sadd.s32 1, %s7779_s23 }
   0x5   : > { %s154_s29 = ssub.s32 %s7783_s24, %s7851_s27  ;;  %p167_p0 = scmp.ne.s32.totalorder %s7779_s23, %s7775_s22 }
   0x6   : > { %p155_p1 = scmp.eq.s32.totalorder %s154_s29, 0  ;;  %p168_p2 = scmp.eq.s32.totalorder %s7847_s25, 1 }
   0x7   : > { %p173_p3 = scmp.ne.s32.totalorder %s7775_s22, %s7771_s21  ;;  %p174_p4 = scmp.eq.s32.totalorder %s6050_s26, 1 }
   0x8   : > { %s7862_s30 = scalar_select %p155_p1, %s7779_s23, %s157_s28  }
   0x9   : > { %p7864_p5 = por %p168_p2, %p167_p0  ;;  %p7868_p6 = por %p174_p4, %p173_p3 }
   0xa   : > { %p6053_p7 = scmp.ge.s32.totalorder %s7783_s24, 1  ;;  %p216_p8 = scmp.lt.s32.totalorder %s7783_s24, 3 }
   0xc   : > { %p217_p9 = pnand %p6053_p7, %p216_p8 }
   0xe   : > { %220 = sbr.rel (%p217_p9) target bundleno = 2510 (0x9ce), region = 44 }
  0x15   : > { %s6055_s9 = sshll.u32 %s7847_s25, 6  ;;  %v10462_v0 = vmov 1   ;;  %v10460_v7 = vmov 0   ;;  %v10458_v11 = vmov 2   ;;  %v7640_v49 = vld [vmem:[%s10453_s2] sm:$0xff]   ;;  %v7641_v52 = vld [vmem:[%s10453_s2 + $0x8] sm:$0xff]  }
  0x16   : > { %7558 = vset.pattern.permute.xlu0 %v10462_v0  ;;  %7556 = vset.pattern.permute.xlu1 %v10462_v0  ;;  %p247_p10 = scmp.lt.s32.totalorder %s6055_s9, 127  ;;  %v7642_v56 = vld [vmem:[%s10453_s2 + $0x10] sm:$0xff]   ;;  %v7643_v60 = vld [vmem:[%s10453_s2 + $0x18] sm:$0xff]   ;;  %v7644_v63 = vld [vmem:[%s10453_s2 + $0x20] sm:$0xff]   ;;  %s243_s12 = sand.u32 1, %s7775_s22  }
  0x17   : > { %6872 = vmatprep.subr.bf16.mxu0 %v7640_v49  ;;  %s6054_s16 = sshll.u32 %s243_s12, 8  ;;  %s6360_s18 = sshll.u32 %s7847_s25, 12 }
  0x18   : > { %s11061_s9 = smov (!%p247_p10, %s6055_s9), 127  ;;  %6873 = vmatpush3.bf16.msra.mxu0 %v7640_v49  ;;  %s10285_s17 = scalar_lea.vmem [#allocation2], %s6054_s16 }
  0x19   : > { %s6056_s10 = sshll.u32 %s11061_s9, 3  ;;  %6874 = vmatprep.subr.bf16.mxu0 %v7641_v52  ;;  %s5988_s19 = sshll.u32 %s10285_s17, 4  ;;  %s10404_s19 = int_to_ptr.vmem [resolvable:$true] %s5988_s19 }
  0x1a   : > { %s7880_s13 = scalar_lea.vmem %s10451_s0, %s6056_s10  ;;  %s10402_s28 = scalar_lea.hbm %s10457_s6, %s6360_s18 }
  0x1b   : > { %v7883_v1 = vld [vmem:[%s7880_s13 + $0x10] sm:$0xff]  ;;  %v7886_v2 = vld [vmem:[%s7880_s13] sm:$0xff]  ;;  %v259_v3 = vld [vmem:[%s7880_s13 + $0x28] sm:$0xff]  ;;  %s10410_s25 = scalar_lea.sflag [#allocation3], %s243_s12  ;;  %s7721_s29 = scalar_lea.vmem %s10404_s19, 4096 }
  0x1c   : > { %780 = vperm.xlu0 %7558, %v7883_v1   ;;  %772 = vperm.xlu1 %7556, %v7886_v2   ;;  %v7892_v4 = vld [vmem:[%s7880_s13 + $0x8] sm:$0xff]  ;;  %v260_v5 = vld [vmem:[%s7880_s13 + $0x30] sm:$0xff]  ;;  %v257_v6 = vld [vmem:[%s7880_s13 + $0x18] sm:$0xff]  ;;  %p7722_p11 = scmp.ne.s32.totalorder %s10404_s19, %s7721_s29  ;;  %s7788_s9 = smov [#allocation2]  }
  0x1d   : > { %v7899_v8 = vld [vmem:[%s7880_s13 + $0x50] sm:$0xff]  ;;  %v7903_v9 = vld [vmem:[%s7880_s13 + $0x68] sm:$0xff]  ;;  %v7931_v16 = vld [vmem:[%s7880_s13 + $0x20] sm:$0xff]  ;;  %6875 = vmatpush3.bf16.msra.mxu0 %v7641_v52  ;;  %s7725_s10 = sshll.u32 %s7788_s9, 4  ;;  %s7726_s10 = int_to_ptr.vmem [resolvable:$false] %s7725_s10 }
  0x1e   : > { %v7908_v10 = vld [vmem:[%s7880_s13 + $0x70] sm:$0xff]  ;;  %v7918_v13 = vld [vmem:[%s7880_s13 + $0xa8] sm:$0xff]  ;;  %v261_v19 = vld [vmem:[%s7880_s13 + $0x38] sm:$0xff]  ;;  %6876 = vmatprep.subr.bf16.mxu0 %v7642_v56  ;;  %p7723_p12 = pnand %p7722_p11, %p7864_p5  ;;  %p7728_p0 = scmp.lt.s32.totalorder %s10404_s19, %s7726_s10 }
  0x1f   : > { %v7914_v12 = vld [vmem:[%s7880_s13 + $0x90] sm:$0xff]  ;;  %v7934_v17 = vld [vmem:[%s7880_s13 + $0xe8] sm:$0xff]  ;;  %v262_v23 = vld [vmem:[%s7880_s13 + $0x40] sm:$0xff] }
  0x20   : > { %792 = vperm.xlu0 %7558, %v259_v3   ;;  %776 = vperm.xlu1 %7556, %v7892_v4   ;;  %v7922_v14 = vld [vmem:[%s7880_s13 + $0xb0] sm:$0xff]  ;;  %v7950_v21 = vld [vmem:[%s7880_s13 + $0x128] sm:$0xff]  ;;  %v7972_v25 = vld [vmem:[%s7880_s13 + $0x60] sm:$0xff]  ;;  %p7724_p13 = pneg %p7723_p12 }
  0x21   : > { %v7927_v15 = vld [vmem:[%s7880_s13 + $0xd0] sm:$0xff]  ;;  %10658 = vst [vmem:[#allocation5_spill] sm:$0xff] %v7950_v21  ;;  %v7967_v24 = vld [vmem:[%s7880_s13 + $0x48] sm:$0xff]  ;;  %v265_v26 = vld [vmem:[%s7880_s13 + $0x58] sm:$0xff]  ;;  %6877 = vmatpush3.bf16.msra.mxu0 %v7642_v56 }
  0x22   : > { %v7940_v18 = vld [vmem:[%s7880_s13 + $0xf0] sm:$0xff]  ;;  %v269_v27 = vld [vmem:[%s7880_s13 + $0x78] sm:$0xff]  ;;  %v7979_v28 = vld [vmem:[%s7880_s13 + $0x88] sm:$0xff]  ;;  %6878 = vmatprep.subr.bf16.mxu0 %v7643_v60 }
  0x23   : > { %v7946_v20 = vld [vmem:[%s7880_s13 + $0x110] sm:$0xff]  ;;  %v7984_v29 = vld [vmem:[%s7880_s13 + $0xa0] sm:$0xff]  ;;  %v7989_v30 = vld [vmem:[%s7880_s13 + $0xb8] sm:$0xff] }
  0x24   : > { %796 = vperm.xlu0 %7558, %v260_v5   ;;  %7557 = vset.pattern.permute.xlu1 %v10460_v7  ;;  %v7956_v22 = vld [vmem:[%s7880_s13 + $0x130] sm:$0xff]  ;;  %v7994_v31 = vld [vmem:[%s7880_s13 + $0xc8] sm:$0xff]  ;;  %v7998_v32 = vld [vmem:[%s7880_s13 + $0xe0] sm:$0xff] }
  0x25   : > { %336 = vperm.xlu1 %7557, %v257_v6   ;;  %10659 = vst [vmem:[#allocation6_spill] sm:$0xff] %v7956_v22  ;;  %v8004_v33 = vld [vmem:[%s7880_s13 + $0xf8] sm:$0xff]  ;;  %v8009_v34 = vld [vmem:[%s7880_s13 + $0x108] sm:$0xff]  ;;  %v8014_v35 = vld [vmem:[%s7880_s13 + $0x120] sm:$0xff]  ;;  %6879 = vmatpush3.bf16.msra.mxu0 %v7643_v60 }
  0x26   : > { %10660 = vst [vmem:[#allocation7_spill] sm:$0xff] %v8014_v35  ;;  %v8020_v36 = vld [vmem:[%s7880_s13 + $0x138] sm:$0xff]  ;;  %v8024_v37 = vld [vmem:[%s7880_s13 + $0x148] sm:$0xff]  ;;  %v8029_v38 = vld [vmem:[%s7880_s13 + $0x160] sm:$0xff]  ;;  %6880 = vmatprep.subr.bf16.mxu0 %v7644_v63 }
  0x27   : > { %10661 = vst [vmem:[#allocation8_spill] sm:$0xff] %v8020_v36  ;;  %10662 = vst [vmem:[#allocation9_spill] sm:$0xff] %v8024_v37  ;;  %v301_v39 = vld [vmem:[%s7880_s13 + $0x178] sm:$0xff]  ;;  %v8041_v42 = vld [vmem:[%s7880_s13 + $0x188] sm:$0xff] }
  0x28   : > { %812 = vperm.xlu0 %7558, %v7899_v8   ;;  %v270_v45 = vld [vmem:[%s7880_s13 + $0x80] sm:$0xff]  ;;  %v309_v50 = vld [vmem:[%s7880_s13 + $0x1b8] sm:$0xff]  ;;  %v8071_v54 = vld [vmem:[%s7880_s13 + $0x1c8] sm:$0xff] }
  0x29   : > { %7559 = vset.pattern.permute.xlu1 %v10462_v0  ;;  %v8051_v46 = vld [vmem:[%s7880_s13 + $0x1a0] sm:$0xff]  ;;  %v273_v58 = vld [vmem:[%s7880_s13 + $0x98] sm:$0xff]  ;;  %6881 = vmatpush3.bf16.msra.mxu0 %v7644_v63 }
  0x2a   : > { %784 = vperm.xlu1 %7559, %v257_v6  }
  0x2c   : > { %824 = vperm.xlu0 %7558, %v7903_v9  }
  0x2e   : > { %7560 = vset.pattern.permute.xlu1 %v10458_v11 }
  0x2f   : > { %1160 = vperm.xlu1 %7560, %v7886_v2  }
  0x30   : > { %828 = vperm.xlu0 %7558, %v7908_v10  }
  0x33   : > { %1168 = vperm.xlu1 %7560, %v7883_v1  }
  0x34   : > { %844 = vperm.xlu0 %7558, %v7914_v12  }
  0x37   : > { %1172 = vperm.xlu1 %7560, %v257_v6  }
  0x38   : > { %856 = vperm.xlu0 %7558, %v7918_v13  }
  0x3b   : > { %7561 = vset.pattern.permute.xlu1 %v10460_v7 }
  0x3c   : > { %860 = vperm.xlu0 %7558, %v7922_v14   ;;  %346 = vperm.xlu1 %7561, %v259_v3  }
  0x40   : > { %876 = vperm.xlu0 %7558, %v7927_v15   ;;  %7562 = vset.pattern.permute.xlu1 %v10462_v0 }
  0x41   : > { %788 = vperm.xlu1 %7562, %v7931_v16  }
  0x44   : > { %888 = vperm.xlu0 %7558, %v7934_v17  }
  0x45   : > { %7563 = vset.pattern.permute.xlu1 %v10460_v7 }
  0x46   : > { %351 = vperm.xlu1 %7563, %v260_v5  }
  0x48   : > { %892 = vperm.xlu0 %7558, %v7940_v18  }
  0x4a   : > { %356 = vperm.xlu1 %7563, %v261_v19  }
  0x4c   : > { %908 = vperm.xlu0 %7558, %v7946_v20  }
  0x4e   : > { %7564 = vset.pattern.permute.xlu1 %v10462_v0 }
  0x4f   : > { %800 = vperm.xlu1 %7564, %v261_v19  }
  0x50   : > { %920 = vperm.xlu0 %7558, %v7950_v21  }
  0x53   : > { %7565 = vset.pattern.permute.xlu1 %v10458_v11 }
  0x54   : > { %924 = vperm.xlu0 %7558, %v7956_v22   ;;  %1180 = vperm.xlu1 %7565, %v259_v3   ;;  %v8285_v22 = vld [vmem:[%s7880_s13 + $0x170] sm:$0xff] }
  0x55   : > { %10714 = vst [vmem:[#allocation58_spill] sm:$0xff] %v8285_v22 }
  0x58   : > { %7604 = vset.pattern.permute.xlu0 %v10458_v11  ;;  %1184 = vperm.xlu1 %7565, %v260_v5  }
  0x59   : > { %1164 = vperm.xlu0 %7604, %v7892_v4  }
  0x5c   : > { %7566 = vset.pattern.permute.xlu1 %v10460_v7 }
  0x5d   : > { %1176 = vperm.xlu0 %7604, %v7931_v16   ;;  %361 = vperm.xlu1 %7566, %v262_v23  }
  0x61   : > { %1188 = vperm.xlu0 %7604, %v261_v19   ;;  %7567 = vset.pattern.permute.xlu1 %v10462_v0  ;;  %v7647_v19 = vld [vmem:[%s10453_s2 + $0x38] sm:$0xff]  }
  0x62   : > { %804 = vperm.xlu1 %7567, %v262_v23  }
  0x65   : > { %1196 = vperm.xlu0 %7604, %v7967_v24  }
  0x66   : > { %808 = vperm.xlu1 %7567, %v7967_v24  }
  0x69   : > { %1208 = vperm.xlu0 %7604, %v7972_v25  }
  0x6a   : > { %7568 = vset.pattern.permute.xlu1 %v10460_v7 }
  0x6b   : > { %376 = vperm.xlu1 %7568, %v265_v26  }
  0x6d   : > { %1220 = vperm.xlu0 %7604, %v269_v27  }
  0x6f   : > { %7569 = vset.pattern.permute.xlu1 %v10462_v0 }
  0x70   : > { %816 = vperm.xlu1 %7569, %v265_v26  }
  0x71   : > { %1228 = vperm.xlu0 %7604, %v7979_v28  }
  0x74   : > { %7570 = vset.pattern.permute.xlu1 %v10458_v11 }
  0x75   : > { %1240 = vperm.xlu0 %7604, %v7984_v29   ;;  %1192 = vperm.xlu1 %7570, %v262_v23  }
  0x79   : > { %1252 = vperm.xlu0 %7604, %v7989_v30   ;;  %1200 = vperm.xlu1 %7570, %v7899_v8  }
  0x7d   : > { %1260 = vperm.xlu0 %7604, %v7994_v31   ;;  %1204 = vperm.xlu1 %7570, %v265_v26  }
  0x81   : > { %1272 = vperm.xlu0 %7604, %v7998_v32   ;;  %7571 = vset.pattern.permute.xlu1 %v10460_v7 }
  0x82   : > { %386 = vperm.xlu1 %7571, %v7903_v9  }
  0x85   : > { %1284 = vperm.xlu0 %7604, %v8004_v33  }
  0x86   : > { %7572 = vset.pattern.permute.xlu1 %v10462_v0 }
  0x87   : > { %820 = vperm.xlu1 %7572, %v7972_v25  }
  0x89   : > { %1292 = vperm.xlu0 %7604, %v8009_v34  }
  0x8b   : > { %7573 = vset.pattern.permute.xlu1 %v10460_v7 }
  0x8c   : > { %391 = vperm.xlu1 %7573, %v7908_v10  }
  0x8d   : > { %1304 = vperm.xlu0 %7604, %v8014_v35  }
  0x90   : > { %396 = vperm.xlu1 %7573, %v269_v27  }
  0x91   : > { %1316 = vperm.xlu0 %7604, %v8020_v36  }
  0x94   : > { %7574 = vset.pattern.permute.xlu1 %v10462_v0 }
  0x95   : > { %1324 = vperm.xlu0 %7604, %v8024_v37   ;;  %832 = vperm.xlu1 %7574, %v269_v27  }
  0x99   : > { %1336 = vperm.xlu0 %7604, %v8029_v38   ;;  %7575 = vset.pattern.permute.xlu1 %v10458_v11 }
  0x9a   : > { %1212 = vperm.xlu1 %7575, %v7903_v9  }
  0x9b   : > { %v8035_v40 = vpop.permute.xlu1 %772  ;;  %v8037_v41 = vpop.permute.xlu0 %780 }
  0x9c   : > { %10663 = vst [vmem:[#allocation10_spill] sm:$0xff] %v8035_v40 }
  0x9d   : > { %1348 = vperm.xlu0 %7604, %v301_v39  }
  0x9e   : > { %1216 = vperm.xlu1 %7575, %v7908_v10  }
  0x9f   : > { %v8043_v43 = vpop.permute.xlu1 %776  ;;  %v8045_v44 = vpop.permute.xlu0 %792 }
  0xa0   : > { %10664 = vst [vmem:[#allocation11_spill] sm:$0xff] %v8043_v43  ;;  %10665 = vst [vmem:[#allocation12_spill] sm:$0xff] %v8045_v44 }
  0xa1   : > { %1356 = vperm.xlu0 %7604, %v8041_v42  }
  0xa2   : > { %7576 = vset.pattern.permute.xlu1 %v10460_v7 }
  0xa3   : > { %401 = vperm.xlu1 %7576, %v270_v45   ;;  %v8053_v47 = vpop.permute.xlu0 %796 }
  0xa4   : > { %10666 = vst [vmem:[#allocation13_spill] sm:$0xff] %v8053_v47  ;;  %v8055_v48 = vpop.permute.xlu1 %336 }
  0xa5   : > { %10667 = vst [vmem:[#allocation14_spill] sm:$0xff] %v8055_v48  ;;  %1368 = vperm.xlu0 %7604, %v8051_v46  }
  0xa7   : > { %7577 = vset.pattern.permute.xlu1 %v10462_v0  ;;  %v8063_v51 = vpop.permute.xlu0 %812 }
  0xa8   : > { %10668 = vst [vmem:[#allocation15_spill] sm:$0xff] %v8063_v51  ;;  %836 = vperm.xlu1 %7577, %v270_v45  }
  0xa9   : > { %1380 = vperm.xlu0 %7604, %v309_v50   ;;  %v8068_v53 = vpop.permute.xlu1 %784 }
  0xaa   : > { %10669 = vst [vmem:[#allocation16_spill] sm:$0xff] %v8068_v53 }
  0xab   : > { %v8073_v55 = vpop.permute.xlu0 %824 }
  0xac   : > { %840 = vperm.xlu1 %7577, %v7979_v28  }
  0xad   : > { %1388 = vperm.xlu0 %7604, %v8071_v54  }
  0xae   : > { %v8080_v57 = vpop.permute.xlu1 %1160 }
  0xaf   : > { %10670 = vst [vmem:[#allocation17_spill] sm:$0xff] %v8080_v57  ;;  %v8083_v59 = vpop.permute.xlu0 %828 }
  0xb0   : > { %7578 = vset.pattern.permute.xlu1 %v10460_v7 }
  0xb1   : > { %7632 = vset.pattern.permute.xlu0 %v10460_v7  ;;  %416 = vperm.xlu1 %7578, %v273_v58  }
  0xb2   : > { %321 = vperm.xlu0 %7632, %v7886_v2   ;;  %v8091_v61 = vpop.permute.xlu1 %1168  ;;  %v7645_v2 = vld [vmem:[%s10453_s2 + $0x28] sm:$0xff]  }
  0xb3   : > { %10671 = vst [vmem:[#allocation18_spill] sm:$0xff] %v8091_v61  ;;  %v8093_v62 = vpop.permute.xlu0 %844  ;;  %6882 = vmatprep.subr.bf16.mxu0 %v7645_v2 }
  0xb4   : > { %6883 = vmatpush3.bf16.msra.mxu0 %v7645_v2 }
  0xb5   : > { %7579 = vset.pattern.permute.xlu1 %v10462_v0 }
  0xb6   : > { %326 = vperm.xlu0 %7632, %v7892_v4   ;;  %848 = vperm.xlu1 %7579, %v273_v58   ;;  %v8100_v3 = vpop.permute.xlu1 %1172  ;;  %v7646_v4 = vld [vmem:[%s10453_s2 + $0x30] sm:$0xff]  }
  0xb7   : > { %10672 = vst [vmem:[#allocation19_spill] sm:$0xff] %v8100_v3  ;;  %v8102_v5 = vpop.permute.xlu0 %856  ;;  %6884 = vmatprep.subr.bf16.mxu0 %v7646_v4 }
  0xb8   : > { %10673 = vst [vmem:[#allocation20_spill] sm:$0xff] %v8102_v5  ;;  %6885 = vmatpush3.bf16.msra.mxu0 %v7646_v4  ;;  %v8199_v4 = vld [vmem:[%s7880_s13 + $0x150] sm:$0xff] }
  0xb9   : > { %6886 = vmatprep.subr.bf16.mxu0 %v7647_v19  ;;  %10693 = vst [vmem:[#allocation40_spill] sm:$0xff] %v8199_v4 }
  0xba   : > { %331 = vperm.xlu0 %7632, %v7883_v1   ;;  %7580 = vset.pattern.permute.xlu1 %v10458_v11 }
  0xbb   : > { %1224 = vperm.xlu1 %7580, %v270_v45   ;;  %v8109_v6 = vpop.permute.xlu1 %346  ;;  %v8111_v9 = vpop.permute.xlu0 %860 }
  0xbc   : > { %10674 = vst [vmem:[#allocation21_spill] sm:$0xff] %v8109_v6  ;;  %10675 = vst [vmem:[#allocation22_spill] sm:$0xff] %v8111_v9  ;;  %6887 = vmatpush3.bf16.msra.mxu0 %v7647_v19 }
  0xbe   : > { %341 = vperm.xlu0 %7632, %v7931_v16  }
  0xbf   : > { %1232 = vperm.xlu1 %7580, %v7914_v12   ;;  %v8118_v10 = vpop.permute.xlu0 %876 }
  0xc0   : > { %10676 = vst [vmem:[#allocation23_spill] sm:$0xff] %v8118_v10  ;;  %v8120_v1 = vpop.permute.xlu1 %788  ;;  %v10701_v10 = vmov 2  }
  0xc2   : > { %366 = vperm.xlu0 %7632, %v7967_v24  }
  0xc3   : > { %1236 = vperm.xlu1 %7580, %v273_v58   ;;  %v8126_v23 = vpop.permute.xlu0 %888  ;;  %v278_v58 = vld [vmem:[%s7880_s13 + $0xc0] sm:$0xff] }
  0xc4   : > { %10677 = vst [vmem:[#allocation24_spill] sm:$0xff] %v8126_v23  ;;  %v8220_v23 = vld [vmem:[%s7880_s13 + $0x190] sm:$0xff] }
  0xc5   : > { %v8128_v16 = vpop.permute.xlu1 %351  ;;  %10700 = vst [vmem:[#allocation45_spill] sm:$0xff] %v8220_v23 }
  0xc6   : > { %10678 = vst [vmem:[#allocation25_spill] sm:$0xff] %v8128_v16  ;;  %371 = vperm.xlu0 %7632, %v7899_v8  }
  0xc7   : > { %7581 = vset.pattern.permute.xlu1 %v10460_v7  ;;  %v8132_v26 = vpop.permute.xlu0 %892 }
  0xc8   : > { %10679 = vst [vmem:[#allocation26_spill] sm:$0xff] %v8132_v26  ;;  %426 = vperm.xlu1 %7581, %v7918_v13  }
  0xc9   : > { %v8135_v27 = vpop.permute.xlu1 %356 }
  0xca   : > { %10680 = vst [vmem:[#allocation27_spill] sm:$0xff] %v8135_v27  ;;  %381 = vperm.xlu0 %7632, %v7972_v25  }
  0xcb   : > { %v8138_v24 = vpop.permute.xlu0 %908 }
  0xcc   : > { %10681 = vst [vmem:[#allocation28_spill] sm:$0xff] %v8138_v24  ;;  %7582 = vset.pattern.permute.xlu1 %v10462_v0 }
  0xcd   : > { %852 = vperm.xlu1 %7582, %v7984_v29  }
  0xce   : > { %406 = vperm.xlu0 %7632, %v7979_v28   ;;  %v8143_v39 = vpop.permute.xlu1 %800 }
  0xcf   : > { %10682 = vst [vmem:[#allocation29_spill] sm:$0xff] %v8143_v39  ;;  %v8145_v8 = vpop.permute.xlu0 %920 }
  0xd0   : > { %10683 = vst [vmem:[#allocation30_spill] sm:$0xff] %v8145_v8 }
  0xd1   : > { %7583 = vset.pattern.permute.xlu1 %v10460_v7 }
  0xd2   : > { %411 = vperm.xlu0 %7632, %v7914_v12   ;;  %431 = vperm.xlu1 %7583, %v7922_v14  }
  0xd3   : > { %v8150_v45 = vpop.permute.xlu1 %1180  ;;  %v8152_v25 = vpop.permute.xlu0 %924 }
  0xd4   : > { %10684 = vst [vmem:[#allocation31_spill] sm:$0xff] %v8150_v45  ;;  %10685 = vst [vmem:[#allocation32_spill] sm:$0xff] %v8152_v25 }
  0xd6   : > { %421 = vperm.xlu0 %7632, %v7984_v29   ;;  %436 = vperm.xlu1 %7583, %v7989_v30  }
  0xd7   : > { %v8156_v49 = vpop.permute.xlu1 %1184 }
  0xd8   : > { %10686 = vst [vmem:[#allocation33_spill] sm:$0xff] %v8156_v49  ;;  %v8158_v28 = vpop.permute.xlu0 %1164 }
  0xd9   : > { %10687 = vst [vmem:[#allocation34_spill] sm:$0xff] %v8158_v28 }
  0xda   : > { %7584 = vset.pattern.permute.xlu1 %v10462_v0  ;;  %446 = vperm.xlu0 %7632, %v7994_v31  }
  0xdb   : > { %864 = vperm.xlu1 %7584, %v7989_v30  }
  0xdc   : > { %v8163_v12 = vpop.permute.xlu0 %1176  ;;  %v8165_v50 = vpop.permute.xlu1 %361 }
  0xdd   : > { %10688 = vst [vmem:[#allocation35_spill] sm:$0xff] %v8165_v50 }
  0xde   : > { %451 = vperm.xlu0 %7632, %v7927_v15  }
  0xdf   : > { %7585 = vset.pattern.permute.xlu1 %v10458_v11 }
  0xe0   : > { %v8169_v29 = vpop.permute.xlu0 %1188  ;;  %1244 = vperm.xlu1 %7585, %v7918_v13  }
  0xe1   : > { %10689 = vst [vmem:[#allocation36_spill] sm:$0xff] %v8169_v29  ;;  %v8172_v52 = vpop.permute.xlu1 %804 }
  0xe2   : > { %10690 = vst [vmem:[#allocation37_spill] sm:$0xff] %v8172_v52  ;;  %461 = vperm.xlu0 %7632, %v7998_v32  }
  0xe4   : > { %1248 = vperm.xlu1 %7585, %v7922_v14   ;;  %v8176_v56 = vpop.permute.xlu0 %1196 }
  0xe5   : > { %v8178_v30 = vpop.permute.xlu1 %808 }
  0xe6   : > { %10691 = vst [vmem:[#allocation38_spill] sm:$0xff] %v8178_v30  ;;  %486 = vperm.xlu0 %7632, %v8009_v34  }
  0xe8   : > { %7586 = vset.pattern.permute.xlu1 %v10460_v7  ;;  %v8183_v60 = vpop.permute.xlu0 %1208  ;;  %v281_v7 = vld [vmem:[%s7880_s13 + $0xd8] sm:$0xff] }
  0xe9   : > { %441 = vperm.xlu1 %7586, %v278_v58  }
  0xea   : > { %v8185_v13 = vpop.permute.xlu1 %376  ;;  %491 = vperm.xlu0 %7632, %v7946_v20  }
  0xec   : > { %v8188_v63 = vpop.permute.xlu0 %1220 }
  0xed   : > { %7587 = vset.pattern.permute.xlu1 %v10462_v0  ;;  %v10696_v0 = vmov 0  }
  0xee   : > { %868 = vperm.xlu1 %7587, %v278_v58   ;;  %501 = vperm.xlu0 %7632, %v8014_v35  }
  0xef   : > { %v8192_v14 = vpop.permute.xlu1 %816 }
  0xf0   : > { %v8194_v2 = vpop.permute.xlu0 %1228 }
  0xf1   : > { %10692 = vst [vmem:[#allocation39_spill] sm:$0xff] %v8194_v2 }
  0xf2   : > { %872 = vperm.xlu1 %7587, %v7994_v31   ;;  %526 = vperm.xlu0 %7632, %v8024_v37   ;;  %v10698_v31 = vmov 1  }
  0xf4   : > { %v8201_v19 = vpop.permute.xlu1 %1192  ;;  %v8203_v11 = vpop.permute.xlu0 %1240 }
  0xf5   : > { %10694 = vst [vmem:[#allocation41_spill] sm:$0xff] %v8201_v19  ;;  %10695 = vst [vmem:[#allocation42_spill] sm:$0xff] %v8203_v11  ;;  %v8313_v11 = vld [vmem:[%s7880_s13 + $0x100] sm:$0xff] }
  0xf6   : > { %7588 = vset.pattern.permute.xlu1 %v10696_v0  ;;  %531 = vperm.xlu0 %7632, %v8199_v4  }
  0xf7   : > { %456 = vperm.xlu1 %7588, %v281_v7  }
  0xf8   : > { %v8208_v25 = vpop.permute.xlu1 %1200  ;;  %v8210_v8 = vpop.permute.xlu0 %1252 }
  0xf9   : > { %10697 = vst [vmem:[#allocation43_spill] sm:$0xff] %v8210_v8 }
  0xfa   : > { %541 = vperm.xlu0 %7632, %v8029_v38  }
  0xfb   : > { %7589 = vset.pattern.permute.xlu1 %v10698_v31 }
  0xfc   : > { %880 = vperm.xlu1 %7589, %v281_v7   ;;  %v8214_v24 = vpop.permute.xlu1 %1204  ;;  %v8216_v26 = vpop.permute.xlu0 %1260 }
  0xfd   : > { %10699 = vst [vmem:[#allocation44_spill] sm:$0xff] %v8216_v26 }
  0xfe   : > { %566 = vperm.xlu0 %7632, %v8041_v42  }
 0x100   : > { %7590 = vset.pattern.permute.xlu1 %v10701_v10  ;;  %v8223_v37 = vpop.permute.xlu0 %1272 }
 0x101   : > { %10702 = vst [vmem:[#allocation46_spill] sm:$0xff] %v8223_v37  ;;  %1256 = vperm.xlu1 %7590, %v278_v58   ;;  %v8225_v36 = vpop.permute.xlu1 %386  ;;  %v8240_v58 = vld [vmem:[%s7880_s13 + $0x1d0] sm:$0xff] }
 0x102   : > { %571 = vperm.xlu0 %7632, %v8220_v23  }
 0x104   : > { %v8228_v38 = vpop.permute.xlu0 %1284 }
 0x105   : > { %10703 = vst [vmem:[#allocation47_spill] sm:$0xff] %v8228_v38  ;;  %1264 = vperm.xlu1 %7590, %v7927_v15   ;;  %v8270_v38 = vld [vmem:[%s7880_s13 + $0x168] sm:$0xff] }
 0x106   : > { %v8231_v26 = vpop.permute.xlu1 %820  ;;  %581 = vperm.xlu0 %7632, %v8051_v46   ;;  %v8250_v46 = vld [vmem:[%s7880_s13 + $0x1e0] sm:$0xff]  ;;  %10710 = vst [vmem:[#allocation54_spill] sm:$0xff] %v8270_v38 }
 0x107   : > { %10706 = vst [vmem:[#allocation50_spill] sm:$0xff] %v8250_v46 }
 0x108   : > { %v8234_v42 = vpop.permute.xlu0 %1292 }
 0x109   : > { %10704 = vst [vmem:[#allocation48_spill] sm:$0xff] %v8234_v42  ;;  %1268 = vperm.xlu1 %7590, %v281_v7  }
 0x10a   : > { %606 = vperm.xlu0 %7632, %v8071_v54  }
 0x10b   : > { %v8237_v37 = vpop.permute.xlu1 %391 }
 0x10c   : > { %v8242_v9 = vpop.permute.xlu0 %1304 }
 0x10d   : > { %10705 = vst [vmem:[#allocation49_spill] sm:$0xff] %v8242_v9  ;;  %7591 = vset.pattern.permute.xlu1 %v10696_v0 }
 0x10e   : > { %466 = vperm.xlu1 %7591, %v7934_v17   ;;  %611 = vperm.xlu0 %7632, %v8240_v58  }
 0x10f   : > { %v8247_v15 = vpop.permute.xlu1 %396 }
 0x110   : > { %v8252_v7 = vpop.permute.xlu0 %1316 }
 0x111   : > { %10707 = vst [vmem:[#allocation51_spill] sm:$0xff] %v8252_v7 }
 0x112   : > { %7592 = vset.pattern.permute.xlu1 %v10698_v31  ;;  %621 = vperm.xlu0 %7632, %v8250_v46  }
 0x113   : > { %884 = vperm.xlu1 %7592, %v7998_v32  }
 0x114   : > { %v8257_v54 = vpop.permute.xlu1 %832  ;;  %v8259_v9 = vpop.permute.xlu0 %1324 }
 0x115   : > { %10708 = vst [vmem:[#allocation52_spill] sm:$0xff] %v8259_v9 }
 0x116   : > { %7633 = vset.pattern.permute.xlu0 %v10698_v31 }
 0x117   : > { %7593 = vset.pattern.permute.xlu1 %v10696_v0  ;;  %940 = vperm.xlu0 %7633, %v8199_v4  }
 0x118   : > { %471 = vperm.xlu1 %7593, %v7940_v18   ;;  %v8265_v7 = vpop.permute.xlu0 %1336 }
 0x119   : > { %10709 = vst [vmem:[#allocation53_spill] sm:$0xff] %v8265_v7  ;;  %v8267_v42 = vpop.permute.xlu1 %1212  ;;  %v639_v7 = vlaneseq }
 0x11b   : > { %952 = vperm.xlu0 %7633, %v8270_v38  }
 0x11c   : > { %476 = vperm.xlu1 %7593, %v8004_v33   ;;  %v8274_v32 = vpop.permute.xlu0 %1348 }
 0x11d   : > { %10711 = vst [vmem:[#allocation55_spill] sm:$0xff] %v8274_v32  ;;  %v8276_v9 = vpop.permute.xlu1 %1216  ;;  %v8291_v32 = vshrl.u32 %v639_v7, 7  ;;  %v8307_v7 = vld [vmem:[%s7880_s13 + $0x1a8] sm:$0xff] }
 0x11e   : > { %10720 = vst [vmem:[#allocation64_spill] sm:$0xff] %v8307_v7 }
 0x11f   : > { %956 = vperm.xlu0 %7633, %v8285_v22   ;;  %10716 = vst [vmem:[#allocation60_spill] sm:$0xff] %v8291_v32  ;;  %v10505_v8 = vsub.s32 2, %v8291_v32 }
 0x120   : > { %7594 = vset.pattern.permute.xlu1 %v10698_v31  ;;  %v8279_v46 = vpop.permute.xlu0 %1356 }
 0x121   : > { %10712 = vst [vmem:[#allocation56_spill] sm:$0xff] %v8279_v46  ;;  %896 = vperm.xlu1 %7594, %v8004_v33  }
 0x122   : > { %v8282_v4 = vpop.permute.xlu1 %401 }
 0x123   : > { %10713 = vst [vmem:[#allocation57_spill] sm:$0xff] %v8282_v4  ;;  %972 = vperm.xlu0 %7633, %v8220_v23   ;;  %v8324_v23 = vld [vmem:[%s7880_s13 + $0x1b0] sm:$0xff] }
 0x124   : > { %v8287_v38 = vpop.permute.xlu0 %1368  ;;  %10723 = vst [vmem:[#allocation66_spill] sm:$0xff] %v8324_v23 }
 0x125   : > { %10715 = vst [vmem:[#allocation59_spill] sm:$0xff] %v8287_v38  ;;  %7595 = vset.pattern.permute.xlu1 %v10701_v10  ;;  %v318_v38 = vld [vmem:[%s10452_s1] sm:$0x7] }
 0x126   : > { %1276 = vperm.xlu1 %7595, %v7934_v17   ;;  %v10503_v17 = vsub.s32 0, %v8291_v32 }
 0x127   : > { %v8294_v46 = vpop.permute.xlu1 %836  ;;  %984 = vperm.xlu0 %7633, %v8307_v7   ;;  %v8335_v7 = vrot.slane %v318_v38, %v10505_v8 }
 0x128   : > { %10717 = vst [vmem:[#allocation61_spill] sm:$0xff] %v8294_v46  ;;  %v8296_v33 = vpop.permute.xlu0 %1380  ;;  %v8328_v35 = vrot.slane %v318_v38, %v10503_v17 }
 0x129   : > { %10718 = vst [vmem:[#allocation62_spill] sm:$0xff] %v8296_v33  ;;  %v1422_v8 = vmul.f32 %v8335_v7, %v8100_v3 }
 0x12a   : > { %1280 = vperm.xlu1 %7595, %v7940_v18   ;;  %v10722_v18 = vsub.s32 1, %v8291_v32 }
 0x12b   : > { %v8304_v22 = vpop.permute.xlu1 %840  ;;  %988 = vperm.xlu0 %7633, %v8324_v23  }
 0x12c   : > { %10719 = vst [vmem:[#allocation63_spill] sm:$0xff] %v8304_v22  ;;  %v8310_v5 = vpop.permute.xlu0 %1388  ;;  %v8319_v33 = vrot.slane %v318_v38, %v10722_v18  ;;  %v646_v38 = vmul.f32 %v8328_v35, %v8055_v48 }
 0x12d   : > { %10721 = vst [vmem:[#allocation65_spill] sm:$0xff] %v8310_v5 }
 0x12e   : > { %7596 = vset.pattern.permute.xlu1 %v10696_v0  ;;  %v1031_v21 = vmul.f32 %v8319_v33, %v8035_v40  ;;  %v1034_v4 = vmul.f32 %v8319_v33, %v8068_v53  ;;  %v1036_v53 = vmul.f32 %v8319_v33, %v8045_v44  ;;  %v1038_v48 = vmul.f32 %v8319_v33, %v8143_v39 }
 0x12f   : > { %481 = vperm.xlu1 %7596, %v8313_v11   ;;  %1004 = vperm.xlu0 %7633, %v8240_v58   ;;  %v648_v58 = vmul.f32 %v8328_v35, %v8109_v6  ;;  %v650_v39 = vmul.f32 %v8328_v35, %v8135_v27  ;;  %v1426_v44 = vmul.f32 %v8335_v7, %v8169_v29 }
 0x130   : > { %v8330_v5 = vpop.permute.xlu1 %416 }
 0x131   : > { %10724 = vst [vmem:[#allocation67_spill] sm:$0xff] %v8330_v5  ;;  %v8337_v18 = vpop.permute.xlu0 %321  ;;  %v1032_v5 = vmul.f32 %v8319_v33, %v8043_v43  ;;  %v1419_v43 = vmul.f32 %v8335_v7, %v8080_v57  ;;  %v649_v57 = vmul.f32 %v8328_v35, %v8128_v16  ;;  %v1102_v27 = vadd.f32 %v1038_v48, %v650_v39 }
 0x132   : > { %10725 = vst [vmem:[#allocation68_spill] sm:$0xff] %v8337_v18  ;;  %v643_v17 = vmul.f32 %v8328_v35, %v8337_v18  ;;  %v1037_v18 = vmul.f32 %v8319_v33, %v8053_v47  ;;  %v1425_v16 = vmul.f32 %v8335_v7, %v8156_v49  ;;  %v8406_v39 = vmul.f32 %v8319_v33, %v8073_v55 }
 0x133   : > { %7597 = vset.pattern.permute.xlu1 %v10698_v31 }
 0x134   : > { %v1095_v32 = vadd.f32 %v1031_v21, %v643_v17  ;;  %900 = vperm.xlu1 %7597, %v8313_v11   ;;  %v1098_v21 = vadd.f32 %v1034_v4, %v646_v38  ;;  %v1420_v17 = vmul.f32 %v8335_v7, %v8158_v28  ;;  %v1033_v38 = vmul.f32 %v8319_v33, %v8037_v41 }
 0x135   : > { %v8362_v40 = vpop.permute.xlu0 %326  ;;  %v8364_v3 = vpop.permute.xlu1 %848  ;;  %v1424_v28 = vmul.f32 %v8335_v7, %v8150_v45  ;;  %v1101_v49 = vadd.f32 %v1037_v18, %v649_v57  ;;  %v1490_v45 = vadd.f32 %v1426_v44, %v1102_v27 }
 0x136   : > { %10726 = vst [vmem:[#allocation69_spill] sm:$0xff] %v8362_v40  ;;  %10727 = vst [vmem:[#allocation70_spill] sm:$0xff] %v8364_v3  ;;  %v644_v47 = vmul.f32 %v8328_v35, %v8362_v40  ;;  %v1483_v4 = vadd.f32 %v1419_v43, %v1095_v32  ;;  %v1486_v6 = vadd.f32 %v1422_v8, %v1098_v21  ;;  %v8394_v43 = vld [vmem:[%s10454_s3] ss:$0 sm:$0xff] }
 0x137   : > { %v8385_v40 = vmul.f32 %v8319_v33, %v8063_v51  ;;  %v1100_v8 = vadd.f32 %v1036_v53, %v648_v58  ;;  %v1421_v21 = vmul.f32 %v8335_v7, %v8091_v61  ;;  %v1039_v61 = vmul.f32 %v8319_v33, %v8172_v52 }
 0x138   : > { %v1096_v23 = vadd.f32 %v1032_v5, %v644_v47  ;;  %904 = vperm.xlu1 %7597, %v8009_v34   ;;  %v8401_v5 = vld [vmem:[%s7880_s13 + $0x118] sm:$0xff]  ;;  %v1552_v48 = vadd.f32 %v8394_v43, %v1483_v4  ;;  %v1555_v51 = vadd.f32 %v8394_v43, %v1486_v6  ;;  %v1423_v4 = vmul.f32 %v8335_v7, %v8163_v12 }
 0x139   : > { %v8389_v29 = vpop.permute.xlu0 %331  ;;  %v1488_v53 = vadd.f32 %v1424_v28, %v1100_v8  ;;  %v1559_v8 = vadd.f32 %v8394_v43, %v1490_v45  ;;  %v1040_v45 = vmul.f32 %v8319_v33, %v8178_v30 }
 0x13a   : > { %10728 = vst [vmem:[#allocation71_spill] sm:$0xff] %v8389_v29  ;;  %v645_v47 = vmul.f32 %v8328_v35, %v8389_v29  ;;  %v8398_v34 = vpop.permute.xlu1 %1224  ;;  %v1484_v32 = vadd.f32 %v1420_v17, %v1096_v23  ;;  %v1035_v23 = vmul.f32 %v8319_v33, %v8120_v1  ;;  %v1489_v17 = vadd.f32 %v1425_v16, %v1101_v49 }
 0x13b   : > { %10729 = vst [vmem:[#allocation72_spill] sm:$0xff] %v8398_v34  ;;  %v1616_v6 = vmax.f32 %v1552_v48, 0.0  ;;  %v8428_v16 = vmul.f32 %v8319_v33, %v8083_v59  ;;  %v651_v49 = vmul.f32 %v8328_v35, %v8165_v50  ;;  %v1619_v52 = vmax.f32 %v1555_v51, 0.0 }
 0x13c   : > { %v1097_v58 = vadd.f32 %v1033_v38, %v645_v47  ;;  %7598 = vset.pattern.permute.xlu1 %v10696_v0  ;;  %v1553_v29 = vadd.f32 %v8394_v43, %v1484_v32  ;;  %v1427_v38 = vmul.f32 %v8335_v7, %v8201_v19  ;;  %v1558_v50 = vadd.f32 %v8394_v43, %v1489_v17 }
 0x13d   : > { %v8419_v57 = vpop.permute.xlu0 %341  ;;  %496 = vperm.xlu1 %7598, %v8401_v5   ;;  %v1103_v48 = vadd.f32 %v1039_v61, %v651_v49  ;;  %v1042_v51 = vmul.f32 %v8319_v33, %v8192_v14 }
 0x13e   : > { %10730 = vst [vmem:[#allocation73_spill] sm:$0xff] %v8419_v57  ;;  %v1485_v44 = vadd.f32 %v1421_v21, %v1097_v58  ;;  %v647_v27 = vmul.f32 %v8328_v35, %v8419_v57  ;;  %v8424_v28 = vpop.permute.xlu1 %1232  ;;  %v1617_v18 = vmax.f32 %v1553_v29, 0.0  ;;  %v1557_v58 = vadd.f32 %v8394_v43, %v1488_v53 }
 0x13f   : > { %10731 = vst [vmem:[#allocation74_spill] sm:$0xff] %v8424_v28  ;;  %v1428_v29 = vmul.f32 %v8335_v7, %v8176_v56  ;;  %v1491_v17 = vadd.f32 %v1427_v38, %v1103_v48  ;;  %v1622_v30 = vmax.f32 %v1558_v50, 0.0  ;;  %v1431_v38 = vmul.f32 %v8335_v7, %v8183_v60 }
 0x140   : > { %v1099_v47 = vadd.f32 %v1035_v23, %v647_v27  ;;  %v1680_v32 = vpack.c.bf16 %v1617_v18, %v1616_v6  ;;  %v1554_v21 = vadd.f32 %v8394_v43, %v1485_v44  ;;  %v8452_v27 = vmul.f32 %v8319_v33, %v8093_v62 }
 0x141   : > { %v8439_v57 = vpop.permute.xlu0 %366  ;;  %7599 = vset.pattern.permute.xlu1 %v10698_v31  ;;  %v1623_v6 = vmax.f32 %v1559_v8, 0.0 }
 0x142   : > { %10732 = vst [vmem:[#allocation75_spill] sm:$0xff] %v8439_v57  ;;  %v1487_v23 = vadd.f32 %v1423_v4, %v1099_v47  ;;  %v652_v44 = vmul.f32 %v8328_v35, %v8439_v57  ;;  %6888 = vmatprep.mubr.bf16.mxu0 %v1680_v32  ;;  %912 = vperm.xlu1 %7599, %v8401_v5   ;;  %v8448_v61 = vpop.permute.xlu1 %1236  ;;  %v1618_v53 = vmax.f32 %v1554_v21, 0.0  ;;  %v1621_v47 = vmax.f32 %v1557_v58, 0.0 }
 0x143   : > { %10733 = vst [vmem:[#allocation76_spill] sm:$0xff] %v8448_v61  ;;  %v654_v32 = vmul.f32 %v8328_v35, %v8185_v13  ;;  %v1430_v21 = vmul.f32 %v8335_v7, %v8214_v24  ;;  %v656_v57 = vmul.f32 %v8328_v35, %v8225_v36  ;;  %v1683_v50 = vpack.c.bf16 %v1623_v6, %v1622_v30 }
 0x144   : > { %v1104_v18 = vadd.f32 %v1040_v45, %v652_v44  ;;  %v1681_v4 = vpack.c.bf16 %v1619_v52, %v1618_v53  ;;  %v1556_v49 = vadd.f32 %v8394_v43, %v1487_v23  ;;  %v1432_v45 = vmul.f32 %v8335_v7, %v8267_v42 }
 0x145   : > { %v8463_v19 = vpop.permute.xlu0 %371  ;;  %v1106_v48 = vadd.f32 %v1042_v51, %v654_v32  ;;  %v1560_v44 = vadd.f32 %v8394_v43, %v1491_v17  ;;  %v1434_v51 = vmul.f32 %v8335_v7, %v8188_v63  ;;  %v1108_v32 = vadd.f32 %v8406_v39, %v656_v57 }
 0x146   : > { %v1492_v8 = vadd.f32 %v1428_v29, %v1104_v18  ;;  %v653_v52 = vmul.f32 %v8328_v35, %v8463_v19  ;;  %6889 = vmatmul.mubr.bf16.vlgmr.msra.gmra.mrb[0].mxu0 %v1681_v4  ;;  %7600 = vset.pattern.permute.xlu1 %v10701_v10  ;;  %v1620_v58 = vmax.f32 %v1556_v49, 0.0  ;;  %v1429_v29 = vmul.f32 %v8335_v7, %v8208_v25 }
 0x147   : > { %1288 = vperm.xlu1 %7600, %v8313_v11   ;;  %v8473_v23 = vpop.permute.xlu1 %426  ;;  %v1494_v49 = vadd.f32 %v1430_v21, %v1106_v48  ;;  %v1046_v11 = vmul.f32 %v8319_v33, %v8257_v54  ;;  %v1043_v17 = vmul.f32 %v8319_v33, %v8231_v26  ;;  %v658_v21 = vmul.f32 %v8328_v35, %v8247_v15 }
 0x148   : > { %10734 = vst [vmem:[#allocation77_spill] sm:$0xff] %v8473_v23  ;;  %v1105_v53 = vadd.f32 %v8385_v40, %v653_v52  ;;  %v1682_v18 = vpack.c.bf16 %v1621_v47, %v1620_v58  ;;  %v1561_v4 = vadd.f32 %v8394_v43, %v1492_v8  ;;  %v657_v40 = vmul.f32 %v8328_v35, %v8237_v37 }
 0x149   : > { %v8485_v30 = vpop.permute.xlu0 %381  ;;  %v1496_v39 = vadd.f32 %v1432_v45, %v1108_v32  ;;  %v1624_v57 = vmax.f32 %v1560_v44, 0.0  ;;  %v1436_v52 = vmul.f32 %v8335_v7, %v8194_v2  ;;  %v1433_v58 = vmul.f32 %v8335_v7, %v8276_v9 }
 0x14a   : > { %10735 = vst [vmem:[#allocation78_spill] sm:$0xff] %v8485_v30  ;;  %v1493_v6 = vadd.f32 %v1429_v29, %v1105_v53  ;;  %v655_v47 = vmul.f32 %v8328_v35, %v8485_v30  ;;  %6892 = vmatprep.mubr.bf16.mxu0 %v1682_v18  ;;  %v1625_v8 = vmax.f32 %v1561_v4, 0.0  ;;  %v1110_v18 = vadd.f32 %v1046_v11, %v658_v21 }
 0x14b   : > { %1296 = vperm.xlu1 %7600, %v7946_v20   ;;  %v1047_v30 = vmul.f32 %v8319_v33, %v8294_v46  ;;  %v1563_v44 = vadd.f32 %v8394_v43, %v1494_v49  ;;  %v1109_v4 = vadd.f32 %v8428_v16, %v657_v40  ;;  %v1048_v32 = vmul.f32 %v8319_v33, %v8304_v22 }
 0x14c   : > { %v1107_v48 = vadd.f32 %v1043_v17, %v655_v47  ;;  %v8500_v29 = vpop.permute.xlu1 %852  ;;  %v1562_v53 = vadd.f32 %v8394_v43, %v1493_v6  ;;  %v1684_v20 = vpack.c.bf16 %v1625_v8, %v1624_v57  ;;  %v10738_v6 = vld [vmem:[#allocation57_spill] sm:$0xff]  ;;  %v1435_v47 = vmul.f32 %v8335_v7, %v8398_v34 }
 0x14d   : > { %10736 = vst [vmem:[#allocation79_spill] sm:$0xff] %v8500_v29  ;;  %v8505_v45 = vpop.permute.xlu0 %406  ;;  %v659_v11 = vmul.f32 %v8328_v35, %v10738_v6  ;;  %v1565_v49 = vadd.f32 %v8394_v43, %v1496_v39  ;;  %v1497_v16 = vadd.f32 %v1433_v58, %v1109_v4  ;;  %v1498_v57 = vadd.f32 %v1434_v51, %v1110_v18  ;;  %v10741_v51 = vld [vmem:[#allocation5_spill] sm:$0xff] }
 0x14e   : > { %10737 = vst [vmem:[#allocation80_spill] sm:$0xff] %v8505_v45  ;;  %v1495_v2 = vadd.f32 %v1431_v38, %v1107_v48  ;;  %v660_v17 = vmul.f32 %v8328_v35, %v8505_v45  ;;  %6893 = vmatmul.mubr.bf16.gmra.mrb[4].mxu0 %v1683_v50  ;;  %v1626_v21 = vmax.f32 %v1562_v53, 0.0  ;;  %v1627_v22 = vmax.f32 %v1563_v44, 0.0 }
 0x14f   : > { %1300 = vperm.xlu1 %7600, %v8401_v5   ;;  %6896 = vmatprep.mubr.bf16.mxu0 %v1684_v20  ;;  %v1111_v8 = vadd.f32 %v1047_v30, %v659_v11  ;;  %v1629_v58 = vmax.f32 %v1565_v49, 0.0  ;;  %v1050_v53 = vmul.f32 %v8319_v33, %v8364_v3  ;;  %v1566_v18 = vadd.f32 %v8394_v43, %v1497_v16 }
 0x150   : > { %v1112_v40 = vadd.f32 %v1048_v32, %v660_v17  ;;  %v1564_v38 = vadd.f32 %v8394_v43, %v1495_v2  ;;  %v1685_v30 = vpack.c.bf16 %v1627_v22, %v1626_v21  ;;  %v1567_v4 = vadd.f32 %v8394_v43, %v1498_v57  ;;  %v10744_v17 = vld [vmem:[#allocation67_spill] sm:$0xff]  ;;  %v10746_v57 = vld [vmem:[#allocation42_spill] sm:$0xff] }
 0x151   : > { %v8520_v48 = vpop.permute.xlu0 %411  ;;  %v8522_v50 = vpop.permute.xlu1 %431  ;;  %v1499_v5 = vadd.f32 %v1435_v47, %v1111_v8  ;;  %v662_v11 = vmul.f32 %v8328_v35, %v10744_v17  ;;  %v1438_v22 = vmul.f32 %v8335_v7, %v8448_v61  ;;  %v10745_v21 = vld [vmem:[#allocation7_spill] sm:$0xff]  ;;  %v1439_v8 = vmul.f32 %v8335_v7, %v10746_v57  ;;  %v10814_v57 = vld [vmem:[#allocation32_spill] sm:$0xff] }
 0x152   : > { %10739 = vst [vmem:[#allocation81_spill] sm:$0xff] %v8520_v48  ;;  %10740 = vst [vmem:[#allocation82_spill] sm:$0xff] %v8522_v50  ;;  %v1500_v45 = vadd.f32 %v1436_v52, %v1112_v40  ;;  %v661_v34 = vmul.f32 %v8328_v35, %v8520_v48  ;;  %v1628_v39 = vmax.f32 %v1564_v38, 0.0  ;;  %v1630_v40 = vmax.f32 %v1566_v18, 0.0 }
 0x153   : > { %7601 = vset.pattern.permute.xlu1 %v10696_v0  ;;  %v1568_v47 = vadd.f32 %v8394_v43, %v1499_v5  ;;  %v1114_v49 = vadd.f32 %v1050_v53, %v662_v11  ;;  %v10748_v5 = vld [vmem:[#allocation20_spill] sm:$0xff]  ;;  %v664_v18 = vmul.f32 %v8328_v35, %v8473_v23 }
 0x154   : > { %v1113_v2 = vadd.f32 %v8452_v27, %v661_v34  ;;  %506 = vperm.xlu1 %7601, %v10741_v51   ;;  %v1686_v44 = vpack.c.bf16 %v1629_v58, %v1628_v39  ;;  %v1569_v32 = vadd.f32 %v8394_v43, %v1500_v45  ;;  %v1437_v34 = vmul.f32 %v8335_v7, %v8424_v28  ;;  %v7707_v23 = vld [vmem:[%s7880_s13 + $0x178] sm:$0xff] }
 0x155   : > { %v8532_v52 = vpop.permute.xlu0 %421  ;;  %v8534_v20 = vpop.permute.xlu1 %436  ;;  %v1051_v45 = vmul.f32 %v8319_v33, %v8500_v29  ;;  %v1502_v39 = vadd.f32 %v1438_v22, %v1114_v49  ;;  %v1052_v53 = vmul.f32 %v8319_v33, %v10748_v5  ;;  %v10749_v22 = vld [vmem:[#allocation43_spill] sm:$0xff] }
 0x156   : > { %10742 = vst [vmem:[#allocation5_spill] sm:$0xff] %v8532_v52  ;;  %10743 = vst [vmem:[#allocation83_spill] sm:$0xff] %v8534_v20  ;;  %v663_v27 = vmul.f32 %v8328_v35, %v8532_v52  ;;  %6897 = vmatmul.mubr.bf16.gmra.mrb[8].mxu0 %v1685_v30  ;;  %v1501_v16 = vadd.f32 %v1437_v34, %v1113_v2  ;;  %v1633_v38 = vmax.f32 %v1569_v32, 0.0  ;;  %v1631_v30 = vmax.f32 %v1567_v4, 0.0 }
 0x157   : > { %6900 = vmatprep.mubr.bf16.mxu0 %v1686_v44  ;;  %v1632_v44 = vmax.f32 %v1568_v47, 0.0  ;;  %v666_v32 = vmul.f32 %v8328_v35, %v8534_v20  ;;  %v1571_v47 = vadd.f32 %v8394_v43, %v1502_v39 }
 0x158   : > { %7602 = vset.pattern.permute.xlu1 %v10698_v31  ;;  %v1115_v58 = vadd.f32 %v1051_v45, %v663_v27  ;;  %v1687_v11 = vpack.c.bf16 %v1631_v30, %v1630_v40  ;;  %v1570_v34 = vadd.f32 %v8394_v43, %v1501_v16  ;;  %v1442_v27 = vmul.f32 %v8335_v7, %v10749_v22 }
 0x159   : > { %916 = vperm.xlu1 %7602, %v10745_v21   ;;  %v1688_v4 = vpack.c.bf16 %v1633_v38, %v1632_v44  ;;  %v10750_v21 = vld [vmem:[#allocation6_spill] sm:$0xff]  ;;  %v1116_v16 = vadd.f32 %v1052_v53, %v664_v18  ;;  %v665_v30 = vmul.f32 %v8328_v35, %v8522_v50  ;;  %v10753_v44 = vld [vmem:[#allocation8_spill] sm:$0xff] }
 0x15a   : > { %v8553_v51 = vpop.permute.xlu1 %864  ;;  %v1503_v49 = vadd.f32 %v1439_v8, %v1115_v58  ;;  %v1634_v8 = vmax.f32 %v1570_v34, 0.0 }
 0x15b   : > { %10747 = vst [vmem:[#allocation7_spill] sm:$0xff] %v8553_v51  ;;  %v1054_v2 = vmul.f32 %v8319_v33, %v8553_v51  ;;  %v10751_v51 = vld [vmem:[#allocation22_spill] sm:$0xff] }
 0x15c   : > { %v1053_v29 = vmul.f32 %v8319_v33, %v10751_v51  ;;  %v1572_v39 = vadd.f32 %v8394_v43, %v1503_v49 }
 0x15d   : > { %7603 = vset.pattern.permute.xlu1 %v10696_v0  ;;  %v1118_v45 = vadd.f32 %v1054_v2, %v666_v32  ;;  %v1635_v32 = vmax.f32 %v1571_v47, 0.0 }
 0x15e   : > { %511 = vperm.xlu1 %7603, %v10750_v21   ;;  %6901 = vmatmul.mubr.bf16.gmra.mrb[12].mxu0 %v1687_v11  ;;  %v1636_v34 = vmax.f32 %v1572_v39, 0.0  ;;  %v8598_v39 = vpop.permute.xlu0 %446 }
 0x15f   : > { %6904 = vmatprep.mubr.bf16.mxu0 %v1688_v4  ;;  %v8571_v40 = vpop.permute.xlu1 %1244  ;;  %v1506_v58 = vadd.f32 %v1442_v27, %v1118_v45  ;;  %v1117_v4 = vadd.f32 %v1053_v29, %v665_v30  ;;  %v1689_v18 = vpack.c.bf16 %v1635_v32, %v1634_v8  ;;  %v294_v32 = vld [vmem:[%s7880_s13 + $0x140] sm:$0xff]  ;;  %10758 = vst [vmem:[#allocation85_spill] sm:$0xff] %v8598_v39 }
 0x160   : > { %10752 = vst [vmem:[#allocation20_spill] sm:$0xff] %v8571_v40  ;;  %v1440_v38 = vmul.f32 %v8335_v7, %v8571_v40 }
 0x161   : > { %v1575_v45 = vadd.f32 %v8394_v43, %v1506_v58  ;;  %v7705_v58 = vld [vmem:[%s7880_s13 + $0x130] sm:$0xff] }
 0x162   : > { %v1504_v2 = vadd.f32 %v1440_v38, %v1116_v16  ;;  %516 = vperm.xlu1 %7603, %v10753_v44   ;;  %v7704_v38 = vld [vmem:[%s7880_s13 + $0x128] sm:$0xff] }
 0x163   : > { %v8579_v11 = vpop.permute.xlu1 %1248  ;;  %v1639_v30 = vmax.f32 %v1575_v45, 0.0  ;;  %v8612_v45 = vpop.permute.xlu0 %451 }
 0x164   : > { %10754 = vst [vmem:[#allocation6_spill] sm:$0xff] %v8579_v11  ;;  %v1441_v53 = vmul.f32 %v8335_v7, %v8579_v11  ;;  %v1573_v21 = vadd.f32 %v8394_v43, %v1504_v2  ;;  %10762 = vst [vmem:[#allocation88_spill] sm:$0xff] %v8612_v45 }
 0x166   : > { %v1505_v22 = vadd.f32 %v1441_v53, %v1117_v4  ;;  %7605 = vset.pattern.permute.xlu1 %v10698_v31  ;;  %6905 = vmatmul.mubr.bf16.gmra.mrb[16].mxu0 %v1689_v18  ;;  %v1637_v27 = vmax.f32 %v1573_v21, 0.0  ;;  %v668_v4 = vmul.f32 %v8328_v35, %v8598_v39  ;;  %v10760_v18 = vld [vmem:[#allocation44_spill] sm:$0xff] }
 0x167   : > { %928 = vperm.xlu1 %7605, %v10753_v44   ;;  %v1444_v21 = vmul.f32 %v8335_v7, %v10760_v18 }
 0x168   : > { %v8587_v29 = vpop.permute.xlu1 %441  ;;  %v1690_v49 = vpack.c.bf16 %v1637_v27, %v1636_v34  ;;  %v1574_v47 = vadd.f32 %v8394_v43, %v1505_v22 }
 0x169   : > { %10755 = vst [vmem:[#allocation22_spill] sm:$0xff] %v8587_v29 }
 0x16a   : > { %6908 = vmatprep.mubr.bf16.mxu0 %v1690_v49  ;;  %v1638_v16 = vmax.f32 %v1574_v47, 0.0  ;;  %v10763_v47 = vld [vmem:[#allocation9_spill] sm:$0xff] }
 0x16b   : > { %7606 = vset.pattern.permute.xlu1 %v10701_v10 }
 0x16c   : > { %1308 = vperm.xlu1 %7606, %v7704_v38   ;;  %v1691_v8 = vpack.c.bf16 %v1639_v30, %v1638_v16  ;;  %v10764_v16 = vld [vmem:[#allocation23_spill] sm:$0xff]  ;;  %v667_v38 = vmul.f32 %v8328_v35, %v8587_v29 }
 0x16d   : > { %v8592_v2 = vpop.permute.xlu1 %868  ;;  %v1057_v30 = vmul.f32 %v8319_v33, %v10764_v16 }
 0x16e   : > { %10756 = vst [vmem:[#allocation8_spill] sm:$0xff] %v8592_v2  ;;  %6909 = vmatmul.mubr.bf16.gmra.mrb[20].mxu0 %v1691_v8  ;;  %v1055_v49 = vmul.f32 %v8319_v33, %v8592_v2 }
 0x170   : > { %1312 = vperm.xlu1 %7606, %v7705_v58   ;;  %v669_v58 = vmul.f32 %v8328_v35, %v8612_v45  ;;  %v1119_v18 = vadd.f32 %v1055_v49, %v667_v38 }
 0x171   : > { %v8595_v44 = vpop.permute.xlu1 %872 }
 0x172   : > { %10757 = vst [vmem:[#allocation84_spill] sm:$0xff] %v8595_v44  ;;  %v1056_v53 = vmul.f32 %v8319_v33, %v8595_v44  ;;  %v1121_v39 = vadd.f32 %v1057_v30, %v669_v58  ;;  %v7649_v58 = vld [vmem:[%s10453_s2 + $0x48] sm:$0xff]  }
 0x174   : > { %7607 = vset.pattern.permute.xlu1 %v10696_v0  ;;  %v1120_v34 = vadd.f32 %v1056_v53, %v668_v4  ;;  %v297_v53 = vld [vmem:[%s7880_s13 + $0x158] sm:$0xff] }
 0x175   : > { %521 = vperm.xlu1 %7607, %v294_v32  }
 0x176   : > { %v8601_v22 = vpop.permute.xlu1 %456  ;;  %v1508_v8 = vadd.f32 %v1444_v21, %v1120_v34  ;;  %v7648_v21 = vld [vmem:[%s10453_s2 + $0x40] sm:$0xff]  }
 0x177   : > { %10759 = vst [vmem:[#allocation86_spill] sm:$0xff] %v8601_v22  ;;  %6952 = vmatprep.subr.bf16.mxu1 %v7648_v21 }
 0x178   : > { %v1577_v2 = vadd.f32 %v8394_v43, %v1508_v8  ;;  %6953 = vmatpush3.bf16.msra.mxu1 %v7648_v21 }
 0x179   : > { %7608 = vset.pattern.permute.xlu1 %v10698_v31  ;;  %6954 = vmatprep.subr.bf16.mxu1 %v7649_v58 }
 0x17a   : > { %932 = vperm.xlu1 %7608, %v294_v32   ;;  %v1641_v8 = vmax.f32 %v1577_v2, 0.0 }
 0x17b   : > { %v8610_v27 = vpop.permute.xlu1 %880 }
 0x17c   : > { %10761 = vst [vmem:[#allocation87_spill] sm:$0xff] %v8610_v27  ;;  %v1058_v16 = vmul.f32 %v8319_v33, %v8610_v27  ;;  %6955 = vmatpush3.bf16.msra.mxu1 %v7649_v58  ;;  %v10777_v27 = vld [vmem:[#allocation50_spill] sm:$0xff] }
 0x17e   : > { %936 = vperm.xlu1 %7608, %v10763_v47  }
 0x180   : > { %v8623_v4 = vpop.permute.xlu1 %1256 }
 0x181   : > { %10765 = vst [vmem:[#allocation9_spill] sm:$0xff] %v8623_v4  ;;  %v1443_v44 = vmul.f32 %v8335_v7, %v8623_v4 }
 0x182   : > { %7609 = vset.pattern.permute.xlu1 %v10696_v0 }
 0x183   : > { %v1507_v47 = vadd.f32 %v1443_v44, %v1119_v18  ;;  %536 = vperm.xlu1 %7609, %v297_v53   ;;  %v670_v44 = vmul.f32 %v8328_v35, %v8601_v22  ;;  %v10778_v22 = vld [vmem:[#allocation24_spill] sm:$0xff] }
 0x184   : > { %v8633_v34 = vpop.permute.xlu1 %1264 }
 0x185   : > { %10766 = vst [vmem:[#allocation89_spill] sm:$0xff] %v8633_v34  ;;  %v1445_v49 = vmul.f32 %v8335_v7, %v8633_v34  ;;  %v1576_v38 = vadd.f32 %v8394_v43, %v1507_v47  ;;  %v1122_v34 = vadd.f32 %v1058_v16, %v670_v44 }
 0x187   : > { %v1509_v18 = vadd.f32 %v1445_v49, %v1121_v39  ;;  %7610 = vset.pattern.permute.xlu1 %v10698_v31  ;;  %v1640_v30 = vmax.f32 %v1576_v38, 0.0  ;;  %v7650_v39 = vld [vmem:[%s10453_s2 + $0x50] sm:$0xff]  }
 0x188   : > { %944 = vperm.xlu1 %7610, %v297_v53   ;;  %v8646_v4 = vpop.permute.xlu1 %1268  ;;  %6956 = vmatprep.subr.bf16.mxu1 %v7650_v39 }
 0x189   : > { %10767 = vst [vmem:[#allocation90_spill] sm:$0xff] %v8646_v4  ;;  %v1446_v47 = vmul.f32 %v8335_v7, %v8646_v4  ;;  %v1692_v21 = vpack.c.bf16 %v1641_v8, %v1640_v30  ;;  %v1578_v2 = vadd.f32 %v8394_v43, %v1509_v18  ;;  %6957 = vmatpush3.bf16.msra.mxu1 %v7650_v39  ;;  %v10769_v8 = vld [vmem:[#allocation40_spill] sm:$0xff]  ;;  %v7653_v39 = vld [vmem:[%s10453_s2 + $0x68] sm:$0xff]  }
 0x18b   : > { %v1510_v49 = vadd.f32 %v1446_v47, %v1122_v34  ;;  %6912 = vmatprep.mubr.bf16.mxu0 %v1692_v21  ;;  %v1642_v44 = vmax.f32 %v1578_v2, 0.0  ;;  %v7651_v34 = vld [vmem:[%s10453_s2 + $0x58] sm:$0xff]   ;;  %v8668_v47 = vld [vmem:[%s7880_s13 + $0x1e8] sm:$0xff]  ;;  %v8679_v2 = vpop.permute.xlu0 %461 }
 0x18c   : > { %7611 = vset.pattern.permute.xlu1 %v10701_v10  ;;  %6958 = vmatprep.subr.bf16.mxu1 %v7651_v34  ;;  %10772 = vst [vmem:[#allocation93_spill] sm:$0xff] %v8679_v2 }
 0x18d   : > { %1320 = vperm.xlu1 %7611, %v294_v32   ;;  %v8655_v16 = vpop.permute.xlu1 %466  ;;  %v1579_v38 = vadd.f32 %v8394_v43, %v1510_v49  ;;  %6959 = vmatpush3.bf16.msra.mxu1 %v7651_v34  ;;  %v7652_v32 = vld [vmem:[%s10453_s2 + $0x60] sm:$0xff]   ;;  %v8677_v49 = vld [vmem:[%s7880_s13 + $0x1f0] sm:$0xff] }
 0x18e   : > { %10768 = vst [vmem:[#allocation91_spill] sm:$0xff] %v8655_v16  ;;  %6960 = vmatprep.subr.bf16.mxu1 %v7652_v32  ;;  %1016 = vperm.xlu0 %7633, %v8668_v47  }
 0x18f   : > { %v1643_v30 = vmax.f32 %v1579_v38, 0.0  ;;  %v10773_v38 = vld [vmem:[#allocation54_spill] sm:$0xff] }
 0x191   : > { %1328 = vperm.xlu1 %7611, %v10769_v8   ;;  %v1693_v18 = vpack.c.bf16 %v1643_v30, %v1642_v44  ;;  %6961 = vmatpush3.bf16.msra.mxu1 %v7652_v32  ;;  %v7654_v44 = vld [vmem:[%s10453_s2 + $0x70] sm:$0xff]   ;;  %v671_v30 = vmul.f32 %v8328_v35, %v8679_v2  ;;  %v7706_v8 = vld [vmem:[%s7880_s13 + $0x160] sm:$0xff]  ;;  %v10775_v32 = vld [vmem:[#allocation46_spill] sm:$0xff] }
 0x192   : > { %v8662_v58 = vpop.permute.xlu1 %884  ;;  %6962 = vmatprep.subr.bf16.mxu1 %v7653_v39  ;;  %1020 = vperm.xlu0 %7633, %v8677_v49  }
 0x193   : > { %10770 = vst [vmem:[#allocation40_spill] sm:$0xff] %v8662_v58  ;;  %6913 = vmatmul.mubr.bf16.gmra.mrb[24].mxu0 %v1693_v18  ;;  %v1059_v34 = vmul.f32 %v8319_v33, %v8662_v58  ;;  %v7655_v18 = vld [vmem:[%s10453_s2 + $0x78] sm:$0xff]  }
 0x195   : > { %1332 = vperm.xlu1 %7611, %v297_v53   ;;  %6963 = vmatpush3.bf16.msra.mxu1 %v7653_v39  ;;  %v1447_v39 = vmul.f32 %v8335_v7, %v10775_v32  ;;  %v1123_v4 = vadd.f32 %v1059_v34, %v671_v30  ;;  %v10779_v30 = vld [vmem:[#allocation47_spill] sm:$0xff] }
 0x196   : > { %6964 = vmatprep.subr.bf16.mxu1 %v7654_v44  ;;  %7638 = vset.pattern.permute.xlu0 %v10701_v10 }
 0x197   : > { %v8671_v21 = vpop.permute.xlu1 %471  ;;  %1400 = vperm.xlu0 %7638, %v10777_v27   ;;  %v1450_v27 = vmul.f32 %v8335_v7, %v10779_v30  ;;  %v1511_v34 = vadd.f32 %v1447_v39, %v1123_v4 }
 0x198   : > { %10771 = vst [vmem:[#allocation92_spill] sm:$0xff] %v8671_v21 }
 0x199   : > { %7612 = vset.pattern.permute.xlu1 %v10696_v0  ;;  %6965 = vmatpush3.bf16.msra.mxu1 %v7654_v44  ;;  %v672_v44 = vmul.f32 %v8328_v35, %v8655_v16  ;;  %v673_v16 = vmul.f32 %v8328_v35, %v8671_v21 }
 0x19a   : > { %546 = vperm.xlu1 %7612, %v10773_v38   ;;  %6966 = vmatprep.subr.bf16.mxu1 %v7655_v18 }
 0x19b   : > { %v8684_v53 = vpop.permute.xlu1 %476 }
 0x19c   : > { %10774 = vst [vmem:[#allocation54_spill] sm:$0xff] %v8684_v53  ;;  %v674_v29 = vmul.f32 %v8328_v35, %v8684_v53 }
 0x19d   : > { %6967 = vmatpush3.bf16.msra.mxu1 %v7655_v18 }
 0x19e   : > { %7613 = vset.pattern.permute.xlu1 %v10698_v31 }
 0x19f   : > { %948 = vperm.xlu1 %7613, %v7706_v8   ;;  %v1060_v8 = vmul.f32 %v8319_v33, %v10778_v22  ;;  %v10782_v22 = vld [vmem:[#allocation26_spill] sm:$0xff] }
 0x1a0   : > { %v8701_v2 = vpop.permute.xlu1 %896  ;;  %v1061_v40 = vmul.f32 %v8319_v33, %v10782_v22 }
 0x1a1   : > { %10776 = vst [vmem:[#allocation94_spill] sm:$0xff] %v8701_v2  ;;  %v1062_v58 = vmul.f32 %v8319_v33, %v8701_v2  ;;  %v10780_v2 = vld [vmem:[#allocation58_spill] sm:$0xff]  ;;  %v1124_v11 = vadd.f32 %v1060_v8, %v672_v44 }
 0x1a3   : > { %7614 = vset.pattern.permute.xlu1 %v10696_v0  ;;  %v1126_v32 = vadd.f32 %v1062_v58, %v674_v29  ;;  %v1580_v29 = vadd.f32 %v8394_v43, %v1511_v34  ;;  %v1125_v58 = vadd.f32 %v1061_v40, %v673_v16 }
 0x1a4   : > { %551 = vperm.xlu1 %7614, %v10780_v2  }
 0x1a5   : > { %v8716_v45 = vpop.permute.xlu1 %1276  ;;  %v1514_v18 = vadd.f32 %v1450_v27, %v1126_v32  ;;  %v1644_v30 = vmax.f32 %v1580_v29, 0.0  ;;  %v8741_v29 = vld [vmem:[%s7880_s13 + $0x1f8] sm:$0xff] }
 0x1a6   : > { %10781 = vst [vmem:[#allocation50_spill] sm:$0xff] %v8716_v45  ;;  %v1448_v53 = vmul.f32 %v8335_v7, %v8716_v45  ;;  %1412 = vperm.xlu0 %7638, %v8741_v29  }
 0x1a8   : > { %v1512_v20 = vadd.f32 %v1448_v53, %v1124_v11  ;;  %556 = vperm.xlu1 %7614, %v7707_v23   ;;  %v1583_v11 = vadd.f32 %v8394_v43, %v1514_v18 }
 0x1a9   : > { %v8726_v4 = vpop.permute.xlu1 %1280 }
 0x1aa   : > { %10783 = vst [vmem:[#allocation58_spill] sm:$0xff] %v8726_v4  ;;  %v1449_v39 = vmul.f32 %v8335_v7, %v8726_v4  ;;  %v1581_v8 = vadd.f32 %v8394_v43, %v1512_v20  ;;  %v1647_v27 = vmax.f32 %v1583_v11, 0.0 }
 0x1ac   : > { %v1513_v44 = vadd.f32 %v1449_v39, %v1125_v58  ;;  %7615 = vset.pattern.permute.xlu1 %v10698_v31  ;;  %v1645_v45 = vmax.f32 %v1581_v8, 0.0 }
 0x1ad   : > { %960 = vperm.xlu1 %7615, %v7707_v23  }
 0x1ae   : > { %v8733_v53 = vpop.permute.xlu1 %481  ;;  %v1694_v32 = vpack.c.bf16 %v1645_v45, %v1644_v30  ;;  %v1582_v40 = vadd.f32 %v8394_v43, %v1513_v44  ;;  %v302_v45 = vld [vmem:[%s7880_s13 + $0x180] sm:$0xff]  ;;  %v8749_v30 = vpop.permute.xlu0 %486 }
 0x1af   : > { %10784 = vst [vmem:[#allocation95_spill] sm:$0xff] %v8733_v53  ;;  %10787 = vst [vmem:[#allocation98_spill] sm:$0xff] %v8749_v30  ;;  %v676_v18 = vmul.f32 %v8328_v35, %v8749_v30  ;;  %v10793_v30 = vld [vmem:[#allocation28_spill] sm:$0xff] }
 0x1b0   : > { %6916 = vmatprep.mubr.bf16.mxu0 %v1694_v32  ;;  %v1646_v16 = vmax.f32 %v1582_v40, 0.0  ;;  %v7708_v40 = vld [vmem:[%s7880_s13 + $0x188] sm:$0xff] }
 0x1b1   : > { %7616 = vset.pattern.permute.xlu1 %v10701_v10 }
 0x1b2   : > { %1340 = vperm.xlu1 %7616, %v10773_v38   ;;  %v1695_v20 = vpack.c.bf16 %v1647_v27, %v1646_v16  ;;  %v8764_v32 = vpop.permute.xlu0 %491  ;;  %v675_v16 = vmul.f32 %v8328_v35, %v8733_v53 }
 0x1b3   : > { %v8738_v34 = vpop.permute.xlu1 %900  ;;  %10791 = vst [vmem:[#allocation101_spill] sm:$0xff] %v8764_v32 }
 0x1b4   : > { %10785 = vst [vmem:[#allocation96_spill] sm:$0xff] %v8738_v34  ;;  %6917 = vmatmul.mubr.bf16.gmra.mrb[28].mxu0 %v1695_v20  ;;  %v1063_v11 = vmul.f32 %v8319_v33, %v8738_v34 }
 0x1b6   : > { %1344 = vperm.xlu1 %7616, %v10780_v2   ;;  %v10789_v2 = vld [vmem:[#allocation48_spill] sm:$0xff] }
 0x1b7   : > { %v8745_v23 = vpop.permute.xlu1 %904  ;;  %v1452_v39 = vmul.f32 %v8335_v7, %v10789_v2  ;;  %v1065_v2 = vmul.f32 %v8319_v33, %v10793_v30 }
 0x1b8   : > { %10786 = vst [vmem:[#allocation97_spill] sm:$0xff] %v8745_v23  ;;  %v1064_v58 = vmul.f32 %v8319_v33, %v8745_v23  ;;  %v305_v23 = vld [vmem:[%s7880_s13 + $0x198] sm:$0xff] }
 0x1ba   : > { %7617 = vset.pattern.permute.xlu1 %v10696_v0  ;;  %v1128_v8 = vadd.f32 %v1064_v58, %v676_v18  ;;  %v677_v18 = vmul.f32 %v8328_v35, %v8764_v32  ;;  %v1127_v58 = vadd.f32 %v1063_v11, %v675_v16 }
 0x1bb   : > { %561 = vperm.xlu1 %7617, %v302_v45  }
 0x1bc   : > { %v8751_v38 = vpop.permute.xlu1 %496  ;;  %v1516_v27 = vadd.f32 %v1452_v39, %v1128_v8  ;;  %v1129_v8 = vadd.f32 %v1065_v2, %v677_v18  ;;  %v8792_v2 = vpop.permute.xlu0 %501 }
 0x1bd   : > { %10788 = vst [vmem:[#allocation99_spill] sm:$0xff] %v8751_v38  ;;  %v678_v16 = vmul.f32 %v8328_v35, %v8751_v38  ;;  %10796 = vst [vmem:[#allocation105_spill] sm:$0xff] %v8792_v2 }
 0x1be   : > { %v1585_v53 = vadd.f32 %v8394_v43, %v1516_v27 }
 0x1bf   : > { %7618 = vset.pattern.permute.xlu1 %v10698_v31 }
 0x1c0   : > { %964 = vperm.xlu1 %7618, %v302_v45  }
 0x1c1   : > { %v8760_v44 = vpop.permute.xlu1 %912 }
 0x1c2   : > { %10790 = vst [vmem:[#allocation100_spill] sm:$0xff] %v8760_v44  ;;  %v1066_v4 = vmul.f32 %v8319_v33, %v8760_v44 }
 0x1c4   : > { %968 = vperm.xlu1 %7618, %v7708_v40   ;;  %v1130_v18 = vadd.f32 %v1066_v4, %v678_v16  ;;  %v10799_v4 = vld [vmem:[#allocation45_spill] sm:$0xff] }
 0x1c6   : > { %v8769_v20 = vpop.permute.xlu1 %1288 }
 0x1c7   : > { %10792 = vst [vmem:[#allocation102_spill] sm:$0xff] %v8769_v20  ;;  %v1451_v34 = vmul.f32 %v8335_v7, %v8769_v20 }
 0x1c8   : > { %7619 = vset.pattern.permute.xlu1 %v10696_v0 }
 0x1c9   : > { %v1515_v40 = vadd.f32 %v1451_v34, %v1127_v58  ;;  %576 = vperm.xlu1 %7619, %v305_v23   ;;  %v1649_v58 = vmax.f32 %v1585_v53, 0.0 }
 0x1ca   : > { %v8780_v39 = vpop.permute.xlu1 %1296 }
 0x1cb   : > { %10794 = vst [vmem:[#allocation103_spill] sm:$0xff] %v8780_v39  ;;  %v1453_v30 = vmul.f32 %v8335_v7, %v8780_v39  ;;  %v1584_v11 = vadd.f32 %v8394_v43, %v1515_v40 }
 0x1cd   : > { %v1517_v20 = vadd.f32 %v1453_v30, %v1129_v8  ;;  %7620 = vset.pattern.permute.xlu1 %v10698_v31  ;;  %v1648_v34 = vmax.f32 %v1584_v11, 0.0  ;;  %v8798_v30 = vpop.permute.xlu0 %526 }
 0x1ce   : > { %976 = vperm.xlu1 %7620, %v305_v23   ;;  %v8790_v27 = vpop.permute.xlu1 %1300  ;;  %10797 = vst [vmem:[#allocation106_spill] sm:$0xff] %v8798_v30 }
 0x1cf   : > { %10795 = vst [vmem:[#allocation104_spill] sm:$0xff] %v8790_v27  ;;  %v1454_v44 = vmul.f32 %v8335_v7, %v8790_v27  ;;  %v1696_v39 = vpack.c.bf16 %v1649_v58, %v1648_v34  ;;  %v1586_v40 = vadd.f32 %v8394_v43, %v1517_v20  ;;  %v679_v58 = vmul.f32 %v8328_v35, %v8792_v2  ;;  %v10809_v27 = vld [vmem:[#allocation30_spill] sm:$0xff] }
 0x1d1   : > { %v1518_v32 = vadd.f32 %v1454_v44, %v1130_v18  ;;  %6920 = vmatprep.mubr.bf16.mxu0 %v1696_v39  ;;  %v1650_v11 = vmax.f32 %v1586_v40, 0.0  ;;  %v8806_v44 = vpop.permute.xlu0 %531  ;;  %v10807_v40 = vld [vmem:[#allocation49_spill] sm:$0xff] }
 0x1d2   : > { %7621 = vset.pattern.permute.xlu1 %v10701_v10  ;;  %10801 = vst [vmem:[#allocation108_spill] sm:$0xff] %v8806_v44 }
 0x1d3   : > { %1352 = vperm.xlu1 %7621, %v302_v45   ;;  %v8800_v53 = vpop.permute.xlu1 %506  ;;  %v1587_v8 = vadd.f32 %v8394_v43, %v1518_v32  ;;  %v10804_v45 = vld [vmem:[#allocation64_spill] sm:$0xff] }
 0x1d4   : > { %10798 = vst [vmem:[#allocation107_spill] sm:$0xff] %v8800_v53  ;;  %v680_v2 = vmul.f32 %v8328_v35, %v8800_v53 }
 0x1d5   : > { %v1651_v38 = vmax.f32 %v1587_v8, 0.0  ;;  %v8810_v39 = vpop.permute.xlu0 %541  ;;  %v1455_v8 = vmul.f32 %v8335_v7, %v10807_v40 }
 0x1d6   : > { %10803 = vst [vmem:[#allocation110_spill] sm:$0xff] %v8810_v39 }
 0x1d7   : > { %1360 = vperm.xlu1 %7621, %v10799_v4   ;;  %v1697_v16 = vpack.c.bf16 %v1651_v38, %v1650_v11 }
 0x1d8   : > { %v8804_v34 = vpop.permute.xlu1 %916 }
 0x1d9   : > { %10800 = vst [vmem:[#allocation45_spill] sm:$0xff] %v8804_v34  ;;  %6921 = vmatmul.mubr.bf16.gmra.mrb[32].mxu0 %v1697_v16  ;;  %v1067_v38 = vmul.f32 %v8319_v33, %v8804_v34  ;;  %v8821_v18 = vpop.permute.xlu0 %566 }
 0x1da   : > { %10806 = vst [vmem:[#allocation111_spill] sm:$0xff] %v8821_v18 }
 0x1db   : > { %1364 = vperm.xlu1 %7621, %v305_v23   ;;  %v7709_v23 = vld [vmem:[%s7880_s13 + $0x1a0] sm:$0xff]  ;;  %v1131_v11 = vadd.f32 %v1067_v38, %v679_v58  ;;  %v10810_v58 = vld [vmem:[#allocation66_spill] sm:$0xff] }
 0x1dd   : > { %v8808_v20 = vpop.permute.xlu1 %511  ;;  %v1519_v22 = vadd.f32 %v1455_v8, %v1131_v11  ;;  %v8838_v38 = vpop.permute.xlu0 %571  ;;  %v1069_v8 = vmul.f32 %v8319_v33, %v10814_v57 }
 0x1de   : > { %10802 = vst [vmem:[#allocation109_spill] sm:$0xff] %v8808_v20  ;;  %10811 = vst [vmem:[#allocation66_spill] sm:$0xff] %v8838_v38 }
 0x1df   : > { %7622 = vset.pattern.permute.xlu1 %v10696_v0 }
 0x1e0   : > { %586 = vperm.xlu1 %7622, %v10804_v45  }
 0x1e1   : > { %v8814_v32 = vpop.permute.xlu1 %516 }
 0x1e2   : > { %10805 = vst [vmem:[#allocation64_spill] sm:$0xff] %v8814_v32  ;;  %v682_v34 = vmul.f32 %v8328_v35, %v8814_v32  ;;  %v681_v32 = vmul.f32 %v8328_v35, %v8808_v20 }
 0x1e4   : > { %7623 = vset.pattern.permute.xlu1 %v10698_v31  ;;  %v1133_v48 = vadd.f32 %v1069_v8, %v681_v32 }
 0x1e5   : > { %980 = vperm.xlu1 %7623, %v7709_v23   ;;  %v1068_v23 = vmul.f32 %v8319_v33, %v10809_v27  ;;  %v1588_v27 = vadd.f32 %v8394_v43, %v1519_v22 }
 0x1e6   : > { %v8826_v4 = vpop.permute.xlu1 %928 }
 0x1e7   : > { %10808 = vst [vmem:[#allocation112_spill] sm:$0xff] %v8826_v4  ;;  %v1070_v16 = vmul.f32 %v8319_v33, %v8826_v4  ;;  %v10813_v4 = vld [vmem:[#allocation51_spill] sm:$0xff]  ;;  %v1132_v52 = vadd.f32 %v1068_v23, %v680_v2  ;;  %v1652_v57 = vmax.f32 %v1588_v27, 0.0 }
 0x1e8   : > { %v1458_v53 = vmul.f32 %v8335_v7, %v10813_v4  ;;  %v8857_v4 = vpop.permute.xlu0 %581 }
 0x1e9   : > { %7624 = vset.pattern.permute.xlu1 %v10696_v0  ;;  %v1134_v40 = vadd.f32 %v1070_v16, %v682_v34  ;;  %v7710_v16 = vld [vmem:[%s7880_s13 + $0x1b8] sm:$0xff]  ;;  %10816 = vst [vmem:[#allocation115_spill] sm:$0xff] %v8857_v4 }
 0x1ea   : > { %591 = vperm.xlu1 %7624, %v10810_v58  }
 0x1eb   : > { %v8840_v21 = vpop.permute.xlu1 %1308  ;;  %v1522_v34 = vadd.f32 %v1458_v53, %v1134_v40 }
 0x1ec   : > { %10812 = vst [vmem:[#allocation113_spill] sm:$0xff] %v8840_v21  ;;  %v1456_v50 = vmul.f32 %v8335_v7, %v8840_v21 }
 0x1ee   : > { %v1520_v11 = vadd.f32 %v1456_v50, %v1132_v52  ;;  %596 = vperm.xlu1 %7624, %v7710_v16   ;;  %v1591_v50 = vadd.f32 %v8394_v43, %v1522_v34 }
 0x1ef   : > { %v8852_v61 = vpop.permute.xlu1 %1312 }
 0x1f0   : > { %10815 = vst [vmem:[#allocation114_spill] sm:$0xff] %v8852_v61  ;;  %v1589_v2 = vadd.f32 %v8394_v43, %v1520_v11  ;;  %v1457_v23 = vmul.f32 %v8335_v7, %v8852_v61  ;;  %v1655_v8 = vmax.f32 %v1591_v50, 0.0  ;;  %v8864_v11 = vpop.permute.xlu0 %606  ;;  %v313_v61 = vld [vmem:[%s7880_s13 + $0x1d8] sm:$0xff] }
 0x1f1   : > { %10818 = vst [vmem:[#allocation117_spill] sm:$0xff] %v8864_v11 }
 0x1f2   : > { %v1521_v21 = vadd.f32 %v1457_v23, %v1133_v48  ;;  %7625 = vset.pattern.permute.xlu1 %v10698_v31  ;;  %v1653_v53 = vmax.f32 %v1589_v2, 0.0 }
 0x1f3   : > { %992 = vperm.xlu1 %7625, %v7710_v16  }
 0x1f4   : > { %v1590_v52 = vadd.f32 %v8394_v43, %v1521_v21  ;;  %v8862_v22 = vpop.permute.xlu1 %521  ;;  %v1698_v32 = vpack.c.bf16 %v1653_v53, %v1652_v57  ;;  %v8871_v34 = vpop.permute.xlu0 %611  ;;  %v310_v57 = vld [vmem:[%s7880_s13 + $0x1c0] sm:$0xff] }
 0x1f5   : > { %10817 = vst [vmem:[#allocation116_spill] sm:$0xff] %v8862_v22  ;;  %10820 = vst [vmem:[#allocation119_spill] sm:$0xff] %v8871_v34 }
 0x1f6   : > { %6924 = vmatprep.mubr.bf16.mxu0 %v1698_v32  ;;  %v1654_v40 = vmax.f32 %v1590_v52, 0.0  ;;  %v10826_v52 = vld [vmem:[#allocation52_spill] sm:$0xff] }
 0x1f7   : > { %7626 = vset.pattern.permute.xlu1 %v10701_v10  ;;  %v1460_v32 = vmul.f32 %v8335_v7, %v10826_v52 }
 0x1f8   : > { %1372 = vperm.xlu1 %7626, %v10804_v45   ;;  %v1699_v48 = vpack.c.bf16 %v1655_v8, %v1654_v40  ;;  %v8879_v2 = vpop.permute.xlu0 %621  ;;  %v684_v45 = vmul.f32 %v8328_v35, %v8798_v30  ;;  %v7711_v8 = vld [vmem:[%s7880_s13 + $0x1c8] sm:$0xff] }
 0x1f9   : > { %v8868_v27 = vpop.permute.xlu1 %932  ;;  %10823 = vst [vmem:[#allocation122_spill] sm:$0xff] %v8879_v2 }
 0x1fa   : > { %10819 = vst [vmem:[#allocation118_spill] sm:$0xff] %v8868_v27  ;;  %6925 = vmatmul.mubr.bf16.gmra.mrb[36].mxu0 %v1699_v48  ;;  %v1071_v40 = vmul.f32 %v8319_v33, %v8868_v27  ;;  %v685_v48 = vmul.f32 %v8328_v35, %v8806_v44 }
 0x1fc   : > { %1376 = vperm.xlu1 %7626, %v10810_v58   ;;  %v8888_v50 = vpop.permute.xlu0 %940 }
 0x1fd   : > { %v8873_v21 = vpop.permute.xlu1 %936  ;;  %10825 = vst [vmem:[#allocation124_spill] sm:$0xff] %v8888_v50 }
 0x1fe   : > { %10821 = vst [vmem:[#allocation120_spill] sm:$0xff] %v8873_v21  ;;  %v1072_v58 = vmul.f32 %v8319_v33, %v8873_v21  ;;  %v683_v21 = vmul.f32 %v8328_v35, %v8862_v22 }
 0x200   : > { %7627 = vset.pattern.permute.xlu1 %v10696_v0  ;;  %v1136_v23 = vadd.f32 %v1072_v58, %v684_v45  ;;  %v1073_v45 = vmul.f32 %v8319_v33, %v8888_v50  ;;  %v1135_v20 = vadd.f32 %v1071_v40, %v683_v21 }
 0x201   : > { %601 = vperm.xlu1 %7627, %v310_v57  }
 0x202   : > { %v8877_v16 = vpop.permute.xlu1 %536  ;;  %v1524_v30 = vadd.f32 %v1460_v32, %v1136_v23  ;;  %v1137_v27 = vadd.f32 %v1073_v45, %v685_v48 }
 0x203   : > { %10822 = vst [vmem:[#allocation121_spill] sm:$0xff] %v8877_v16  ;;  %v686_v40 = vmul.f32 %v8328_v35, %v8877_v16 }
 0x204   : > { %v1593_v44 = vadd.f32 %v8394_v43, %v1524_v30 }
 0x205   : > { %7628 = vset.pattern.permute.xlu1 %v10698_v31 }
 0x206   : > { %996 = vperm.xlu1 %7628, %v310_v57  }
 0x207   : > { %v8886_v53 = vpop.permute.xlu1 %944 }
 0x208   : > { %10824 = vst [vmem:[#allocation123_spill] sm:$0xff] %v8886_v53  ;;  %v1074_v23 = vmul.f32 %v8319_v33, %v8886_v53 }
 0x20a   : > { %1000 = vperm.xlu1 %7628, %v7711_v8   ;;  %v1138_v48 = vadd.f32 %v1074_v23, %v686_v40 }
 0x20c   : > { %v8901_v58 = vpop.permute.xlu1 %1320 }
 0x20d   : > { %10827 = vst [vmem:[#allocation125_spill] sm:$0xff] %v8901_v58  ;;  %v1459_v52 = vmul.f32 %v8335_v7, %v8901_v58 }
 0x20e   : > { %7629 = vset.pattern.permute.xlu1 %v10696_v0 }
 0x20f   : > { %v1523_v8 = vadd.f32 %v1459_v52, %v1135_v20  ;;  %616 = vperm.xlu1 %7629, %v313_v61   ;;  %v1657_v52 = vmax.f32 %v1593_v44, 0.0  ;;  %v8932_v44 = vld [vmem:[%s10454_s3] ss:$0 sm:$0xff] }
 0x210   : > { %v8908_v28 = vpop.permute.xlu1 %1328 }
 0x211   : > { %10828 = vst [vmem:[#allocation126_spill] sm:$0xff] %v8908_v28  ;;  %v1592_v32 = vadd.f32 %v8394_v43, %v1523_v8  ;;  %v1461_v21 = vmul.f32 %v8335_v7, %v8908_v28  ;;  %v7713_v28 = vld [vmem:[%s7880_s13 + $0x1d0] sm:$0xff] }
 0x213   : > { %v1525_v58 = vadd.f32 %v1461_v21, %v1137_v27  ;;  %7630 = vset.pattern.permute.xlu1 %v10698_v31  ;;  %v1656_v20 = vmax.f32 %v1592_v32, 0.0  ;;  %v8926_v27 = vld [vmem:[%s10454_s3 + $0x1] ss:$0 sm:$0xff] }
 0x214   : > { %1008 = vperm.xlu1 %7630, %v313_v61   ;;  %v8918_v30 = vpop.permute.xlu1 %1332 }
 0x215   : > { %10829 = vst [vmem:[#allocation127_spill] sm:$0xff] %v8918_v30  ;;  %v1462_v45 = vmul.f32 %v8335_v7, %v8918_v30  ;;  %v1700_v53 = vpack.c.bf16 %v1657_v52, %v1656_v20  ;;  %v1594_v8 = vadd.f32 %v8394_v43, %v1525_v58 }
 0x217   : > { %v1526_v50 = vadd.f32 %v1462_v45, %v1138_v48  ;;  %6928 = vmatprep.mubr.bf16.mxu0 %v1700_v53  ;;  %v1658_v20 = vmax.f32 %v1594_v8, 0.0 }
 0x218   : > { %7631 = vset.pattern.permute.xlu1 %v10701_v10 }
 0x219   : > { %v1595_v23 = vadd.f32 %v8932_v44, %v1526_v50  ;;  %v6890_v32 = vpop.f32.mrb[0].mxu0  ;;  %1384 = vperm.xlu1 %7631, %v310_v57   ;;  %v8935_v43 = vpop.permute.xlu1 %546 }
 0x21a   : > { %10830 = vst [vmem:[#allocation128_spill] sm:$0xff] %v8935_v43  ;;  %v1824_v53 = vadd.f32 %v6890_v32, %v8926_v27  ;;  %v1815_v58 = vpop.f32.mrb[1].mxu0 }
 0x21b   : > { %v1816_v21 = vadd.f32 %v8926_v27, %v1815_v58  ;;  %v6891_v40 = vpop.f32.mrb[2].mxu0  ;;  %v1659_v52 = vmax.f32 %v1595_v23, 0.0 }
 0x21c   : > { %v1827_v48 = vadd.f32 %v6891_v40, %v8926_v27  ;;  %v1818_v45 = vpop.f32.mrb[3].mxu0  ;;  %v2072_v16 = vmax.f32 %v1824_v53, 0.0 }
 0x21d   : > { %v1819_v30 = vadd.f32 %v8926_v27, %v1818_v45  ;;  %1392 = vperm.xlu1 %7631, %v7713_v28   ;;  %v1701_v50 = vpack.c.bf16 %v1659_v52, %v1658_v20  ;;  %v2070_v3 = vmax.f32 %v1816_v21, 0.0 }
 0x21e   : > { %v2073_v57 = vmax.f32 %v1827_v48, 0.0  ;;  %v8942_v22 = vpop.permute.xlu1 %948 }
 0x21f   : > { %10831 = vst [vmem:[#allocation129_spill] sm:$0xff] %v8942_v22  ;;  %v2071_v32 = vmax.f32 %v1819_v30, 0.0  ;;  %6929 = vmatmul.mubr.bf16.gmra.mrb[40].mxu0 %v1701_v50  ;;  %v1075_v21 = vmul.f32 %v8319_v33, %v8942_v22 }
 0x220   : > { %v2135_v17 = vpack.c.bf16 %v2073_v57, %v2072_v16 }
 0x221   : > { %v6894_v58 = vpop.f32.mrb[4].mxu0  ;;  %1396 = vperm.xlu1 %7631, %v313_v61   ;;  %v2134_v8 = vpack.c.bf16 %v2071_v32, %v2070_v3  ;;  %v687_v3 = vmul.f32 %v8328_v35, %v8810_v39 }
 0x222   : > { %v1840_v23 = vadd.f32 %v6894_v58, %v8926_v27  ;;  %v1831_v40 = vpop.f32.mrb[5].mxu0  ;;  %v8958_v58 = vpop.permute.xlu0 %952 }
 0x223   : > { %v1832_v46 = vadd.f32 %v8926_v27, %v1831_v40  ;;  %v6895_v45 = vpop.f32.mrb[6].mxu0  ;;  %6968 = vmatprep.mubr.bf16.mxu1 %v2134_v8  ;;  %v8946_v28 = vpop.permute.xlu1 %551  ;;  %10834 = vst [vmem:[#allocation132_spill] sm:$0xff] %v8958_v58  ;;  %v1139_v40 = vadd.f32 %v1075_v21, %v687_v3 }
 0x224   : > { %10832 = vst [vmem:[#allocation130_spill] sm:$0xff] %v8946_v28  ;;  %v1843_v53 = vadd.f32 %v6895_v45, %v8926_v27  ;;  %v1834_v20 = vpop.f32.mrb[7].mxu0  ;;  %6969 = vmatmul.mubr.bf16.vlgmr.msra.gmra.mrb[0].mxu1 %v2135_v17  ;;  %v2076_v16 = vmax.f32 %v1840_v23, 0.0 }
 0x225   : > { %v1835_v30 = vadd.f32 %v8926_v27, %v1834_v20  ;;  %7634 = vset.pattern.permute.xlu1 %v10696_v0  ;;  %v2074_v52 = vmax.f32 %v1832_v46, 0.0  ;;  %v7714_v20 = vld [vmem:[%s7880_s13 + $0x1e0] sm:$0xff]  ;;  %s7727_s13 = scalar_lea.vmem %s7726_s10, 8192 }
 0x226   : > { %v2077_v61 = vmax.f32 %v1843_v53, 0.0  ;;  %626 = vperm.xlu1 %7634, %v8668_v47   ;;  %p7729_p1 = scmp.lt.s32.totalorder %s7727_s13, %s7721_s29 }
 0x227   : > { %v2075_v48 = vmax.f32 %v1835_v30, 0.0  ;;  %v8956_v50 = vpop.permute.xlu1 %556 }
 0x228   : > { %10833 = vst [vmem:[#allocation131_spill] sm:$0xff] %v8956_v50  ;;  %v2137_v17 = vpack.c.bf16 %v2077_v61, %v2076_v16  ;;  %v10836_v61 = vld [vmem:[#allocation53_spill] sm:$0xff]  ;;  %p7730_p2 = por %p7729_p1, %p7728_p0 }
 0x229   : > { %v2136_v57 = vpack.c.bf16 %v2075_v48, %v2074_v52  ;;  %v6898_v32 = vpop.f32.mrb[8].mxu0  ;;  %v1463_v52 = vmul.f32 %v8335_v7, %v10836_v61  ;;  %v1076_v48 = vmul.f32 %v8319_v33, %v8958_v58 }
 0x22a   : > { %v1856_v8 = vadd.f32 %v6898_v32, %v8926_v27  ;;  %v1847_v23 = vpop.f32.mrb[9].mxu0  ;;  %7635 = vset.pattern.permute.xlu1 %v10698_v31  ;;  %v8976_v32 = vpop.permute.xlu0 %956  ;;  %p7731_p3 = pnand %p7730_p2, %p7724_p13 }
 0x22b   : > { %v1848_v45 = vadd.f32 %v8926_v27, %v1847_v23  ;;  %v6899_v53 = vpop.f32.mrb[10].mxu0  ;;  %6972 = vmatprep.mubr.bf16.mxu1 %v2136_v57  ;;  %1012 = vperm.xlu1 %7635, %v7714_v20   ;;  %v688_v57 = vmul.f32 %v8328_v35, %v8935_v43  ;;  %10837 = vst [vmem:[#allocation134_spill] sm:$0xff] %v8976_v32 }
 0x22c   : > { %v1859_v46 = vadd.f32 %v6899_v53, %v8926_v27  ;;  %v1850_v30 = vpop.f32.mrb[11].mxu0  ;;  %6973 = vmatmul.mubr.bf16.gmra.mrb[4].mxu1 %v2137_v17  ;;  %v8965_v16 = vpop.permute.xlu1 %960  ;;  %v690_v17 = vmul.f32 %v8328_v35, %v8956_v50  ;;  %v2080_v23 = vmax.f32 %v1856_v8, 0.0  ;;  %v1527_v20 = vadd.f32 %v1463_v52, %v1139_v40  ;;  %v10839_v8 = vld [vmem:[#allocation55_spill] sm:$0xff] }
 0x22d   : > { %10835 = vst [vmem:[#allocation133_spill] sm:$0xff] %v8965_v16  ;;  %v1851_v3 = vadd.f32 %v8926_v27, %v1850_v30  ;;  %v1078_v21 = vmul.f32 %v8319_v33, %v8965_v16  ;;  %v2078_v22 = vmax.f32 %v1848_v45, 0.0  ;;  %v1077_v16 = vmul.f32 %v8319_v33, %v8976_v32 }
 0x22e   : > { %v2081_v53 = vmax.f32 %v1859_v46, 0.0  ;;  %v689_v43 = vmul.f32 %v8328_v35, %v8946_v28  ;;  %v1466_v40 = vmul.f32 %v8335_v7, %v10839_v8  ;;  %v1140_v45 = vadd.f32 %v1076_v48, %v688_v57 }
 0x22f   : > { %v2079_v39 = vmax.f32 %v1851_v3, 0.0  ;;  %7636 = vset.pattern.permute.xlu1 %v10696_v0  ;;  %v1142_v30 = vadd.f32 %v1078_v21, %v690_v17  ;;  %v1596_v17 = vadd.f32 %v8932_v44, %v1527_v20 }
 0x230   : > { %v2139_v58 = vpack.c.bf16 %v2081_v53, %v2080_v23  ;;  %631 = vperm.xlu1 %7636, %v8677_v49   ;;  %v1141_v48 = vadd.f32 %v1077_v16, %v689_v43 }
 0x231   : > { %v2138_v61 = vpack.c.bf16 %v2079_v39, %v2078_v22  ;;  %v6902_v6 = vpop.f32.mrb[12].mxu0  ;;  %v8986_v50 = vpop.permute.xlu1 %1340  ;;  %v1530_v39 = vadd.f32 %v1466_v40, %v1142_v30  ;;  %v1660_v40 = vmax.f32 %v1596_v17, 0.0 }
 0x232   : > { %10838 = vst [vmem:[#allocation135_spill] sm:$0xff] %v8986_v50  ;;  %v1872_v0 = vadd.f32 %v6902_v6, %v8926_v27  ;;  %v1464_v46 = vmul.f32 %v8335_v7, %v8986_v50  ;;  %v1863_v52 = vpop.f32.mrb[13].mxu0 }
 0x233   : > { %v1864_v3 = vadd.f32 %v8926_v27, %v1863_v52  ;;  %v6903_v21 = vpop.f32.mrb[14].mxu0  ;;  %6976 = vmatprep.mubr.bf16.mxu1 %v2138_v61  ;;  %v1599_v43 = vadd.f32 %v8932_v44, %v1530_v39 }
 0x234   : > { %v1528_v22 = vadd.f32 %v1464_v46, %v1140_v45  ;;  %v1875_v23 = vadd.f32 %v6903_v21, %v8926_v27  ;;  %v1866_v53 = vpop.f32.mrb[15].mxu0  ;;  %6977 = vmatmul.mubr.bf16.gmra.mrb[8].mxu1 %v2139_v58  ;;  %636 = vperm.xlu1 %7636, %v8741_v29   ;;  %v2084_v50 = vmax.f32 %v1872_v0, 0.0 }
 0x235   : > { %v1867_v6 = vadd.f32 %v8926_v27, %v1866_v53  ;;  %v8998_v57 = vpop.permute.xlu1 %1344  ;;  %v2082_v20 = vmax.f32 %v1864_v3, 0.0 }
 0x236   : > { %10840 = vst [vmem:[#allocation136_spill] sm:$0xff] %v8998_v57  ;;  %v1597_v52 = vadd.f32 %v8932_v44, %v1528_v22  ;;  %v2085_v8 = vmax.f32 %v1875_v23, 0.0  ;;  %v1465_v61 = vmul.f32 %v8335_v7, %v8998_v57  ;;  %v10905_v57 = vld [vmem:[#allocation33_spill] sm:$0xff] }
 0x237   : > { %v2083_v30 = vmax.f32 %v1867_v6, 0.0 }
 0x238   : > { %v2141_v45 = vpack.c.bf16 %v2085_v8, %v2084_v50  ;;  %v1529_v46 = vadd.f32 %v1465_v61, %v1141_v48  ;;  %7637 = vset.pattern.permute.xlu1 %v10698_v31  ;;  %v1661_v58 = vmax.f32 %v1597_v52, 0.0  ;;  %v1663_v48 = vmax.f32 %v1599_v43, 0.0 }
 0x239   : > { %v2140_v16 = vpack.c.bf16 %v2083_v30, %v2082_v20  ;;  %v6906_v21 = vpop.f32.mrb[16].mxu0  ;;  %1024 = vperm.xlu1 %7637, %v8741_v29  }
 0x23a   : > { %v1598_v0 = vadd.f32 %v8932_v44, %v1529_v46  ;;  %v1888_v22 = vadd.f32 %v6906_v21, %v8926_v27  ;;  %v1879_v23 = vpop.f32.mrb[17].mxu0  ;;  %v9008_v53 = vpop.permute.xlu1 %561  ;;  %v1702_v3 = vpack.c.bf16 %v1661_v58, %v1660_v40 }
 0x23b   : > { %10841 = vst [vmem:[#allocation137_spill] sm:$0xff] %v9008_v53  ;;  %v1880_v50 = vadd.f32 %v8926_v27, %v1879_v23  ;;  %v6907_v8 = vpop.f32.mrb[18].mxu0  ;;  %6980 = vmatprep.mubr.bf16.mxu1 %v2140_v16 }
 0x23c   : > { %v1891_v31 = vadd.f32 %v6907_v8, %v8926_v27  ;;  %v1882_v17 = vpop.f32.mrb[19].mxu0  ;;  %6932 = vmatprep.mubr.bf16.mxu0 %v1702_v3  ;;  %6981 = vmatmul.mubr.bf16.gmra.mrb[12].mxu1 %v2141_v45  ;;  %v1662_v39 = vmax.f32 %v1598_v0, 0.0  ;;  %v2088_v6 = vmax.f32 %v1888_v22, 0.0  ;;  %v10844_v8 = vld [vmem:[#allocation56_spill] sm:$0xff] }
 0x23d   : > { %v1883_v29 = vadd.f32 %v8926_v27, %v1882_v17  ;;  %7639 = vset.pattern.permute.xlu1 %v10701_v10  ;;  %v2086_v20 = vmax.f32 %v1880_v50, 0.0 }
 0x23e   : > { %v2089_v52 = vmax.f32 %v1891_v31, 0.0  ;;  %1404 = vperm.xlu1 %7639, %v8668_v47   ;;  %v1703_v61 = vpack.c.bf16 %v1663_v48, %v1662_v39  ;;  %v692_v47 = vmul.f32 %v8328_v35, %v8821_v18 }
 0x23f   : > { %v2087_v30 = vmax.f32 %v1883_v29, 0.0  ;;  %v9015_v40 = vpop.permute.xlu1 %964 }
 0x240   : > { %10842 = vst [vmem:[#allocation138_spill] sm:$0xff] %v9015_v40  ;;  %v2143_v46 = vpack.c.bf16 %v2089_v52, %v2088_v6  ;;  %6933 = vmatmul.mubr.bf16.gmra.mrb[44].mxu0 %v1703_v61 }
 0x241   : > { %v2142_v58 = vpack.c.bf16 %v2087_v30, %v2086_v20  ;;  %v6910_v16 = vpop.f32.mrb[20].mxu0 }
 0x242   : > { %v1904_v45 = vadd.f32 %v6910_v16, %v8926_v27  ;;  %v1895_v43 = vpop.f32.mrb[21].mxu0  ;;  %1408 = vperm.xlu1 %7639, %v8677_v49   ;;  %v1468_v49 = vmul.f32 %v8335_v7, %v10844_v8  ;;  %v9038_v16 = vpop.permute.xlu0 %972 }
 0x243   : > { %v1896_v10 = vadd.f32 %v8926_v27, %v1895_v43  ;;  %v6911_v21 = vpop.f32.mrb[22].mxu0  ;;  %6984 = vmatprep.mubr.bf16.mxu1 %v2142_v58  ;;  %v9020_v0 = vpop.permute.xlu1 %968  ;;  %v691_v58 = vmul.f32 %v8328_v35, %v9008_v53  ;;  %10847 = vst [vmem:[#allocation142_spill] sm:$0xff] %v9038_v16  ;;  %v693_v43 = vmul.f32 %v8328_v35, %v8838_v38 }
 0x244   : > { %10843 = vst [vmem:[#allocation139_spill] sm:$0xff] %v9020_v0  ;;  %v1907_v22 = vadd.f32 %v6911_v21, %v8926_v27  ;;  %v1080_v23 = vmul.f32 %v8319_v33, %v9020_v0  ;;  %v1898_v3 = vpop.f32.mrb[23].mxu0  ;;  %6985 = vmatmul.mubr.bf16.gmra.mrb[16].mxu1 %v2143_v46  ;;  %v2092_v31 = vmax.f32 %v1904_v45, 0.0  ;;  %v1079_v46 = vmul.f32 %v8319_v33, %v9015_v40  ;;  %v10902_v40 = vld [vmem:[#allocation29_spill] sm:$0xff] }
 0x245   : > { %v1899_v50 = vadd.f32 %v8926_v27, %v1898_v3  ;;  %v2090_v48 = vmax.f32 %v1896_v10, 0.0  ;;  %v1081_v10 = vmul.f32 %v8319_v33, %v9038_v16 }
 0x246   : > { %v2093_v17 = vmax.f32 %v1907_v22, 0.0  ;;  %v1144_v39 = vadd.f32 %v1080_v23, %v692_v47  ;;  %v1143_v21 = vadd.f32 %v1079_v46, %v691_v58 }
 0x247   : > { %v2091_v29 = vmax.f32 %v1899_v50, 0.0  ;;  %v1145_v50 = vadd.f32 %v1081_v10, %v693_v43 }
 0x248   : > { %v2145_v6 = vpack.c.bf16 %v2093_v17, %v2092_v31  ;;  %v1532_v52 = vadd.f32 %v1468_v49, %v1144_v39  ;;  %v9030_v61 = vpop.permute.xlu1 %576  ;;  %v7656_v39 = vld [vmem:[%s10453_s2 + $0x80] sm:$0xff]  }
 0x249   : > { %10845 = vst [vmem:[#allocation140_spill] sm:$0xff] %v9030_v61  ;;  %v2144_v20 = vpack.c.bf16 %v2091_v29, %v2090_v48  ;;  %v7657_v48 = vld [vmem:[%s10453_s2 + $0x88] sm:$0xff]   ;;  %v694_v29 = vmul.f32 %v8328_v35, %v9030_v61  ;;  %7032 = vmatprep.subr.bf16.mxu0 %v7656_v39 }
 0x24a   : > { %v1601_v23 = vadd.f32 %v8932_v44, %v1532_v52  ;;  %7033 = vmatpush3.bf16.msra.mxu0 %v7656_v39 }
 0x24b   : > { %6988 = vmatprep.mubr.bf16.mxu1 %v2144_v20  ;;  %7034 = vmatprep.subr.bf16.mxu0 %v7657_v48 }
 0x24c   : > { %6989 = vmatmul.mubr.bf16.gmra.mrb[20].mxu1 %v2145_v6  ;;  %v1665_v20 = vmax.f32 %v1601_v23, 0.0 }
 0x24d   : > { %v9032_v30 = vpop.permute.xlu1 %976 }
 0x24e   : > { %10846 = vst [vmem:[#allocation141_spill] sm:$0xff] %v9032_v30  ;;  %v1082_v49 = vmul.f32 %v8319_v33, %v9032_v30  ;;  %7035 = vmatpush3.bf16.msra.mxu0 %v7657_v48 }
 0x250   : > { %v1146_v58 = vadd.f32 %v1082_v49, %v694_v29  ;;  %v7659_v49 = vld [vmem:[%s10453_s2 + $0x98] sm:$0xff]  }
 0x252   : > { %v9040_v45 = vpop.permute.xlu1 %1352 }
 0x253   : > { %10848 = vst [vmem:[#allocation143_spill] sm:$0xff] %v9040_v45  ;;  %v1467_v47 = vmul.f32 %v8335_v7, %v9040_v45 }
 0x255   : > { %v1531_v22 = vadd.f32 %v1467_v47, %v1143_v21  ;;  %v7658_v21 = vld [vmem:[%s10453_s2 + $0x90] sm:$0xff]  }
 0x256   : > { %v9049_v3 = vpop.permute.xlu1 %1360  ;;  %7036 = vmatprep.subr.bf16.mxu0 %v7658_v21 }
 0x257   : > { %10849 = vst [vmem:[#allocation144_spill] sm:$0xff] %v9049_v3  ;;  %v1600_v31 = vadd.f32 %v8932_v44, %v1531_v22  ;;  %v1469_v17 = vmul.f32 %v8335_v7, %v9049_v3  ;;  %7037 = vmatpush3.bf16.msra.mxu0 %v7658_v21 }
 0x258   : > { %7038 = vmatprep.subr.bf16.mxu0 %v7659_v49 }
 0x259   : > { %v1533_v6 = vadd.f32 %v1469_v17, %v1145_v50  ;;  %v1664_v52 = vmax.f32 %v1600_v31, 0.0 }
 0x25a   : > { %v9064_v46 = vpop.permute.xlu1 %1364 }
 0x25b   : > { %10850 = vst [vmem:[#allocation145_spill] sm:$0xff] %v9064_v46  ;;  %v1470_v43 = vmul.f32 %v8335_v7, %v9064_v46  ;;  %v1704_v10 = vpack.c.bf16 %v1665_v20, %v1664_v52  ;;  %v1602_v47 = vadd.f32 %v8932_v44, %v1533_v6  ;;  %v695_v6 = vmul.f32 %v8328_v35, %v8857_v4  ;;  %v10853_v20 = vld [vmem:[#allocation59_spill] sm:$0xff] }
 0x25c   : > { %7039 = vmatpush3.bf16.msra.mxu0 %v7659_v49  ;;  %v9094_v49 = vpop.permute.xlu0 %984 }
 0x25d   : > { %v1534_v22 = vadd.f32 %v1470_v43, %v1146_v58  ;;  %6936 = vmatprep.mubr.bf16.mxu0 %v1704_v10  ;;  %v1666_v31 = vmax.f32 %v1602_v47, 0.0  ;;  %v1471_v58 = vmul.f32 %v8335_v7, %v10853_v20  ;;  %10856 = vst [vmem:[#allocation150_spill] sm:$0xff] %v9094_v49 }
 0x25f   : > { %v1603_v23 = vadd.f32 %v8932_v44, %v1534_v22  ;;  %v9073_v50 = vpop.permute.xlu1 %586 }
 0x260   : > { %10851 = vst [vmem:[#allocation146_spill] sm:$0xff] %v9073_v50 }
 0x261   : > { %v1667_v17 = vmax.f32 %v1603_v23, 0.0 }
 0x263   : > { %v1705_v39 = vpack.c.bf16 %v1667_v17, %v1666_v31 }
 0x264   : > { %v9078_v29 = vpop.permute.xlu1 %980 }
 0x265   : > { %10852 = vst [vmem:[#allocation147_spill] sm:$0xff] %v9078_v29  ;;  %v1083_v52 = vmul.f32 %v8319_v33, %v9078_v29  ;;  %6937 = vmatmul.mubr.bf16.gmra.mrb[48].mxu0 %v1705_v39 }
 0x266   : > { %v6914_v48 = vpop.f32.mrb[24].mxu0 }
 0x267   : > { %v1147_v43 = vadd.f32 %v1083_v52, %v695_v6  ;;  %v1920_v10 = vadd.f32 %v6914_v48, %v8926_v27  ;;  %v1911_v47 = vpop.f32.mrb[25].mxu0 }
 0x268   : > { %v1912_v21 = vadd.f32 %v8926_v27, %v1911_v47  ;;  %v6915_v22 = vpop.f32.mrb[26].mxu0 }
 0x269   : > { %v1535_v23 = vadd.f32 %v1471_v58, %v1147_v43  ;;  %v1923_v31 = vadd.f32 %v6915_v22, %v8926_v27  ;;  %v1914_v17 = vpop.f32.mrb[27].mxu0  ;;  %v9089_v4 = vpop.permute.xlu1 %591  ;;  %v2096_v29 = vmax.f32 %v1920_v10, 0.0  ;;  %v7660_v58 = vld [vmem:[%s10453_s2 + $0xa0] sm:$0xff]  }
 0x26a   : > { %10854 = vst [vmem:[#allocation148_spill] sm:$0xff] %v9089_v4  ;;  %v1915_v39 = vadd.f32 %v8926_v27, %v1914_v17  ;;  %v2094_v46 = vmax.f32 %v1912_v21, 0.0  ;;  %7040 = vmatprep.subr.bf16.mxu0 %v7660_v58  ;;  %v10858_v21 = vld [vmem:[#allocation62_spill] sm:$0xff] }
 0x26b   : > { %v2097_v8 = vmax.f32 %v1923_v31, 0.0  ;;  %7041 = vmatpush3.bf16.msra.mxu0 %v7660_v58  ;;  %v1474_v22 = vmul.f32 %v8335_v7, %v10858_v21  ;;  %v9114_v31 = vpop.permute.xlu0 %988 }
 0x26c   : > { %v2095_v20 = vmax.f32 %v1915_v39, 0.0  ;;  %10859 = vst [vmem:[#allocation152_spill] sm:$0xff] %v9114_v31  ;;  %v1085_v39 = vmul.f32 %v8319_v33, %v9114_v31 }
 0x26d   : > { %v2147_v6 = vpack.c.bf16 %v2097_v8, %v2096_v29  ;;  %v9092_v52 = vpop.permute.xlu1 %596  ;;  %v1084_v8 = vmul.f32 %v8319_v33, %v9094_v49  ;;  %v1604_v49 = vadd.f32 %v8932_v44, %v1535_v23 }
 0x26e   : > { %10855 = vst [vmem:[#allocation149_spill] sm:$0xff] %v9092_v52  ;;  %v2146_v48 = vpack.c.bf16 %v2095_v20, %v2094_v46  ;;  %v696_v46 = vmul.f32 %v8328_v35, %v9073_v50  ;;  %v698_v29 = vmul.f32 %v8328_v35, %v9092_v52  ;;  %v7661_v20 = vld [vmem:[%s10453_s2 + $0xa8] sm:$0xff]  }
 0x26f   : > { %7042 = vmatprep.subr.bf16.mxu0 %v7661_v20  ;;  %v1668_v52 = vmax.f32 %v1604_v49, 0.0 }
 0x270   : > { %6992 = vmatprep.mubr.bf16.mxu1 %v2146_v48  ;;  %v697_v48 = vmul.f32 %v8328_v35, %v9089_v4  ;;  %7043 = vmatpush3.bf16.msra.mxu0 %v7661_v20  ;;  %v7663_v20 = vld [vmem:[%s10453_s2 + $0xb8] sm:$0xff]  }
 0x271   : > { %6993 = vmatmul.mubr.bf16.gmra.mrb[24].mxu1 %v2147_v6  ;;  %v1148_v6 = vadd.f32 %v1084_v8, %v696_v46 }
 0x272   : > { %v9099_v43 = vpop.permute.xlu1 %992  ;;  %v1149_v50 = vadd.f32 %v1085_v39, %v697_v48 }
 0x273   : > { %10857 = vst [vmem:[#allocation151_spill] sm:$0xff] %v9099_v43  ;;  %v1086_v10 = vmul.f32 %v8319_v33, %v9099_v43 }
 0x275   : > { %v1150_v47 = vadd.f32 %v1086_v10, %v698_v29  ;;  %v7662_v10 = vld [vmem:[%s10453_s2 + $0xb0] sm:$0xff]  }
 0x276   : > { %7044 = vmatprep.subr.bf16.mxu0 %v7662_v10 }
 0x277   : > { %v9116_v17 = vpop.permute.xlu1 %1372  ;;  %v1538_v29 = vadd.f32 %v1474_v22, %v1150_v47  ;;  %7045 = vmatpush3.bf16.msra.mxu0 %v7662_v10 }
 0x278   : > { %10860 = vst [vmem:[#allocation153_spill] sm:$0xff] %v9116_v17  ;;  %v1472_v58 = vmul.f32 %v8335_v7, %v9116_v17  ;;  %7046 = vmatprep.subr.bf16.mxu0 %v7663_v20 }
 0x279   : > { %v1607_v22 = vadd.f32 %v8932_v44, %v1538_v29 }
 0x27a   : > { %v1536_v21 = vadd.f32 %v1472_v58, %v1148_v6 }
 0x27b   : > { %v9128_v43 = vpop.permute.xlu1 %1376  ;;  %7047 = vmatpush3.bf16.msra.mxu0 %v7663_v20  ;;  %v1671_v48 = vmax.f32 %v1607_v22, 0.0 }
 0x27c   : > { %10861 = vst [vmem:[#allocation154_spill] sm:$0xff] %v9128_v43  ;;  %v1605_v8 = vadd.f32 %v8932_v44, %v1536_v21  ;;  %v1473_v46 = vmul.f32 %v8335_v7, %v9128_v43 }
 0x27e   : > { %v1537_v17 = vadd.f32 %v1473_v46, %v1149_v50  ;;  %v1669_v47 = vmax.f32 %v1605_v8, 0.0 }
 0x280   : > { %v1606_v23 = vadd.f32 %v8932_v44, %v1537_v17  ;;  %v9138_v6 = vpop.permute.xlu1 %601  ;;  %v1706_v39 = vpack.c.bf16 %v1669_v47, %v1668_v52  ;;  %v700_v52 = vmul.f32 %v8328_v35, %v8864_v11 }
 0x281   : > { %10862 = vst [vmem:[#allocation155_spill] sm:$0xff] %v9138_v6 }
 0x282   : > { %6940 = vmatprep.mubr.bf16.mxu0 %v1706_v39  ;;  %v1670_v21 = vmax.f32 %v1606_v23, 0.0  ;;  %v10865_v23 = vld [vmem:[#allocation65_spill] sm:$0xff] }
 0x284   : > { %v1707_v58 = vpack.c.bf16 %v1671_v48, %v1670_v21 }
 0x285   : > { %v9140_v10 = vpop.permute.xlu1 %996 }
 0x286   : > { %10863 = vst [vmem:[#allocation156_spill] sm:$0xff] %v9140_v10  ;;  %6941 = vmatmul.mubr.bf16.gmra.mrb[52].mxu0 %v1707_v58 }
 0x287   : > { %v6918_v43 = vpop.f32.mrb[28].mxu0 }
 0x288   : > { %v1936_v50 = vadd.f32 %v6918_v43, %v8926_v27  ;;  %v1927_v49 = vpop.f32.mrb[29].mxu0  ;;  %v1476_v43 = vmul.f32 %v8335_v7, %v10865_v23 }
 0x289   : > { %v1928_v29 = vadd.f32 %v8926_v27, %v1927_v49  ;;  %v6919_v8 = vpop.f32.mrb[30].mxu0  ;;  %v9144_v46 = vpop.permute.xlu1 %1000 }
 0x28a   : > { %10864 = vst [vmem:[#allocation157_spill] sm:$0xff] %v9144_v46  ;;  %v1939_v17 = vadd.f32 %v6919_v8, %v8926_v27  ;;  %v1088_v20 = vmul.f32 %v8319_v33, %v9144_v46  ;;  %v1930_v47 = vpop.f32.mrb[31].mxu0  ;;  %v2100_v39 = vmax.f32 %v1936_v50, 0.0  ;;  %v9160_v46 = vpop.permute.xlu0 %1004  ;;  %v699_v50 = vmul.f32 %v8328_v35, %v9138_v6  ;;  %v10900_v6 = vld [vmem:[#allocation68_spill] sm:$0xff] }
 0x28b   : > { %v1931_v22 = vadd.f32 %v8926_v27, %v1930_v47  ;;  %v2098_v58 = vmax.f32 %v1928_v29, 0.0  ;;  %v1087_v47 = vmul.f32 %v8319_v33, %v9140_v10  ;;  %10868 = vst [vmem:[#allocation160_spill] sm:$0xff] %v9160_v46  ;;  %v701_v29 = vmul.f32 %v8328_v35, %v8871_v34 }
 0x28c   : > { %v2101_v21 = vmax.f32 %v1939_v17, 0.0  ;;  %v1152_v48 = vadd.f32 %v1088_v20, %v700_v52  ;;  %v1089_v17 = vmul.f32 %v8319_v33, %v9160_v46  ;;  %v10899_v46 = vld [vmem:[#allocation25_spill] sm:$0xff] }
 0x28d   : > { %v2099_v49 = vmax.f32 %v1931_v22, 0.0 }
 0x28e   : > { %v2149_v31 = vpack.c.bf16 %v2101_v21, %v2100_v39  ;;  %v1540_v4 = vadd.f32 %v1476_v43, %v1152_v48  ;;  %v9154_v45 = vpop.permute.xlu1 %616  ;;  %v1153_v39 = vadd.f32 %v1089_v17, %v701_v29 }
 0x28f   : > { %10866 = vst [vmem:[#allocation158_spill] sm:$0xff] %v9154_v45  ;;  %v2148_v11 = vpack.c.bf16 %v2099_v49, %v2098_v58  ;;  %v702_v49 = vmul.f32 %v8328_v35, %v9154_v45 }
 0x290   : > { %v1609_v22 = vadd.f32 %v8932_v44, %v1540_v4 }
 0x291   : > { %6996 = vmatprep.mubr.bf16.mxu1 %v2148_v11  ;;  %v1151_v11 = vadd.f32 %v1087_v47, %v699_v50 }
 0x292   : > { %6997 = vmatmul.mubr.bf16.gmra.mrb[28].mxu1 %v2149_v31  ;;  %v1673_v23 = vmax.f32 %v1609_v22, 0.0  ;;  %v9192_v22 = vpop.permute.xlu0 %1016 }
 0x293   : > { %v9156_v8 = vpop.permute.xlu1 %1008  ;;  %10874 = vst [vmem:[#allocation166_spill] sm:$0xff] %v9192_v22 }
 0x294   : > { %10867 = vst [vmem:[#allocation159_spill] sm:$0xff] %v9156_v8  ;;  %v1090_v21 = vmul.f32 %v8319_v33, %v9156_v8 }
 0x296   : > { %v1154_v4 = vadd.f32 %v1090_v21, %v702_v49 }
 0x298   : > { %v9164_v52 = vpop.permute.xlu1 %1384 }
 0x299   : > { %10869 = vst [vmem:[#allocation161_spill] sm:$0xff] %v9164_v52  ;;  %v1475_v31 = vmul.f32 %v8335_v7, %v9164_v52 }
 0x29b   : > { %v1539_v20 = vadd.f32 %v1475_v31, %v1151_v11 }
 0x29c   : > { %v9173_v43 = vpop.permute.xlu1 %1392 }
 0x29d   : > { %10870 = vst [vmem:[#allocation162_spill] sm:$0xff] %v9173_v43  ;;  %v1608_v48 = vadd.f32 %v8932_v44, %v1539_v20  ;;  %v1477_v58 = vmul.f32 %v8335_v7, %v9173_v43 }
 0x29f   : > { %v1541_v47 = vadd.f32 %v1477_v58, %v1153_v39  ;;  %v1672_v50 = vmax.f32 %v1608_v48, 0.0 }
 0x2a0   : > { %v9182_v11 = vpop.permute.xlu1 %1396 }
 0x2a1   : > { %10871 = vst [vmem:[#allocation163_spill] sm:$0xff] %v9182_v11  ;;  %v1478_v29 = vmul.f32 %v8335_v7, %v9182_v11  ;;  %v1708_v17 = vpack.c.bf16 %v1673_v23, %v1672_v50  ;;  %v1610_v31 = vadd.f32 %v8932_v44, %v1541_v47 }
 0x2a3   : > { %v1542_v52 = vadd.f32 %v1478_v29, %v1154_v4  ;;  %6944 = vmatprep.mubr.bf16.mxu0 %v1708_v17  ;;  %v1674_v8 = vmax.f32 %v1610_v31, 0.0 }
 0x2a5   : > { %v1611_v20 = vadd.f32 %v8932_v44, %v1542_v52  ;;  %v9188_v43 = vpop.permute.xlu1 %626 }
 0x2a6   : > { %10872 = vst [vmem:[#allocation164_spill] sm:$0xff] %v9188_v43 }
 0x2a7   : > { %v1675_v10 = vmax.f32 %v1611_v20, 0.0 }
 0x2a9   : > { %v1709_v39 = vpack.c.bf16 %v1675_v10, %v1674_v8  ;;  %v9200_v10 = vpop.permute.xlu0 %1020 }
 0x2aa   : > { %v9190_v48 = vpop.permute.xlu1 %1012  ;;  %10876 = vst [vmem:[#allocation168_spill] sm:$0xff] %v9200_v10 }
 0x2ab   : > { %10873 = vst [vmem:[#allocation165_spill] sm:$0xff] %v9190_v48  ;;  %6945 = vmatmul.mubr.bf16.gmra.mrb[56].mxu0 %v1709_v39 }
 0x2ac   : > { %v6922_v21 = vpop.f32.mrb[32].mxu0 }
 0x2ad   : > { %v1952_v58 = vadd.f32 %v6922_v21, %v8926_v27  ;;  %v1943_v23 = vpop.f32.mrb[33].mxu0  ;;  %v1091_v21 = vmul.f32 %v8319_v33, %v9190_v48  ;;  %v9206_v45 = vpop.permute.xlu0 %1400  ;;  %v1093_v48 = vmul.f32 %v8319_v33, %v9200_v10 }
 0x2ae   : > { %v1944_v49 = vadd.f32 %v8926_v27, %v1943_v23  ;;  %v6923_v47 = vpop.f32.mrb[34].mxu0  ;;  %10878 = vst [vmem:[#allocation170_spill] sm:$0xff] %v9206_v45 }
 0x2af   : > { %v1955_v50 = vadd.f32 %v6923_v47, %v8926_v27  ;;  %v1946_v52 = vpop.f32.mrb[35].mxu0  ;;  %v9197_v4 = vpop.permute.xlu1 %631  ;;  %v2104_v8 = vmax.f32 %v1952_v58, 0.0  ;;  %v703_v47 = vmul.f32 %v8328_v35, %v8879_v2  ;;  %v1479_v58 = vmul.f32 %v8335_v7, %v9206_v45  ;;  %v10897_v2 = vld [vmem:[#allocation21_spill] sm:$0xff] }
 0x2b0   : > { %10875 = vst [vmem:[#allocation167_spill] sm:$0xff] %v9197_v4  ;;  %v1947_v29 = vadd.f32 %v8926_v27, %v1946_v52  ;;  %v2102_v31 = vmax.f32 %v1944_v49, 0.0  ;;  %v705_v45 = vmul.f32 %v8328_v35, %v9197_v4 }
 0x2b1   : > { %v2105_v17 = vmax.f32 %v1955_v50, 0.0  ;;  %v1155_v52 = vadd.f32 %v1091_v21, %v703_v47 }
 0x2b2   : > { %v2103_v20 = vmax.f32 %v1947_v29, 0.0  ;;  %v9216_v29 = vpop.permute.xlu0 %1412 }
 0x2b3   : > { %v2151_v39 = vpack.c.bf16 %v2105_v17, %v2104_v8  ;;  %v9202_v11 = vpop.permute.xlu1 %636  ;;  %10880 = vst [vmem:[#allocation172_spill] sm:$0xff] %v9216_v29  ;;  %v704_v8 = vmul.f32 %v8328_v35, %v9188_v43  ;;  %v1482_v21 = vmul.f32 %v8335_v7, %v9216_v29 }
 0x2b4   : > { %10877 = vst [vmem:[#allocation169_spill] sm:$0xff] %v9202_v11  ;;  %v2150_v23 = vpack.c.bf16 %v2103_v20, %v2102_v31  ;;  %v706_v17 = vmul.f32 %v8328_v35, %v9202_v11  ;;  %v1092_v31 = vmul.f32 %v8319_v33, %v9192_v22  ;;  %v1543_v20 = vadd.f32 %v1479_v58, %v1155_v52 }
 0x2b6   : > { %7000 = vmatprep.mubr.bf16.mxu1 %v2150_v23  ;;  %v1156_v47 = vadd.f32 %v1092_v31, %v704_v8  ;;  %v1612_v43 = vadd.f32 %v8932_v44, %v1543_v20 }
 0x2b7   : > { %7001 = vmatmul.mubr.bf16.gmra.mrb[32].mxu1 %v2151_v39 }
 0x2b8   : > { %v9212_v49 = vpop.permute.xlu1 %1024  ;;  %v1676_v29 = vmax.f32 %v1612_v43, 0.0 }
 0x2b9   : > { %10879 = vst [vmem:[#allocation171_spill] sm:$0xff] %v9212_v49  ;;  %v1094_v50 = vmul.f32 %v8319_v33, %v9212_v49 }
 0x2bb   : > { %v1158_v39 = vadd.f32 %v1094_v50, %v706_v17  ;;  %v1157_v50 = vadd.f32 %v1093_v48, %v705_v45 }
 0x2bd   : > { %v9226_v23 = vpop.permute.xlu1 %1404  ;;  %v1546_v22 = vadd.f32 %v1482_v21, %v1158_v39 }
 0x2be   : > { %10881 = vst [vmem:[#allocation173_spill] sm:$0xff] %v9226_v23  ;;  %v1480_v49 = vmul.f32 %v8335_v7, %v9226_v23 }
 0x2bf   : > { %v1615_v35 = vadd.f32 %v8932_v44, %v1546_v22 }
 0x2c0   : > { %v1544_v52 = vadd.f32 %v1480_v49, %v1156_v47 }
 0x2c1   : > { %v9235_v58 = vpop.permute.xlu1 %1408  ;;  %v1679_v10 = vmax.f32 %v1615_v35, 0.0 }
 0x2c2   : > { %10882 = vst [vmem:[#allocation174_spill] sm:$0xff] %v9235_v58  ;;  %v1613_v17 = vadd.f32 %v8932_v44, %v1544_v52  ;;  %v1481_v8 = vmul.f32 %v8335_v7, %v9235_v58 }
 0x2c4   : > { %v1545_v31 = vadd.f32 %v1481_v8, %v1157_v50  ;;  %v1677_v23 = vmax.f32 %v1613_v17, 0.0 }
 0x2c6   : > { %v1614_v11 = vadd.f32 %v8932_v44, %v1545_v31  ;;  %v1710_v33 = vpack.c.bf16 %v1677_v23, %v1676_v29 }
 0x2c8   : > { %v1678_v20 = vmax.f32 %v1614_v11, 0.0  ;;  %6948 = vmatprep.mubr.bf16.mxu0 %v1710_v33 }
 0x2ca   : > { %v1711_v49 = vpack.c.bf16 %v1679_v10, %v1678_v20 }
 0x2cc   : > { %6949 = vmatmul.mubr.bf16.gmra.mrb[60].mxu0 %v1711_v49  ;;  %v9252_v49 = vld [vmem:[%s10454_s3 + $0x2] ss:$0 sm:$0xff] }
 0x2cd   : > { %v6926_v39 = vpop.f32.mrb[36].mxu0 }
 0x2ce   : > { %v1968_v45 = vadd.f32 %v6926_v39, %v8926_v27  ;;  %v1959_v48 = vpop.f32.mrb[37].mxu0 }
 0x2cf   : > { %v1960_v21 = vadd.f32 %v8926_v27, %v1959_v48  ;;  %v6927_v7 = vpop.f32.mrb[38].mxu0 }
 0x2d0   : > { %v1971_v22 = vadd.f32 %v6927_v7, %v8926_v27  ;;  %v1962_v47 = vpop.f32.mrb[39].mxu0  ;;  %v2108_v52 = vmax.f32 %v1968_v45, 0.0 }
 0x2d1   : > { %v1963_v43 = vadd.f32 %v8926_v27, %v1962_v47  ;;  %v2106_v29 = vmax.f32 %v1960_v21, 0.0 }
 0x2d2   : > { %v2109_v44 = vmax.f32 %v1971_v22, 0.0 }
 0x2d3   : > { %v2107_v23 = vmax.f32 %v1963_v43, 0.0 }
 0x2d4   : > { %v2153_v11 = vpack.c.bf16 %v2109_v44, %v2108_v52 }
 0x2d5   : > { %v2152_v50 = vpack.c.bf16 %v2107_v23, %v2106_v29 }
 0x2d7   : > { %7004 = vmatprep.mubr.bf16.mxu1 %v2152_v50 }
 0x2d8   : > { %7005 = vmatmul.mubr.bf16.gmra.mrb[36].mxu1 %v2153_v11 }
 0x2f2   : > { %v6930_v10 = vpop.f32.mrb[40].mxu0 }
 0x2f3   : > { %v1984_v17 = vadd.f32 %v6930_v10, %v8926_v27  ;;  %v1975_v8 = vpop.f32.mrb[41].mxu0 }
 0x2f4   : > { %v1976_v35 = vadd.f32 %v8926_v27, %v1975_v8  ;;  %v6931_v31 = vpop.f32.mrb[42].mxu0 }
 0x2f5   : > { %v1987_v33 = vadd.f32 %v6931_v31, %v8926_v27  ;;  %v1978_v20 = vpop.f32.mrb[43].mxu0  ;;  %v2112_v45 = vmax.f32 %v1984_v17, 0.0 }
 0x2f6   : > { %v1979_v39 = vadd.f32 %v8926_v27, %v1978_v20  ;;  %v2110_v7 = vmax.f32 %v1976_v35, 0.0 }
 0x2f7   : > { %v2113_v48 = vmax.f32 %v1987_v33, 0.0  ;;  %v6970_v21 = vpop.f32.mrb[0].mxu1 }
 0x2f8   : > { %v2111_v22 = vmax.f32 %v1979_v39, 0.0  ;;  %v2279_v47 = vadd.f32 %v6970_v21, %v9252_v49  ;;  %v2270_v43 = vpop.f32.mrb[1].mxu1 }
 0x2f9   : > { %v2155_v52 = vpack.c.bf16 %v2113_v48, %v2112_v45  ;;  %v2271_v44 = vadd.f32 %v9252_v49, %v2270_v43  ;;  %v6971_v29 = vpop.f32.mrb[2].mxu1 }
 0x2fa   : > { %v2154_v23 = vpack.c.bf16 %v2111_v22, %v2110_v7  ;;  %v2282_v11 = vadd.f32 %v6971_v29, %v9252_v49  ;;  %v2273_v50 = vpop.f32.mrb[3].mxu1  ;;  %v2527_v8 = vmax.f32 %v2279_v47, 0.0 }
 0x2fb   : > { %v2274_v10 = vadd.f32 %v9252_v49, %v2273_v50  ;;  %v2525_v17 = vmax.f32 %v2271_v44, 0.0 }
 0x2fc   : > { %v2528_v31 = vmax.f32 %v2282_v11, 0.0  ;;  %7008 = vmatprep.mubr.bf16.mxu1 %v2154_v23 }
 0x2fd   : > { %v2526_v33 = vmax.f32 %v2274_v10, 0.0  ;;  %7009 = vmatmul.mubr.bf16.gmra.mrb[40].mxu1 %v2155_v52 }
 0x2fe   : > { %v2590_v35 = vpack.c.bf16 %v2528_v31, %v2527_v8 }
 0x2ff   : > { %v2589_v20 = vpack.c.bf16 %v2526_v33, %v2525_v17  ;;  %v6974_v39 = vpop.f32.mrb[4].mxu1 }
 0x300   : > { %v2295_v45 = vadd.f32 %v6974_v39, %v9252_v49  ;;  %v2286_v48 = vpop.f32.mrb[5].mxu1 }
 0x301   : > { %v2287_v21 = vadd.f32 %v9252_v49, %v2286_v48  ;;  %v6975_v7 = vpop.f32.mrb[6].mxu1  ;;  %7048 = vmatprep.mubr.bf16.mxu0 %v2589_v20 }
 0x302   : > { %v2298_v22 = vadd.f32 %v6975_v7, %v9252_v49  ;;  %v2289_v43 = vpop.f32.mrb[7].mxu1  ;;  %7049 = vmatmul.mubr.bf16.vlgmr.msra.gmra.mrb[64].mxu0 %v2590_v35  ;;  %v2531_v29 = vmax.f32 %v2295_v45, 0.0 }
 0x303   : > { %v2290_v47 = vadd.f32 %v9252_v49, %v2289_v43  ;;  %v2529_v23 = vmax.f32 %v2287_v21, 0.0 }
 0x304   : > { %v2532_v44 = vmax.f32 %v2298_v22, 0.0 }
 0x305   : > { %v2530_v52 = vmax.f32 %v2290_v47, 0.0 }
 0x306   : > { %v2592_v11 = vpack.c.bf16 %v2532_v44, %v2531_v29 }
 0x307   : > { %v2591_v50 = vpack.c.bf16 %v2530_v52, %v2529_v23  ;;  %v6978_v10 = vpop.f32.mrb[8].mxu1 }
 0x308   : > { %v2311_v8 = vadd.f32 %v6978_v10, %v9252_v49  ;;  %v2302_v31 = vpop.f32.mrb[9].mxu1 }
 0x309   : > { %v2303_v17 = vadd.f32 %v9252_v49, %v2302_v31  ;;  %v6979_v33 = vpop.f32.mrb[10].mxu1  ;;  %7052 = vmatprep.mubr.bf16.mxu0 %v2591_v50 }
 0x30a   : > { %v2314_v20 = vadd.f32 %v6979_v33, %v9252_v49  ;;  %v2305_v39 = vpop.f32.mrb[11].mxu1  ;;  %7053 = vmatmul.mubr.bf16.gmra.mrb[68].mxu0 %v2592_v11  ;;  %v2535_v45 = vmax.f32 %v2311_v8, 0.0 }
 0x30b   : > { %v2306_v35 = vadd.f32 %v9252_v49, %v2305_v39  ;;  %v2533_v21 = vmax.f32 %v2303_v17, 0.0 }
 0x30c   : > { %v2536_v48 = vmax.f32 %v2314_v20, 0.0 }
 0x30d   : > { %v2534_v7 = vmax.f32 %v2306_v35, 0.0 }
 0x30e   : > { %v2594_v22 = vpack.c.bf16 %v2536_v48, %v2535_v45 }
 0x30f   : > { %v2593_v43 = vpack.c.bf16 %v2534_v7, %v2533_v21  ;;  %v6982_v47 = vpop.f32.mrb[12].mxu1 }
 0x310   : > { %v2327_v29 = vadd.f32 %v6982_v47, %v9252_v49  ;;  %v2318_v44 = vpop.f32.mrb[13].mxu1 }
 0x311   : > { %v2319_v23 = vadd.f32 %v9252_v49, %v2318_v44  ;;  %v6983_v52 = vpop.f32.mrb[14].mxu1  ;;  %7056 = vmatprep.mubr.bf16.mxu0 %v2593_v43 }
 0x312   : > { %v2330_v50 = vadd.f32 %v6983_v52, %v9252_v49  ;;  %v2321_v10 = vpop.f32.mrb[15].mxu1  ;;  %7057 = vmatmul.mubr.bf16.gmra.mrb[72].mxu0 %v2594_v22  ;;  %v2539_v31 = vmax.f32 %v2327_v29, 0.0 }
 0x313   : > { %v2322_v11 = vadd.f32 %v9252_v49, %v2321_v10  ;;  %v6934_v8 = vpop.f32.mrb[44].mxu0  ;;  %v2537_v39 = vmax.f32 %v2319_v23, 0.0 }
 0x314   : > { %v2540_v17 = vmax.f32 %v2330_v50, 0.0  ;;  %v2000_v33 = vadd.f32 %v6934_v8, %v8926_v27  ;;  %v1991_v20 = vpop.f32.mrb[45].mxu0 }
 0x315   : > { %v2538_v35 = vmax.f32 %v2322_v11, 0.0  ;;  %v1992_v45 = vadd.f32 %v8926_v27, %v1991_v20  ;;  %v6935_v48 = vpop.f32.mrb[46].mxu0 }
 0x316   : > { %v2596_v21 = vpack.c.bf16 %v2540_v17, %v2539_v31  ;;  %v2003_v7 = vadd.f32 %v6935_v48, %v8926_v27  ;;  %v1994_v43 = vpop.f32.mrb[47].mxu0  ;;  %v2116_v52 = vmax.f32 %v2000_v33, 0.0 }
 0x317   : > { %v2595_v47 = vpack.c.bf16 %v2538_v35, %v2537_v39  ;;  %v1995_v22 = vadd.f32 %v8926_v27, %v1994_v43  ;;  %v6986_v44 = vpop.f32.mrb[16].mxu1  ;;  %v2114_v8 = vmax.f32 %v1992_v45, 0.0 }
 0x318   : > { %v2117_v10 = vmax.f32 %v2003_v7, 0.0  ;;  %v2343_v29 = vadd.f32 %v6986_v44, %v9252_v49  ;;  %v2334_v50 = vpop.f32.mrb[17].mxu1 }
 0x319   : > { %v2115_v58 = vmax.f32 %v1995_v22, 0.0  ;;  %v2335_v23 = vadd.f32 %v9252_v49, %v2334_v50  ;;  %v6987_v11 = vpop.f32.mrb[18].mxu1  ;;  %7060 = vmatprep.mubr.bf16.mxu0 %v2595_v47 }
 0x31a   : > { %v2157_v20 = vpack.c.bf16 %v2117_v10, %v2116_v52  ;;  %v2346_v31 = vadd.f32 %v6987_v11, %v9252_v49  ;;  %v2337_v17 = vpop.f32.mrb[19].mxu1  ;;  %7061 = vmatmul.mubr.bf16.gmra.mrb[76].mxu0 %v2596_v21  ;;  %v2543_v35 = vmax.f32 %v2343_v29, 0.0 }
 0x31b   : > { %v2156_v39 = vpack.c.bf16 %v2115_v58, %v2114_v8  ;;  %v2338_v27 = vadd.f32 %v9252_v49, %v2337_v17  ;;  %v2541_v48 = vmax.f32 %v2335_v23, 0.0  ;;  %v7664_v17 = vld [vmem:[%s10453_s2 + $0xc0] sm:$0xff]  }
 0x31c   : > { %v2544_v33 = vmax.f32 %v2346_v31, 0.0  ;;  %7112 = vmatprep.subr.bf16.mxu1 %v7664_v17 }
 0x31d   : > { %v2542_v7 = vmax.f32 %v2338_v27, 0.0  ;;  %7012 = vmatprep.mubr.bf16.mxu1 %v2156_v39  ;;  %v7665_v39 = vld [vmem:[%s10453_s2 + $0xc8] sm:$0xff]   ;;  %7113 = vmatpush3.bf16.msra.mxu1 %v7664_v17 }
 0x31e   : > { %v2598_v43 = vpack.c.bf16 %v2544_v33, %v2543_v35  ;;  %7013 = vmatmul.mubr.bf16.gmra.mrb[44].mxu1 %v2157_v20  ;;  %v9292_v35 = vld [vmem:[%s10454_s3 + $0x1] ss:$0 sm:$0xff]  ;;  %7114 = vmatprep.subr.bf16.mxu1 %v7665_v39 }
 0x31f   : > { %v2597_v45 = vpack.c.bf16 %v2542_v7, %v2541_v48  ;;  %v6990_v22 = vpop.f32.mrb[20].mxu1 }
 0x320   : > { %v2359_v44 = vadd.f32 %v6990_v22, %v9252_v49  ;;  %v2350_v47 = vpop.f32.mrb[21].mxu1 }
 0x321   : > { %v2351_v52 = vadd.f32 %v9252_v49, %v2350_v47  ;;  %v6991_v10 = vpop.f32.mrb[22].mxu1  ;;  %7064 = vmatprep.mubr.bf16.mxu0 %v2597_v45  ;;  %v7666_v45 = vld [vmem:[%s10453_s2 + $0xd0] sm:$0xff]   ;;  %7115 = vmatpush3.bf16.msra.mxu1 %v7665_v39 }
 0x322   : > { %v2362_v58 = vadd.f32 %v6991_v10, %v9252_v49  ;;  %v2353_v21 = vpop.f32.mrb[23].mxu1  ;;  %7065 = vmatmul.mubr.bf16.gmra.mrb[80].mxu0 %v2598_v43  ;;  %v2547_v50 = vmax.f32 %v2359_v44, 0.0  ;;  %7116 = vmatprep.subr.bf16.mxu1 %v7666_v45 }
 0x323   : > { %v2354_v29 = vadd.f32 %v9252_v49, %v2353_v21  ;;  %v2545_v23 = vmax.f32 %v2351_v52, 0.0 }
 0x324   : > { %v2548_v8 = vmax.f32 %v2362_v58, 0.0 }
 0x325   : > { %v2546_v11 = vmax.f32 %v2354_v29, 0.0  ;;  %v7667_v29 = vld [vmem:[%s10453_s2 + $0xd8] sm:$0xff]   ;;  %7117 = vmatpush3.bf16.msra.mxu1 %v7666_v45 }
 0x326   : > { %v2600_v20 = vpack.c.bf16 %v2548_v8, %v2547_v50  ;;  %7118 = vmatprep.subr.bf16.mxu1 %v7667_v29 }
 0x327   : > { %v2599_v31 = vpack.c.bf16 %v2546_v11, %v2545_v23 }
 0x329   : > { %7068 = vmatprep.mubr.bf16.mxu0 %v2599_v31  ;;  %7119 = vmatpush3.bf16.msra.mxu1 %v7667_v29 }
 0x32a   : > { %7069 = vmatmul.mubr.bf16.gmra.mrb[84].mxu0 %v2600_v20 }
 0x338   : > { %v6938_v27 = vpop.f32.mrb[48].mxu0 }
 0x339   : > { %v2016_v33 = vadd.f32 %v9292_v35, %v6938_v27  ;;  %v2007_v48 = vpop.f32.mrb[49].mxu0 }
 0x33a   : > { %v2008_v7 = vadd.f32 %v9292_v35, %v2007_v48  ;;  %v6939_v43 = vpop.f32.mrb[50].mxu0 }
 0x33b   : > { %v2019_v22 = vadd.f32 %v9292_v35, %v6939_v43  ;;  %v2010_v44 = vpop.f32.mrb[51].mxu0  ;;  %v2120_v52 = vmax.f32 %v2016_v33, 0.0 }
 0x33c   : > { %v2011_v47 = vadd.f32 %v9292_v35, %v2010_v44  ;;  %v2118_v58 = vmax.f32 %v2008_v7, 0.0 }
 0x33d   : > { %v2121_v10 = vmax.f32 %v2019_v22, 0.0 }
 0x33e   : > { %v2119_v21 = vmax.f32 %v2011_v47, 0.0  ;;  %v7668_v47 = vld [vmem:[%s10453_s2 + $0xe0] sm:$0xff]  }
 0x33f   : > { %v2159_v50 = vpack.c.bf16 %v2121_v10, %v2120_v52  ;;  %7120 = vmatprep.subr.bf16.mxu1 %v7668_v47  ;;  %v7669_v52 = vld [vmem:[%s10453_s2 + $0xe8] sm:$0xff]   ;;  %v7670_v10 = vld [vmem:[%s10453_s2 + $0xf0] sm:$0xff]  }
 0x340   : > { %v2158_v8 = vpack.c.bf16 %v2119_v21, %v2118_v58  ;;  %7121 = vmatpush3.bf16.msra.mxu1 %v7668_v47 }
 0x341   : > { %7122 = vmatprep.subr.bf16.mxu1 %v7669_v52 }
 0x342   : > { %7016 = vmatprep.mubr.bf16.mxu1 %v2158_v8 }
 0x343   : > { %7017 = vmatmul.mubr.bf16.gmra.mrb[48].mxu1 %v2159_v50 }
 0x344   : > { %v6994_v23 = vpop.f32.mrb[24].mxu1  ;;  %7123 = vmatpush3.bf16.msra.mxu1 %v7669_v52 }
 0x345   : > { %v2375_v11 = vadd.f32 %v6994_v23, %v9252_v49  ;;  %v2366_v20 = vpop.f32.mrb[25].mxu1  ;;  %7124 = vmatprep.subr.bf16.mxu1 %v7670_v10  ;;  %v7671_v23 = vld [vmem:[%s10453_s2 + $0xf8] sm:$0xff]  }
 0x346   : > { %v2367_v31 = vadd.f32 %v9252_v49, %v2366_v20  ;;  %v6995_v17 = vpop.f32.mrb[26].mxu1 }
 0x347   : > { %v2378_v39 = vadd.f32 %v6995_v17, %v9252_v49  ;;  %v2369_v27 = vpop.f32.mrb[27].mxu1  ;;  %v2551_v48 = vmax.f32 %v2375_v11, 0.0 }
 0x348   : > { %v2370_v33 = vadd.f32 %v9252_v49, %v2369_v27  ;;  %v2549_v43 = vmax.f32 %v2367_v31, 0.0  ;;  %7125 = vmatpush3.bf16.msra.mxu1 %v7670_v10 }
 0x349   : > { %v2552_v7 = vmax.f32 %v2378_v39, 0.0  ;;  %7126 = vmatprep.subr.bf16.mxu1 %v7671_v23 }
 0x34a   : > { %v2550_v45 = vmax.f32 %v2370_v33, 0.0 }
 0x34b   : > { %v2602_v22 = vpack.c.bf16 %v2552_v7, %v2551_v48 }
 0x34c   : > { %v2601_v44 = vpack.c.bf16 %v2550_v45, %v2549_v43  ;;  %7127 = vmatpush3.bf16.msra.mxu1 %v7671_v23 }
 0x34e   : > { %7072 = vmatprep.mubr.bf16.mxu0 %v2601_v44 }
 0x34f   : > { %7073 = vmatmul.mubr.bf16.gmra.mrb[88].mxu0 %v2602_v22 }
 0x359   : > { %v6942_v58 = vpop.f32.mrb[52].mxu0 }
 0x35a   : > { %v2032_v21 = vadd.f32 %v9292_v35, %v6942_v58  ;;  %v2023_v29 = vpop.f32.mrb[53].mxu0 }
 0x35b   : > { %v2024_v50 = vadd.f32 %v9292_v35, %v2023_v29  ;;  %v6943_v8 = vpop.f32.mrb[54].mxu0 }
 0x35c   : > { %v2035_v11 = vadd.f32 %v9292_v35, %v6943_v8  ;;  %v2026_v20 = vpop.f32.mrb[55].mxu0  ;;  %v2124_v17 = vmax.f32 %v2032_v21, 0.0 }
 0x35d   : > { %v2027_v31 = vadd.f32 %v9292_v35, %v2026_v20  ;;  %v2122_v27 = vmax.f32 %v2024_v50, 0.0 }
 0x35e   : > { %v2125_v39 = vmax.f32 %v2035_v11, 0.0 }
 0x35f   : > { %v2123_v33 = vmax.f32 %v2027_v31, 0.0 }
 0x360   : > { %v2161_v48 = vpack.c.bf16 %v2125_v39, %v2124_v17 }
 0x361   : > { %v2160_v7 = vpack.c.bf16 %v2123_v33, %v2122_v27 }
 0x363   : > { %7020 = vmatprep.mubr.bf16.mxu1 %v2160_v7 }
 0x364   : > { %7021 = vmatmul.mubr.bf16.gmra.mrb[52].mxu1 %v2161_v48 }
 0x365   : > { %v6998_v43 = vpop.f32.mrb[28].mxu1 }
 0x366   : > { %v2391_v45 = vadd.f32 %v6998_v43, %v9252_v49  ;;  %v2382_v22 = vpop.f32.mrb[29].mxu1 }
 0x367   : > { %v2383_v44 = vadd.f32 %v9252_v49, %v2382_v22  ;;  %v6999_v47 = vpop.f32.mrb[30].mxu1 }
 0x368   : > { %v2394_v52 = vadd.f32 %v6999_v47, %v9252_v49  ;;  %v2385_v10 = vpop.f32.mrb[31].mxu1  ;;  %v2555_v21 = vmax.f32 %v2391_v45, 0.0 }
 0x369   : > { %v2386_v58 = vadd.f32 %v9252_v49, %v2385_v10  ;;  %v2553_v50 = vmax.f32 %v2383_v44, 0.0 }
 0x36a   : > { %v2556_v29 = vmax.f32 %v2394_v52, 0.0 }
 0x36b   : > { %v2554_v8 = vmax.f32 %v2386_v58, 0.0 }
 0x36c   : > { %v2604_v23 = vpack.c.bf16 %v2556_v29, %v2555_v21 }
 0x36d   : > { %v2603_v11 = vpack.c.bf16 %v2554_v8, %v2553_v50 }
 0x36f   : > { %7076 = vmatprep.mubr.bf16.mxu0 %v2603_v11 }
 0x370   : > { %7077 = vmatmul.mubr.bf16.gmra.mrb[92].mxu0 %v2604_v23 }
 0x37e   : > { %v6946_v20 = vpop.f32.mrb[56].mxu0 }
 0x37f   : > { %v2048_v31 = vadd.f32 %v9292_v35, %v6946_v20  ;;  %v2039_v17 = vpop.f32.mrb[57].mxu0 }
 0x380   : > { %v2040_v39 = vadd.f32 %v9292_v35, %v2039_v17  ;;  %v6947_v27 = vpop.f32.mrb[58].mxu0 }
 0x381   : > { %v2051_v33 = vadd.f32 %v9292_v35, %v6947_v27  ;;  %v2042_v48 = vpop.f32.mrb[59].mxu0  ;;  %v2128_v43 = vmax.f32 %v2048_v31, 0.0 }
 0x382   : > { %v2043_v7 = vadd.f32 %v9292_v35, %v2042_v48  ;;  %v2126_v22 = vmax.f32 %v2040_v39, 0.0 }
 0x383   : > { %v2129_v45 = vmax.f32 %v2051_v33, 0.0 }
 0x384   : > { %v2127_v44 = vmax.f32 %v2043_v7, 0.0 }
 0x385   : > { %v2163_v47 = vpack.c.bf16 %v2129_v45, %v2128_v43 }
 0x386   : > { %v2162_v52 = vpack.c.bf16 %v2127_v44, %v2126_v22 }
 0x388   : > { %7024 = vmatprep.mubr.bf16.mxu1 %v2162_v52 }
 0x389   : > { %7025 = vmatmul.mubr.bf16.gmra.mrb[56].mxu1 %v2163_v47 }
 0x38a   : > { %v7002_v10 = vpop.f32.mrb[32].mxu1 }
 0x38b   : > { %v2407_v58 = vadd.f32 %v7002_v10, %v9252_v49  ;;  %v2398_v21 = vpop.f32.mrb[33].mxu1 }
 0x38c   : > { %v2399_v29 = vadd.f32 %v9252_v49, %v2398_v21  ;;  %v7003_v50 = vpop.f32.mrb[34].mxu1 }
 0x38d   : > { %v2410_v8 = vadd.f32 %v7003_v50, %v9252_v49  ;;  %v2401_v23 = vpop.f32.mrb[35].mxu1  ;;  %v2559_v20 = vmax.f32 %v2407_v58, 0.0 }
 0x38e   : > { %v2402_v11 = vadd.f32 %v9252_v49, %v2401_v23  ;;  %v2557_v17 = vmax.f32 %v2399_v29, 0.0 }
 0x38f   : > { %v2560_v31 = vmax.f32 %v2410_v8, 0.0 }
 0x390   : > { %v2558_v39 = vmax.f32 %v2402_v11, 0.0 }
 0x391   : > { %v2606_v27 = vpack.c.bf16 %v2560_v31, %v2559_v20 }
 0x392   : > { %v2605_v33 = vpack.c.bf16 %v2558_v39, %v2557_v17 }
 0x394   : > { %7080 = vmatprep.mubr.bf16.mxu0 %v2605_v33 }
 0x395   : > { %7081 = vmatmul.mubr.bf16.gmra.mrb[96].mxu0 %v2606_v27 }
 0x39f   : > { %v6950_v48 = vpop.f32.mrb[60].mxu0 }
 0x3a0   : > { %v2064_v7 = vadd.f32 %v9292_v35, %v6950_v48  ;;  %v2055_v43 = vpop.f32.mrb[61].mxu0 }
 0x3a1   : > { %v2056_v45 = vadd.f32 %v9292_v35, %v2055_v43  ;;  %v6951_v22 = vpop.f32.mrb[62].mxu0 }
 0x3a2   : > { %v2067_v44 = vadd.f32 %v9292_v35, %v6951_v22  ;;  %v2058_v47 = vpop.f32.mrb[63].mxu0  ;;  %v2132_v10 = vmax.f32 %v2064_v7, 0.0 }
 0x3a3   : > { %v2059_v52 = vadd.f32 %v9292_v35, %v2058_v47  ;;  %v2130_v21 = vmax.f32 %v2056_v45, 0.0 }
 0x3a4   : > { %v2133_v58 = vmax.f32 %v2067_v44, 0.0 }
 0x3a5   : > { %v2131_v29 = vmax.f32 %v2059_v52, 0.0 }
 0x3a6   : > { %v2165_v50 = vpack.c.bf16 %v2133_v58, %v2132_v10 }
 0x3a7   : > { %v2164_v8 = vpack.c.bf16 %v2131_v29, %v2130_v21 }
 0x3a9   : > { %7028 = vmatprep.mubr.bf16.mxu1 %v2164_v8 }
 0x3aa   : > { %7029 = vmatmul.mubr.bf16.gmra.mrb[60].mxu1 %v2165_v50  ;;  %v9350_v50 = vld [vmem:[%s10454_s3 + $0x3] ss:$0 sm:$0xff] }
 0x3ab   : > { %v7006_v23 = vpop.f32.mrb[36].mxu1 }
 0x3ac   : > { %v2423_v11 = vadd.f32 %v7006_v23, %v9252_v49  ;;  %v2414_v20 = vpop.f32.mrb[37].mxu1 }
 0x3ad   : > { %v2415_v31 = vadd.f32 %v9252_v49, %v2414_v20  ;;  %v7007_v17 = vpop.f32.mrb[38].mxu1 }
 0x3ae   : > { %v2426_v39 = vadd.f32 %v7007_v17, %v9252_v49  ;;  %v2417_v27 = vpop.f32.mrb[39].mxu1  ;;  %v2563_v33 = vmax.f32 %v2423_v11, 0.0 }
 0x3af   : > { %v2418_v35 = vadd.f32 %v9252_v49, %v2417_v27  ;;  %v2561_v7 = vmax.f32 %v2415_v31, 0.0 }
 0x3b0   : > { %v2564_v48 = vmax.f32 %v2426_v39, 0.0 }
 0x3b1   : > { %v2562_v43 = vmax.f32 %v2418_v35, 0.0 }
 0x3b2   : > { %v2608_v45 = vpack.c.bf16 %v2564_v48, %v2563_v33 }
 0x3b3   : > { %v2607_v22 = vpack.c.bf16 %v2562_v43, %v2561_v7 }
 0x3b5   : > { %7084 = vmatprep.mubr.bf16.mxu0 %v2607_v22 }
 0x3b6   : > { %7085 = vmatmul.mubr.bf16.gmra.mrb[100].mxu0 %v2608_v45 }
 0x3d0   : > { %v7010_v44 = vpop.f32.mrb[40].mxu1 }
 0x3d1   : > { %v2439_v47 = vadd.f32 %v7010_v44, %v9252_v49  ;;  %v2430_v52 = vpop.f32.mrb[41].mxu1 }
 0x3d2   : > { %v2431_v10 = vadd.f32 %v9252_v49, %v2430_v52  ;;  %v7011_v58 = vpop.f32.mrb[42].mxu1 }
 0x3d3   : > { %v2442_v21 = vadd.f32 %v7011_v58, %v9252_v49  ;;  %v2433_v29 = vpop.f32.mrb[43].mxu1  ;;  %v2567_v23 = vmax.f32 %v2439_v47, 0.0 }
 0x3d4   : > { %v2434_v8 = vadd.f32 %v9252_v49, %v2433_v29  ;;  %v2565_v31 = vmax.f32 %v2431_v10, 0.0 }
 0x3d5   : > { %v2568_v11 = vmax.f32 %v2442_v21, 0.0  ;;  %v7050_v20 = vpop.f32.mrb[64].mxu0 }
 0x3d6   : > { %v2566_v17 = vmax.f32 %v2434_v8, 0.0  ;;  %v2734_v39 = vadd.f32 %v7050_v20, %v9350_v50  ;;  %v2725_v27 = vpop.f32.mrb[65].mxu0 }
 0x3d7   : > { %v2610_v35 = vpack.c.bf16 %v2568_v11, %v2567_v23  ;;  %v2726_v33 = vadd.f32 %v9350_v50, %v2725_v27  ;;  %v7051_v48 = vpop.f32.mrb[66].mxu0 }
 0x3d8   : > { %v2609_v7 = vpack.c.bf16 %v2566_v17, %v2565_v31  ;;  %v2737_v43 = vadd.f32 %v7051_v48, %v9350_v50  ;;  %v2728_v45 = vpop.f32.mrb[67].mxu0  ;;  %v2982_v44 = vmax.f32 %v2734_v39, 0.0 }
 0x3d9   : > { %v2729_v22 = vadd.f32 %v9350_v50, %v2728_v45  ;;  %v2980_v47 = vmax.f32 %v2726_v33, 0.0 }
 0x3da   : > { %v2983_v52 = vmax.f32 %v2737_v43, 0.0  ;;  %7088 = vmatprep.mubr.bf16.mxu0 %v2609_v7 }
 0x3db   : > { %v2981_v58 = vmax.f32 %v2729_v22, 0.0  ;;  %7089 = vmatmul.mubr.bf16.gmra.mrb[104].mxu0 %v2610_v35 }
 0x3dc   : > { %v3045_v10 = vpack.c.bf16 %v2983_v52, %v2982_v44 }
 0x3dd   : > { %v3044_v21 = vpack.c.bf16 %v2981_v58, %v2980_v47  ;;  %v7054_v29 = vpop.f32.mrb[68].mxu0 }
 0x3de   : > { %v2750_v8 = vadd.f32 %v7054_v29, %v9350_v50  ;;  %v2741_v23 = vpop.f32.mrb[69].mxu0 }
 0x3df   : > { %v2742_v11 = vadd.f32 %v9350_v50, %v2741_v23  ;;  %v7055_v20 = vpop.f32.mrb[70].mxu0  ;;  %7128 = vmatprep.mubr.bf16.mxu1 %v3044_v21 }
 0x3e0   : > { %v2753_v31 = vadd.f32 %v7055_v20, %v9350_v50  ;;  %v2744_v17 = vpop.f32.mrb[71].mxu0  ;;  %7129 = vmatmul.mubr.bf16.vlgmr.msra.gmra.mrb[64].mxu1 %v3045_v10  ;;  %v2986_v27 = vmax.f32 %v2750_v8, 0.0 }
 0x3e1   : > { %v2745_v39 = vadd.f32 %v9350_v50, %v2744_v17  ;;  %v2984_v48 = vmax.f32 %v2742_v11, 0.0 }
 0x3e2   : > { %v2987_v33 = vmax.f32 %v2753_v31, 0.0 }
 0x3e3   : > { %v2985_v35 = vmax.f32 %v2745_v39, 0.0 }
 0x3e4   : > { %v3047_v7 = vpack.c.bf16 %v2987_v33, %v2986_v27 }
 0x3e5   : > { %v3046_v43 = vpack.c.bf16 %v2985_v35, %v2984_v48  ;;  %v7058_v45 = vpop.f32.mrb[72].mxu0 }
 0x3e6   : > { %v2766_v22 = vadd.f32 %v7058_v45, %v9350_v50  ;;  %v2757_v44 = vpop.f32.mrb[73].mxu0 }
 0x3e7   : > { %v2758_v52 = vadd.f32 %v9350_v50, %v2757_v44  ;;  %v7059_v47 = vpop.f32.mrb[74].mxu0  ;;  %7132 = vmatprep.mubr.bf16.mxu1 %v3046_v43 }
 0x3e8   : > { %v2769_v58 = vadd.f32 %v7059_v47, %v9350_v50  ;;  %v2760_v21 = vpop.f32.mrb[75].mxu0  ;;  %7133 = vmatmul.mubr.bf16.gmra.mrb[68].mxu1 %v3047_v7  ;;  %v2990_v29 = vmax.f32 %v2766_v22, 0.0 }
 0x3e9   : > { %v2761_v10 = vadd.f32 %v9350_v50, %v2760_v21  ;;  %v2988_v23 = vmax.f32 %v2758_v52, 0.0 }
 0x3ea   : > { %v2991_v8 = vmax.f32 %v2769_v58, 0.0 }
 0x3eb   : > { %v2989_v11 = vmax.f32 %v2761_v10, 0.0 }
 0x3ec   : > { %v3049_v20 = vpack.c.bf16 %v2991_v8, %v2990_v29 }
 0x3ed   : > { %v3048_v31 = vpack.c.bf16 %v2989_v11, %v2988_v23  ;;  %v7062_v17 = vpop.f32.mrb[76].mxu0 }
 0x3ee   : > { %v2782_v39 = vadd.f32 %v7062_v17, %v9350_v50  ;;  %v2773_v27 = vpop.f32.mrb[77].mxu0 }
 0x3ef   : > { %v2774_v33 = vadd.f32 %v9350_v50, %v2773_v27  ;;  %v7063_v48 = vpop.f32.mrb[78].mxu0  ;;  %7136 = vmatprep.mubr.bf16.mxu1 %v3048_v31 }
 0x3f0   : > { %v2785_v35 = vadd.f32 %v7063_v48, %v9350_v50  ;;  %v2776_v43 = vpop.f32.mrb[79].mxu0  ;;  %7137 = vmatmul.mubr.bf16.gmra.mrb[72].mxu1 %v3049_v20  ;;  %v2994_v22 = vmax.f32 %v2782_v39, 0.0 }
 0x3f1   : > { %v2777_v7 = vadd.f32 %v9350_v50, %v2776_v43  ;;  %v7014_v45 = vpop.f32.mrb[44].mxu1  ;;  %v2992_v58 = vmax.f32 %v2774_v33, 0.0 }
 0x3f2   : > { %v2995_v44 = vmax.f32 %v2785_v35, 0.0  ;;  %v2455_v52 = vadd.f32 %v7014_v45, %v9252_v49  ;;  %v2446_v47 = vpop.f32.mrb[45].mxu1 }
 0x3f3   : > { %v2993_v21 = vmax.f32 %v2777_v7, 0.0  ;;  %v2447_v10 = vadd.f32 %v9252_v49, %v2446_v47  ;;  %v7015_v29 = vpop.f32.mrb[46].mxu1 }
 0x3f4   : > { %v3051_v8 = vpack.c.bf16 %v2995_v44, %v2994_v22  ;;  %v2458_v23 = vadd.f32 %v7015_v29, %v9252_v49  ;;  %v2449_v11 = vpop.f32.mrb[47].mxu1  ;;  %v2571_v27 = vmax.f32 %v2455_v52, 0.0 }
 0x3f5   : > { %v3050_v31 = vpack.c.bf16 %v2993_v21, %v2992_v58  ;;  %v2450_v20 = vadd.f32 %v9252_v49, %v2449_v11  ;;  %v7066_v17 = vpop.f32.mrb[80].mxu0  ;;  %v2569_v43 = vmax.f32 %v2447_v10, 0.0 }
 0x3f6   : > { %v2572_v48 = vmax.f32 %v2458_v23, 0.0  ;;  %v2798_v39 = vadd.f32 %v7066_v17, %v9350_v50  ;;  %v2789_v35 = vpop.f32.mrb[81].mxu0 }
 0x3f7   : > { %v2570_v45 = vmax.f32 %v2450_v20, 0.0  ;;  %v2790_v33 = vadd.f32 %v9350_v50, %v2789_v35  ;;  %v7067_v7 = vpop.f32.mrb[82].mxu0  ;;  %7140 = vmatprep.mubr.bf16.mxu1 %v3050_v31 }
 0x3f8   : > { %v2612_v47 = vpack.c.bf16 %v2572_v48, %v2571_v27  ;;  %v2801_v22 = vadd.f32 %v7067_v7, %v9350_v50  ;;  %v2792_v44 = vpop.f32.mrb[83].mxu0  ;;  %7141 = vmatmul.mubr.bf16.gmra.mrb[76].mxu1 %v3051_v8  ;;  %v2998_v29 = vmax.f32 %v2798_v39, 0.0 }
 0x3f9   : > { %v2611_v58 = vpack.c.bf16 %v2570_v45, %v2569_v43  ;;  %v2793_v21 = vadd.f32 %v9350_v50, %v2792_v44  ;;  %v2996_v23 = vmax.f32 %v2790_v33, 0.0 }
 0x3fa   : > { %v2999_v52 = vmax.f32 %v2801_v22, 0.0 }
 0x3fb   : > { %v2997_v11 = vmax.f32 %v2793_v21, 0.0  ;;  %7092 = vmatprep.mubr.bf16.mxu0 %v2611_v58  ;;  %v7672_v58 = vld [vmem:[%s10453_s2 + $0x100] sm:$0xff]   ;;  %v7673_v21 = vld [vmem:[%s10453_s2 + $0x108] sm:$0xff]  }
 0x3fc   : > { %v3053_v17 = vpack.c.bf16 %v2999_v52, %v2998_v29  ;;  %7093 = vmatmul.mubr.bf16.gmra.mrb[108].mxu0 %v2612_v47  ;;  %7192 = vmatprep.subr.bf16.mxu0 %v7672_v58 }
 0x3fd   : > { %v3052_v10 = vpack.c.bf16 %v2997_v11, %v2996_v23  ;;  %v7070_v20 = vpop.f32.mrb[84].mxu0  ;;  %7193 = vmatpush3.bf16.msra.mxu0 %v7672_v58 }
 0x3fe   : > { %v2814_v35 = vadd.f32 %v7070_v20, %v9350_v50  ;;  %v2805_v31 = vpop.f32.mrb[85].mxu0  ;;  %7194 = vmatprep.subr.bf16.mxu0 %v7673_v21 }
 0x3ff   : > { %v2806_v27 = vadd.f32 %v9350_v50, %v2805_v31  ;;  %v7071_v48 = vpop.f32.mrb[86].mxu0  ;;  %7144 = vmatprep.mubr.bf16.mxu1 %v3052_v10  ;;  %v7674_v10 = vld [vmem:[%s10453_s2 + $0x110] sm:$0xff]  }
 0x400   : > { %v2817_v8 = vadd.f32 %v7071_v48, %v9350_v50  ;;  %v2808_v43 = vpop.f32.mrb[87].mxu0  ;;  %7145 = vmatmul.mubr.bf16.gmra.mrb[80].mxu1 %v3053_v17  ;;  %v3002_v45 = vmax.f32 %v2814_v35, 0.0 }
 0x401   : > { %v2809_v39 = vadd.f32 %v9350_v50, %v2808_v43  ;;  %v3000_v7 = vmax.f32 %v2806_v27, 0.0  ;;  %7195 = vmatpush3.bf16.msra.mxu0 %v7673_v21 }
 0x402   : > { %v3003_v33 = vmax.f32 %v2817_v8, 0.0  ;;  %7196 = vmatprep.subr.bf16.mxu0 %v7674_v10 }
 0x403   : > { %v3001_v22 = vmax.f32 %v2809_v39, 0.0  ;;  %v7675_v39 = vld [vmem:[%s10453_s2 + $0x118] sm:$0xff]  }
 0x404   : > { %v3055_v47 = vpack.c.bf16 %v3003_v33, %v3002_v45 }
 0x405   : > { %v3054_v44 = vpack.c.bf16 %v3001_v22, %v3000_v7  ;;  %7197 = vmatpush3.bf16.msra.mxu0 %v7674_v10 }
 0x406   : > { %7198 = vmatprep.subr.bf16.mxu0 %v7675_v39 }
 0x407   : > { %7148 = vmatprep.mubr.bf16.mxu1 %v3054_v44 }
 0x408   : > { %7149 = vmatmul.mubr.bf16.gmra.mrb[84].mxu1 %v3055_v47 }
 0x409   : > { %7199 = vmatpush3.bf16.msra.mxu0 %v7675_v39 }
 0x416   : > { %v7018_v29 = vpop.f32.mrb[48].mxu1 }
 0x417   : > { %v2471_v52 = vadd.f32 %v7018_v29, %v9252_v49  ;;  %v2462_v23 = vpop.f32.mrb[49].mxu1 }
 0x418   : > { %v2463_v11 = vadd.f32 %v9252_v49, %v2462_v23  ;;  %v7019_v17 = vpop.f32.mrb[50].mxu1 }
 0x419   : > { %v2474_v20 = vadd.f32 %v7019_v17, %v9252_v49  ;;  %v2465_v35 = vpop.f32.mrb[51].mxu1  ;;  %v2575_v27 = vmax.f32 %v2471_v52, 0.0 }
 0x41a   : > { %v2466_v31 = vadd.f32 %v9252_v49, %v2465_v35  ;;  %v2573_v8 = vmax.f32 %v2463_v11, 0.0 }
 0x41b   : > { %v2576_v48 = vmax.f32 %v2474_v20, 0.0 }
 0x41c   : > { %v2574_v43 = vmax.f32 %v2466_v31, 0.0  ;;  %v7676_v31 = vld [vmem:[%s10453_s2 + $0x120] sm:$0xff]  }
 0x41d   : > { %v2614_v45 = vpack.c.bf16 %v2576_v48, %v2575_v27  ;;  %7200 = vmatprep.subr.bf16.mxu0 %v7676_v31  ;;  %v7677_v27 = vld [vmem:[%s10453_s2 + $0x128] sm:$0xff]   ;;  %v7678_v48 = vld [vmem:[%s10453_s2 + $0x130] sm:$0xff]  }
 0x41e   : > { %v2613_v33 = vpack.c.bf16 %v2574_v43, %v2573_v8  ;;  %7201 = vmatpush3.bf16.msra.mxu0 %v7676_v31 }
 0x41f   : > { %7202 = vmatprep.subr.bf16.mxu0 %v7677_v27 }
 0x420   : > { %7096 = vmatprep.mubr.bf16.mxu0 %v2613_v33 }
 0x421   : > { %7097 = vmatmul.mubr.bf16.gmra.mrb[112].mxu0 %v2614_v45 }
 0x422   : > { %v7074_v7 = vpop.f32.mrb[88].mxu0  ;;  %7203 = vmatpush3.bf16.msra.mxu0 %v7677_v27 }
 0x423   : > { %v2830_v22 = vadd.f32 %v7074_v7, %v9350_v50  ;;  %v2821_v47 = vpop.f32.mrb[89].mxu0  ;;  %7204 = vmatprep.subr.bf16.mxu0 %v7678_v48  ;;  %v7679_v7 = vld [vmem:[%s10453_s2 + $0x138] sm:$0xff]  }
 0x424   : > { %v2822_v44 = vadd.f32 %v9350_v50, %v2821_v47  ;;  %v7075_v58 = vpop.f32.mrb[90].mxu0 }
 0x425   : > { %v2833_v21 = vadd.f32 %v7075_v58, %v9350_v50  ;;  %v2824_v29 = vpop.f32.mrb[91].mxu0  ;;  %v3006_v23 = vmax.f32 %v2830_v22, 0.0 }
 0x426   : > { %v2825_v52 = vadd.f32 %v9350_v50, %v2824_v29  ;;  %v3004_v17 = vmax.f32 %v2822_v44, 0.0  ;;  %7205 = vmatpush3.bf16.msra.mxu0 %v7678_v48 }
 0x427   : > { %v3007_v11 = vmax.f32 %v2833_v21, 0.0  ;;  %7206 = vmatprep.subr.bf16.mxu0 %v7679_v7 }
 0x428   : > { %v3005_v10 = vmax.f32 %v2825_v52, 0.0 }
 0x429   : > { %v3057_v20 = vpack.c.bf16 %v3007_v11, %v3006_v23 }
 0x42a   : > { %v3056_v35 = vpack.c.bf16 %v3005_v10, %v3004_v17  ;;  %7207 = vmatpush3.bf16.msra.mxu0 %v7679_v7 }
 0x42c   : > { %7152 = vmatprep.mubr.bf16.mxu1 %v3056_v35 }
 0x42d   : > { %7153 = vmatmul.mubr.bf16.gmra.mrb[88].mxu1 %v3057_v20 }
 0x437   : > { %v7022_v8 = vpop.f32.mrb[52].mxu1 }
 0x438   : > { %v2487_v43 = vadd.f32 %v7022_v8, %v9252_v49  ;;  %v2478_v39 = vpop.f32.mrb[53].mxu1 }
 0x439   : > { %v2479_v45 = vadd.f32 %v9252_v49, %v2478_v39  ;;  %v7023_v33 = vpop.f32.mrb[54].mxu1 }
 0x43a   : > { %v2490_v22 = vadd.f32 %v7023_v33, %v9252_v49  ;;  %v2481_v47 = vpop.f32.mrb[55].mxu1  ;;  %v2579_v58 = vmax.f32 %v2487_v43, 0.0 }
 0x43b   : > { %v2482_v44 = vadd.f32 %v9252_v49, %v2481_v47  ;;  %v2577_v29 = vmax.f32 %v2479_v45, 0.0 }
 0x43c   : > { %v2580_v21 = vmax.f32 %v2490_v22, 0.0 }
 0x43d   : > { %v2578_v52 = vmax.f32 %v2482_v44, 0.0 }
 0x43e   : > { %v2616_v23 = vpack.c.bf16 %v2580_v21, %v2579_v58 }
 0x43f   : > { %v2615_v11 = vpack.c.bf16 %v2578_v52, %v2577_v29 }
 0x441   : > { %7100 = vmatprep.mubr.bf16.mxu0 %v2615_v11 }
 0x442   : > { %7101 = vmatmul.mubr.bf16.gmra.mrb[116].mxu0 %v2616_v23 }
 0x443   : > { %v7078_v17 = vpop.f32.mrb[92].mxu0 }
 0x444   : > { %v2846_v10 = vadd.f32 %v7078_v17, %v9350_v50  ;;  %v2837_v20 = vpop.f32.mrb[93].mxu0 }
 0x445   : > { %v2838_v35 = vadd.f32 %v9350_v50, %v2837_v20  ;;  %v7079_v31 = vpop.f32.mrb[94].mxu0 }
 0x446   : > { %v2849_v27 = vadd.f32 %v7079_v31, %v9350_v50  ;;  %v2840_v48 = vpop.f32.mrb[95].mxu0  ;;  %v3010_v43 = vmax.f32 %v2846_v10, 0.0 }
 0x447   : > { %v2841_v8 = vadd.f32 %v9350_v50, %v2840_v48  ;;  %v3008_v45 = vmax.f32 %v2838_v35, 0.0 }
 0x448   : > { %v3011_v39 = vmax.f32 %v2849_v27, 0.0 }
 0x449   : > { %v3009_v33 = vmax.f32 %v2841_v8, 0.0 }
 0x44a   : > { %v3059_v7 = vpack.c.bf16 %v3011_v39, %v3010_v43 }
 0x44b   : > { %v3058_v22 = vpack.c.bf16 %v3009_v33, %v3008_v45 }
 0x44d   : > { %7156 = vmatprep.mubr.bf16.mxu1 %v3058_v22 }
 0x44e   : > { %7157 = vmatmul.mubr.bf16.gmra.mrb[92].mxu1 %v3059_v7 }
 0x45c   : > { %v7026_v47 = vpop.f32.mrb[56].mxu1 }
 0x45d   : > { %v2503_v44 = vadd.f32 %v7026_v47, %v9252_v49  ;;  %v2494_v58 = vpop.f32.mrb[57].mxu1 }
 0x45e   : > { %v2495_v21 = vadd.f32 %v9252_v49, %v2494_v58  ;;  %v7027_v29 = vpop.f32.mrb[58].mxu1 }
 0x45f   : > { %v2506_v52 = vadd.f32 %v7027_v29, %v9252_v49  ;;  %v2497_v23 = vpop.f32.mrb[59].mxu1  ;;  %v2583_v17 = vmax.f32 %v2503_v44, 0.0 }
 0x460   : > { %v2498_v11 = vadd.f32 %v9252_v49, %v2497_v23  ;;  %v2581_v20 = vmax.f32 %v2495_v21, 0.0  ;;  %v7716_v23 = vld [vmem:[%s10454_s3 + $0x2] ss:$0 sm:$0xff] }
 0x461   : > { %v2584_v10 = vmax.f32 %v2506_v52, 0.0 }
 0x462   : > { %v2582_v35 = vmax.f32 %v2498_v11, 0.0 }
 0x463   : > { %v2618_v31 = vpack.c.bf16 %v2584_v10, %v2583_v17 }
 0x464   : > { %v2617_v27 = vpack.c.bf16 %v2582_v35, %v2581_v20 }
 0x466   : > { %7104 = vmatprep.mubr.bf16.mxu0 %v2617_v27 }
 0x467   : > { %7105 = vmatmul.mubr.bf16.gmra.mrb[120].mxu0 %v2618_v31 }
 0x468   : > { %v7082_v48 = vpop.f32.mrb[96].mxu0 }
 0x469   : > { %v2862_v8 = vadd.f32 %v7082_v48, %v9350_v50  ;;  %v2853_v43 = vpop.f32.mrb[97].mxu0 }
 0x46a   : > { %v2854_v39 = vadd.f32 %v9350_v50, %v2853_v43  ;;  %v7083_v45 = vpop.f32.mrb[98].mxu0 }
 0x46b   : > { %v2865_v33 = vadd.f32 %v7083_v45, %v9350_v50  ;;  %v2856_v7 = vpop.f32.mrb[99].mxu0  ;;  %v3014_v22 = vmax.f32 %v2862_v8, 0.0 }
 0x46c   : > { %v2857_v49 = vadd.f32 %v9350_v50, %v2856_v7  ;;  %v3012_v44 = vmax.f32 %v2854_v39, 0.0 }
 0x46d   : > { %v3015_v47 = vmax.f32 %v2865_v33, 0.0 }
 0x46e   : > { %v3013_v58 = vmax.f32 %v2857_v49, 0.0 }
 0x46f   : > { %v3061_v21 = vpack.c.bf16 %v3015_v47, %v3014_v22 }
 0x470   : > { %v3060_v29 = vpack.c.bf16 %v3013_v58, %v3012_v44 }
 0x472   : > { %7160 = vmatprep.mubr.bf16.mxu1 %v3060_v29 }
 0x473   : > { %7161 = vmatmul.mubr.bf16.gmra.mrb[96].mxu1 %v3061_v21 }
 0x47d   : > { %v7030_v52 = vpop.f32.mrb[60].mxu1 }
 0x47e   : > { %v2519_v11 = vadd.f32 %v7716_v23, %v7030_v52  ;;  %v2510_v17 = vpop.f32.mrb[61].mxu1 }
 0x47f   : > { %v2511_v10 = vadd.f32 %v7716_v23, %v2510_v17  ;;  %v7031_v20 = vpop.f32.mrb[62].mxu1 }
 0x480   : > { %v2522_v35 = vadd.f32 %v7716_v23, %v7031_v20  ;;  %v2513_v31 = vpop.f32.mrb[63].mxu1  ;;  %v2587_v48 = vmax.f32 %v2519_v11, 0.0 }
 0x481   : > { %v2514_v27 = vadd.f32 %v7716_v23, %v2513_v31  ;;  %v2585_v43 = vmax.f32 %v2511_v10, 0.0 }
 0x482   : > { %v2588_v8 = vmax.f32 %v2522_v35, 0.0 }
 0x483   : > { %v2586_v39 = vmax.f32 %v2514_v27, 0.0 }
 0x484   : > { %v2620_v45 = vpack.c.bf16 %v2588_v8, %v2587_v48 }
 0x485   : > { %v2619_v33 = vpack.c.bf16 %v2586_v39, %v2585_v43 }
 0x487   : > { %7108 = vmatprep.mubr.bf16.mxu0 %v2619_v33 }
 0x488   : > { %7109 = vmatmul.mubr.bf16.gmra.mrb[124].mxu0 %v2620_v45  ;;  %v9442_v45 = vld [vmem:[%s10454_s3 + $0x4] ss:$0 sm:$0xff] }
 0x489   : > { %v7086_v7 = vpop.f32.mrb[100].mxu0 }
 0x48a   : > { %v2878_v49 = vadd.f32 %v7086_v7, %v9350_v50  ;;  %v2869_v22 = vpop.f32.mrb[101].mxu0 }
 0x48b   : > { %v2870_v47 = vadd.f32 %v9350_v50, %v2869_v22  ;;  %v7087_v44 = vpop.f32.mrb[102].mxu0 }
 0x48c   : > { %v2881_v58 = vadd.f32 %v7087_v44, %v9350_v50  ;;  %v2872_v21 = vpop.f32.mrb[103].mxu0  ;;  %v3018_v52 = vmax.f32 %v2878_v49, 0.0 }
 0x48d   : > { %v2873_v29 = vadd.f32 %v9350_v50, %v2872_v21  ;;  %v3016_v11 = vmax.f32 %v2870_v47, 0.0 }
 0x48e   : > { %v3019_v23 = vmax.f32 %v2881_v58, 0.0 }
 0x48f   : > { %v3017_v17 = vmax.f32 %v2873_v29, 0.0 }
 0x490   : > { %v3063_v10 = vpack.c.bf16 %v3019_v23, %v3018_v52 }
 0x491   : > { %v3062_v20 = vpack.c.bf16 %v3017_v17, %v3016_v11 }
 0x493   : > { %7164 = vmatprep.mubr.bf16.mxu1 %v3062_v20 }
 0x494   : > { %7165 = vmatmul.mubr.bf16.gmra.mrb[100].mxu1 %v3063_v10 }
 0x4ae   : > { %v7090_v35 = vpop.f32.mrb[104].mxu0 }
 0x4af   : > { %v2894_v31 = vadd.f32 %v7090_v35, %v9350_v50  ;;  %v2885_v27 = vpop.f32.mrb[105].mxu0 }
 0x4b0   : > { %v2886_v48 = vadd.f32 %v9350_v50, %v2885_v27  ;;  %v7091_v8 = vpop.f32.mrb[106].mxu0 }
 0x4b1   : > { %v2897_v43 = vadd.f32 %v7091_v8, %v9350_v50  ;;  %v2888_v39 = vpop.f32.mrb[107].mxu0  ;;  %v3022_v7 = vmax.f32 %v2894_v31, 0.0 }
 0x4b2   : > { %v2889_v33 = vadd.f32 %v9350_v50, %v2888_v39  ;;  %v3020_v47 = vmax.f32 %v2886_v48, 0.0 }
 0x4b3   : > { %v3023_v49 = vmax.f32 %v2897_v43, 0.0  ;;  %v7130_v22 = vpop.f32.mrb[64].mxu1 }
 0x4b4   : > { %v3021_v44 = vmax.f32 %v2889_v33, 0.0  ;;  %v3189_v58 = vadd.f32 %v7130_v22, %v9442_v45  ;;  %v3180_v21 = vpop.f32.mrb[65].mxu1 }
 0x4b5   : > { %v3065_v29 = vpack.c.bf16 %v3023_v49, %v3022_v7  ;;  %v3181_v52 = vadd.f32 %v9442_v45, %v3180_v21  ;;  %v7131_v23 = vpop.f32.mrb[66].mxu1 }
 0x4b6   : > { %v3064_v11 = vpack.c.bf16 %v3021_v44, %v3020_v47  ;;  %v3192_v17 = vadd.f32 %v7131_v23, %v9442_v45  ;;  %v3183_v10 = vpop.f32.mrb[67].mxu1  ;;  %v3437_v35 = vmax.f32 %v3189_v58, 0.0 }
 0x4b7   : > { %v3184_v20 = vadd.f32 %v9442_v45, %v3183_v10  ;;  %v3435_v31 = vmax.f32 %v3181_v52, 0.0 }
 0x4b8   : > { %v3438_v27 = vmax.f32 %v3192_v17, 0.0  ;;  %7168 = vmatprep.mubr.bf16.mxu1 %v3064_v11 }
 0x4b9   : > { %v3436_v8 = vmax.f32 %v3184_v20, 0.0  ;;  %7169 = vmatmul.mubr.bf16.gmra.mrb[104].mxu1 %v3065_v29 }
 0x4ba   : > { %v3500_v48 = vpack.c.bf16 %v3438_v27, %v3437_v35 }
 0x4bb   : > { %v3499_v43 = vpack.c.bf16 %v3436_v8, %v3435_v31  ;;  %v7134_v39 = vpop.f32.mrb[68].mxu1 }
 0x4bc   : > { %v3205_v33 = vadd.f32 %v7134_v39, %v9442_v45  ;;  %v3196_v7 = vpop.f32.mrb[69].mxu1 }
 0x4bd   : > { %v3197_v49 = vadd.f32 %v9442_v45, %v3196_v7  ;;  %v7135_v22 = vpop.f32.mrb[70].mxu1  ;;  %7208 = vmatprep.mubr.bf16.mxu0 %v3499_v43 }
 0x4be   : > { %v3208_v47 = vadd.f32 %v7135_v22, %v9442_v45  ;;  %v3199_v44 = vpop.f32.mrb[71].mxu1  ;;  %7209 = vmatmul.mubr.bf16.vlgmr.msra.gmra.mrb[128].mxu0 %v3500_v48  ;;  %v3441_v21 = vmax.f32 %v3205_v33, 0.0 }
 0x4bf   : > { %v3200_v58 = vadd.f32 %v9442_v45, %v3199_v44  ;;  %v3439_v23 = vmax.f32 %v3197_v49, 0.0 }
 0x4c0   : > { %v3442_v52 = vmax.f32 %v3208_v47, 0.0 }
 0x4c1   : > { %v3440_v29 = vmax.f32 %v3200_v58, 0.0 }
 0x4c2   : > { %v3502_v11 = vpack.c.bf16 %v3442_v52, %v3441_v21 }
 0x4c3   : > { %v3501_v17 = vpack.c.bf16 %v3440_v29, %v3439_v23  ;;  %v7138_v10 = vpop.f32.mrb[72].mxu1 }
 0x4c4   : > { %v3221_v20 = vadd.f32 %v7138_v10, %v9442_v45  ;;  %v3212_v35 = vpop.f32.mrb[73].mxu1 }
 0x4c5   : > { %v3213_v27 = vadd.f32 %v9442_v45, %v3212_v35  ;;  %v7139_v31 = vpop.f32.mrb[74].mxu1  ;;  %7212 = vmatprep.mubr.bf16.mxu0 %v3501_v17 }
 0x4c6   : > { %v3224_v8 = vadd.f32 %v7139_v31, %v9442_v45  ;;  %v3215_v43 = vpop.f32.mrb[75].mxu1  ;;  %7213 = vmatmul.mubr.bf16.gmra.mrb[132].mxu0 %v3502_v11  ;;  %v3445_v39 = vmax.f32 %v3221_v20, 0.0 }
 0x4c7   : > { %v3216_v48 = vadd.f32 %v9442_v45, %v3215_v43  ;;  %v3443_v7 = vmax.f32 %v3213_v27, 0.0 }
 0x4c8   : > { %v3446_v33 = vmax.f32 %v3224_v8, 0.0 }
 0x4c9   : > { %v3444_v49 = vmax.f32 %v3216_v48, 0.0 }
 0x4ca   : > { %v3504_v22 = vpack.c.bf16 %v3446_v33, %v3445_v39 }
 0x4cb   : > { %v3503_v47 = vpack.c.bf16 %v3444_v49, %v3443_v7  ;;  %v7142_v44 = vpop.f32.mrb[76].mxu1 }
 0x4cc   : > { %v3237_v58 = vadd.f32 %v7142_v44, %v9442_v45  ;;  %v3228_v21 = vpop.f32.mrb[77].mxu1 }
 0x4cd   : > { %v3229_v52 = vadd.f32 %v9442_v45, %v3228_v21  ;;  %v7143_v23 = vpop.f32.mrb[78].mxu1  ;;  %7216 = vmatprep.mubr.bf16.mxu0 %v3503_v47 }
 0x4ce   : > { %v3240_v29 = vadd.f32 %v7143_v23, %v9442_v45  ;;  %v3231_v17 = vpop.f32.mrb[79].mxu1  ;;  %7217 = vmatmul.mubr.bf16.gmra.mrb[136].mxu0 %v3504_v22  ;;  %v3449_v20 = vmax.f32 %v3237_v58, 0.0 }
 0x4cf   : > { %v3232_v11 = vadd.f32 %v9442_v45, %v3231_v17  ;;  %v7094_v10 = vpop.f32.mrb[108].mxu0  ;;  %v3447_v8 = vmax.f32 %v3229_v52, 0.0 }
 0x4d0   : > { %v3450_v35 = vmax.f32 %v3240_v29, 0.0  ;;  %v2910_v27 = vadd.f32 %v7094_v10, %v9350_v50  ;;  %v2901_v31 = vpop.f32.mrb[109].mxu0 }
 0x4d1   : > { %v3448_v43 = vmax.f32 %v3232_v11, 0.0  ;;  %v2902_v48 = vadd.f32 %v9350_v50, %v2901_v31  ;;  %v7095_v39 = vpop.f32.mrb[110].mxu0 }
 0x4d2   : > { %v3506_v33 = vpack.c.bf16 %v3450_v35, %v3449_v20  ;;  %v2913_v7 = vadd.f32 %v7095_v39, %v9350_v50  ;;  %v2904_v49 = vpop.f32.mrb[111].mxu0  ;;  %v3026_v21 = vmax.f32 %v2910_v27, 0.0 }
 0x4d3   : > { %v3505_v47 = vpack.c.bf16 %v3448_v43, %v3447_v8  ;;  %v2905_v22 = vadd.f32 %v9350_v50, %v2904_v49  ;;  %v7146_v44 = vpop.f32.mrb[80].mxu1  ;;  %v3024_v17 = vmax.f32 %v2902_v48, 0.0 }
 0x4d4   : > { %v3027_v23 = vmax.f32 %v2913_v7, 0.0  ;;  %v3253_v58 = vadd.f32 %v7146_v44, %v9442_v45  ;;  %v3244_v29 = vpop.f32.mrb[81].mxu1 }
 0x4d5   : > { %v3025_v10 = vmax.f32 %v2905_v22, 0.0  ;;  %v3245_v52 = vadd.f32 %v9442_v45, %v3244_v29  ;;  %v7147_v11 = vpop.f32.mrb[82].mxu1  ;;  %7220 = vmatprep.mubr.bf16.mxu0 %v3505_v47 }
 0x4d6   : > { %v3067_v31 = vpack.c.bf16 %v3027_v23, %v3026_v21  ;;  %v3256_v20 = vadd.f32 %v7147_v11, %v9442_v45  ;;  %v3247_v35 = vpop.f32.mrb[83].mxu1  ;;  %7221 = vmatmul.mubr.bf16.gmra.mrb[140].mxu0 %v3506_v33  ;;  %v3453_v39 = vmax.f32 %v3253_v58, 0.0 }
 0x4d7   : > { %v3066_v8 = vpack.c.bf16 %v3025_v10, %v3024_v17  ;;  %v3248_v43 = vadd.f32 %v9442_v45, %v3247_v35  ;;  %v3451_v7 = vmax.f32 %v3245_v52, 0.0 }
 0x4d8   : > { %v3454_v27 = vmax.f32 %v3256_v20, 0.0 }
 0x4d9   : > { %v3452_v49 = vmax.f32 %v3248_v43, 0.0  ;;  %7172 = vmatprep.mubr.bf16.mxu1 %v3066_v8  ;;  %v7680_v8 = vld [vmem:[%s10453_s2 + $0x140] sm:$0xff]   ;;  %v7681_v43 = vld [vmem:[%s10453_s2 + $0x148] sm:$0xff]  }
 0x4da   : > { %v3508_v44 = vpack.c.bf16 %v3454_v27, %v3453_v39  ;;  %7173 = vmatmul.mubr.bf16.gmra.mrb[108].mxu1 %v3067_v31  ;;  %7272 = vmatprep.subr.bf16.mxu1 %v7680_v8 }
 0x4db   : > { %v3507_v48 = vpack.c.bf16 %v3452_v49, %v3451_v7  ;;  %v7150_v22 = vpop.f32.mrb[84].mxu1  ;;  %7273 = vmatpush3.bf16.msra.mxu1 %v7680_v8 }
 0x4dc   : > { %v3269_v29 = vadd.f32 %v7150_v22, %v9442_v45  ;;  %v3260_v47 = vpop.f32.mrb[85].mxu1  ;;  %7274 = vmatprep.subr.bf16.mxu1 %v7681_v43 }
 0x4dd   : > { %v3261_v21 = vadd.f32 %v9442_v45, %v3260_v47  ;;  %v7151_v23 = vpop.f32.mrb[86].mxu1  ;;  %7224 = vmatprep.mubr.bf16.mxu0 %v3507_v48  ;;  %v7682_v48 = vld [vmem:[%s10453_s2 + $0x150] sm:$0xff]  }
 0x4de   : > { %v3272_v33 = vadd.f32 %v7151_v23, %v9442_v45  ;;  %v3263_v17 = vpop.f32.mrb[87].mxu1  ;;  %7225 = vmatmul.mubr.bf16.gmra.mrb[144].mxu0 %v3508_v44  ;;  %v3457_v10 = vmax.f32 %v3269_v29, 0.0 }
 0x4df   : > { %v3264_v58 = vadd.f32 %v9442_v45, %v3263_v17  ;;  %v3455_v11 = vmax.f32 %v3261_v21, 0.0  ;;  %7275 = vmatpush3.bf16.msra.mxu1 %v7681_v43 }
 0x4e0   : > { %v3458_v52 = vmax.f32 %v3272_v33, 0.0  ;;  %7276 = vmatprep.subr.bf16.mxu1 %v7682_v48 }
 0x4e1   : > { %v3456_v20 = vmax.f32 %v3264_v58, 0.0 }
 0x4e2   : > { %v3510_v31 = vpack.c.bf16 %v3458_v52, %v3457_v10 }
 0x4e3   : > { %v3509_v35 = vpack.c.bf16 %v3456_v20, %v3455_v11  ;;  %7277 = vmatpush3.bf16.msra.mxu1 %v7682_v48 }
 0x4e5   : > { %7228 = vmatprep.mubr.bf16.mxu0 %v3509_v35 }
 0x4e6   : > { %7229 = vmatmul.mubr.bf16.gmra.mrb[148].mxu0 %v3510_v31 }
 0x4f4   : > { %v7098_v39 = vpop.f32.mrb[112].mxu0 }
 0x4f5   : > { %v2926_v27 = vadd.f32 %v7098_v39, %v9350_v50  ;;  %v2917_v7 = vpop.f32.mrb[113].mxu0 }
 0x4f6   : > { %v2918_v49 = vadd.f32 %v9350_v50, %v2917_v7  ;;  %v7099_v44 = vpop.f32.mrb[114].mxu0 }
 0x4f7   : > { %v2929_v22 = vadd.f32 %v7099_v44, %v9350_v50  ;;  %v2920_v29 = vpop.f32.mrb[115].mxu0  ;;  %v3030_v21 = vmax.f32 %v2926_v27, 0.0 }
 0x4f8   : > { %v2921_v47 = vadd.f32 %v9350_v50, %v2920_v29  ;;  %v3028_v33 = vmax.f32 %v2918_v49, 0.0  ;;  %v7683_v29 = vld [vmem:[%s10453_s2 + $0x158] sm:$0xff]  }
 0x4f9   : > { %v3031_v23 = vmax.f32 %v2929_v22, 0.0  ;;  %7278 = vmatprep.subr.bf16.mxu1 %v7683_v29 }
 0x4fa   : > { %v3029_v17 = vmax.f32 %v2921_v47, 0.0  ;;  %7279 = vmatpush3.bf16.msra.mxu1 %v7683_v29  ;;  %v7684_v47 = vld [vmem:[%s10453_s2 + $0x160] sm:$0xff]  }
 0x4fb   : > { %v3069_v58 = vpack.c.bf16 %v3031_v23, %v3030_v21  ;;  %7280 = vmatprep.subr.bf16.mxu1 %v7684_v47  ;;  %v7685_v23 = vld [vmem:[%s10453_s2 + $0x168] sm:$0xff]  }
 0x4fc   : > { %v3068_v10 = vpack.c.bf16 %v3029_v17, %v3028_v33 }
 0x4fe   : > { %7176 = vmatprep.mubr.bf16.mxu1 %v3068_v10  ;;  %7281 = vmatpush3.bf16.msra.mxu1 %v7684_v47 }
 0x4ff   : > { %7177 = vmatmul.mubr.bf16.gmra.mrb[112].mxu1 %v3069_v58  ;;  %7282 = vmatprep.subr.bf16.mxu1 %v7685_v23 }
 0x500   : > { %v7154_v52 = vpop.f32.mrb[88].mxu1 }
 0x501   : > { %v3285_v11 = vadd.f32 %v7154_v52, %v9442_v45  ;;  %v3276_v20 = vpop.f32.mrb[89].mxu1 }
 0x502   : > { %v3277_v31 = vadd.f32 %v9442_v45, %v3276_v20  ;;  %v7155_v35 = vpop.f32.mrb[90].mxu1  ;;  %7283 = vmatpush3.bf16.msra.mxu1 %v7685_v23 }
 0x503   : > { %v3288_v8 = vadd.f32 %v7155_v35, %v9442_v45  ;;  %v3279_v39 = vpop.f32.mrb[91].mxu1  ;;  %v3461_v27 = vmax.f32 %v3285_v11, 0.0 }
 0x504   : > { %v3280_v43 = vadd.f32 %v9442_v45, %v3279_v39  ;;  %v3459_v49 = vmax.f32 %v3277_v31, 0.0  ;;  %v7686_v31 = vld [vmem:[%s10453_s2 + $0x170] sm:$0xff]  }
 0x505   : > { %v3462_v7 = vmax.f32 %v3288_v8, 0.0  ;;  %7284 = vmatprep.subr.bf16.mxu1 %v7686_v31 }
 0x506   : > { %v3460_v44 = vmax.f32 %v3280_v43, 0.0  ;;  %7285 = vmatpush3.bf16.msra.mxu1 %v7686_v31 }
 0x507   : > { %v3512_v22 = vpack.c.bf16 %v3462_v7, %v3461_v27 }
 0x508   : > { %v3511_v48 = vpack.c.bf16 %v3460_v44, %v3459_v49  ;;  %v7687_v49 = vld [vmem:[%s10453_s2 + $0x178] sm:$0xff]  }
 0x509   : > { %7286 = vmatprep.subr.bf16.mxu1 %v7687_v49 }
 0x50a   : > { %7232 = vmatprep.mubr.bf16.mxu0 %v3511_v48  ;;  %7287 = vmatpush3.bf16.msra.mxu1 %v7687_v49 }
 0x50b   : > { %7233 = vmatmul.mubr.bf16.gmra.mrb[152].mxu0 %v3512_v22 }
 0x515   : > { %v7102_v21 = vpop.f32.mrb[116].mxu0 }
 0x516   : > { %v2942_v33 = vadd.f32 %v7102_v21, %v9350_v50  ;;  %v2933_v17 = vpop.f32.mrb[117].mxu0 }
 0x517   : > { %v2934_v58 = vadd.f32 %v9350_v50, %v2933_v17  ;;  %v7103_v10 = vpop.f32.mrb[118].mxu0 }
 0x518   : > { %v2945_v52 = vadd.f32 %v7103_v10, %v9350_v50  ;;  %v2936_v11 = vpop.f32.mrb[119].mxu0  ;;  %v3034_v35 = vmax.f32 %v2942_v33, 0.0 }
 0x519   : > { %v2937_v20 = vadd.f32 %v9350_v50, %v2936_v11  ;;  %v3032_v39 = vmax.f32 %v2934_v58, 0.0 }
 0x51a   : > { %v3035_v8 = vmax.f32 %v2945_v52, 0.0 }
 0x51b   : > { %v3033_v43 = vmax.f32 %v2937_v20, 0.0 }
 0x51c   : > { %v3071_v27 = vpack.c.bf16 %v3035_v8, %v3034_v35 }
 0x51d   : > { %v3070_v7 = vpack.c.bf16 %v3033_v43, %v3032_v39 }
 0x51f   : > { %7180 = vmatprep.mubr.bf16.mxu1 %v3070_v7 }
 0x520   : > { %7181 = vmatmul.mubr.bf16.gmra.mrb[116].mxu1 %v3071_v27 }
 0x521   : > { %v7158_v44 = vpop.f32.mrb[92].mxu1 }
 0x522   : > { %v3301_v22 = vadd.f32 %v7158_v44, %v9442_v45  ;;  %v3292_v48 = vpop.f32.mrb[93].mxu1 }
 0x523   : > { %v3293_v29 = vadd.f32 %v9442_v45, %v3292_v48  ;;  %v7159_v47 = vpop.f32.mrb[94].mxu1 }
 0x524   : > { %v3304_v21 = vadd.f32 %v7159_v47, %v9442_v45  ;;  %v3295_v23 = vpop.f32.mrb[95].mxu1  ;;  %v3465_v17 = vmax.f32 %v3301_v22, 0.0 }
 0x525   : > { %v3296_v33 = vadd.f32 %v9442_v45, %v3295_v23  ;;  %v3463_v10 = vmax.f32 %v3293_v29, 0.0 }
 0x526   : > { %v3466_v58 = vmax.f32 %v3304_v21, 0.0 }
 0x527   : > { %v3464_v52 = vmax.f32 %v3296_v33, 0.0 }
 0x528   : > { %v3514_v11 = vpack.c.bf16 %v3466_v58, %v3465_v17 }
 0x529   : > { %v3513_v20 = vpack.c.bf16 %v3464_v52, %v3463_v10 }
 0x52b   : > { %7236 = vmatprep.mubr.bf16.mxu0 %v3513_v20 }
 0x52c   : > { %7237 = vmatmul.mubr.bf16.gmra.mrb[156].mxu0 %v3514_v11 }
 0x53a   : > { %v7106_v31 = vpop.f32.mrb[120].mxu0 }
 0x53b   : > { %v2958_v35 = vadd.f32 %v7106_v31, %v9350_v50  ;;  %v2949_v8 = vpop.f32.mrb[121].mxu0 }
 0x53c   : > { %v2950_v39 = vadd.f32 %v9350_v50, %v2949_v8  ;;  %v7107_v43 = vpop.f32.mrb[122].mxu0 }
 0x53d   : > { %v2961_v27 = vadd.f32 %v7107_v43, %v9350_v50  ;;  %v2952_v7 = vpop.f32.mrb[123].mxu0  ;;  %v3038_v44 = vmax.f32 %v2958_v35, 0.0 }
 0x53e   : > { %v2953_v49 = vadd.f32 %v9350_v50, %v2952_v7  ;;  %v3036_v48 = vmax.f32 %v2950_v39, 0.0  ;;  %v7717_v7 = vld [vmem:[%s10454_s3 + $0x3] ss:$0 sm:$0xff] }
 0x53f   : > { %v3039_v22 = vmax.f32 %v2961_v27, 0.0 }
 0x540   : > { %v3037_v29 = vmax.f32 %v2953_v49, 0.0 }
 0x541   : > { %v3073_v47 = vpack.c.bf16 %v3039_v22, %v3038_v44 }
 0x542   : > { %v3072_v21 = vpack.c.bf16 %v3037_v29, %v3036_v48 }
 0x544   : > { %7184 = vmatprep.mubr.bf16.mxu1 %v3072_v21 }
 0x545   : > { %7185 = vmatmul.mubr.bf16.gmra.mrb[120].mxu1 %v3073_v47 }
 0x546   : > { %v7162_v23 = vpop.f32.mrb[96].mxu1 }
 0x547   : > { %v3317_v33 = vadd.f32 %v7162_v23, %v9442_v45  ;;  %v3308_v17 = vpop.f32.mrb[97].mxu1 }
 0x548   : > { %v3309_v58 = vadd.f32 %v9442_v45, %v3308_v17  ;;  %v7163_v10 = vpop.f32.mrb[98].mxu1 }
 0x549   : > { %v3320_v52 = vadd.f32 %v7163_v10, %v9442_v45  ;;  %v3311_v11 = vpop.f32.mrb[99].mxu1  ;;  %v3469_v20 = vmax.f32 %v3317_v33, 0.0 }
 0x54a   : > { %v3312_v50 = vadd.f32 %v9442_v45, %v3311_v11  ;;  %v3467_v35 = vmax.f32 %v3309_v58, 0.0 }
 0x54b   : > { %v3470_v31 = vmax.f32 %v3320_v52, 0.0 }
 0x54c   : > { %v3468_v8 = vmax.f32 %v3312_v50, 0.0 }
 0x54d   : > { %v3516_v39 = vpack.c.bf16 %v3470_v31, %v3469_v20 }
 0x54e   : > { %v3515_v43 = vpack.c.bf16 %v3468_v8, %v3467_v35 }
 0x550   : > { %7240 = vmatprep.mubr.bf16.mxu0 %v3515_v43 }
 0x551   : > { %7241 = vmatmul.mubr.bf16.gmra.mrb[160].mxu0 %v3516_v39 }
 0x55b   : > { %v7110_v27 = vpop.f32.mrb[124].mxu0 }
 0x55c   : > { %v2974_v49 = vadd.f32 %v7717_v7, %v7110_v27  ;;  %v2965_v44 = vpop.f32.mrb[125].mxu0 }
 0x55d   : > { %v2966_v22 = vadd.f32 %v7717_v7, %v2965_v44  ;;  %v7111_v48 = vpop.f32.mrb[126].mxu0 }
 0x55e   : > { %v2977_v29 = vadd.f32 %v7717_v7, %v7111_v48  ;;  %v2968_v47 = vpop.f32.mrb[127].mxu0  ;;  %v3042_v23 = vmax.f32 %v2974_v49, 0.0 }
 0x55f   : > { %v2969_v21 = vadd.f32 %v7717_v7, %v2968_v47  ;;  %v3040_v17 = vmax.f32 %v2966_v22, 0.0  ;;  %v10883_v47 = vld [vmem:[#allocation60_spill] sm:$0xff] }
 0x560   : > { %v3043_v33 = vmax.f32 %v2977_v29, 0.0  ;;  %v6158_v29 = vld [vmem:[%s10452_s1 + $0x4] sm:$0x7] }
 0x561   : > { %v3041_v58 = vmax.f32 %v2969_v21, 0.0  ;;  %v10884_v21 = vsub.s32 1, %v10883_v47 }
 0x562   : > { %v3075_v10 = vpack.c.bf16 %v3043_v33, %v3042_v23  ;;  %v10885_v33 = vsub.s32 0, %v10883_v47 }
 0x563   : > { %v3074_v52 = vpack.c.bf16 %v3041_v58, %v3040_v17  ;;  %v9533_v23 = vrot.slane %v6158_v29, %v10884_v21  ;;  %v10886_v58 = vsub.s32 2, %v10883_v47  ;;  %v10894_v47 = vld [vmem:[#allocation17_spill] sm:$0xff] }
 0x564   : > { %v9537_v17 = vrot.slane %v6158_v29, %v10885_v33 }
 0x565   : > { %7188 = vmatprep.mubr.bf16.mxu1 %v3074_v52  ;;  %v10887_v52 = vld [vmem:[#allocation10_spill] sm:$0xff]  ;;  %v9573_v33 = vmul.f32 %v9533_v23, %v8083_v59  ;;  %v9587_v59 = vmul.f32 %v9533_v23, %v10748_v5 }
 0x566   : > { %7189 = vmatmul.mubr.bf16.gmra.mrb[124].mxu1 %v3075_v10  ;;  %v9541_v10 = vrot.slane %v6158_v29, %v10886_v58  ;;  %v9567_v29 = vmul.f32 %v9533_v23, %v8073_v55 }
 0x567   : > { %v7166_v11 = vpop.f32.mrb[100].mxu1 }
 0x568   : > { %v3333_v50 = vadd.f32 %v7166_v11, %v9442_v45  ;;  %v3324_v20 = vpop.f32.mrb[101].mxu1  ;;  %v3959_v11 = vmul.f32 %v9533_v23, %v10887_v52  ;;  %v4091_v21 = vmul.f32 %v9541_v10, %v10894_v47 }
 0x569   : > { %v3325_v31 = vadd.f32 %v9442_v45, %v3324_v20  ;;  %v7167_v35 = vpop.f32.mrb[102].mxu1  ;;  %v10888_v20 = vld [vmem:[#allocation11_spill] sm:$0xff] }
 0x56a   : > { %v3336_v8 = vadd.f32 %v7167_v35, %v9442_v45  ;;  %v3327_v39 = vpop.f32.mrb[103].mxu1  ;;  %v3473_v27 = vmax.f32 %v3333_v50, 0.0  ;;  %v3961_v50 = vmul.f32 %v9533_v23, %v8037_v41  ;;  %v10889_v35 = vld [vmem:[#allocation12_spill] sm:$0xff]  ;;  %v10893_v41 = vld [vmem:[#allocation14_spill] sm:$0xff] }
 0x56b   : > { %v3328_v43 = vadd.f32 %v9442_v45, %v3327_v39  ;;  %v3471_v49 = vmax.f32 %v3325_v31, 0.0  ;;  %v3960_v31 = vmul.f32 %v9533_v23, %v10888_v20  ;;  %v10890_v39 = vld [vmem:[#allocation13_spill] sm:$0xff]  ;;  %v10895_v20 = vld [vmem:[#allocation18_spill] sm:$0xff] }
 0x56c   : > { %v3474_v7 = vmax.f32 %v3336_v8, 0.0  ;;  %v9551_v8 = vmul.f32 %v9533_v23, %v10889_v35  ;;  %v4093_v35 = vmul.f32 %v9541_v10, %v10895_v20 }
 0x56d   : > { %v3472_v44 = vmax.f32 %v3328_v43, 0.0  ;;  %v9555_v43 = vmul.f32 %v9533_v23, %v10890_v39  ;;  %v9580_v39 = vmul.f32 %v9533_v23, %v8093_v62  ;;  %v9596_v62 = vmul.f32 %v9537_v17, %v10897_v2  ;;  %v10901_v2 = vld [vmem:[#allocation27_spill] sm:$0xff] }
 0x56e   : > { %v3518_v22 = vpack.c.bf16 %v3474_v7, %v3473_v27  ;;  %v10891_v27 = vld [vmem:[#allocation15_spill] sm:$0xff]  ;;  %v3561_v30 = vmul.f32 %v9537_v17, %v10901_v2  ;;  %v4097_v2 = vmul.f32 %v9541_v10, %v10905_v57 }
 0x56f   : > { %v3517_v48 = vpack.c.bf16 %v3472_v44, %v3471_v49  ;;  %v9559_v7 = vmul.f32 %v9533_v23, %v10891_v27  ;;  %v10892_v49 = vld [vmem:[#allocation16_spill] sm:$0xff]  ;;  %v10896_v27 = vld [vmem:[#allocation19_spill] sm:$0xff] }
 0x570   : > { %v3962_v44 = vmul.f32 %v9533_v23, %v10892_v49  ;;  %v4094_v55 = vmul.f32 %v9541_v10, %v10896_v27  ;;  %v9600_v27 = vmul.f32 %v9533_v23, %v8120_v1  ;;  %v3966_v1 = vmul.f32 %v9533_v23, %v10902_v40 }
 0x571   : > { %7244 = vmatprep.mubr.bf16.mxu0 %v3517_v48  ;;  %v3557_v48 = vmul.f32 %v9537_v17, %v10893_v41 }
 0x572   : > { %7245 = vmatmul.mubr.bf16.gmra.mrb[164].mxu0 %v3518_v22 }
 0x58c   : > { %v7170_v22 = vpop.f32.mrb[104].mxu1 }
 0x58d   : > { %v3349_v58 = vadd.f32 %v7170_v22, %v9442_v45  ;;  %v3340_v52 = vpop.f32.mrb[105].mxu1  ;;  %v9591_v22 = vmul.f32 %v9533_v23, %v10751_v51  ;;  %v3560_v51 = vmul.f32 %v9537_v17, %v10899_v46  ;;  %v10904_v46 = vld [vmem:[#allocation69_spill] sm:$0xff] }
 0x58e   : > { %v3341_v49 = vadd.f32 %v9442_v45, %v3340_v52  ;;  %v7171_v41 = vpop.f32.mrb[106].mxu1  ;;  %v10898_v52 = vld [vmem:[#allocation71_spill] sm:$0xff] }
 0x58f   : > { %v3352_v47 = vadd.f32 %v7171_v41, %v9442_v45  ;;  %v3343_v20 = vpop.f32.mrb[107].mxu1  ;;  %v3556_v4 = vmul.f32 %v9537_v17, %v10898_v52  ;;  %v3554_v41 = vmul.f32 %v9537_v17, %v10900_v6  ;;  %v3477_v34 = vmax.f32 %v3349_v58, 0.0 }
 0x590   : > { %v3344_v5 = vadd.f32 %v9442_v45, %v3343_v20  ;;  %v3475_v18 = vmax.f32 %v3341_v49, 0.0  ;;  %v10903_v20 = vld [vmem:[#allocation31_spill] sm:$0xff]  ;;  %v3555_v6 = vmul.f32 %v9537_v17, %v10904_v46  ;;  %v10910_v46 = vld [vmem:[#allocation38_spill] sm:$0xff] }
 0x591   : > { %v3478_v0 = vmax.f32 %v3352_v47, 0.0  ;;  %v7210_v3 = vpop.f32.mrb[128].mxu0  ;;  %v9615_v53 = vmul.f32 %v9541_v10, %v10903_v20  ;;  %v9628_v20 = vld [vmem:[%s10454_s3 + $0x5] ss:$0 sm:$0xff] }
 0x592   : > { %v3476_v61 = vmax.f32 %v3344_v5, 0.0  ;;  %v3709_v52 = vadd.f32 %v7210_v3, %v3556_v4  ;;  %v3700_v16 = vpop.f32.mrb[129].mxu0  ;;  %v10906_v5 = vld [vmem:[#allocation34_spill] sm:$0xff]  ;;  %v4095_v4 = vmul.f32 %v9541_v10, %v8163_v12  ;;  %v9640_v12 = vmul.f32 %v9541_v10, %v8176_v56 }
 0x593   : > { %v3520_v58 = vpack.c.bf16 %v3478_v0, %v3477_v34  ;;  %v3701_v47 = vadd.f32 %v3700_v16, %v3554_v41  ;;  %v7211_v38 = vpop.f32.mrb[130].mxu0  ;;  %v4092_v3 = vmul.f32 %v9541_v10, %v10906_v5  ;;  %v10907_v16 = vld [vmem:[#allocation36_spill] sm:$0xff] }
 0x594   : > { %v3519_v32 = vpack.c.bf16 %v3476_v61, %v3475_v18  ;;  %v4025_v28 = vadd.f32 %v3961_v50, %v3709_v52  ;;  %v3712_v40 = vadd.f32 %v7211_v38, %v3557_v48  ;;  %v3703_v49 = vpop.f32.mrb[131].mxu0  ;;  %v4098_v57 = vmul.f32 %v9541_v10, %v10907_v16  ;;  %v10908_v38 = vld [vmem:[#allocation35_spill] sm:$0xff]  ;;  %v10909_v48 = vld [vmem:[#allocation37_spill] sm:$0xff] }
 0x595   : > { %v4023_v34 = vadd.f32 %v3959_v11, %v3701_v47  ;;  %v3704_v0 = vadd.f32 %v3703_v49, %v3555_v6  ;;  %v3562_v50 = vmul.f32 %v9537_v17, %v10908_v38  ;;  %v9636_v41 = vmul.f32 %v9533_v23, %v10909_v48 }
 0x596   : > { %v4157_v18 = vadd.f32 %v4093_v35, %v4025_v28  ;;  %v4026_v61 = vadd.f32 %v3962_v44, %v3712_v40  ;;  %7248 = vmatprep.mubr.bf16.mxu0 %v3519_v32  ;;  %v9644_v6 = vmul.f32 %v9533_v23, %v10910_v46  ;;  %v9648_v28 = vmul.f32 %v9541_v10, %v8183_v60  ;;  %v10911_v35 = vld [vmem:[#allocation73_spill] sm:$0xff] }
 0x597   : > { %v4155_v52 = vadd.f32 %v4091_v21, %v4023_v34  ;;  %v4024_v11 = vadd.f32 %v3960_v31, %v3704_v0  ;;  %7249 = vmatmul.mubr.bf16.gmra.mrb[168].mxu0 %v3520_v58  ;;  %v3558_v47 = vmul.f32 %v9537_v17, %v10911_v35  ;;  %v3565_v31 = vmul.f32 %v9537_v17, %v8185_v13  ;;  %v10912_v34 = vld [vmem:[#allocation41_spill] sm:$0xff] }
 0x598   : > { %v4226_v32 = vadd.f32 %v9628_v20, %v4157_v18  ;;  %v4158_v44 = vadd.f32 %v4094_v55, %v4026_v61  ;;  %v9658_v58 = vmul.f32 %v9541_v10, %v8188_v63  ;;  %v3970_v60 = vmul.f32 %v9533_v23, %v8192_v14 }
 0x599   : > { %v4156_v40 = vadd.f32 %v4092_v3, %v4024_v11  ;;  %v7214_v56 = vpop.f32.mrb[132].mxu0  ;;  %v4224_v21 = vadd.f32 %v9628_v20, %v4155_v52  ;;  %v4099_v3 = vmul.f32 %v9541_v10, %v10912_v34  ;;  %v4101_v0 = vmul.f32 %v9541_v10, %v8208_v25 }
 0x59a   : > { %v4227_v49 = vadd.f32 %v9628_v20, %v4158_v44  ;;  %v3725_v55 = vadd.f32 %v7214_v56, %v3560_v51  ;;  %v3716_v5 = vpop.f32.mrb[133].mxu0  ;;  %v4290_v61 = vmax.f32 %v4226_v32, 0.0  ;;  %v4102_v44 = vmul.f32 %v9541_v10, %v8214_v24 }
 0x59b   : > { %v3717_v16 = vadd.f32 %v3716_v5, %v3558_v47  ;;  %v7215_v18 = vpop.f32.mrb[134].mxu0  ;;  %v4225_v13 = vadd.f32 %v9628_v20, %v4156_v40  ;;  %v4288_v11 = vmax.f32 %v4224_v21, 0.0 }
 0x59c   : > { %v4291_v63 = vmax.f32 %v4227_v49, 0.0  ;;  %v4029_v38 = vadd.f32 %v9555_v43, %v3725_v55  ;;  %v3728_v48 = vadd.f32 %v7215_v18, %v3561_v30  ;;  %v3719_v14 = vpop.f32.mrb[135].mxu0  ;;  %v9676_v30 = vmul.f32 %v9537_v17, %v8225_v36  ;;  %v10913_v49 = vld [vmem:[#allocation75_spill] sm:$0xff] }
 0x59d   : > { %v4027_v52 = vadd.f32 %v9600_v27, %v3717_v16  ;;  %v3720_v51 = vadd.f32 %v3719_v14, %v9596_v62  ;;  %v4289_v46 = vmax.f32 %v4225_v13, 0.0  ;;  %v9680_v43 = vmul.f32 %v9533_v23, %v8231_v26 }
 0x59e   : > { %v4353_v25 = vpack.c.bf16 %v4291_v63, %v4290_v61  ;;  %v4161_v35 = vadd.f32 %v4097_v2, %v4029_v38  ;;  %v4030_v47 = vadd.f32 %v3966_v1, %v3728_v48  ;;  %v3564_v62 = vmul.f32 %v9537_v17, %v8463_v19 }
 0x59f   : > { %v4159_v56 = vadd.f32 %v4095_v4, %v4027_v52  ;;  %v4028_v32 = vadd.f32 %v9551_v8, %v3720_v51  ;;  %v4352_v40 = vpack.c.bf16 %v4289_v46, %v4288_v11  ;;  %v3568_v8 = vmul.f32 %v9537_v17, %v8237_v37  ;;  %v10914_v51 = vld [vmem:[#allocation57_spill] sm:$0xff] }
 0x5a0   : > { %v4162_v27 = vadd.f32 %v4098_v57, %v4030_v47  ;;  %v4230_v24 = vadd.f32 %v9628_v20, %v4161_v35  ;;  %v3569_v4 = vmul.f32 %v9537_v17, %v8247_v15  ;;  %v3974_v26 = vmul.f32 %v9533_v23, %v8257_v54  ;;  %v10915_v11 = vld [vmem:[#allocation61_spill] sm:$0xff]  ;;  %v10916_v35 = vld [vmem:[#allocation63_spill] sm:$0xff] }
 0x5a1   : > { %v4160_v1 = vadd.f32 %v9615_v53, %v4028_v32  ;;  %v7218_v2 = vpop.f32.mrb[136].mxu0  ;;  %7288 = vmatprep.mubr.bf16.mxu1 %v4352_v40  ;;  %v4228_v36 = vadd.f32 %v9628_v20, %v4159_v56  ;;  %v9695_v19 = vmul.f32 %v9541_v10, %v8267_v42  ;;  %v4105_v37 = vmul.f32 %v9541_v10, %v8276_v9  ;;  %v10918_v32 = vld [vmem:[#allocation70_spill] sm:$0xff] }
 0x5a2   : > { %v3741_v57 = vadd.f32 %v7218_v2, %v3564_v62  ;;  %v3732_v21 = vpop.f32.mrb[137].mxu0  ;;  %7289 = vmatmul.mubr.bf16.vlgmr.msra.gmra.mrb[128].mxu1 %v4353_v25  ;;  %v4231_v53 = vadd.f32 %v9628_v20, %v4162_v27  ;;  %v3563_v55 = vmul.f32 %v9537_v17, %v10913_v49  ;;  %v4294_v18 = vmax.f32 %v4230_v24, 0.0  ;;  %v10919_v62 = vld [vmem:[#allocation78_spill] sm:$0xff]  ;;  %v10922_v49 = vld [vmem:[#allocation80_spill] sm:$0xff] }
 0x5a3   : > { %v3733_v5 = vadd.f32 %v3732_v21, %v3562_v50  ;;  %v7219_v15 = vpop.f32.mrb[138].mxu0  ;;  %v4229_v34 = vadd.f32 %v9628_v20, %v4160_v1  ;;  %v4292_v38 = vmax.f32 %v4228_v36, 0.0  ;;  %v9707_v50 = vmul.f32 %v9537_v17, %v10914_v51  ;;  %v10920_v1 = vld [vmem:[#allocation72_spill] sm:$0xff]  ;;  %v10921_v2 = vld [vmem:[#allocation74_spill] sm:$0xff] }
 0x5a4   : > { %v4033_v54 = vadd.f32 %v9559_v7, %v3741_v57  ;;  %v3744_v16 = vadd.f32 %v7219_v15, %v3565_v31  ;;  %v3735_v42 = vpop.f32.mrb[139].mxu0  ;;  %v4295_v13 = vmax.f32 %v4231_v53, 0.0  ;;  %v9711_v46 = vmul.f32 %v9533_v23, %v10915_v11 }
 0x5a5   : > { %v4031_v61 = vadd.f32 %v9636_v41, %v3733_v5  ;;  %v3736_v63 = vadd.f32 %v3735_v42, %v3563_v55  ;;  %v4293_v48 = vmax.f32 %v4229_v34, 0.0  ;;  %v9716_v41 = vmul.f32 %v9533_v23, %v10916_v35 }
 0x5a6   : > { %v4165_v14 = vadd.f32 %v4101_v0, %v4033_v54  ;;  %v4034_v9 = vadd.f32 %v3970_v60, %v3744_v16  ;;  %v4355_v52 = vpack.c.bf16 %v4295_v13, %v4294_v18  ;;  %v10917_v0 = vld [vmem:[#allocation67_spill] sm:$0xff]  ;;  %v9723_v40 = vmul.f32 %v9533_v23, %v10918_v32 }
 0x5a7   : > { %v4163_v7 = vadd.f32 %v4099_v3, %v4031_v61  ;;  %v4032_v31 = vadd.f32 %v9644_v6, %v3736_v63  ;;  %v4354_v25 = vpack.c.bf16 %v4293_v48, %v4292_v38  ;;  %v3573_v56 = vmul.f32 %v9537_v17, %v10917_v0 }
 0x5a8   : > { %v4166_v47 = vadd.f32 %v4102_v44, %v4034_v9  ;;  %v4234_v60 = vadd.f32 %v9628_v20, %v4165_v14  ;;  %v3566_v3 = vmul.f32 %v9537_v17, %v10919_v62  ;;  %v9731_v44 = vmul.f32 %v9541_v10, %v10920_v1 }
 0x5a9   : > { %v4164_v6 = vadd.f32 %v9640_v12, %v4032_v31  ;;  %v7222_v27 = vpop.f32.mrb[140].mxu0  ;;  %7292 = vmatprep.mubr.bf16.mxu1 %v4354_v25  ;;  %v4232_v24 = vadd.f32 %v9628_v20, %v4163_v7  ;;  %v4109_v36 = vmul.f32 %v9541_v10, %v10921_v2  ;;  %v3571_v55 = vmul.f32 %v9537_v17, %v10922_v49  ;;  %v10923_v12 = vld [vmem:[#allocation81_spill] sm:$0xff] }
 0x5aa   : > { %v3757_v57 = vadd.f32 %v7222_v27, %v3568_v8  ;;  %v3748_v21 = vpop.f32.mrb[141].mxu0  ;;  %7293 = vmatmul.mubr.bf16.gmra.mrb[132].mxu1 %v4355_v52  ;;  %v4235_v53 = vadd.f32 %v9628_v20, %v4166_v47  ;;  %v3572_v5 = vmul.f32 %v9537_v17, %v10923_v12  ;;  %v4298_v13 = vmax.f32 %v4234_v60, 0.0 }
 0x5ab   : > { %v3749_v15 = vadd.f32 %v3748_v21, %v3566_v3  ;;  %v7223_v34 = vpop.f32.mrb[142].mxu0  ;;  %v4233_v54 = vadd.f32 %v9628_v20, %v4164_v6  ;;  %v4296_v48 = vmax.f32 %v4232_v24, 0.0 }
 0x5ac   : > { %v4037_v16 = vadd.f32 %v9573_v33, %v3757_v57  ;;  %v3760_v42 = vadd.f32 %v7223_v34, %v3569_v4  ;;  %v3751_v18 = vpop.f32.mrb[143].mxu0  ;;  %v4299_v8 = vmax.f32 %v4235_v53, 0.0 }
 0x5ad   : > { %v4035_v61 = vadd.f32 %v9680_v43, %v3749_v15  ;;  %v3752_v63 = vadd.f32 %v3751_v18, %v9676_v30  ;;  %v7174_v38 = vpop.f32.mrb[108].mxu1  ;;  %v4297_v14 = vmax.f32 %v4233_v54, 0.0 }
 0x5ae   : > { %v4169_v9 = vadd.f32 %v4105_v37, %v4037_v16  ;;  %v4038_v52 = vadd.f32 %v3974_v26, %v3760_v42  ;;  %v3365_v51 = vadd.f32 %v7174_v38, %v9442_v45  ;;  %v3356_v11 = vpop.f32.mrb[109].mxu1  ;;  %v4357_v7 = vpack.c.bf16 %v4299_v8, %v4298_v13  ;;  %v10924_v16 = vld [vmem:[#allocation76_spill] sm:$0xff]  ;;  %v10925_v8 = vld [vmem:[#allocation39_spill] sm:$0xff]  ;;  %v10926_v38 = vld [vmem:[#allocation42_spill] sm:$0xff] }
 0x5af   : > { %v4167_v31 = vadd.f32 %v9648_v28, %v4035_v61  ;;  %v4036_v33 = vadd.f32 %v9567_v29, %v3752_v63  ;;  %v3357_v4 = vadd.f32 %v9442_v45, %v3356_v11  ;;  %v7175_v25 = vpop.f32.mrb[110].mxu1  ;;  %v4356_v35 = vpack.c.bf16 %v4297_v14, %v4296_v48  ;;  %v10927_v48 = vld [vmem:[#allocation82_spill] sm:$0xff]  ;;  %v10928_v14 = vld [vmem:[#allocation5_spill] sm:$0xff] }
 0x5b0   : > { %v4170_v43 = vadd.f32 %v9658_v58, %v4038_v52  ;;  %v3481_v30 = vmax.f32 %v3365_v51, 0.0  ;;  %v3368_v47 = vadd.f32 %v7175_v25, %v9442_v45  ;;  %v3359_v60 = vpop.f32.mrb[111].mxu1  ;;  %v4238_v26 = vadd.f32 %v9628_v20, %v4169_v9  ;;  %v10931_v25 = vld [vmem:[#allocation83_spill] sm:$0xff] }
 0x5b1   : > { %v4168_v37 = vadd.f32 %v9695_v19, %v4036_v33  ;;  %v3479_v0 = vmax.f32 %v3357_v4, 0.0  ;;  %v3360_v32 = vadd.f32 %v9442_v45, %v3359_v60  ;;  %v7226_v28 = vpop.f32.mrb[144].mxu0  ;;  %7296 = vmatprep.mubr.bf16.mxu1 %v4356_v35  ;;  %v4236_v29 = vadd.f32 %v9628_v20, %v4167_v31  ;;  %v10933_v60 = vld [vmem:[#allocation6_spill] sm:$0xff] }
 0x5b2   : > { %v3482_v62 = vmax.f32 %v3368_v47, 0.0  ;;  %v3773_v3 = vadd.f32 %v7226_v28, %v3572_v5  ;;  %v3764_v6 = vpop.f32.mrb[145].mxu0  ;;  %7297 = vmatmul.mubr.bf16.gmra.mrb[136].mxu1 %v4357_v7  ;;  %v4239_v58 = vadd.f32 %v9628_v20, %v4170_v43  ;;  %v4302_v27 = vmax.f32 %v4238_v26, 0.0  ;;  %v10930_v7 = vld [vmem:[#allocation79_spill] sm:$0xff] }
 0x5b3   : > { %v3480_v24 = vmax.f32 %v3360_v32, 0.0  ;;  %v3765_v1 = vadd.f32 %v3764_v6, %v9707_v50  ;;  %v7227_v2 = vpop.f32.mrb[146].mxu0  ;;  %v4237_v19 = vadd.f32 %v9628_v20, %v4168_v37  ;;  %v4300_v57 = vmax.f32 %v4236_v29, 0.0 }
 0x5b4   : > { %v3522_v21 = vpack.c.bf16 %v3482_v62, %v3481_v30  ;;  %v4041_v45 = vadd.f32 %v9580_v39, %v3773_v3  ;;  %v3776_v53 = vadd.f32 %v7227_v2, %v3573_v56  ;;  %v3767_v49 = vpop.f32.mrb[147].mxu0  ;;  %v4303_v12 = vmax.f32 %v4239_v58, 0.0  ;;  %v10932_v30 = vld [vmem:[#allocation7_spill] sm:$0xff] }
 0x5b5   : > { %v3521_v15 = vpack.c.bf16 %v3480_v24, %v3479_v0  ;;  %v4039_v5 = vadd.f32 %v9711_v46, %v3765_v1  ;;  %v3768_v34 = vadd.f32 %v3767_v49, %v3571_v55  ;;  %v4301_v54 = vmax.f32 %v4237_v19, 0.0  ;;  %v10934_v2 = vld [vmem:[#allocation43_spill] sm:$0xff] }
 0x5b6   : > { %v4110_v42 = vmul.f32 %v9541_v10, %v10924_v16  ;;  %v4173_v18 = vadd.f32 %v4109_v36, %v4041_v45  ;;  %v4042_v50 = vadd.f32 %v9723_v40, %v3776_v53  ;;  %v4359_v13 = vpack.c.bf16 %v4303_v12, %v4302_v27  ;;  %v10935_v53 = vld [vmem:[#allocation20_spill] sm:$0xff] }
 0x5b7   : > { %v4108_v61 = vmul.f32 %v9541_v10, %v10925_v8  ;;  %v4171_v39 = vadd.f32 %v9731_v44, %v4039_v5  ;;  %v4040_v56 = vadd.f32 %v9716_v41, %v3768_v34  ;;  %7252 = vmatprep.mubr.bf16.mxu0 %v3521_v15  ;;  %v4358_v63 = vpack.c.bf16 %v4301_v54, %v4300_v57  ;;  %v10929_v44 = vld [vmem:[#allocation77_spill] sm:$0xff] }
 0x5b8   : > { %v4111_v46 = vmul.f32 %v9541_v10, %v10926_v38  ;;  %v4174_v55 = vadd.f32 %v4110_v42, %v4042_v50  ;;  %7253 = vmatmul.mubr.bf16.gmra.mrb[172].mxu0 %v3522_v21  ;;  %v3576_v36 = vmul.f32 %v9537_v17, %v10927_v48  ;;  %v4242_v40 = vadd.f32 %v9628_v20, %v4173_v18 }
 0x5b9   : > { %v3574_v9 = vmul.f32 %v9537_v17, %v10928_v14  ;;  %v4172_v52 = vadd.f32 %v4108_v61, %v4040_v56  ;;  %v7230_v51 = vpop.f32.mrb[148].mxu0  ;;  %7300 = vmatprep.mubr.bf16.mxu1 %v4358_v63  ;;  %v3575_v41 = vmul.f32 %v9537_v17, %v10929_v44  ;;  %v4240_v11 = vadd.f32 %v9628_v20, %v4171_v39  ;;  %v9799_v63 = vld [vmem:[%s10454_s3 + $0x4] ss:$0 sm:$0xff] }
 0x5ba   : > { %v3979_v31 = vmul.f32 %v9533_v23, %v10930_v7  ;;  %v3789_v33 = vadd.f32 %v7230_v51, %v3576_v36  ;;  %v3780_v4 = vpop.f32.mrb[149].mxu0  ;;  %7301 = vmatmul.mubr.bf16.gmra.mrb[140].mxu1 %v4359_v13  ;;  %v3577_v35 = vmul.f32 %v9537_v17, %v10931_v25  ;;  %v4243_v43 = vadd.f32 %v9628_v20, %v4174_v55 }
 0x5bb   : > { %v3982_v47 = vmul.f32 %v9533_v23, %v10932_v30  ;;  %v4113_v26 = vmul.f32 %v9541_v10, %v10933_v60  ;;  %v3781_v37 = vadd.f32 %v3780_v4, %v3574_v9  ;;  %v7231_v0 = vpop.f32.mrb[150].mxu0  ;;  %v4241_v32 = vadd.f32 %v9628_v20, %v4172_v52  ;;  %v7688_v9 = vld [vmem:[%s10453_s2 + $0x180] sm:$0xff]   ;;  %v7689_v52 = vld [vmem:[%s10453_s2 + $0x188] sm:$0xff]   ;;  %v10936_v4 = vld [vmem:[#allocation88_spill] sm:$0xff] }
 0x5bc   : > { %v4045_v28 = vadd.f32 %v9591_v22, %v3789_v33  ;;  %v3792_v29 = vadd.f32 %v7231_v0, %v3577_v35  ;;  %v3783_v62 = vpop.f32.mrb[151].mxu0  ;;  %v4306_v3 = vmax.f32 %v4242_v40, 0.0  ;;  %v4307_v6 = vmax.f32 %v4243_v43, 0.0  ;;  %7352 = vmatprep.subr.bf16.mxu0 %v7688_v9  ;;  %v7690_v33 = vld [vmem:[%s10453_s2 + $0x190] sm:$0xff]   ;;  %v10937_v43 = vld [vmem:[#allocation22_spill] sm:$0xff] }
 0x5bd   : > { %v4043_v58 = vadd.f32 %v3979_v31, %v3781_v37  ;;  %v3784_v27 = vadd.f32 %v3783_v62, %v3575_v41  ;;  %v4304_v24 = vmax.f32 %v4240_v11, 0.0  ;;  %v4305_v1 = vmax.f32 %v4241_v32, 0.0  ;;  %7353 = vmatpush3.bf16.msra.mxu0 %v7688_v9  ;;  %v10939_v0 = vld [vmem:[#allocation86_spill] sm:$0xff]  ;;  %v10941_v62 = vld [vmem:[#allocation85_spill] sm:$0xff] }
 0x5be   : > { %v4114_v19 = vmul.f32 %v9541_v10, %v10934_v2  ;;  %v4177_v57 = vadd.f32 %v4113_v26, %v4045_v28  ;;  %v4046_v21 = vadd.f32 %v3982_v47, %v3792_v29  ;;  %v4361_v45 = vpack.c.bf16 %v4307_v6, %v4306_v3  ;;  %7354 = vmatprep.subr.bf16.mxu0 %v7689_v52  ;;  %v10938_v47 = vld [vmem:[#allocation23_spill] sm:$0xff]  ;;  %v10940_v28 = vld [vmem:[#allocation8_spill] sm:$0xff] }
 0x5bf   : > { %v4112_v49 = vmul.f32 %v9541_v10, %v10935_v53  ;;  %v4175_v12 = vadd.f32 %v4111_v46, %v4043_v58  ;;  %v4044_v22 = vadd.f32 %v9587_v59, %v3784_v27  ;;  %v4360_v15 = vpack.c.bf16 %v4305_v1, %v4304_v24  ;;  %v10942_v27 = vld [vmem:[#allocation87_spill] sm:$0xff]  ;;  %v10943_v1 = vld [vmem:[#allocation89_spill] sm:$0xff] }
 0x5c0   : > { %v4178_v5 = vadd.f32 %v4114_v19, %v4046_v21  ;;  %v4246_v34 = vadd.f32 %v9628_v20, %v4177_v57  ;;  %v3580_v25 = vmul.f32 %v9537_v17, %v10936_v4  ;;  %v3578_v30 = vmul.f32 %v9537_v17, %v10937_v43 }
 0x5c1   : > { %v4176_v54 = vadd.f32 %v4112_v49, %v4044_v22  ;;  %7304 = vmatprep.mubr.bf16.mxu1 %v4360_v15  ;;  %v4244_v16 = vadd.f32 %v9628_v20, %v4175_v12  ;;  %7355 = vmatpush3.bf16.msra.mxu0 %v7689_v52  ;;  %v3985_v60 = vmul.f32 %v9533_v23, %v10938_v47  ;;  %v10945_v49 = vld [vmem:[#allocation9_spill] sm:$0xff] }
 0x5c2   : > { %7305 = vmatmul.mubr.bf16.gmra.mrb[144].mxu1 %v4361_v45  ;;  %v4247_v42 = vadd.f32 %v9628_v20, %v4178_v5  ;;  %v4310_v50 = vmax.f32 %v4246_v34, 0.0  ;;  %v3581_v32 = vmul.f32 %v9537_v17, %v10939_v0  ;;  %7356 = vmatprep.subr.bf16.mxu0 %v7690_v33  ;;  %v3983_v29 = vmul.f32 %v9533_v23, %v10940_v28  ;;  %v10944_v45 = vld [vmem:[#allocation84_spill] sm:$0xff]  ;;  %v10946_v5 = vld [vmem:[#allocation90_spill] sm:$0xff]  ;;  %v7692_v52 = vld [vmem:[%s10453_s2 + $0x1a0] sm:$0xff]  }
 0x5c3   : > { %v4245_v18 = vadd.f32 %v9628_v20, %v4176_v54  ;;  %v4308_v8 = vmax.f32 %v4244_v16, 0.0  ;;  %v3579_v3 = vmul.f32 %v9537_v17, %v10941_v62  ;;  %v3986_v24 = vmul.f32 %v9533_v23, %v10942_v27  ;;  %v7695_v0 = vld [vmem:[%s10453_s2 + $0x1b8] sm:$0xff]  }
 0x5c4   : > { %v4311_v13 = vmax.f32 %v4247_v42, 0.0  ;;  %v4117_v2 = vmul.f32 %v9541_v10, %v10943_v1  ;;  %v3984_v53 = vmul.f32 %v9533_v23, %v10944_v45  ;;  %v4115_v12 = vmul.f32 %v9541_v10, %v10945_v49  ;;  %v10947_v42 = vld [vmem:[#allocation44_spill] sm:$0xff]  ;;  %v10951_v1 = vld [vmem:[#allocation54_spill] sm:$0xff] }
 0x5c5   : > { %v4309_v61 = vmax.f32 %v4245_v18, 0.0  ;;  %7357 = vmatpush3.bf16.msra.mxu0 %v7690_v33  ;;  %v4118_v34 = vmul.f32 %v9541_v10, %v10946_v5  ;;  %v4116_v18 = vmul.f32 %v9541_v10, %v10947_v42  ;;  %v10956_v42 = vld [vmem:[#allocation24_spill] sm:$0xff] }
 0x5c6   : > { %v4363_v39 = vpack.c.bf16 %v4311_v13, %v4310_v50 }
 0x5c7   : > { %v4362_v56 = vpack.c.bf16 %v4309_v61, %v4308_v8 }
 0x5c9   : > { %7308 = vmatprep.mubr.bf16.mxu1 %v4362_v56 }
 0x5ca   : > { %7309 = vmatmul.mubr.bf16.gmra.mrb[148].mxu1 %v4363_v39 }
 0x5d2   : > { %v7178_v59 = vpop.f32.mrb[112].mxu1 }
 0x5d3   : > { %v3381_v38 = vadd.f32 %v9799_v63, %v7178_v59  ;;  %v3372_v46 = vpop.f32.mrb[113].mxu1 }
 0x5d4   : > { %v3373_v55 = vadd.f32 %v9799_v63, %v3372_v46  ;;  %v7179_v48 = vpop.f32.mrb[114].mxu1 }
 0x5d5   : > { %v3384_v36 = vadd.f32 %v9799_v63, %v7179_v48  ;;  %v3375_v40 = vpop.f32.mrb[115].mxu1  ;;  %v3485_v51 = vmax.f32 %v3381_v38, 0.0 }
 0x5d6   : > { %v3376_v14 = vadd.f32 %v9799_v63, %v3375_v40  ;;  %v3483_v41 = vmax.f32 %v3373_v55, 0.0 }
 0x5d7   : > { %v3486_v44 = vmax.f32 %v3384_v36, 0.0 }
 0x5d8   : > { %v3484_v11 = vmax.f32 %v3376_v14, 0.0  ;;  %v7691_v14 = vld [vmem:[%s10453_s2 + $0x198] sm:$0xff]  }
 0x5d9   : > { %v3524_v7 = vpack.c.bf16 %v3486_v44, %v3485_v51  ;;  %7358 = vmatprep.subr.bf16.mxu0 %v7691_v14  ;;  %v7693_v51 = vld [vmem:[%s10453_s2 + $0x1a8] sm:$0xff]  }
 0x5da   : > { %v3523_v31 = vpack.c.bf16 %v3484_v11, %v3483_v41  ;;  %7359 = vmatpush3.bf16.msra.mxu0 %v7691_v14 }
 0x5db   : > { %7360 = vmatprep.subr.bf16.mxu0 %v7692_v52 }
 0x5dc   : > { %7256 = vmatprep.mubr.bf16.mxu0 %v3523_v31 }
 0x5dd   : > { %7257 = vmatmul.mubr.bf16.gmra.mrb[176].mxu0 %v3524_v7 }
 0x5de   : > { %v7234_v35 = vpop.f32.mrb[152].mxu0  ;;  %7361 = vmatpush3.bf16.msra.mxu0 %v7692_v52 }
 0x5df   : > { %v3805_v26 = vadd.f32 %v7234_v35, %v3580_v25  ;;  %v3796_v37 = vpop.f32.mrb[153].mxu0  ;;  %7362 = vmatprep.subr.bf16.mxu0 %v7693_v51  ;;  %v7694_v35 = vld [vmem:[%s10453_s2 + $0x1b0] sm:$0xff]  }
 0x5e0   : > { %v3797_v6 = vadd.f32 %v3796_v37, %v3578_v30  ;;  %v7235_v58 = vpop.f32.mrb[154].mxu0 }
 0x5e1   : > { %v4049_v19 = vadd.f32 %v3985_v60, %v3805_v26  ;;  %v3808_v57 = vadd.f32 %v7235_v58, %v3581_v32  ;;  %v3799_v21 = vpop.f32.mrb[155].mxu0  ;;  %v10948_v32 = vld [vmem:[#allocation92_spill] sm:$0xff] }
 0x5e2   : > { %v4047_v22 = vadd.f32 %v3983_v29, %v3797_v6  ;;  %v3800_v15 = vadd.f32 %v3799_v21, %v3579_v3  ;;  %7363 = vmatpush3.bf16.msra.mxu0 %v7693_v51  ;;  %v3584_v28 = vmul.f32 %v9537_v17, %v10948_v32  ;;  %v10949_v29 = vld [vmem:[#allocation93_spill] sm:$0xff]  ;;  %v10950_v6 = vld [vmem:[#allocation26_spill] sm:$0xff] }
 0x5e3   : > { %v4181_v54 = vadd.f32 %v4117_v2, %v4049_v19  ;;  %v4050_v16 = vadd.f32 %v3986_v24, %v3808_v57  ;;  %7364 = vmatprep.subr.bf16.mxu0 %v7694_v35  ;;  %v3582_v62 = vmul.f32 %v9537_v17, %v10949_v29  ;;  %v3989_v58 = vmul.f32 %v9533_v23, %v10950_v6  ;;  %v10952_v19 = vld [vmem:[#allocation40_spill] sm:$0xff]  ;;  %v10960_v6 = vld [vmem:[#allocation101_spill] sm:$0xff] }
 0x5e4   : > { %v4179_v50 = vadd.f32 %v4115_v12, %v4047_v22  ;;  %v4048_v13 = vadd.f32 %v3984_v53, %v3800_v15  ;;  %v3585_v2 = vmul.f32 %v9537_v17, %v10951_v1  ;;  %v3987_v57 = vmul.f32 %v9533_v23, %v10952_v19  ;;  %v10953_v53 = vld [vmem:[#allocation91_spill] sm:$0xff]  ;;  %v10954_v12 = vld [vmem:[#allocation94_spill] sm:$0xff] }
 0x5e5   : > { %v4182_v8 = vadd.f32 %v4118_v34, %v4050_v16  ;;  %v4250_v61 = vadd.f32 %v9628_v20, %v4181_v54  ;;  %v3583_v49 = vmul.f32 %v9537_v17, %v10953_v53  ;;  %v3990_v22 = vmul.f32 %v9533_v23, %v10954_v12  ;;  %v10955_v15 = vld [vmem:[#allocation58_spill] sm:$0xff] }
 0x5e6   : > { %v4180_v39 = vadd.f32 %v4116_v18, %v4048_v13  ;;  %v4248_v56 = vadd.f32 %v9628_v20, %v4179_v50  ;;  %7365 = vmatpush3.bf16.msra.mxu0 %v7694_v35  ;;  %v4121_v5 = vmul.f32 %v9541_v10, %v10955_v15  ;;  %v3988_v18 = vmul.f32 %v9533_v23, %v10956_v42  ;;  %v10957_v50 = vld [vmem:[#allocation46_spill] sm:$0xff]  ;;  %v10967_v42 = vld [vmem:[#allocation103_spill] sm:$0xff] }
 0x5e7   : > { %v4251_v59 = vadd.f32 %v9628_v20, %v4182_v8  ;;  %v4314_v46 = vmax.f32 %v4250_v61, 0.0  ;;  %7366 = vmatprep.subr.bf16.mxu0 %v7695_v0  ;;  %v4119_v13 = vmul.f32 %v9541_v10, %v10957_v50 }
 0x5e8   : > { %v4249_v38 = vadd.f32 %v9628_v20, %v4180_v39  ;;  %v4312_v48 = vmax.f32 %v4248_v56, 0.0  ;;  %v10958_v39 = vld [vmem:[#allocation47_spill] sm:$0xff] }
 0x5e9   : > { %v4315_v55 = vmax.f32 %v4251_v59, 0.0  ;;  %v4122_v56 = vmul.f32 %v9541_v10, %v10958_v39 }
 0x5ea   : > { %v4313_v36 = vmax.f32 %v4249_v38, 0.0  ;;  %7367 = vmatpush3.bf16.msra.mxu0 %v7695_v0 }
 0x5eb   : > { %v4365_v40 = vpack.c.bf16 %v4315_v55, %v4314_v46  ;;  %v10959_v46 = vld [vmem:[#allocation50_spill] sm:$0xff] }
 0x5ec   : > { %v4364_v9 = vpack.c.bf16 %v4313_v36, %v4312_v48  ;;  %v4120_v55 = vmul.f32 %v9541_v10, %v10959_v46 }
 0x5ee   : > { %7312 = vmatprep.mubr.bf16.mxu1 %v4364_v9 }
 0x5ef   : > { %7313 = vmatmul.mubr.bf16.gmra.mrb[152].mxu1 %v4365_v40 }
 0x5f3   : > { %v7182_v44 = vpop.f32.mrb[116].mxu1 }
 0x5f4   : > { %v3397_v41 = vadd.f32 %v9799_v63, %v7182_v44  ;;  %v3388_v11 = vpop.f32.mrb[117].mxu1 }
 0x5f5   : > { %v3389_v7 = vadd.f32 %v9799_v63, %v3388_v11  ;;  %v7183_v31 = vpop.f32.mrb[118].mxu1 }
 0x5f6   : > { %v3400_v33 = vadd.f32 %v9799_v63, %v7183_v31  ;;  %v3391_v4 = vpop.f32.mrb[119].mxu1  ;;  %v3489_v43 = vmax.f32 %v3397_v41, 0.0 }
 0x5f7   : > { %v3392_v25 = vadd.f32 %v9799_v63, %v3391_v4  ;;  %v3487_v47 = vmax.f32 %v3389_v7, 0.0 }
 0x5f8   : > { %v3490_v30 = vmax.f32 %v3400_v33, 0.0 }
 0x5f9   : > { %v3488_v60 = vmax.f32 %v3392_v25, 0.0 }
 0x5fa   : > { %v3526_v26 = vpack.c.bf16 %v3490_v30, %v3489_v43 }
 0x5fb   : > { %v3525_v37 = vpack.c.bf16 %v3488_v60, %v3487_v47 }
 0x5fd   : > { %7260 = vmatprep.mubr.bf16.mxu0 %v3525_v37 }
 0x5fe   : > { %7261 = vmatmul.mubr.bf16.gmra.mrb[180].mxu0 %v3526_v26 }
 0x5ff   : > { %v7238_v3 = vpop.f32.mrb[156].mxu0 }
 0x600   : > { %v3821_v27 = vadd.f32 %v7238_v3, %v3584_v28  ;;  %v3812_v24 = vpop.f32.mrb[157].mxu0 }
 0x601   : > { %v3813_v21 = vadd.f32 %v3812_v24, %v3582_v62  ;;  %v7239_v45 = vpop.f32.mrb[158].mxu0  ;;  %v10961_v24 = vld [vmem:[#allocation95_spill] sm:$0xff] }
 0x602   : > { %v4053_v34 = vadd.f32 %v3989_v58, %v3821_v27  ;;  %v3824_v54 = vadd.f32 %v7239_v45, %v3585_v2  ;;  %v3815_v16 = vpop.f32.mrb[159].mxu0  ;;  %v3588_v58 = vmul.f32 %v9537_v17, %v10960_v6  ;;  %v3586_v1 = vmul.f32 %v9537_v17, %v10961_v24  ;;  %v10962_v2 = vld [vmem:[#allocation28_spill] sm:$0xff]  ;;  %v10963_v45 = vld [vmem:[#allocation99_spill] sm:$0xff] }
 0x603   : > { %v4051_v8 = vadd.f32 %v3987_v57, %v3813_v21  ;;  %v3816_v61 = vadd.f32 %v3815_v16, %v3583_v49  ;;  %v3993_v19 = vmul.f32 %v9533_v23, %v10962_v2  ;;  %v3589_v53 = vmul.f32 %v9537_v17, %v10963_v45  ;;  %v10964_v49 = vld [vmem:[#allocation98_spill] sm:$0xff]  ;;  %v10972_v2 = vld [vmem:[#allocation109_spill] sm:$0xff] }
 0x604   : > { %v4185_v59 = vadd.f32 %v4121_v5, %v4053_v34  ;;  %v4054_v38 = vadd.f32 %v3990_v22, %v3824_v54  ;;  %v3587_v12 = vmul.f32 %v9537_v17, %v10964_v49  ;;  %v10965_v22 = vld [vmem:[#allocation96_spill] sm:$0xff] }
 0x605   : > { %v4183_v48 = vadd.f32 %v4119_v13, %v4051_v8  ;;  %v4052_v36 = vadd.f32 %v3988_v18, %v3816_v61  ;;  %v3991_v15 = vmul.f32 %v9533_v23, %v10965_v22  ;;  %v10966_v54 = vld [vmem:[#allocation100_spill] sm:$0xff]  ;;  %v4125_v18 = vmul.f32 %v9541_v10, %v10967_v42  ;;  %v10968_v61 = vld [vmem:[#allocation97_spill] sm:$0xff]  ;;  %v10977_v42 = vld [vmem:[#allocation107_spill] sm:$0xff] }
 0x606   : > { %v4186_v40 = vadd.f32 %v4122_v56, %v4054_v38  ;;  %v4254_v14 = vadd.f32 %v9628_v20, %v4185_v59  ;;  %v3994_v16 = vmul.f32 %v9533_v23, %v10966_v54  ;;  %v3992_v39 = vmul.f32 %v9533_v23, %v10968_v61  ;;  %v10969_v56 = vld [vmem:[#allocation102_spill] sm:$0xff] }
 0x607   : > { %v4184_v9 = vadd.f32 %v4120_v55, %v4052_v36  ;;  %v4252_v52 = vadd.f32 %v9628_v20, %v4183_v48  ;;  %v4123_v59 = vmul.f32 %v9541_v10, %v10969_v56  ;;  %v10970_v55 = vld [vmem:[#allocation104_spill] sm:$0xff] }
 0x608   : > { %v4255_v51 = vadd.f32 %v9628_v20, %v4186_v40  ;;  %v4318_v41 = vmax.f32 %v4254_v14, 0.0  ;;  %v4126_v48 = vmul.f32 %v9541_v10, %v10970_v55  ;;  %v10971_v14 = vld [vmem:[#allocation48_spill] sm:$0xff]  ;;  %v10981_v55 = vld [vmem:[#allocation49_spill] sm:$0xff] }
 0x609   : > { %v4253_v44 = vadd.f32 %v9628_v20, %v4184_v9  ;;  %v4316_v7 = vmax.f32 %v4252_v52, 0.0  ;;  %v4124_v9 = vmul.f32 %v9541_v10, %v10971_v14  ;;  %v10982_v14 = vld [vmem:[#allocation51_spill] sm:$0xff] }
 0x60a   : > { %v4319_v11 = vmax.f32 %v4255_v51, 0.0 }
 0x60b   : > { %v4317_v31 = vmax.f32 %v4253_v44, 0.0 }
 0x60c   : > { %v4367_v33 = vpack.c.bf16 %v4319_v11, %v4318_v41 }
 0x60d   : > { %v4366_v4 = vpack.c.bf16 %v4317_v31, %v4316_v7 }
 0x60f   : > { %7316 = vmatprep.mubr.bf16.mxu1 %v4366_v4 }
 0x610   : > { %7317 = vmatmul.mubr.bf16.gmra.mrb[156].mxu1 %v4367_v33 }
 0x618   : > { %v7186_v25 = vpop.f32.mrb[120].mxu1 }
 0x619   : > { %v3413_v35 = vadd.f32 %v9799_v63, %v7186_v25  ;;  %v3404_v43 = vpop.f32.mrb[121].mxu1 }
 0x61a   : > { %v3405_v30 = vadd.f32 %v9799_v63, %v3404_v43  ;;  %v7187_v47 = vpop.f32.mrb[122].mxu1 }
 0x61b   : > { %v3416_v60 = vadd.f32 %v9799_v63, %v7187_v47  ;;  %v3407_v26 = vpop.f32.mrb[123].mxu1  ;;  %v3493_v0 = vmax.f32 %v3413_v35, 0.0 }
 0x61c   : > { %v3408_v37 = vadd.f32 %v9799_v63, %v3407_v26  ;;  %v3491_v28 = vmax.f32 %v3405_v30, 0.0 }
 0x61d   : > { %v3494_v32 = vmax.f32 %v3416_v60, 0.0 }
 0x61e   : > { %v3492_v29 = vmax.f32 %v3408_v37, 0.0 }
 0x61f   : > { %v3528_v62 = vpack.c.bf16 %v3494_v32, %v3493_v0 }
 0x620   : > { %v3527_v3 = vpack.c.bf16 %v3492_v29, %v3491_v28 }
 0x622   : > { %7264 = vmatprep.mubr.bf16.mxu0 %v3527_v3 }
 0x623   : > { %7265 = vmatmul.mubr.bf16.gmra.mrb[184].mxu0 %v3528_v62 }
 0x624   : > { %v7242_v27 = vpop.f32.mrb[160].mxu0 }
 0x625   : > { %v3837_v57 = vadd.f32 %v7242_v27, %v3588_v58  ;;  %v3828_v21 = vpop.f32.mrb[161].mxu0 }
 0x626   : > { %v3829_v5 = vadd.f32 %v3828_v21, %v3586_v1  ;;  %v7243_v34 = vpop.f32.mrb[162].mxu0 }
 0x627   : > { %v4057_v50 = vadd.f32 %v3993_v19, %v3837_v57  ;;  %v3840_v13 = vadd.f32 %v7243_v34, %v3589_v53  ;;  %v3831_v8 = vpop.f32.mrb[163].mxu0  ;;  %v3592_v19 = vmul.f32 %v9537_v17, %v10972_v2  ;;  %v10973_v57 = vld [vmem:[#allocation105_spill] sm:$0xff]  ;;  %v10974_v53 = vld [vmem:[#allocation32_spill] sm:$0xff] }
 0x628   : > { %v4055_v38 = vadd.f32 %v3991_v15, %v3829_v5  ;;  %v3832_v46 = vadd.f32 %v3831_v8, %v3587_v12  ;;  %v3590_v21 = vmul.f32 %v9537_v17, %v10973_v57  ;;  %v3997_v49 = vmul.f32 %v9533_v23, %v10974_v53  ;;  %v10975_v12 = vld [vmem:[#allocation64_spill] sm:$0xff]  ;;  %v10976_v5 = vld [vmem:[#allocation45_spill] sm:$0xff]  ;;  %v10979_v8 = vld [vmem:[#allocation114_spill] sm:$0xff] }
 0x629   : > { %v4189_v36 = vadd.f32 %v4125_v18, %v4057_v50  ;;  %v4058_v40 = vadd.f32 %v3994_v16, %v3840_v13  ;;  %v3995_v34 = vmul.f32 %v9533_v23, %v10976_v5  ;;  %v3591_v18 = vmul.f32 %v9537_v17, %v10977_v42  ;;  %v10978_v50 = vld [vmem:[#allocation112_spill] sm:$0xff] }
 0x62a   : > { %v4187_v52 = vadd.f32 %v4123_v59, %v4055_v38  ;;  %v4056_v51 = vadd.f32 %v3992_v39, %v3832_v46  ;;  %v3998_v13 = vmul.f32 %v9533_v23, %v10978_v50  ;;  %v4129_v61 = vmul.f32 %v9541_v10, %v10979_v8  ;;  %v10980_v38 = vld [vmem:[#allocation30_spill] sm:$0xff] }
 0x62b   : > { %v4190_v44 = vadd.f32 %v4126_v48, %v4058_v40  ;;  %v4258_v41 = vadd.f32 %v9628_v20, %v4189_v36  ;;  %v3996_v46 = vmul.f32 %v9533_v23, %v10980_v38  ;;  %v4127_v48 = vmul.f32 %v9541_v10, %v10981_v55  ;;  %v10995_v38 = vld [vmem:[#allocation52_spill] sm:$0xff] }
 0x62c   : > { %v4188_v11 = vadd.f32 %v4124_v9, %v4056_v51  ;;  %v4256_v7 = vadd.f32 %v9628_v20, %v4187_v52  ;;  %v4130_v9 = vmul.f32 %v9541_v10, %v10982_v14 }
 0x62d   : > { %v4259_v31 = vadd.f32 %v9628_v20, %v4190_v44  ;;  %v4322_v4 = vmax.f32 %v4258_v41, 0.0  ;;  %v10983_v44 = vld [vmem:[#allocation113_spill] sm:$0xff] }
 0x62e   : > { %v4257_v33 = vadd.f32 %v9628_v20, %v4188_v11  ;;  %v4320_v35 = vmax.f32 %v4256_v7, 0.0  ;;  %v4128_v41 = vmul.f32 %v9541_v10, %v10983_v44 }
 0x62f   : > { %v4323_v25 = vmax.f32 %v4259_v31, 0.0 }
 0x630   : > { %v4321_v43 = vmax.f32 %v4257_v33, 0.0 }
 0x631   : > { %v4369_v30 = vpack.c.bf16 %v4323_v25, %v4322_v4 }
 0x632   : > { %v4368_v47 = vpack.c.bf16 %v4321_v43, %v4320_v35 }
 0x634   : > { %7320 = vmatprep.mubr.bf16.mxu1 %v4368_v47 }
 0x635   : > { %7321 = vmatmul.mubr.bf16.gmra.mrb[160].mxu1 %v4369_v30 }
 0x639   : > { %v7190_v60 = vpop.f32.mrb[124].mxu1 }
 0x63a   : > { %v3429_v26 = vadd.f32 %v9799_v63, %v7190_v60  ;;  %v3420_v37 = vpop.f32.mrb[125].mxu1 }
 0x63b   : > { %v3421_v0 = vadd.f32 %v9799_v63, %v3420_v37  ;;  %v7191_v32 = vpop.f32.mrb[126].mxu1 }
 0x63c   : > { %v3432_v28 = vadd.f32 %v9799_v63, %v7191_v32  ;;  %v3423_v29 = vpop.f32.mrb[127].mxu1  ;;  %v3497_v3 = vmax.f32 %v3429_v26, 0.0  ;;  %v10984_v32 = vld [vmem:[#allocation108_spill] sm:$0xff] }
 0x63d   : > { %v3424_v62 = vadd.f32 %v9799_v63, %v3423_v29  ;;  %v3495_v58 = vmax.f32 %v3421_v0, 0.0  ;;  %v3593_v63 = vmul.f32 %v9537_v17, %v10975_v12  ;;  %v10985_v29 = vld [vmem:[#allocation116_spill] sm:$0xff]  ;;  %v10990_v12 = vld [vmem:[#allocation123_spill] sm:$0xff] }
 0x63e   : > { %v3498_v6 = vmax.f32 %v3432_v28, 0.0  ;;  %v3596_v28 = vmul.f32 %v9537_v17, %v10984_v32 }
 0x63f   : > { %v3496_v27 = vmax.f32 %v3424_v62, 0.0  ;;  %v3594_v62 = vmul.f32 %v9537_v17, %v10985_v29 }
 0x640   : > { %v3530_v24 = vpack.c.bf16 %v3498_v6, %v3497_v3  ;;  %v10986_v6 = vld [vmem:[#allocation121_spill] sm:$0xff] }
 0x641   : > { %v3529_v1 = vpack.c.bf16 %v3496_v27, %v3495_v58  ;;  %v3597_v58 = vmul.f32 %v9537_v17, %v10986_v6  ;;  %v10987_v27 = vld [vmem:[#allocation124_spill] sm:$0xff] }
 0x643   : > { %7268 = vmatprep.mubr.bf16.mxu0 %v3529_v1 }
 0x644   : > { %7269 = vmatmul.mubr.bf16.gmra.mrb[188].mxu0 %v3530_v24  ;;  %v4001_v24 = vmul.f32 %v9533_v23, %v10987_v27 }
 0x645   : > { %v7246_v45 = vpop.f32.mrb[164].mxu0 }
 0x646   : > { %v3853_v22 = vadd.f32 %v7246_v45, %v3592_v19  ;;  %v3844_v15 = vpop.f32.mrb[165].mxu0  ;;  %v10988_v19 = vld [vmem:[#allocation106_spill] sm:$0xff] }
 0x647   : > { %v3845_v54 = vadd.f32 %v3844_v15, %v3590_v21  ;;  %v7247_v16 = vpop.f32.mrb[166].mxu0  ;;  %v3595_v57 = vmul.f32 %v9537_v17, %v10988_v19  ;;  %v10989_v21 = vld [vmem:[#allocation118_spill] sm:$0xff] }
 0x648   : > { %v4061_v39 = vadd.f32 %v3997_v49, %v3853_v22  ;;  %v3856_v56 = vadd.f32 %v7247_v16, %v3593_v63  ;;  %v3847_v59 = vpop.f32.mrb[167].mxu0  ;;  %v3999_v45 = vmul.f32 %v9533_v23, %v10989_v21  ;;  %v4002_v63 = vmul.f32 %v9533_v23, %v10990_v12  ;;  %v10991_v22 = vld [vmem:[#allocation126_spill] sm:$0xff]  ;;  %v10992_v16 = vld [vmem:[#allocation120_spill] sm:$0xff] }
 0x649   : > { %v4059_v36 = vadd.f32 %v3995_v34, %v3845_v54  ;;  %v3848_v40 = vadd.f32 %v3847_v59, %v3591_v18  ;;  %v4133_v15 = vmul.f32 %v9541_v10, %v10991_v22  ;;  %v4000_v42 = vmul.f32 %v9533_v23, %v10992_v16  ;;  %v10993_v18 = vld [vmem:[#allocation125_spill] sm:$0xff] }
 0x64a   : > { %v4193_v52 = vadd.f32 %v4129_v61, %v4061_v39  ;;  %v4062_v51 = vadd.f32 %v3998_v13, %v3856_v56  ;;  %v4131_v50 = vmul.f32 %v9541_v10, %v10993_v18  ;;  %v10994_v61 = vld [vmem:[#allocation127_spill] sm:$0xff]  ;;  %v10996_v18 = vld [vmem:[#allocation53_spill] sm:$0xff] }
 0x64b   : > { %v4191_v11 = vadd.f32 %v4127_v48, %v4059_v36  ;;  %v4060_v7 = vadd.f32 %v3996_v46, %v3848_v40  ;;  %v4134_v39 = vmul.f32 %v9541_v10, %v10994_v61  ;;  %v4132_v46 = vmul.f32 %v9541_v10, %v10995_v38  ;;  %v10999_v38 = vld [vmem:[#allocation134_spill] sm:$0xff] }
 0x64c   : > { %v4194_v31 = vadd.f32 %v4130_v9, %v4062_v51  ;;  %v4262_v33 = vadd.f32 %v9628_v20, %v4193_v52  ;;  %v9982_v52 = vld [vmem:[%s10454_s3 + $0x6] ss:$0 sm:$0xff] }
 0x64d   : > { %v4192_v4 = vadd.f32 %v4128_v41, %v4060_v7  ;;  %v4260_v25 = vadd.f32 %v9628_v20, %v4191_v11 }
 0x64e   : > { %v4263_v35 = vadd.f32 %v9628_v20, %v4194_v31  ;;  %v4326_v30 = vmax.f32 %v4262_v33, 0.0 }
 0x64f   : > { %v4261_v43 = vadd.f32 %v9628_v20, %v4192_v4  ;;  %v4324_v60 = vmax.f32 %v4260_v25, 0.0 }
 0x650   : > { %v4327_v47 = vmax.f32 %v4263_v35, 0.0 }
 0x651   : > { %v4325_v26 = vmax.f32 %v4261_v43, 0.0 }
 0x652   : > { %v4371_v37 = vpack.c.bf16 %v4327_v47, %v4326_v30 }
 0x653   : > { %v4370_v0 = vpack.c.bf16 %v4325_v26, %v4324_v60 }
 0x655   : > { %7324 = vmatprep.mubr.bf16.mxu1 %v4370_v0 }
 0x656   : > { %7325 = vmatmul.mubr.bf16.gmra.mrb[164].mxu1 %v4371_v37 }
 0x66a   : > { %v7250_v3 = vpop.f32.mrb[168].mxu0 }
 0x66b   : > { %v3869_v1 = vadd.f32 %v7250_v3, %v3596_v28  ;;  %v3860_v2 = vpop.f32.mrb[169].mxu0 }
 0x66c   : > { %v3861_v53 = vadd.f32 %v3860_v2, %v3594_v62  ;;  %v7251_v49 = vpop.f32.mrb[170].mxu0 }
 0x66d   : > { %v4065_v5 = vadd.f32 %v4001_v24, %v3869_v1  ;;  %v3872_v34 = vadd.f32 %v7251_v49, %v3597_v58  ;;  %v3863_v54 = vpop.f32.mrb[171].mxu0 }
 0x66e   : > { %v4063_v13 = vadd.f32 %v3999_v45, %v3861_v53  ;;  %v3864_v8 = vadd.f32 %v3863_v54, %v3595_v57 }
 0x66f   : > { %v4197_v56 = vadd.f32 %v4133_v15, %v4065_v5  ;;  %v4066_v59 = vadd.f32 %v4002_v63, %v3872_v34 }
 0x670   : > { %v4195_v55 = vadd.f32 %v4131_v50, %v4063_v13  ;;  %v4064_v48 = vadd.f32 %v4000_v42, %v3864_v8  ;;  %v4135_v50 = vmul.f32 %v9541_v10, %v10996_v18  ;;  %v10997_v13 = vld [vmem:[#allocation130_spill] sm:$0xff] }
 0x671   : > { %v4198_v36 = vadd.f32 %v4134_v39, %v4066_v59  ;;  %v4266_v40 = vadd.f32 %v9628_v20, %v4197_v56  ;;  %v3600_v8 = vmul.f32 %v9537_v17, %v10997_v13  ;;  %v10998_v56 = vld [vmem:[#allocation110_spill] sm:$0xff] }
 0x672   : > { %v4196_v14 = vadd.f32 %v4132_v46, %v4064_v48  ;;  %v4264_v9 = vadd.f32 %v9628_v20, %v4195_v55  ;;  %v3598_v59 = vmul.f32 %v9537_v17, %v10998_v56  ;;  %v4005_v46 = vmul.f32 %v9533_v23, %v10999_v38 }
 0x673   : > { %v4267_v51 = vadd.f32 %v9628_v20, %v4198_v36  ;;  %v4330_v11 = vmax.f32 %v4266_v40, 0.0  ;;  %v11000_v40 = vld [vmem:[#allocation128_spill] sm:$0xff] }
 0x674   : > { %v4265_v44 = vadd.f32 %v9628_v20, %v4196_v14  ;;  %v4328_v4 = vmax.f32 %v4264_v9, 0.0  ;;  %v3599_v14 = vmul.f32 %v9537_v17, %v11000_v40  ;;  %v11001_v9 = vld [vmem:[#allocation131_spill] sm:$0xff] }
 0x675   : > { %v7290_v41 = vpop.f32.mrb[128].mxu1  ;;  %v4331_v7 = vmax.f32 %v4267_v51, 0.0  ;;  %v3601_v51 = vmul.f32 %v9537_v17, %v11001_v9 }
 0x676   : > { %v4497_v31 = vadd.f32 %v7290_v41, %v9982_v52  ;;  %v4488_v33 = vpop.f32.mrb[129].mxu1  ;;  %v4329_v25 = vmax.f32 %v4265_v44, 0.0 }
 0x677   : > { %v4489_v35 = vadd.f32 %v9982_v52, %v4488_v33  ;;  %v7291_v43 = vpop.f32.mrb[130].mxu1  ;;  %v4373_v30 = vpack.c.bf16 %v4331_v7, %v4330_v11  ;;  %v11002_v7 = vld [vmem:[#allocation129_spill] sm:$0xff] }
 0x678   : > { %v4500_v47 = vadd.f32 %v7291_v43, %v9982_v52  ;;  %v4491_v60 = vpop.f32.mrb[131].mxu1  ;;  %v4372_v26 = vpack.c.bf16 %v4329_v25, %v4328_v4  ;;  %v4745_v0 = vmax.f32 %v4497_v31, 0.0  ;;  %v4003_v31 = vmul.f32 %v9533_v23, %v11002_v7  ;;  %v11003_v33 = vld [vmem:[#allocation133_spill] sm:$0xff] }
 0x679   : > { %v4492_v37 = vadd.f32 %v9982_v52, %v4491_v60  ;;  %v4743_v32 = vmax.f32 %v4489_v35, 0.0  ;;  %v4006_v4 = vmul.f32 %v9533_v23, %v11003_v33 }
 0x67a   : > { %v4746_v20 = vmax.f32 %v4500_v47, 0.0  ;;  %7328 = vmatprep.mubr.bf16.mxu1 %v4372_v26  ;;  %v11004_v47 = vld [vmem:[#allocation136_spill] sm:$0xff] }
 0x67b   : > { %v4744_v28 = vmax.f32 %v4492_v37, 0.0  ;;  %7329 = vmatmul.mubr.bf16.gmra.mrb[168].mxu1 %v4373_v30  ;;  %v4137_v60 = vmul.f32 %v9541_v10, %v11004_v47 }
 0x67c   : > { %v4808_v29 = vpack.c.bf16 %v4746_v20, %v4745_v0 }
 0x67d   : > { %v4807_v62 = vpack.c.bf16 %v4744_v28, %v4743_v32  ;;  %v7294_v3 = vpop.f32.mrb[132].mxu1  ;;  %v11005_v28 = vld [vmem:[#allocation132_spill] sm:$0xff] }
 0x67e   : > { %v4513_v6 = vadd.f32 %v7294_v3, %v9982_v52  ;;  %v4504_v58 = vpop.f32.mrb[133].mxu1 }
 0x67f   : > { %v4505_v27 = vadd.f32 %v9982_v52, %v4504_v58  ;;  %v7295_v24 = vpop.f32.mrb[134].mxu1  ;;  %7368 = vmatprep.mubr.bf16.mxu0 %v4807_v62 }
 0x680   : > { %v4516_v1 = vadd.f32 %v7295_v24, %v9982_v52  ;;  %v4507_v2 = vpop.f32.mrb[135].mxu1  ;;  %7369 = vmatmul.mubr.bf16.vlgmr.msra.gmra.mrb[192].mxu0 %v4808_v29  ;;  %v4749_v57 = vmax.f32 %v4513_v6, 0.0  ;;  %v4004_v29 = vmul.f32 %v9533_v23, %v11005_v28 }
 0x681   : > { %v4508_v19 = vadd.f32 %v9982_v52, %v4507_v2  ;;  %v4747_v45 = vmax.f32 %v4505_v27, 0.0  ;;  %v11006_v27 = vld [vmem:[#allocation55_spill] sm:$0xff] }
 0x682   : > { %v4750_v21 = vmax.f32 %v4516_v1, 0.0  ;;  %v4138_v24 = vmul.f32 %v9541_v10, %v11006_v27  ;;  %v11009_v27 = vld [vmem:[#allocation137_spill] sm:$0xff] }
 0x683   : > { %v4748_v53 = vmax.f32 %v4508_v19, 0.0 }
 0x684   : > { %v4810_v49 = vpack.c.bf16 %v4750_v21, %v4749_v57  ;;  %v11007_v21 = vld [vmem:[#allocation135_spill] sm:$0xff] }
 0x685   : > { %v4809_v12 = vpack.c.bf16 %v4748_v53, %v4747_v45  ;;  %v7298_v63 = vpop.f32.mrb[136].mxu1  ;;  %v4136_v45 = vmul.f32 %v9541_v10, %v11007_v21 }
 0x686   : > { %v4529_v22 = vadd.f32 %v7298_v63, %v9982_v52  ;;  %v4520_v15 = vpop.f32.mrb[137].mxu1 }
 0x687   : > { %v4521_v5 = vadd.f32 %v9982_v52, %v4520_v15  ;;  %v7299_v34 = vpop.f32.mrb[138].mxu1  ;;  %7372 = vmatprep.mubr.bf16.mxu0 %v4809_v12 }
 0x688   : > { %v4532_v54 = vadd.f32 %v7299_v34, %v9982_v52  ;;  %v4523_v16 = vpop.f32.mrb[139].mxu1  ;;  %7373 = vmatmul.mubr.bf16.gmra.mrb[196].mxu0 %v4810_v49  ;;  %v4753_v61 = vmax.f32 %v4529_v22, 0.0 }
 0x689   : > { %v4524_v42 = vadd.f32 %v9982_v52, %v4523_v16  ;;  %v4751_v55 = vmax.f32 %v4521_v5, 0.0  ;;  %v10029_v5 = vld [vmem:[%s10454_s3 + $0x5] ss:$0 sm:$0xff] }
 0x68a   : > { %v4754_v39 = vmax.f32 %v4532_v54, 0.0 }
 0x68b   : > { %v4752_v48 = vmax.f32 %v4524_v42, 0.0  ;;  %v7254_v36 = vpop.f32.mrb[172].mxu0 }
 0x68c   : > { %v4812_v44 = vpack.c.bf16 %v4754_v39, %v4753_v61  ;;  %v3885_v41 = vadd.f32 %v7254_v36, %v3600_v8  ;;  %v3876_v11 = vpop.f32.mrb[173].mxu0 }
 0x68d   : > { %v4811_v25 = vpack.c.bf16 %v4752_v48, %v4751_v55  ;;  %v3877_v35 = vadd.f32 %v3876_v11, %v3598_v59  ;;  %v7255_v43 = vpop.f32.mrb[174].mxu0  ;;  %v7302_v30 = vpop.f32.mrb[140].mxu1 }
 0x68e   : > { %v4069_v26 = vadd.f32 %v4005_v46, %v3885_v41  ;;  %v3888_v37 = vadd.f32 %v7255_v43, %v3601_v51  ;;  %v4545_v0 = vadd.f32 %v7302_v30, %v9982_v52  ;;  %v3879_v20 = vpop.f32.mrb[175].mxu0  ;;  %v4536_v32 = vpop.f32.mrb[141].mxu1 }
 0x68f   : > { %v4067_v62 = vadd.f32 %v4003_v31, %v3877_v35  ;;  %v3880_v3 = vadd.f32 %v3879_v20, %v3599_v14  ;;  %v4537_v6 = vadd.f32 %v9982_v52, %v4536_v32  ;;  %v7303_v58 = vpop.f32.mrb[142].mxu1  ;;  %7376 = vmatprep.mubr.bf16.mxu0 %v4811_v25 }
 0x690   : > { %v4201_v1 = vadd.f32 %v4137_v60, %v4069_v26  ;;  %v4070_v2 = vadd.f32 %v4006_v4, %v3888_v37  ;;  %v4548_v19 = vadd.f32 %v7303_v58, %v9982_v52  ;;  %v4539_v57 = vpop.f32.mrb[143].mxu1  ;;  %7377 = vmatmul.mubr.bf16.gmra.mrb[200].mxu0 %v4812_v44  ;;  %v4757_v22 = vmax.f32 %v4545_v0, 0.0 }
 0x691   : > { %v4199_v53 = vadd.f32 %v4135_v50, %v4067_v62  ;;  %v4068_v49 = vadd.f32 %v4004_v29, %v3880_v3  ;;  %v4540_v12 = vadd.f32 %v9982_v52, %v4539_v57  ;;  %v4755_v16 = vmax.f32 %v4537_v6, 0.0  ;;  %v11008_v6 = vld [vmem:[#allocation66_spill] sm:$0xff]  ;;  %v11011_v57 = vld [vmem:[#allocation140_spill] sm:$0xff] }
 0x692   : > { %v4202_v63 = vadd.f32 %v4138_v24, %v4070_v2  ;;  %v4758_v15 = vmax.f32 %v4548_v19, 0.0  ;;  %v4270_v34 = vadd.f32 %v10029_v5, %v4201_v1  ;;  %v3604_v58 = vmul.f32 %v9537_v17, %v11008_v6  ;;  %v11010_v2 = vld [vmem:[#allocation142_spill] sm:$0xff] }
 0x693   : > { %v4200_v54 = vadd.f32 %v4136_v45, %v4068_v49  ;;  %v4756_v42 = vmax.f32 %v4540_v12, 0.0  ;;  %v4268_v18 = vadd.f32 %v10029_v5, %v4199_v53  ;;  %v3602_v24 = vmul.f32 %v9537_v17, %v11009_v27  ;;  %v11012_v49 = vld [vmem:[#allocation111_spill] sm:$0xff] }
 0x694   : > { %v4814_v13 = vpack.c.bf16 %v4758_v15, %v4757_v22  ;;  %v4271_v50 = vadd.f32 %v10029_v5, %v4202_v63  ;;  %v4334_v38 = vmax.f32 %v4270_v34, 0.0  ;;  %v4009_v19 = vmul.f32 %v9533_v23, %v11010_v2  ;;  %v11013_v63 = vld [vmem:[#allocation138_spill] sm:$0xff] }
 0x695   : > { %v4813_v8 = vpack.c.bf16 %v4756_v42, %v4755_v16  ;;  %v7306_v61 = vpop.f32.mrb[144].mxu1  ;;  %v4269_v39 = vadd.f32 %v10029_v5, %v4200_v54  ;;  %v4332_v36 = vmax.f32 %v4268_v18, 0.0  ;;  %v3605_v21 = vmul.f32 %v9537_v17, %v11011_v57  ;;  %v11014_v54 = vld [vmem:[#allocation141_spill] sm:$0xff]  ;;  %v11015_v42 = vld [vmem:[#allocation144_spill] sm:$0xff] }
 0x696   : > { %v4561_v56 = vadd.f32 %v7306_v61, %v9982_v52  ;;  %v4552_v59 = vpop.f32.mrb[145].mxu1  ;;  %v4335_v46 = vmax.f32 %v4271_v50, 0.0  ;;  %v3603_v12 = vmul.f32 %v9537_v17, %v11012_v49  ;;  %v4007_v22 = vmul.f32 %v9533_v23, %v11013_v63  ;;  %v11016_v61 = vld [vmem:[#allocation139_spill] sm:$0xff] }
 0x697   : > { %v4553_v55 = vadd.f32 %v9982_v52, %v4552_v59  ;;  %v7307_v48 = vpop.f32.mrb[146].mxu1  ;;  %7380 = vmatprep.mubr.bf16.mxu0 %v4813_v8  ;;  %v4333_v40 = vmax.f32 %v4269_v39, 0.0  ;;  %v4010_v16 = vmul.f32 %v9533_v23, %v11014_v54  ;;  %v4141_v18 = vmul.f32 %v9541_v10, %v11015_v42 }
 0x698   : > { %v4564_v14 = vadd.f32 %v7307_v48, %v9982_v52  ;;  %v4555_v9 = vpop.f32.mrb[147].mxu1  ;;  %7381 = vmatmul.mubr.bf16.gmra.mrb[204].mxu0 %v4814_v13  ;;  %v4375_v51 = vpack.c.bf16 %v4335_v46, %v4334_v38  ;;  %v4761_v11 = vmax.f32 %v4561_v56, 0.0  ;;  %v4008_v39 = vmul.f32 %v9533_v23, %v11016_v61  ;;  %v11017_v56 = vld [vmem:[#allocation143_spill] sm:$0xff]  ;;  %v7697_v48 = vld [vmem:[%s10455_s4 + $0x8] sm:$0xff]  }
 0x699   : > { %v4556_v44 = vadd.f32 %v9982_v52, %v4555_v9  ;;  %v4374_v41 = vpack.c.bf16 %v4333_v40, %v4332_v36  ;;  %v4759_v31 = vmax.f32 %v4553_v55, 0.0  ;;  %v4139_v59 = vmul.f32 %v9541_v10, %v11017_v56  ;;  %v7696_v55 = vld [vmem:[%s10455_s4] sm:$0xff]   ;;  %v11025_v61 = vld [vmem:[#allocation147_spill] sm:$0xff] }
 0x69a   : > { %v4762_v7 = vmax.f32 %v4564_v14, 0.0  ;;  %v11018_v36 = vld [vmem:[#allocation145_spill] sm:$0xff]  ;;  %7432 = vmatprep.subr.bf16.mxu1 %v7696_v55 }
 0x69b   : > { %v4760_v33 = vmax.f32 %v4556_v44, 0.0  ;;  %7332 = vmatprep.mubr.bf16.mxu1 %v4374_v41  ;;  %v4142_v40 = vmul.f32 %v9541_v10, %v11018_v36  ;;  %7433 = vmatpush3.bf16.msra.mxu1 %v7696_v55  ;;  %v11027_v55 = vld [vmem:[#allocation154_spill] sm:$0xff] }
 0x69c   : > { %v4816_v4 = vpack.c.bf16 %v4762_v7, %v4761_v11  ;;  %7333 = vmatmul.mubr.bf16.gmra.mrb[172].mxu1 %v4375_v51  ;;  %v11019_v51 = vld [vmem:[#allocation56_spill] sm:$0xff]  ;;  %7434 = vmatprep.subr.bf16.mxu1 %v7697_v48 }
 0x69d   : > { %v4815_v25 = vpack.c.bf16 %v4760_v33, %v4759_v31  ;;  %v7310_v35 = vpop.f32.mrb[148].mxu1  ;;  %v4140_v44 = vmul.f32 %v9541_v10, %v11019_v51 }
 0x69e   : > { %v4577_v43 = vadd.f32 %v7310_v35, %v9982_v52  ;;  %v4568_v30 = vpop.f32.mrb[149].mxu1 }
 0x69f   : > { %v4569_v47 = vadd.f32 %v9982_v52, %v4568_v30  ;;  %v7311_v60 = vpop.f32.mrb[150].mxu1  ;;  %7384 = vmatprep.mubr.bf16.mxu0 %v4815_v25  ;;  %v7698_v25 = vld [vmem:[%s10455_s4 + $0x10] sm:$0xff]   ;;  %7435 = vmatpush3.bf16.msra.mxu1 %v7697_v48  ;;  %v4145_v48 = vmul.f32 %v9541_v10, %v11027_v55 }
 0x6a0   : > { %v4580_v26 = vadd.f32 %v7311_v60, %v9982_v52  ;;  %v4571_v37 = vpop.f32.mrb[151].mxu1  ;;  %7385 = vmatmul.mubr.bf16.gmra.mrb[208].mxu0 %v4816_v4  ;;  %v4765_v20 = vmax.f32 %v4577_v43, 0.0  ;;  %7436 = vmatprep.subr.bf16.mxu1 %v7698_v25 }
 0x6a1   : > { %v4572_v0 = vadd.f32 %v9982_v52, %v4571_v37  ;;  %v4763_v28 = vmax.f32 %v4569_v47, 0.0  ;;  %v7699_v37 = vld [vmem:[%s10455_s4 + $0x18] sm:$0xff]  }
 0x6a2   : > { %v4766_v32 = vmax.f32 %v4580_v26, 0.0 }
 0x6a3   : > { %v4764_v29 = vmax.f32 %v4572_v0, 0.0  ;;  %7437 = vmatpush3.bf16.msra.mxu1 %v7698_v25 }
 0x6a4   : > { %v4818_v62 = vpack.c.bf16 %v4766_v32, %v4765_v20  ;;  %7438 = vmatprep.subr.bf16.mxu1 %v7699_v37 }
 0x6a5   : > { %v4817_v3 = vpack.c.bf16 %v4764_v29, %v4763_v28 }
 0x6a7   : > { %7388 = vmatprep.mubr.bf16.mxu0 %v4817_v3  ;;  %7439 = vmatpush3.bf16.msra.mxu1 %v7699_v37 }
 0x6a8   : > { %7389 = vmatmul.mubr.bf16.gmra.mrb[212].mxu0 %v4818_v62 }
 0x6b0   : > { %v7258_v1 = vpop.f32.mrb[176].mxu0 }
 0x6b1   : > { %v3901_v45 = vadd.f32 %v7258_v1, %v3604_v58  ;;  %v3892_v53 = vpop.f32.mrb[177].mxu0 }
 0x6b2   : > { %v3893_v15 = vadd.f32 %v3892_v53, %v3602_v24  ;;  %v7259_v34 = vpop.f32.mrb[178].mxu0  ;;  %v11020_v53 = vld [vmem:[#allocation148_spill] sm:$0xff] }
 0x6b3   : > { %v4073_v13 = vadd.f32 %v4009_v19, %v3901_v45  ;;  %v3904_v50 = vadd.f32 %v7259_v34, %v3605_v21  ;;  %v3895_v8 = vpop.f32.mrb[179].mxu0  ;;  %v7700_v45 = vld [vmem:[%s10455_s4 + $0x20] sm:$0xff]   ;;  %v3608_v49 = vmul.f32 %v9537_v17, %v11020_v53  ;;  %v11022_v34 = vld [vmem:[#allocation152_spill] sm:$0xff] }
 0x6b4   : > { %v4071_v38 = vadd.f32 %v4007_v22, %v3893_v15  ;;  %v3896_v46 = vadd.f32 %v3895_v8, %v3603_v12  ;;  %7440 = vmatprep.subr.bf16.mxu1 %v7700_v45  ;;  %v11021_v12 = vld [vmem:[#allocation115_spill] sm:$0xff]  ;;  %v7701_v15 = vld [vmem:[%s10455_s4 + $0x28] sm:$0xff]   ;;  %v4013_v54 = vmul.f32 %v9533_v23, %v11022_v34 }
 0x6b5   : > { %v4205_v14 = vadd.f32 %v4141_v18, %v4073_v13  ;;  %v4074_v9 = vadd.f32 %v4010_v16, %v3904_v50  ;;  %7441 = vmatpush3.bf16.msra.mxu1 %v7700_v45  ;;  %v3606_v63 = vmul.f32 %v9537_v17, %v11021_v12  ;;  %v11023_v16 = vld [vmem:[#allocation149_spill] sm:$0xff]  ;;  %v11024_v50 = vld [vmem:[#allocation146_spill] sm:$0xff] }
 0x6b6   : > { %v4203_v41 = vadd.f32 %v4139_v59, %v4071_v38  ;;  %v4072_v11 = vadd.f32 %v4008_v39, %v3896_v46  ;;  %v3609_v42 = vmul.f32 %v9537_v17, %v11023_v16  ;;  %v3607_v8 = vmul.f32 %v9537_v17, %v11024_v50  ;;  %7442 = vmatprep.subr.bf16.mxu1 %v7701_v15  ;;  %v11026_v38 = vld [vmem:[#allocation151_spill] sm:$0xff] }
 0x6b7   : > { %v4206_v7 = vadd.f32 %v4142_v40, %v4074_v9  ;;  %v4274_v31 = vadd.f32 %v10029_v5, %v4205_v14  ;;  %v4011_v39 = vmul.f32 %v9533_v23, %v11025_v61  ;;  %v4014_v46 = vmul.f32 %v9533_v23, %v11026_v38  ;;  %v11028_v9 = vld [vmem:[#allocation59_spill] sm:$0xff] }
 0x6b8   : > { %v4204_v33 = vadd.f32 %v4140_v44, %v4072_v11  ;;  %v4272_v4 = vadd.f32 %v10029_v5, %v4203_v41  ;;  %v4143_v51 = vmul.f32 %v9541_v10, %v11028_v9  ;;  %v11029_v44 = vld [vmem:[#allocation150_spill] sm:$0xff]  ;;  %v11032_v16 = vld [vmem:[#allocation119_spill] sm:$0xff] }
 0x6b9   : > { %v4275_v35 = vadd.f32 %v10029_v5, %v4206_v7  ;;  %v4338_v30 = vmax.f32 %v4274_v31, 0.0  ;;  %7443 = vmatpush3.bf16.msra.mxu1 %v7701_v15  ;;  %v4012_v41 = vmul.f32 %v9533_v23, %v11029_v44  ;;  %v7702_v31 = vld [vmem:[%s10455_s4 + $0x30] sm:$0xff]   ;;  %v11039_v44 = vld [vmem:[#allocation162_spill] sm:$0xff] }
 0x6ba   : > { %v4273_v43 = vadd.f32 %v10029_v5, %v4204_v33  ;;  %v4336_v60 = vmax.f32 %v4272_v4, 0.0  ;;  %v11030_v33 = vld [vmem:[#allocation62_spill] sm:$0xff]  ;;  %7444 = vmatprep.subr.bf16.mxu1 %v7702_v31  ;;  %v11038_v9 = vld [vmem:[#allocation159_spill] sm:$0xff] }
 0x6bb   : > { %v4339_v47 = vmax.f32 %v4275_v35, 0.0  ;;  %v4146_v4 = vmul.f32 %v9541_v10, %v11030_v33  ;;  %v11040_v33 = vld [vmem:[#allocation157_spill] sm:$0xff] }
 0x6bc   : > { %v4337_v26 = vmax.f32 %v4273_v43, 0.0  ;;  %v11031_v43 = vld [vmem:[#allocation153_spill] sm:$0xff] }
 0x6bd   : > { %v4377_v0 = vpack.c.bf16 %v4339_v47, %v4338_v30  ;;  %v4144_v30 = vmul.f32 %v9541_v10, %v11031_v43  ;;  %7445 = vmatpush3.bf16.msra.mxu1 %v7702_v31 }
 0x6be   : > { %v4376_v20 = vpack.c.bf16 %v4337_v26, %v4336_v60 }
 0x6c0   : > { %7336 = vmatprep.mubr.bf16.mxu1 %v4376_v20 }
 0x6c1   : > { %7337 = vmatmul.mubr.bf16.gmra.mrb[176].mxu1 %v4377_v0 }
 0x6c2   : > { %v7314_v32 = vpop.f32.mrb[152].mxu1 }
 0x6c3   : > { %v4593_v28 = vadd.f32 %v7314_v32, %v9982_v52  ;;  %v4584_v29 = vpop.f32.mrb[153].mxu1  ;;  %v7703_v32 = vld [vmem:[%s10455_s4 + $0x38] sm:$0xff]  }
 0x6c4   : > { %v4585_v62 = vadd.f32 %v9982_v52, %v4584_v29  ;;  %v7315_v3 = vpop.f32.mrb[154].mxu1  ;;  %7446 = vmatprep.subr.bf16.mxu1 %v7703_v32 }
 0x6c5   : > { %v4596_v6 = vadd.f32 %v7315_v3, %v9982_v52  ;;  %v4587_v58 = vpop.f32.mrb[155].mxu1  ;;  %v4769_v24 = vmax.f32 %v4593_v28, 0.0  ;;  %7447 = vmatpush3.bf16.msra.mxu1 %v7703_v32 }
 0x6c6   : > { %v4588_v27 = vadd.f32 %v9982_v52, %v4587_v58  ;;  %v4767_v2 = vmax.f32 %v4585_v62, 0.0 }
 0x6c7   : > { %v4770_v1 = vmax.f32 %v4596_v6, 0.0 }
 0x6c8   : > { %v4768_v19 = vmax.f32 %v4588_v27, 0.0 }
 0x6c9   : > { %v4820_v57 = vpack.c.bf16 %v4770_v1, %v4769_v24 }
 0x6ca   : > { %v4819_v21 = vpack.c.bf16 %v4768_v19, %v4767_v2 }
 0x6cc   : > { %7392 = vmatprep.mubr.bf16.mxu0 %v4819_v21 }
 0x6cd   : > { %7393 = vmatmul.mubr.bf16.gmra.mrb[216].mxu0 %v4820_v57 }
 0x6d1   : > { %v7262_v22 = vpop.f32.mrb[180].mxu0 }
 0x6d2   : > { %v3917_v18 = vadd.f32 %v7262_v22, %v3608_v49  ;;  %v3908_v13 = vpop.f32.mrb[181].mxu0 }
 0x6d3   : > { %v3909_v56 = vadd.f32 %v3908_v13, %v3606_v63  ;;  %v7263_v59 = vpop.f32.mrb[182].mxu0 }
 0x6d4   : > { %v4077_v36 = vadd.f32 %v4013_v54, %v3917_v18  ;;  %v3920_v40 = vadd.f32 %v7263_v59, %v3609_v42  ;;  %v3911_v14 = vpop.f32.mrb[183].mxu0  ;;  %v3612_v42 = vmul.f32 %v9537_v17, %v11032_v16  ;;  %v11033_v18 = vld [vmem:[#allocation155_spill] sm:$0xff] }
 0x6d5   : > { %v4075_v11 = vadd.f32 %v4011_v39, %v3909_v56  ;;  %v3912_v7 = vadd.f32 %v3911_v14, %v3607_v8  ;;  %v3610_v13 = vmul.f32 %v9537_v17, %v11033_v18  ;;  %v11034_v8 = vld [vmem:[#allocation160_spill] sm:$0xff]  ;;  %v11035_v39 = vld [vmem:[#allocation158_spill] sm:$0xff] }
 0x6d6   : > { %v4209_v25 = vadd.f32 %v4145_v48, %v4077_v36  ;;  %v4078_v35 = vadd.f32 %v4014_v46, %v3920_v40  ;;  %v4017_v61 = vmul.f32 %v9533_v23, %v11034_v8  ;;  %v3613_v56 = vmul.f32 %v9537_v17, %v11035_v39  ;;  %v11036_v46 = vld [vmem:[#allocation117_spill] sm:$0xff]  ;;  %v11037_v48 = vld [vmem:[#allocation156_spill] sm:$0xff]  ;;  %v11044_v8 = vld [vmem:[#allocation167_spill] sm:$0xff] }
 0x6d7   : > { %v4207_v47 = vadd.f32 %v4143_v51, %v4075_v11  ;;  %v4076_v60 = vadd.f32 %v4012_v41, %v3912_v7  ;;  %v3611_v55 = vmul.f32 %v9537_v17, %v11036_v46  ;;  %v4015_v36 = vmul.f32 %v9533_v23, %v11037_v48  ;;  %v11045_v39 = vld [vmem:[#allocation122_spill] sm:$0xff] }
 0x6d8   : > { %v4210_v26 = vadd.f32 %v4146_v4, %v4078_v35  ;;  %v4278_v37 = vadd.f32 %v10029_v5, %v4209_v25  ;;  %v4018_v51 = vmul.f32 %v9533_v23, %v11038_v9  ;;  %v4149_v41 = vmul.f32 %v9541_v10, %v11039_v44  ;;  %v11041_v25 = vld [vmem:[#allocation161_spill] sm:$0xff] }
 0x6d9   : > { %v4208_v0 = vadd.f32 %v4144_v30, %v4076_v60  ;;  %v4276_v20 = vadd.f32 %v10029_v5, %v4207_v47  ;;  %v4016_v4 = vmul.f32 %v9533_v23, %v11040_v33  ;;  %v4147_v35 = vmul.f32 %v9541_v10, %v11041_v25  ;;  %v11042_v47 = vld [vmem:[#allocation163_spill] sm:$0xff]  ;;  %v11051_v33 = vld [vmem:[#allocation174_spill] sm:$0xff] }
 0x6da   : > { %v4279_v28 = vadd.f32 %v10029_v5, %v4210_v26  ;;  %v4342_v62 = vmax.f32 %v4278_v37, 0.0  ;;  %v4150_v60 = vmul.f32 %v9541_v10, %v11042_v47 }
 0x6db   : > { %v4277_v29 = vadd.f32 %v10029_v5, %v4208_v0  ;;  %v4340_v6 = vmax.f32 %v4276_v20, 0.0  ;;  %v11043_v0 = vld [vmem:[#allocation65_spill] sm:$0xff] }
 0x6dc   : > { %v4343_v3 = vmax.f32 %v4279_v28, 0.0  ;;  %v4148_v20 = vmul.f32 %v9541_v10, %v11043_v0  ;;  %v11054_v0 = vld [vmem:[#allocation172_spill] sm:$0xff] }
 0x6dd   : > { %v4341_v58 = vmax.f32 %v4277_v29, 0.0 }
 0x6de   : > { %v4379_v27 = vpack.c.bf16 %v4343_v3, %v4342_v62 }
 0x6df   : > { %v4378_v24 = vpack.c.bf16 %v4341_v58, %v4340_v6 }
 0x6e1   : > { %7340 = vmatprep.mubr.bf16.mxu1 %v4378_v24 }
 0x6e2   : > { %7341 = vmatmul.mubr.bf16.gmra.mrb[180].mxu1 %v4379_v27 }
 0x6e3   : > { %v7318_v1 = vpop.f32.mrb[156].mxu1 }
 0x6e4   : > { %v4609_v2 = vadd.f32 %v7318_v1, %v9982_v52  ;;  %v4600_v19 = vpop.f32.mrb[157].mxu1 }
 0x6e5   : > { %v4601_v57 = vadd.f32 %v9982_v52, %v4600_v19  ;;  %v7319_v21 = vpop.f32.mrb[158].mxu1 }
 0x6e6   : > { %v4612_v45 = vadd.f32 %v7319_v21, %v9982_v52  ;;  %v4603_v53 = vpop.f32.mrb[159].mxu1  ;;  %v4773_v12 = vmax.f32 %v4609_v2, 0.0 }
 0x6e7   : > { %v4604_v49 = vadd.f32 %v9982_v52, %v4603_v53  ;;  %v4771_v22 = vmax.f32 %v4601_v57, 0.0 }
 0x6e8   : > { %v4774_v63 = vmax.f32 %v4612_v45, 0.0 }
 0x6e9   : > { %v4772_v15 = vmax.f32 %v4604_v49, 0.0 }
 0x6ea   : > { %v4822_v34 = vpack.c.bf16 %v4774_v63, %v4773_v12 }
 0x6eb   : > { %v4821_v54 = vpack.c.bf16 %v4772_v15, %v4771_v22 }
 0x6ed   : > { %7396 = vmatprep.mubr.bf16.mxu0 %v4821_v54 }
 0x6ee   : > { %7397 = vmatmul.mubr.bf16.gmra.mrb[220].mxu0 %v4822_v34 }
 0x6f6   : > { %v7266_v50 = vpop.f32.mrb[184].mxu0 }
 0x6f7   : > { %v3933_v59 = vadd.f32 %v7266_v50, %v3612_v42  ;;  %v3924_v38 = vpop.f32.mrb[185].mxu0 }
 0x6f8   : > { %v3925_v40 = vadd.f32 %v3924_v38, %v3610_v13  ;;  %v7267_v14 = vpop.f32.mrb[186].mxu0  ;;  %v11046_v38 = vld [vmem:[#allocation168_spill] sm:$0xff] }
 0x6f9   : > { %v4081_v11 = vadd.f32 %v4017_v61, %v3933_v59  ;;  %v3936_v7 = vadd.f32 %v7267_v14, %v3613_v56  ;;  %v3927_v31 = vpop.f32.mrb[187].mxu0  ;;  %v3616_v61 = vmul.f32 %v9537_v17, %v11044_v8  ;;  %v3614_v56 = vmul.f32 %v9537_v17, %v11045_v39  ;;  %v11048_v14 = vld [vmem:[#allocation164_spill] sm:$0xff] }
 0x6fa   : > { %v4079_v43 = vadd.f32 %v4015_v36, %v3925_v40  ;;  %v3928_v30 = vadd.f32 %v3927_v31, %v3611_v55  ;;  %v4021_v46 = vmul.f32 %v9533_v23, %v11046_v38  ;;  %v11047_v55 = vld [vmem:[#allocation169_spill] sm:$0xff]  ;;  %v3615_v9 = vmul.f32 %v9537_v17, %v11048_v14 }
 0x6fb   : > { %v4213_v26 = vadd.f32 %v4149_v41, %v4081_v11  ;;  %v4082_v37 = vadd.f32 %v4018_v51, %v3936_v7  ;;  %v3617_v48 = vmul.f32 %v9537_v17, %v11047_v55  ;;  %v11049_v51 = vld [vmem:[#allocation165_spill] sm:$0xff]  ;;  %v11050_v7 = vld [vmem:[#allocation171_spill] sm:$0xff] }
 0x6fc   : > { %v4211_v32 = vadd.f32 %v4147_v35, %v4079_v43  ;;  %v4080_v28 = vadd.f32 %v4016_v4, %v3928_v30  ;;  %v4019_v44 = vmul.f32 %v9533_v23, %v11049_v51  ;;  %v4022_v31 = vmul.f32 %v9533_v23, %v11050_v7  ;;  %v11052_v30 = vld [vmem:[#allocation166_spill] sm:$0xff] }
 0x6fd   : > { %v4214_v29 = vadd.f32 %v4150_v60, %v4082_v37  ;;  %v4282_v62 = vadd.f32 %v10029_v5, %v4213_v26  ;;  %v4153_v4 = vmul.f32 %v9541_v10, %v11051_v33  ;;  %v4020_v47 = vmul.f32 %v9533_v23, %v11052_v30  ;;  %v11053_v60 = vld [vmem:[#allocation170_spill] sm:$0xff] }
 0x6fe   : > { %v4212_v3 = vadd.f32 %v4148_v20, %v4080_v28  ;;  %v4280_v6 = vadd.f32 %v10029_v5, %v4211_v32  ;;  %v4151_v17 = vmul.f32 %v9541_v10, %v11053_v60  ;;  %v4154_v20 = vmul.f32 %v9541_v10, %v11054_v0 }
 0x6ff   : > { %v4283_v58 = vadd.f32 %v10029_v5, %v4214_v29  ;;  %v4346_v24 = vmax.f32 %v4282_v62, 0.0  ;;  %v11055_v29 = vld [vmem:[#allocation173_spill] sm:$0xff] }
 0x700   : > { %v4281_v27 = vadd.f32 %v10029_v5, %v4212_v3  ;;  %v4344_v2 = vmax.f32 %v4280_v6, 0.0  ;;  %v4152_v62 = vmul.f32 %v9541_v10, %v11055_v29 }
 0x701   : > { %v4347_v1 = vmax.f32 %v4283_v58, 0.0 }
 0x702   : > { %v4345_v19 = vmax.f32 %v4281_v27, 0.0 }
 0x703   : > { %v4381_v57 = vpack.c.bf16 %v4347_v1, %v4346_v24 }
 0x704   : > { %v4380_v21 = vpack.c.bf16 %v4345_v19, %v4344_v2 }
 0x706   : > { %7344 = vmatprep.mubr.bf16.mxu1 %v4380_v21 }
 0x707   : > { %7345 = vmatmul.mubr.bf16.gmra.mrb[184].mxu1 %v4381_v57 }
 0x708   : > { %v7322_v45 = vpop.f32.mrb[160].mxu1 }
 0x709   : > { %v4625_v53 = vadd.f32 %v7322_v45, %v9982_v52  ;;  %v4616_v49 = vpop.f32.mrb[161].mxu1 }
 0x70a   : > { %v4617_v12 = vadd.f32 %v9982_v52, %v4616_v49  ;;  %v7323_v63 = vpop.f32.mrb[162].mxu1 }
 0x70b   : > { %v4628_v22 = vadd.f32 %v7323_v63, %v9982_v52  ;;  %v4619_v15 = vpop.f32.mrb[163].mxu1  ;;  %v4777_v54 = vmax.f32 %v4625_v53, 0.0 }
 0x70c   : > { %v4620_v34 = vadd.f32 %v9982_v52, %v4619_v15  ;;  %v4775_v42 = vmax.f32 %v4617_v12, 0.0 }
 0x70d   : > { %v4778_v16 = vmax.f32 %v4628_v22, 0.0 }
 0x70e   : > { %v4776_v18 = vmax.f32 %v4620_v34, 0.0 }
 0x70f   : > { %v4824_v13 = vpack.c.bf16 %v4778_v16, %v4777_v54 }
 0x710   : > { %v4823_v50 = vpack.c.bf16 %v4776_v18, %v4775_v42 }
 0x712   : > { %7400 = vmatprep.mubr.bf16.mxu0 %v4823_v50 }
 0x713   : > { %7401 = vmatmul.mubr.bf16.gmra.mrb[224].mxu0 %v4824_v13 }
 0x717   : > { %v7270_v59 = vpop.f32.mrb[188].mxu0 }
 0x718   : > { %v3949_v36 = vadd.f32 %v7270_v59, %v3616_v61  ;;  %v3940_v40 = vpop.f32.mrb[189].mxu0 }
 0x719   : > { %v3941_v41 = vadd.f32 %v3940_v40, %v3614_v56  ;;  %v7271_v11 = vpop.f32.mrb[190].mxu0 }
 0x71a   : > { %v4085_v25 = vadd.f32 %v4021_v46, %v3949_v36  ;;  %v3952_v35 = vadd.f32 %v7271_v11, %v3617_v48  ;;  %v3943_v43 = vpop.f32.mrb[191].mxu0  ;;  %v10201_v48 = vld [vmem:[%s10454_s3 + $0x7] ss:$0 sm:$0xff] }
 0x71b   : > { %v4083_v26 = vadd.f32 %v4019_v44, %v3941_v41  ;;  %v3944_v37 = vadd.f32 %v3943_v43, %v3615_v9 }
 0x71c   : > { %v4217_v32 = vadd.f32 %v4153_v4, %v4085_v25  ;;  %v4086_v28 = vadd.f32 %v4022_v31, %v3952_v35 }
 0x71d   : > { %v4215_v3 = vadd.f32 %v4151_v17, %v4083_v26  ;;  %v4084_v6 = vadd.f32 %v4020_v47, %v3944_v37 }
 0x71e   : > { %v4218_v58 = vadd.f32 %v4154_v20, %v4086_v28  ;;  %v4286_v27 = vadd.f32 %v10029_v5, %v4217_v32 }
 0x71f   : > { %v4216_v24 = vadd.f32 %v4152_v62, %v4084_v6  ;;  %v4284_v23 = vadd.f32 %v10029_v5, %v4215_v3 }
 0x720   : > { %v4287_v1 = vadd.f32 %v10029_v5, %v4218_v58  ;;  %v4350_v19 = vmax.f32 %v4286_v27, 0.0 }
 0x721   : > { %v4285_v2 = vadd.f32 %v10029_v5, %v4216_v24  ;;  %v4348_v21 = vmax.f32 %v4284_v23, 0.0 }
 0x722   : > { %v4351_v57 = vmax.f32 %v4287_v1, 0.0 }
 0x723   : > { %v4349_v45 = vmax.f32 %v4285_v2, 0.0 }
 0x724   : > { %v4383_v53 = vpack.c.bf16 %v4351_v57, %v4350_v19 }
 0x725   : > { %v4382_v49 = vpack.c.bf16 %v4349_v45, %v4348_v21 }
 0x727   : > { %7348 = vmatprep.mubr.bf16.mxu1 %v4382_v49 }
 0x728   : > { %7349 = vmatmul.mubr.bf16.gmra.mrb[188].mxu1 %v4383_v53 }
 0x729   : > { %v7326_v10 = vpop.f32.mrb[164].mxu1 }
 0x72a   : > { %v4641_v12 = vadd.f32 %v7326_v10, %v9982_v52  ;;  %v4632_v63 = vpop.f32.mrb[165].mxu1 }
 0x72b   : > { %v4633_v22 = vadd.f32 %v9982_v52, %v4632_v63  ;;  %v7327_v15 = vpop.f32.mrb[166].mxu1 }
 0x72c   : > { %v4644_v34 = vadd.f32 %v7327_v15, %v9982_v52  ;;  %v4635_v54 = vpop.f32.mrb[167].mxu1  ;;  %v4781_v16 = vmax.f32 %v4641_v12, 0.0 }
 0x72d   : > { %v4636_v5 = vadd.f32 %v9982_v52, %v4635_v54  ;;  %v4779_v18 = vmax.f32 %v4633_v22, 0.0 }
 0x72e   : > { %v4782_v42 = vmax.f32 %v4644_v34, 0.0 }
 0x72f   : > { %v4780_v13 = vmax.f32 %v4636_v5, 0.0 }
 0x730   : > { %v4826_v50 = vpack.c.bf16 %v4782_v42, %v4781_v16 }
 0x731   : > { %v4825_v8 = vpack.c.bf16 %v4780_v13, %v4779_v18 }
 0x733   : > { %7404 = vmatprep.mubr.bf16.mxu0 %v4825_v8 }
 0x734   : > { %7405 = vmatmul.mubr.bf16.gmra.mrb[228].mxu0 %v4826_v50 }
 0x74e   : > { %v7330_v61 = vpop.f32.mrb[168].mxu1 }
 0x74f   : > { %v4657_v39 = vadd.f32 %v7330_v61, %v9982_v52  ;;  %v4648_v56 = vpop.f32.mrb[169].mxu1 }
 0x750   : > { %v4649_v59 = vadd.f32 %v9982_v52, %v4648_v56  ;;  %v7331_v38 = vpop.f32.mrb[170].mxu1 }
 0x751   : > { %v4660_v46 = vadd.f32 %v7331_v38, %v9982_v52  ;;  %v4651_v55 = vpop.f32.mrb[171].mxu1  ;;  %v4785_v40 = vmax.f32 %v4657_v39, 0.0 }
 0x752   : > { %v4652_v36 = vadd.f32 %v9982_v52, %v4651_v55  ;;  %v4783_v51 = vmax.f32 %v4649_v59, 0.0 }
 0x753   : > { %v4786_v14 = vmax.f32 %v4660_v46, 0.0  ;;  %v7370_v9 = vpop.f32.mrb[192].mxu0 }
 0x754   : > { %v4784_v44 = vmax.f32 %v4652_v36, 0.0  ;;  %v4952_v41 = vadd.f32 %v7370_v9, %v10201_v48  ;;  %v4943_v11 = vpop.f32.mrb[193].mxu0 }
 0x755   : > { %v4828_v7 = vpack.c.bf16 %v4786_v14, %v4785_v40  ;;  %v4944_v31 = vadd.f32 %v10201_v48, %v4943_v11  ;;  %v7371_v33 = vpop.f32.mrb[194].mxu0 }
 0x756   : > { %v4827_v4 = vpack.c.bf16 %v4784_v44, %v4783_v51  ;;  %v4955_v25 = vadd.f32 %v7371_v33, %v10201_v48  ;;  %v4946_v35 = vpop.f32.mrb[195].mxu0  ;;  %v5200_v30 = vmax.f32 %v4952_v41, 0.0 }
 0x757   : > { %v4947_v43 = vadd.f32 %v10201_v48, %v4946_v35  ;;  %v5198_v60 = vmax.f32 %v4944_v31, 0.0 }
 0x758   : > { %v5201_v47 = vmax.f32 %v4955_v25, 0.0  ;;  %7408 = vmatprep.mubr.bf16.mxu0 %v4827_v4 }
 0x759   : > { %v5199_v17 = vmax.f32 %v4947_v43, 0.0  ;;  %7409 = vmatmul.mubr.bf16.gmra.mrb[232].mxu0 %v4828_v7 }
 0x75a   : > { %v5263_v26 = vpack.c.bf16 %v5201_v47, %v5200_v30 }
 0x75b   : > { %v5262_v37 = vpack.c.bf16 %v5199_v17, %v5198_v60  ;;  %v7374_v0 = vpop.f32.mrb[196].mxu0 }
 0x75c   : > { %v4968_v20 = vadd.f32 %v7374_v0, %v10201_v48  ;;  %v4959_v32 = vpop.f32.mrb[197].mxu0 }
 0x75d   : > { %v4960_v28 = vadd.f32 %v10201_v48, %v4959_v32  ;;  %v7375_v29 = vpop.f32.mrb[198].mxu0  ;;  %7448 = vmatprep.mubr.bf16.mxu1 %v5262_v37 }
 0x75e   : > { %v4971_v62 = vadd.f32 %v7375_v29, %v10201_v48  ;;  %v4962_v3 = vpop.f32.mrb[199].mxu0  ;;  %7449 = vmatmul.mubr.bf16.vlgmr.msra.gmra.mrb[192].mxu1 %v5263_v26  ;;  %v5204_v58 = vmax.f32 %v4968_v20, 0.0 }
 0x75f   : > { %v4963_v6 = vadd.f32 %v10201_v48, %v4962_v3  ;;  %v5202_v24 = vmax.f32 %v4960_v28, 0.0 }
 0x760   : > { %v5205_v27 = vmax.f32 %v4971_v62, 0.0 }
 0x761   : > { %v5203_v23 = vmax.f32 %v4963_v6, 0.0 }
 0x762   : > { %v5265_v1 = vpack.c.bf16 %v5205_v27, %v5204_v58 }
 0x763   : > { %v5264_v2 = vpack.c.bf16 %v5203_v23, %v5202_v24  ;;  %v7378_v19 = vpop.f32.mrb[200].mxu0 }
 0x764   : > { %v4984_v57 = vadd.f32 %v7378_v19, %v10201_v48  ;;  %v4975_v21 = vpop.f32.mrb[201].mxu0 }
 0x765   : > { %v4976_v45 = vadd.f32 %v10201_v48, %v4975_v21  ;;  %v7379_v53 = vpop.f32.mrb[202].mxu0  ;;  %7452 = vmatprep.mubr.bf16.mxu1 %v5264_v2 }
 0x766   : > { %v4987_v49 = vadd.f32 %v7379_v53, %v10201_v48  ;;  %v4978_v10 = vpop.f32.mrb[203].mxu0  ;;  %7453 = vmatmul.mubr.bf16.gmra.mrb[196].mxu1 %v5265_v1  ;;  %v5208_v63 = vmax.f32 %v4984_v57, 0.0 }
 0x767   : > { %v4979_v12 = vadd.f32 %v10201_v48, %v4978_v10  ;;  %v5206_v15 = vmax.f32 %v4976_v45, 0.0 }
 0x768   : > { %v5209_v22 = vmax.f32 %v4987_v49, 0.0 }
 0x769   : > { %v5207_v34 = vmax.f32 %v4979_v12, 0.0 }
 0x76a   : > { %v5267_v54 = vpack.c.bf16 %v5209_v22, %v5208_v63  ;;  %v10235_v63 = vld [vmem:[%s10454_s3 + $0x6] ss:$0 sm:$0xff] }
 0x76b   : > { %v5266_v5 = vpack.c.bf16 %v5207_v34, %v5206_v15  ;;  %v7382_v16 = vpop.f32.mrb[204].mxu0 }
 0x76c   : > { %v5000_v42 = vadd.f32 %v7382_v16, %v10201_v48  ;;  %v4991_v18 = vpop.f32.mrb[205].mxu0 }
 0x76d   : > { %v4992_v13 = vadd.f32 %v10201_v48, %v4991_v18  ;;  %v7383_v50 = vpop.f32.mrb[206].mxu0  ;;  %7456 = vmatprep.mubr.bf16.mxu1 %v5266_v5 }
 0x76e   : > { %v5003_v8 = vadd.f32 %v7383_v50, %v10201_v48  ;;  %v4994_v61 = vpop.f32.mrb[207].mxu0  ;;  %7457 = vmatmul.mubr.bf16.gmra.mrb[200].mxu1 %v5267_v54  ;;  %v5212_v59 = vmax.f32 %v5000_v42, 0.0 }
 0x76f   : > { %v4995_v39 = vadd.f32 %v10201_v48, %v4994_v61  ;;  %v7334_v56 = vpop.f32.mrb[172].mxu1  ;;  %v5210_v36 = vmax.f32 %v4992_v13, 0.0 }
 0x770   : > { %v5213_v38 = vmax.f32 %v5003_v8, 0.0  ;;  %v4673_v46 = vadd.f32 %v7334_v56, %v9982_v52  ;;  %v4664_v55 = vpop.f32.mrb[173].mxu1 }
 0x771   : > { %v5211_v40 = vmax.f32 %v4995_v39, 0.0  ;;  %v4665_v14 = vadd.f32 %v9982_v52, %v4664_v55  ;;  %v7335_v9 = vpop.f32.mrb[174].mxu1 }
 0x772   : > { %v5269_v51 = vpack.c.bf16 %v5213_v38, %v5212_v59  ;;  %v4676_v44 = vadd.f32 %v7335_v9, %v9982_v52  ;;  %v4667_v41 = vpop.f32.mrb[175].mxu1  ;;  %v4789_v33 = vmax.f32 %v4673_v46, 0.0 }
 0x773   : > { %v5268_v11 = vpack.c.bf16 %v5211_v40, %v5210_v36  ;;  %v4668_v7 = vadd.f32 %v9982_v52, %v4667_v41  ;;  %v7386_v31 = vpop.f32.mrb[208].mxu0  ;;  %v4787_v43 = vmax.f32 %v4665_v14, 0.0 }
 0x774   : > { %v4790_v4 = vmax.f32 %v4676_v44, 0.0  ;;  %v5016_v25 = vadd.f32 %v7386_v31, %v10201_v48  ;;  %v5007_v35 = vpop.f32.mrb[209].mxu0 }
 0x775   : > { %v4788_v30 = vmax.f32 %v4668_v7, 0.0  ;;  %v5008_v47 = vadd.f32 %v10201_v48, %v5007_v35  ;;  %v7387_v60 = vpop.f32.mrb[210].mxu0  ;;  %7460 = vmatprep.mubr.bf16.mxu1 %v5268_v11 }
 0x776   : > { %v4830_v17 = vpack.c.bf16 %v4790_v4, %v4789_v33  ;;  %v5019_v26 = vadd.f32 %v7387_v60, %v10201_v48  ;;  %v5010_v37 = vpop.f32.mrb[211].mxu0  ;;  %7461 = vmatmul.mubr.bf16.gmra.mrb[204].mxu1 %v5269_v51  ;;  %v5216_v20 = vmax.f32 %v5016_v25, 0.0 }
 0x777   : > { %v4829_v0 = vpack.c.bf16 %v4788_v30, %v4787_v43  ;;  %v5011_v52 = vadd.f32 %v10201_v48, %v5010_v37  ;;  %v5214_v28 = vmax.f32 %v5008_v47, 0.0 }
 0x778   : > { %v5217_v32 = vmax.f32 %v5019_v26, 0.0 }
 0x779   : > { %v5215_v29 = vmax.f32 %v5011_v52, 0.0  ;;  %7412 = vmatprep.mubr.bf16.mxu0 %v4829_v0 }
 0x77a   : > { %v5271_v62 = vpack.c.bf16 %v5217_v32, %v5216_v20  ;;  %7413 = vmatmul.mubr.bf16.gmra.mrb[236].mxu0 %v4830_v17 }
 0x77b   : > { %v5270_v3 = vpack.c.bf16 %v5215_v29, %v5214_v28  ;;  %v7390_v6 = vpop.f32.mrb[212].mxu0 }
 0x77c   : > { %v5032_v58 = vadd.f32 %v7390_v6, %v10201_v48  ;;  %v5023_v27 = vpop.f32.mrb[213].mxu0 }
 0x77d   : > { %v5024_v24 = vadd.f32 %v10201_v48, %v5023_v27  ;;  %v7391_v23 = vpop.f32.mrb[214].mxu0  ;;  %7464 = vmatprep.mubr.bf16.mxu1 %v5270_v3 }
 0x77e   : > { %v5035_v1 = vadd.f32 %v7391_v23, %v10201_v48  ;;  %v5026_v2 = vpop.f32.mrb[215].mxu0  ;;  %7465 = vmatmul.mubr.bf16.gmra.mrb[208].mxu1 %v5271_v62  ;;  %v5220_v57 = vmax.f32 %v5032_v58, 0.0 }
 0x77f   : > { %v5027_v19 = vadd.f32 %v10201_v48, %v5026_v2  ;;  %v5218_v45 = vmax.f32 %v5024_v24, 0.0 }
 0x780   : > { %v5221_v21 = vmax.f32 %v5035_v1, 0.0 }
 0x781   : > { %v5219_v53 = vmax.f32 %v5027_v19, 0.0 }
 0x782   : > { %v5273_v49 = vpack.c.bf16 %v5221_v21, %v5220_v57 }
 0x783   : > { %v5272_v10 = vpack.c.bf16 %v5219_v53, %v5218_v45 }
 0x785   : > { %7468 = vmatprep.mubr.bf16.mxu1 %v5272_v10 }
 0x786   : > { %7469 = vmatmul.mubr.bf16.gmra.mrb[212].mxu1 %v5273_v49 }
 0x794   : > { %v7338_v12 = vpop.f32.mrb[176].mxu1 }
 0x795   : > { %v4689_v22 = vadd.f32 %v10235_v63, %v7338_v12  ;;  %v4680_v15 = vpop.f32.mrb[177].mxu1 }
 0x796   : > { %v4681_v34 = vadd.f32 %v10235_v63, %v4680_v15  ;;  %v7339_v54 = vpop.f32.mrb[178].mxu1 }
 0x797   : > { %v4692_v5 = vadd.f32 %v10235_v63, %v7339_v54  ;;  %v4683_v16 = vpop.f32.mrb[179].mxu1  ;;  %v4793_v18 = vmax.f32 %v4689_v22, 0.0 }
 0x798   : > { %v4684_v42 = vadd.f32 %v10235_v63, %v4683_v16  ;;  %v4791_v50 = vmax.f32 %v4681_v34, 0.0 }
 0x799   : > { %v4794_v13 = vmax.f32 %v4692_v5, 0.0 }
 0x79a   : > { %v4792_v8 = vmax.f32 %v4684_v42, 0.0 }
 0x79b   : > { %v4832_v61 = vpack.c.bf16 %v4794_v13, %v4793_v18 }
 0x79c   : > { %v4831_v39 = vpack.c.bf16 %v4792_v8, %v4791_v50 }
 0x79e   : > { %7416 = vmatprep.mubr.bf16.mxu0 %v4831_v39 }
 0x79f   : > { %7417 = vmatmul.mubr.bf16.gmra.mrb[240].mxu0 %v4832_v61 }
 0x7a0   : > { %v7394_v56 = vpop.f32.mrb[216].mxu0 }
 0x7a1   : > { %v5048_v59 = vadd.f32 %v7394_v56, %v10201_v48  ;;  %v5039_v38 = vpop.f32.mrb[217].mxu0 }
 0x7a2   : > { %v5040_v46 = vadd.f32 %v10201_v48, %v5039_v38  ;;  %v7395_v55 = vpop.f32.mrb[218].mxu0 }
 0x7a3   : > { %v5051_v36 = vadd.f32 %v7395_v55, %v10201_v48  ;;  %v5042_v40 = vpop.f32.mrb[219].mxu0  ;;  %v5224_v9 = vmax.f32 %v5048_v59, 0.0 }
 0x7a4   : > { %v5043_v14 = vadd.f32 %v10201_v48, %v5042_v40  ;;  %v5222_v44 = vmax.f32 %v5040_v46, 0.0 }
 0x7a5   : > { %v5225_v51 = vmax.f32 %v5051_v36, 0.0 }
 0x7a6   : > { %v5223_v41 = vmax.f32 %v5043_v14, 0.0 }
 0x7a7   : > { %v5275_v11 = vpack.c.bf16 %v5225_v51, %v5224_v9 }
 0x7a8   : > { %v5274_v7 = vpack.c.bf16 %v5223_v41, %v5222_v44 }
 0x7aa   : > { %7472 = vmatprep.mubr.bf16.mxu1 %v5274_v7 }
 0x7ab   : > { %7473 = vmatmul.mubr.bf16.gmra.mrb[216].mxu1 %v5275_v11 }
 0x7b5   : > { %v7342_v31 = vpop.f32.mrb[180].mxu1 }
 0x7b6   : > { %v4705_v33 = vadd.f32 %v10235_v63, %v7342_v31  ;;  %v4696_v4 = vpop.f32.mrb[181].mxu1 }
 0x7b7   : > { %v4697_v25 = vadd.f32 %v10235_v63, %v4696_v4  ;;  %v7343_v35 = vpop.f32.mrb[182].mxu1 }
 0x7b8   : > { %v4708_v43 = vadd.f32 %v10235_v63, %v7343_v35  ;;  %v4699_v30 = vpop.f32.mrb[183].mxu1  ;;  %v4797_v60 = vmax.f32 %v4705_v33, 0.0 }
 0x7b9   : > { %v4700_v47 = vadd.f32 %v10235_v63, %v4699_v30  ;;  %v4795_v26 = vmax.f32 %v4697_v25, 0.0 }
 0x7ba   : > { %v4798_v17 = vmax.f32 %v4708_v43, 0.0 }
 0x7bb   : > { %v4796_v37 = vmax.f32 %v4700_v47, 0.0 }
 0x7bc   : > { %v4834_v0 = vpack.c.bf16 %v4798_v17, %v4797_v60 }
 0x7bd   : > { %v4833_v52 = vpack.c.bf16 %v4796_v37, %v4795_v26 }
 0x7bf   : > { %7420 = vmatprep.mubr.bf16.mxu0 %v4833_v52 }
 0x7c0   : > { %7421 = vmatmul.mubr.bf16.gmra.mrb[244].mxu0 %v4834_v0 }
 0x7c1   : > { %v7398_v20 = vpop.f32.mrb[220].mxu0 }
 0x7c2   : > { %v5064_v32 = vadd.f32 %v7398_v20, %v10201_v48  ;;  %v5055_v28 = vpop.f32.mrb[221].mxu0 }
 0x7c3   : > { %v5056_v29 = vadd.f32 %v10201_v48, %v5055_v28  ;;  %v7399_v62 = vpop.f32.mrb[222].mxu0 }
 0x7c4   : > { %v5067_v3 = vadd.f32 %v7399_v62, %v10201_v48  ;;  %v5058_v6 = vpop.f32.mrb[223].mxu0  ;;  %v5228_v27 = vmax.f32 %v5064_v32, 0.0 }
 0x7c5   : > { %v5059_v58 = vadd.f32 %v10201_v48, %v5058_v6  ;;  %v5226_v23 = vmax.f32 %v5056_v29, 0.0 }
 0x7c6   : > { %v5229_v24 = vmax.f32 %v5067_v3, 0.0 }
 0x7c7   : > { %v5227_v1 = vmax.f32 %v5059_v58, 0.0 }
 0x7c8   : > { %v5277_v2 = vpack.c.bf16 %v5229_v24, %v5228_v27 }
 0x7c9   : > { %v5276_v19 = vpack.c.bf16 %v5227_v1, %v5226_v23 }
 0x7cb   : > { %7476 = vmatprep.mubr.bf16.mxu1 %v5276_v19 }
 0x7cc   : > { %7477 = vmatmul.mubr.bf16.gmra.mrb[220].mxu1 %v5277_v2 }
 0x7da   : > { %v7346_v57 = vpop.f32.mrb[184].mxu1 }
 0x7db   : > { %v4721_v21 = vadd.f32 %v10235_v63, %v7346_v57  ;;  %v4712_v45 = vpop.f32.mrb[185].mxu1 }
 0x7dc   : > { %v4713_v53 = vadd.f32 %v10235_v63, %v4712_v45  ;;  %v7347_v49 = vpop.f32.mrb[186].mxu1 }
 0x7dd   : > { %v4724_v10 = vadd.f32 %v10235_v63, %v7347_v49  ;;  %v4715_v12 = vpop.f32.mrb[187].mxu1  ;;  %v4801_v15 = vmax.f32 %v4721_v21, 0.0  ;;  %v10277_v49 = vld [vmem:[%s10456_s5] ss:$0 sm:$0xff] }
 0x7de   : > { %v4716_v22 = vadd.f32 %v10235_v63, %v4715_v12  ;;  %v4799_v54 = vmax.f32 %v4713_v53, 0.0 }
 0x7df   : > { %v4802_v34 = vmax.f32 %v4724_v10, 0.0 }
 0x7e0   : > { %v4800_v5 = vmax.f32 %v4716_v22, 0.0 }
 0x7e1   : > { %v4836_v16 = vpack.c.bf16 %v4802_v34, %v4801_v15 }
 0x7e2   : > { %v4835_v42 = vpack.c.bf16 %v4800_v5, %v4799_v54 }
 0x7e4   : > { %7424 = vmatprep.mubr.bf16.mxu0 %v4835_v42 }
 0x7e5   : > { %7425 = vmatmul.mubr.bf16.gmra.mrb[248].mxu0 %v4836_v16 }
 0x7e6   : > { %v7402_v18 = vpop.f32.mrb[224].mxu0 }
 0x7e7   : > { %v5080_v13 = vadd.f32 %v7402_v18, %v10201_v48  ;;  %v5071_v50 = vpop.f32.mrb[225].mxu0 }
 0x7e8   : > { %v5072_v8 = vadd.f32 %v10201_v48, %v5071_v50  ;;  %v7403_v61 = vpop.f32.mrb[226].mxu0 }
 0x7e9   : > { %v5083_v39 = vadd.f32 %v7403_v61, %v10201_v48  ;;  %v5074_v56 = vpop.f32.mrb[227].mxu0  ;;  %v5232_v38 = vmax.f32 %v5080_v13, 0.0 }
 0x7ea   : > { %v5075_v59 = vadd.f32 %v10201_v48, %v5074_v56  ;;  %v5230_v55 = vmax.f32 %v5072_v8, 0.0 }
 0x7eb   : > { %v5233_v46 = vmax.f32 %v5083_v39, 0.0 }
 0x7ec   : > { %v5231_v36 = vmax.f32 %v5075_v59, 0.0 }
 0x7ed   : > { %v5279_v40 = vpack.c.bf16 %v5233_v46, %v5232_v38 }
 0x7ee   : > { %v5278_v14 = vpack.c.bf16 %v5231_v36, %v5230_v55 }
 0x7f0   : > { %7480 = vmatprep.mubr.bf16.mxu1 %v5278_v14 }
 0x7f1   : > { %7481 = vmatmul.mubr.bf16.gmra.mrb[224].mxu1 %v5279_v40 }
 0x7fb   : > { %v7350_v9 = vpop.f32.mrb[188].mxu1 }
 0x7fc   : > { %v4737_v51 = vadd.f32 %v10235_v63, %v7350_v9  ;;  %v4728_v44 = vpop.f32.mrb[189].mxu1 }
 0x7fd   : > { %v4729_v41 = vadd.f32 %v10235_v63, %v4728_v44  ;;  %v7351_v11 = vpop.f32.mrb[190].mxu1 }
 0x7fe   : > { %v4740_v7 = vadd.f32 %v10235_v63, %v7351_v11  ;;  %v4731_v31 = vpop.f32.mrb[191].mxu1  ;;  %v4805_v4 = vmax.f32 %v4737_v51, 0.0 }
 0x7ff   : > { %v4732_v33 = vadd.f32 %v10235_v63, %v4731_v31  ;;  %v4803_v35 = vmax.f32 %v4729_v41, 0.0 }
 0x800   : > { %v4806_v25 = vmax.f32 %v4740_v7, 0.0 }
 0x801   : > { %v4804_v43 = vmax.f32 %v4732_v33, 0.0 }
 0x802   : > { %v4838_v30 = vpack.c.bf16 %v4806_v25, %v4805_v4 }
 0x803   : > { %v4837_v47 = vpack.c.bf16 %v4804_v43, %v4803_v35 }
 0x805   : > { %7428 = vmatprep.mubr.bf16.mxu0 %v4837_v47 }
 0x806   : > { %7429 = vmatmul.mubr.bf16.gmra.mrb[252].mxu0 %v4838_v30 }
 0x807   : > { %v7406_v60 = vpop.f32.mrb[228].mxu0 }
 0x808   : > { %v5096_v17 = vadd.f32 %v7406_v60, %v10201_v48  ;;  %v5087_v26 = vpop.f32.mrb[229].mxu0 }
 0x809   : > { %v5088_v37 = vadd.f32 %v10201_v48, %v5087_v26  ;;  %v7407_v0 = vpop.f32.mrb[230].mxu0 }
 0x80a   : > { %v5099_v52 = vadd.f32 %v7407_v0, %v10201_v48  ;;  %v5090_v20 = vpop.f32.mrb[231].mxu0  ;;  %v5236_v32 = vmax.f32 %v5096_v17, 0.0 }
 0x80b   : > { %v5091_v63 = vadd.f32 %v10201_v48, %v5090_v20  ;;  %v5234_v29 = vmax.f32 %v5088_v37, 0.0 }
 0x80c   : > { %v5237_v28 = vmax.f32 %v5099_v52, 0.0 }
 0x80d   : > { %v5235_v62 = vmax.f32 %v5091_v63, 0.0 }
 0x80e   : > { %v5281_v3 = vpack.c.bf16 %v5237_v28, %v5236_v32 }
 0x80f   : > { %v5280_v6 = vpack.c.bf16 %v5235_v62, %v5234_v29 }
 0x811   : > { %7484 = vmatprep.mubr.bf16.mxu1 %v5280_v6 }
 0x812   : > { %7485 = vmatmul.mubr.bf16.gmra.mrb[228].mxu1 %v5281_v3 }
 0x82c   : > { %v7410_v58 = vpop.f32.mrb[232].mxu0 }
 0x82d   : > { %v5112_v27 = vadd.f32 %v7410_v58, %v10201_v48  ;;  %v5103_v24 = vpop.f32.mrb[233].mxu0 }
 0x82e   : > { %v5104_v23 = vadd.f32 %v10201_v48, %v5103_v24  ;;  %v7411_v1 = vpop.f32.mrb[234].mxu0 }
 0x82f   : > { %v5115_v2 = vadd.f32 %v7411_v1, %v10201_v48  ;;  %v5106_v19 = vpop.f32.mrb[235].mxu0  ;;  %v5240_v21 = vmax.f32 %v5112_v27, 0.0 }
 0x830   : > { %v5107_v57 = vadd.f32 %v10201_v48, %v5106_v19  ;;  %v5238_v10 = vmax.f32 %v5104_v23, 0.0 }
 0x831   : > { %v5241_v45 = vmax.f32 %v5115_v2, 0.0  ;;  %v7450_v53 = vpop.f32.mrb[192].mxu1 }
 0x832   : > { %v5239_v12 = vmax.f32 %v5107_v57, 0.0  ;;  %v5399_v22 = vpop.f32.mrb[193].mxu1  ;;  %v5408_v5 = vadd.f32 %v7450_v53, %v10277_v49 }
 0x833   : > { %v5283_v15 = vpack.c.bf16 %v5241_v45, %v5240_v21  ;;  %v7451_v34 = vpop.f32.mrb[194].mxu1  ;;  %v5400_v18 = vadd.f32 %v10277_v49, %v5399_v22 }
 0x834   : > { %v5282_v54 = vpack.c.bf16 %v5239_v12, %v5238_v10  ;;  %v5411_v16 = vadd.f32 %v7451_v34, %v10277_v49  ;;  %v5402_v42 = vpop.f32.mrb[195].mxu1 }
 0x835   : > { %v5403_v13 = vadd.f32 %v10277_v49, %v5402_v42 }
 0x836   : > { %v6369_v50 = vpack.c.bf16 %v5411_v16, %v5408_v5  ;;  %7488 = vmatprep.mubr.bf16.mxu1 %v5282_v54 }
 0x837   : > { %v6364_v8 = vpack.c.bf16 %v5403_v13, %v5400_v18  ;;  %7489 = vmatmul.mubr.bf16.gmra.mrb[232].mxu1 %v5283_v15 }
 0x838   : > { %6521 = vst [vmem:[%s10285_s17 + $0x8] sm:$0xff] %v6369_v50  }
 0x839   : > { %6365 = vst [vmem:[%s10285_s17] sm:$0xff] %v6364_v8   ;;  %v7454_v61 = vpop.f32.mrb[196].mxu1 }
 0x83a   : > { %v5415_v39 = vpop.f32.mrb[197].mxu1  ;;  %v5424_v59 = vadd.f32 %v7454_v61, %v10277_v49 }
 0x83b   : > { %v7455_v56 = vpop.f32.mrb[198].mxu1  ;;  %v5416_v55 = vadd.f32 %v10277_v49, %v5415_v39 }
 0x83c   : > { %v5427_v38 = vadd.f32 %v7455_v56, %v10277_v49  ;;  %v5418_v46 = vpop.f32.mrb[199].mxu1 }
 0x83d   : > { %v5419_v36 = vadd.f32 %v10277_v49, %v5418_v46 }
 0x83e   : > { %v6379_v40 = vpack.c.bf16 %v5427_v38, %v5424_v59 }
 0x83f   : > { %v6374_v14 = vpack.c.bf16 %v5419_v36, %v5416_v55 }
 0x840   : > { %6523 = vst [vmem:[%s10285_s17 + $0x18] sm:$0xff] %v6379_v40  }
 0x841   : > { %6522 = vst [vmem:[%s10285_s17 + $0x10] sm:$0xff] %v6374_v14   ;;  %v7458_v9 = vpop.f32.mrb[200].mxu1 }
 0x842   : > { %v5431_v51 = vpop.f32.mrb[201].mxu1  ;;  %v5440_v41 = vadd.f32 %v7458_v9, %v10277_v49 }
 0x843   : > { %v7459_v44 = vpop.f32.mrb[202].mxu1  ;;  %v5432_v31 = vadd.f32 %v10277_v49, %v5431_v51 }
 0x844   : > { %v5443_v11 = vadd.f32 %v7459_v44, %v10277_v49  ;;  %v5434_v7 = vpop.f32.mrb[203].mxu1 }
 0x845   : > { %v5435_v33 = vadd.f32 %v10277_v49, %v5434_v7 }
 0x846   : > { %v6389_v4 = vpack.c.bf16 %v5443_v11, %v5440_v41 }
 0x847   : > { %v6384_v25 = vpack.c.bf16 %v5435_v33, %v5432_v31 }
 0x848   : > { %6525 = vst [vmem:[%s10285_s17 + $0x28] sm:$0xff] %v6389_v4  }
 0x849   : > { %6524 = vst [vmem:[%s10285_s17 + $0x20] sm:$0xff] %v6384_v25   ;;  %v7462_v35 = vpop.f32.mrb[204].mxu1 }
 0x84a   : > { %v5447_v43 = vpop.f32.mrb[205].mxu1  ;;  %v5456_v47 = vadd.f32 %v7462_v35, %v10277_v49 }
 0x84b   : > { %v7463_v30 = vpop.f32.mrb[206].mxu1  ;;  %v5448_v26 = vadd.f32 %v10277_v49, %v5447_v43 }
 0x84c   : > { %v5459_v60 = vadd.f32 %v7463_v30, %v10277_v49  ;;  %v5450_v17 = vpop.f32.mrb[207].mxu1 }
 0x84d   : > { %v5451_v37 = vadd.f32 %v10277_v49, %v5450_v17  ;;  %v7414_v0 = vpop.f32.mrb[236].mxu0 }
 0x84e   : > { %v6399_v52 = vpack.c.bf16 %v5459_v60, %v5456_v47  ;;  %v5128_v20 = vadd.f32 %v7414_v0, %v10201_v48  ;;  %v5119_v63 = vpop.f32.mrb[237].mxu0 }
 0x84f   : > { %v6394_v32 = vpack.c.bf16 %v5451_v37, %v5448_v26  ;;  %v5120_v28 = vadd.f32 %v10201_v48, %v5119_v63  ;;  %v7415_v29 = vpop.f32.mrb[238].mxu0 }
 0x850   : > { %6527 = vst [vmem:[%s10285_s17 + $0x38] sm:$0xff] %v6399_v52   ;;  %v5131_v62 = vadd.f32 %v7415_v29, %v10201_v48  ;;  %v5122_v3 = vpop.f32.mrb[239].mxu0  ;;  %v5244_v27 = vmax.f32 %v5128_v20, 0.0 }
 0x851   : > { %6526 = vst [vmem:[%s10285_s17 + $0x30] sm:$0xff] %v6394_v32   ;;  %v5123_v6 = vadd.f32 %v10201_v48, %v5122_v3  ;;  %v7466_v58 = vpop.f32.mrb[208].mxu1  ;;  %v5242_v1 = vmax.f32 %v5120_v28, 0.0 }
 0x852   : > { %v5245_v24 = vmax.f32 %v5131_v62, 0.0  ;;  %v5463_v23 = vpop.f32.mrb[209].mxu1  ;;  %v5472_v21 = vadd.f32 %v7466_v58, %v10277_v49 }
 0x853   : > { %v5243_v2 = vmax.f32 %v5123_v6, 0.0  ;;  %v7467_v19 = vpop.f32.mrb[210].mxu1  ;;  %v5464_v12 = vadd.f32 %v10277_v49, %v5463_v23 }
 0x854   : > { %v5285_v57 = vpack.c.bf16 %v5245_v24, %v5244_v27  ;;  %v5475_v45 = vadd.f32 %v7467_v19, %v10277_v49  ;;  %v5466_v53 = vpop.f32.mrb[211].mxu1 }
 0x855   : > { %v5284_v10 = vpack.c.bf16 %v5243_v2, %v5242_v1  ;;  %v5467_v22 = vadd.f32 %v10277_v49, %v5466_v53 }
 0x856   : > { %v6409_v15 = vpack.c.bf16 %v5475_v45, %v5472_v21 }
 0x857   : > { %v6404_v34 = vpack.c.bf16 %v5467_v22, %v5464_v12  ;;  %7492 = vmatprep.mubr.bf16.mxu1 %v5284_v10 }
 0x858   : > { %6529 = vst [vmem:[%s10285_s17 + $0x48] sm:$0xff] %v6409_v15   ;;  %7493 = vmatmul.mubr.bf16.gmra.mrb[236].mxu1 %v5285_v57 }
 0x859   : > { %6528 = vst [vmem:[%s10285_s17 + $0x40] sm:$0xff] %v6404_v34   ;;  %v7470_v54 = vpop.f32.mrb[212].mxu1 }
 0x85a   : > { %v5479_v5 = vpop.f32.mrb[213].mxu1  ;;  %v5488_v42 = vadd.f32 %v7470_v54, %v10277_v49 }
 0x85b   : > { %v7471_v16 = vpop.f32.mrb[214].mxu1  ;;  %v5480_v50 = vadd.f32 %v10277_v49, %v5479_v5 }
 0x85c   : > { %v5491_v18 = vadd.f32 %v7471_v16, %v10277_v49  ;;  %v5482_v13 = vpop.f32.mrb[215].mxu1 }
 0x85d   : > { %v5483_v8 = vadd.f32 %v10277_v49, %v5482_v13 }
 0x85e   : > { %v6419_v61 = vpack.c.bf16 %v5491_v18, %v5488_v42 }
 0x85f   : > { %v6414_v39 = vpack.c.bf16 %v5483_v8, %v5480_v50 }
 0x860   : > { %6531 = vst [vmem:[%s10285_s17 + $0x58] sm:$0xff] %v6419_v61  }
 0x861   : > { %6530 = vst [vmem:[%s10285_s17 + $0x50] sm:$0xff] %v6414_v39  }
 0x872   : > { %v7418_v56 = vpop.f32.mrb[240].mxu0 }
 0x873   : > { %v5144_v59 = vadd.f32 %v7418_v56, %v10201_v48  ;;  %v5135_v38 = vpop.f32.mrb[241].mxu0 }
 0x874   : > { %v5136_v46 = vadd.f32 %v10201_v48, %v5135_v38  ;;  %v7419_v55 = vpop.f32.mrb[242].mxu0 }
 0x875   : > { %v5147_v36 = vadd.f32 %v7419_v55, %v10201_v48  ;;  %v5138_v40 = vpop.f32.mrb[243].mxu0  ;;  %v5248_v9 = vmax.f32 %v5144_v59, 0.0 }
 0x876   : > { %v5139_v14 = vadd.f32 %v10201_v48, %v5138_v40  ;;  %v5246_v44 = vmax.f32 %v5136_v46, 0.0 }
 0x877   : > { %v5249_v51 = vmax.f32 %v5147_v36, 0.0 }
 0x878   : > { %v5247_v41 = vmax.f32 %v5139_v14, 0.0 }
 0x879   : > { %v5287_v11 = vpack.c.bf16 %v5249_v51, %v5248_v9 }
 0x87a   : > { %v5286_v7 = vpack.c.bf16 %v5247_v41, %v5246_v44 }
 0x87c   : > { %7496 = vmatprep.mubr.bf16.mxu1 %v5286_v7 }
 0x87d   : > { %7497 = vmatmul.mubr.bf16.gmra.mrb[240].mxu1 %v5287_v11 }
 0x87e   : > { %v7474_v31 = vpop.f32.mrb[216].mxu1 }
 0x87f   : > { %v5495_v33 = vpop.f32.mrb[217].mxu1  ;;  %v5504_v25 = vadd.f32 %v7474_v31, %v10277_v49 }
 0x880   : > { %v7475_v4 = vpop.f32.mrb[218].mxu1  ;;  %v5496_v30 = vadd.f32 %v10277_v49, %v5495_v33 }
 0x881   : > { %v5507_v35 = vadd.f32 %v7475_v4, %v10277_v49  ;;  %v5498_v43 = vpop.f32.mrb[219].mxu1 }
 0x882   : > { %v5499_v47 = vadd.f32 %v10277_v49, %v5498_v43 }
 0x883   : > { %v6429_v60 = vpack.c.bf16 %v5507_v35, %v5504_v25 }
 0x884   : > { %v6424_v17 = vpack.c.bf16 %v5499_v47, %v5496_v30 }
 0x885   : > { %6533 = vst [vmem:[%s10285_s17 + $0x68] sm:$0xff] %v6429_v60  }
 0x886   : > { %6532 = vst [vmem:[%s10285_s17 + $0x60] sm:$0xff] %v6424_v17  }
 0x893   : > { %v7422_v26 = vpop.f32.mrb[244].mxu0 }
 0x894   : > { %v5160_v37 = vadd.f32 %v7422_v26, %v10201_v48  ;;  %v5151_v0 = vpop.f32.mrb[245].mxu0 }
 0x895   : > { %v5152_v52 = vadd.f32 %v10201_v48, %v5151_v0  ;;  %v7423_v20 = vpop.f32.mrb[246].mxu0 }
 0x896   : > { %v5163_v63 = vadd.f32 %v7423_v20, %v10201_v48  ;;  %v5154_v32 = vpop.f32.mrb[247].mxu0  ;;  %v5252_v29 = vmax.f32 %v5160_v37, 0.0 }
 0x897   : > { %v5155_v28 = vadd.f32 %v10201_v48, %v5154_v32  ;;  %v5250_v3 = vmax.f32 %v5152_v52, 0.0 }
 0x898   : > { %v5253_v62 = vmax.f32 %v5163_v63, 0.0 }
 0x899   : > { %v5251_v6 = vmax.f32 %v5155_v28, 0.0 }
 0x89a   : > { %v5289_v58 = vpack.c.bf16 %v5253_v62, %v5252_v29 }
 0x89b   : > { %v5288_v27 = vpack.c.bf16 %v5251_v6, %v5250_v3 }
 0x89d   : > { %7500 = vmatprep.mubr.bf16.mxu1 %v5288_v27 }
 0x89e   : > { %7501 = vmatmul.mubr.bf16.gmra.mrb[244].mxu1 %v5289_v58 }
 0x89f   : > { %v7478_v24 = vpop.f32.mrb[220].mxu1 }
 0x8a0   : > { %v5511_v23 = vpop.f32.mrb[221].mxu1  ;;  %v5520_v2 = vadd.f32 %v7478_v24, %v10277_v49 }
 0x8a1   : > { %v7479_v1 = vpop.f32.mrb[222].mxu1  ;;  %v5512_v21 = vadd.f32 %v10277_v49, %v5511_v23 }
 0x8a2   : > { %v5523_v19 = vadd.f32 %v7479_v1, %v10277_v49  ;;  %v5514_v57 = vpop.f32.mrb[223].mxu1 }
 0x8a3   : > { %v5515_v45 = vadd.f32 %v10277_v49, %v5514_v57 }
 0x8a4   : > { %v6439_v53 = vpack.c.bf16 %v5523_v19, %v5520_v2 }
 0x8a5   : > { %v6434_v10 = vpack.c.bf16 %v5515_v45, %v5512_v21 }
 0x8a6   : > { %6535 = vst [vmem:[%s10285_s17 + $0x78] sm:$0xff] %v6439_v53  }
 0x8a7   : > { %6534 = vst [vmem:[%s10285_s17 + $0x70] sm:$0xff] %v6434_v10  }
 0x8b8   : > { %v7426_v12 = vpop.f32.mrb[248].mxu0 }
 0x8b9   : > { %v5176_v22 = vadd.f32 %v7426_v12, %v10201_v48  ;;  %v5167_v15 = vpop.f32.mrb[249].mxu0 }
 0x8ba   : > { %v5168_v34 = vadd.f32 %v10201_v48, %v5167_v15  ;;  %v7427_v54 = vpop.f32.mrb[250].mxu0 }
 0x8bb   : > { %v5179_v5 = vadd.f32 %v7427_v54, %v10201_v48  ;;  %v5170_v16 = vpop.f32.mrb[251].mxu0  ;;  %v5256_v18 = vmax.f32 %v5176_v22, 0.0 }
 0x8bc   : > { %v5171_v42 = vadd.f32 %v10201_v48, %v5170_v16  ;;  %v5254_v50 = vmax.f32 %v5168_v34, 0.0 }
 0x8bd   : > { %v5257_v13 = vmax.f32 %v5179_v5, 0.0 }
 0x8be   : > { %v5255_v8 = vmax.f32 %v5171_v42, 0.0 }
 0x8bf   : > { %v5291_v61 = vpack.c.bf16 %v5257_v13, %v5256_v18 }
 0x8c0   : > { %v5290_v39 = vpack.c.bf16 %v5255_v8, %v5254_v50 }
 0x8c2   : > { %7504 = vmatprep.mubr.bf16.mxu1 %v5290_v39 }
 0x8c3   : > { %7505 = vmatmul.mubr.bf16.gmra.mrb[248].mxu1 %v5291_v61 }
 0x8c4   : > { %v7482_v56 = vpop.f32.mrb[224].mxu1 }
 0x8c5   : > { %v5527_v59 = vpop.f32.mrb[225].mxu1  ;;  %v5536_v46 = vadd.f32 %v7482_v56, %v10277_v49 }
 0x8c6   : > { %v7483_v38 = vpop.f32.mrb[226].mxu1  ;;  %v5528_v40 = vadd.f32 %v10277_v49, %v5527_v59 }
 0x8c7   : > { %v5539_v55 = vadd.f32 %v7483_v38, %v10277_v49  ;;  %v5530_v36 = vpop.f32.mrb[227].mxu1 }
 0x8c8   : > { %v5531_v14 = vadd.f32 %v10277_v49, %v5530_v36 }
 0x8c9   : > { %v6449_v9 = vpack.c.bf16 %v5539_v55, %v5536_v46 }
 0x8ca   : > { %v6444_v51 = vpack.c.bf16 %v5531_v14, %v5528_v40 }
 0x8cb   : > { %6537 = vst [vmem:[%s10285_s17 + $0x88] sm:$0xff] %v6449_v9  }
 0x8cc   : > { %6536 = vst [vmem:[%s10285_s17 + $0x80] sm:$0xff] %v6444_v51  }
 0x8d9   : > { %v7430_v44 = vpop.f32.mrb[252].mxu0 }
 0x8da   : > { %v5192_v41 = vadd.f32 %v7430_v44, %v10201_v48  ;;  %v5183_v11 = vpop.f32.mrb[253].mxu0 }
 0x8db   : > { %v5184_v7 = vadd.f32 %v10201_v48, %v5183_v11  ;;  %v7431_v31 = vpop.f32.mrb[254].mxu0 }
 0x8dc   : > { %v5195_v33 = vadd.f32 %v7431_v31, %v10201_v48  ;;  %v5186_v4 = vpop.f32.mrb[255].mxu0  ;;  %v5260_v35 = vmax.f32 %v5192_v41, 0.0 }
 0x8dd   : > { %v5187_v25 = vadd.f32 %v10201_v48, %v5186_v4  ;;  %v5258_v30 = vmax.f32 %v5184_v7, 0.0 }
 0x8de   : > { %v5261_v43 = vmax.f32 %v5195_v33, 0.0 }
 0x8df   : > { %v5259_v47 = vmax.f32 %v5187_v25, 0.0 }
 0x8e0   : > { %v5293_v60 = vpack.c.bf16 %v5261_v43, %v5260_v35 }
 0x8e1   : > { %v5292_v17 = vpack.c.bf16 %v5259_v47, %v5258_v30 }
 0x8e3   : > { %7508 = vmatprep.mubr.bf16.mxu1 %v5292_v17 }
 0x8e4   : > { %7509 = vmatmul.mubr.bf16.gmra.mrb[252].mxu1 %v5293_v60 }
 0x8e5   : > { %v7486_v26 = vpop.f32.mrb[228].mxu1 }
 0x8e6   : > { %v5543_v37 = vpop.f32.mrb[229].mxu1  ;;  %v5552_v52 = vadd.f32 %v7486_v26, %v10277_v49 }
 0x8e7   : > { %v7487_v0 = vpop.f32.mrb[230].mxu1  ;;  %v5544_v48 = vadd.f32 %v10277_v49, %v5543_v37 }
 0x8e8   : > { %v5555_v20 = vadd.f32 %v7487_v0, %v10277_v49  ;;  %v5546_v63 = vpop.f32.mrb[231].mxu1 }
 0x8e9   : > { %v5547_v32 = vadd.f32 %v10277_v49, %v5546_v63 }
 0x8ea   : > { %v6459_v28 = vpack.c.bf16 %v5555_v20, %v5552_v52 }
 0x8eb   : > { %v6454_v29 = vpack.c.bf16 %v5547_v32, %v5544_v48 }
 0x8ec   : > { %6539 = vst [vmem:[%s10285_s17 + $0x98] sm:$0xff] %v6459_v28  }
 0x8ed   : > { %6538 = vst [vmem:[%s10285_s17 + $0x90] sm:$0xff] %v6454_v29  }
 0x90a   : > { %v7490_v62 = vpop.f32.mrb[232].mxu1 }
 0x90b   : > { %v5559_v3 = vpop.f32.mrb[233].mxu1  ;;  %v5568_v58 = vadd.f32 %v7490_v62, %v10277_v49 }
 0x90c   : > { %v7491_v6 = vpop.f32.mrb[234].mxu1  ;;  %v5560_v23 = vadd.f32 %v10277_v49, %v5559_v3 }
 0x90d   : > { %v5571_v27 = vadd.f32 %v7491_v6, %v10277_v49  ;;  %v5562_v24 = vpop.f32.mrb[235].mxu1 }
 0x90e   : > { %v5563_v1 = vadd.f32 %v10277_v49, %v5562_v24 }
 0x90f   : > { %v6469_v2 = vpack.c.bf16 %v5571_v27, %v5568_v58 }
 0x910   : > { %v6464_v19 = vpack.c.bf16 %v5563_v1, %v5560_v23 }
 0x911   : > { %6541 = vst [vmem:[%s10285_s17 + $0xa8] sm:$0xff] %v6469_v2  }
 0x912   : > { %6540 = vst [vmem:[%s10285_s17 + $0xa0] sm:$0xff] %v6464_v19  }
 0x92b   : > { %v7494_v57 = vpop.f32.mrb[236].mxu1 }
 0x92c   : > { %v5575_v21 = vpop.f32.mrb[237].mxu1  ;;  %v5584_v53 = vadd.f32 %v7494_v57, %v10277_v49 }
 0x92d   : > { %v7495_v45 = vpop.f32.mrb[238].mxu1  ;;  %v5576_v22 = vadd.f32 %v10277_v49, %v5575_v21 }
 0x92e   : > { %v5587_v10 = vadd.f32 %v7495_v45, %v10277_v49  ;;  %v5578_v12 = vpop.f32.mrb[239].mxu1 }
 0x92f   : > { %v5579_v15 = vadd.f32 %v10277_v49, %v5578_v12 }
 0x930   : > { %v6479_v34 = vpack.c.bf16 %v5587_v10, %v5584_v53 }
 0x931   : > { %v6474_v54 = vpack.c.bf16 %v5579_v15, %v5576_v22 }
 0x932   : > { %6543 = vst [vmem:[%s10285_s17 + $0xb8] sm:$0xff] %v6479_v34  }
 0x933   : > { %6542 = vst [vmem:[%s10285_s17 + $0xb0] sm:$0xff] %v6474_v54  }
 0x950   : > { %v7498_v5 = vpop.f32.mrb[240].mxu1 }
 0x951   : > { %v5591_v16 = vpop.f32.mrb[241].mxu1  ;;  %v5600_v18 = vadd.f32 %v7498_v5, %v10277_v49 }
 0x952   : > { %v7499_v42 = vpop.f32.mrb[242].mxu1  ;;  %v5592_v8 = vadd.f32 %v10277_v49, %v5591_v16 }
 0x953   : > { %v5603_v13 = vadd.f32 %v7499_v42, %v10277_v49  ;;  %v5594_v50 = vpop.f32.mrb[243].mxu1 }
 0x954   : > { %v5595_v61 = vadd.f32 %v10277_v49, %v5594_v50 }
 0x955   : > { %v6489_v39 = vpack.c.bf16 %v5603_v13, %v5600_v18 }
 0x956   : > { %v6484_v56 = vpack.c.bf16 %v5595_v61, %v5592_v8 }
 0x957   : > { %6545 = vst [vmem:[%s10285_s17 + $0xc8] sm:$0xff] %v6489_v39  }
 0x958   : > { %6544 = vst [vmem:[%s10285_s17 + $0xc0] sm:$0xff] %v6484_v56  }
 0x971   : > { %v7502_v59 = vpop.f32.mrb[244].mxu1 }
 0x972   : > { %v5607_v38 = vpop.f32.mrb[245].mxu1  ;;  %v5616_v55 = vadd.f32 %v7502_v59, %v10277_v49 }
 0x973   : > { %v7503_v46 = vpop.f32.mrb[246].mxu1  ;;  %v5608_v14 = vadd.f32 %v10277_v49, %v5607_v38 }
 0x974   : > { %v5619_v36 = vadd.f32 %v7503_v46, %v10277_v49  ;;  %v5610_v40 = vpop.f32.mrb[247].mxu1 }
 0x975   : > { %v5611_v9 = vadd.f32 %v10277_v49, %v5610_v40 }
 0x976   : > { %v6499_v51 = vpack.c.bf16 %v5619_v36, %v5616_v55 }
 0x977   : > { %v6494_v44 = vpack.c.bf16 %v5611_v9, %v5608_v14 }
 0x978   : > { %6547 = vst [vmem:[%s10285_s17 + $0xd8] sm:$0xff] %v6499_v51  }
 0x979   : > { %6546 = vst [vmem:[%s10285_s17 + $0xd0] sm:$0xff] %v6494_v44  }
 0x996   : > { %v7506_v41 = vpop.f32.mrb[248].mxu1 }
 0x997   : > { %v5623_v11 = vpop.f32.mrb[249].mxu1  ;;  %v5632_v31 = vadd.f32 %v7506_v41, %v10277_v49 }
 0x998   : > { %v7507_v7 = vpop.f32.mrb[250].mxu1  ;;  %v5624_v25 = vadd.f32 %v10277_v49, %v5623_v11 }
 0x999   : > { %v5635_v33 = vadd.f32 %v7507_v7, %v10277_v49  ;;  %v5626_v4 = vpop.f32.mrb[251].mxu1 }
 0x99a   : > { %v5627_v35 = vadd.f32 %v10277_v49, %v5626_v4 }
 0x99b   : > { %v6509_v43 = vpack.c.bf16 %v5635_v33, %v5632_v31 }
 0x99c   : > { %v6504_v30 = vpack.c.bf16 %v5627_v35, %v5624_v25 }
 0x99d   : > { %6549 = vst [vmem:[%s10285_s17 + $0xe8] sm:$0xff] %v6509_v43  }
 0x99e   : > { %6548 = vst [vmem:[%s10285_s17 + $0xe0] sm:$0xff] %v6504_v30  }
 0x9b7   : > { %v7510_v47 = vpop.f32.mrb[252].mxu1 }
 0x9b8   : > { %v5639_v60 = vpop.f32.mrb[253].mxu1  ;;  %v5648_v26 = vadd.f32 %v7510_v47, %v10277_v49 }
 0x9b9   : > { %v7511_v17 = vpop.f32.mrb[254].mxu1  ;;  %v5640_v52 = vadd.f32 %v10277_v49, %v5639_v60 }
 0x9ba   : > { %v5651_v37 = vadd.f32 %v7511_v17, %v10277_v49  ;;  %v5642_v0 = vpop.f32.mrb[255].mxu1 }
 0x9bb   : > { %v5643_v20 = vadd.f32 %v10277_v49, %v5642_v0 }
 0x9bc   : > { %v6519_v63 = vpack.c.bf16 %v5651_v37, %v5648_v26 }
 0x9bd   : > { %v6514_v48 = vpack.c.bf16 %v5643_v20, %v5640_v52 }
 0x9be   : > { %6551 = vst [vmem:[%s10285_s17 + $0xf8] sm:$0xff] %v6519_v63  }
 0x9bf   : > { %6550 = vst [vmem:[%s10285_s17 + $0xf0] sm:$0xff] %v6514_v48  }
 0x9c0   : > { %7734 = shalt.err (!%p7731_p3)
}
 0x9c1   : > { %s7735_s11 = scalar_lea.hbm %s10402_s28, 4096  ;;  %s7739_s15 = scalar_lea.hbm %s10457_s6, 8192 }
 0x9c2   : > { %p7736_p4 = scmp.ne.s32.totalorder %s10402_s28, %s7735_s11  ;;  %p7740_p9 = scmp.lt.u32.totalorder %s10402_s28, %s10457_s6 }
 0x9c3   : > { %p7741_p10 = scmp.lt.u32.totalorder %s7739_s15, %s7735_s11  ;;  %p7743_p12 = scmp.lt.u32.totalorder %s7735_s11, %s10402_s28 }
 0x9c4   : > { %p7737_p7 = pnand %p7736_p4, %p7864_p5 }
 0x9c5   : > { %p7742_p11 = por %p7741_p10, %p7740_p9 }
 0x9c6   : > { %p7738_p8 = pneg %p7737_p7 }
 0x9c7   : > { %p7744_p13 = por %p7743_p12, %p7742_p11 }
 0x9c9   : > { %p7745_p0 = pnand %p7744_p13, %p7738_p8 }
 0x9cb   : > { %7748 = shalt.err (!%p7745_p0)
}
 0x9cc   : > { %s7789_s18 = smov 64   ;;  %s7790_s20 = smov 4  }
 0x9cd   : > { %7512 = dma.vmem_to_hbm [thread:$0]  (%p7864_p5), %s10404_s19, 4096, %s10402_s28, %s10410_s25, %s7789_s18, %s7789_s18, %s7790_s20  }
 0x9ce PF: > { %p7518_p1 = scmp.ge.s32.totalorder %s7783_s24, 2  ;;  %s6003_s26 = sand.u32 1, %s7771_s21  }
 0x9cf   : > { %s6004_s29 = scalar_lea.sflag [#allocation3], %s6003_s26 }
 0x9d0   : > { %p7515_p2 = pnand %p7518_p1, %p7868_p6 }
 0x9d2   : > { %7766 = dma.done.wait (!%p7515_p2), %s6004_s29, 4096  }
 0x9d3   : > { %7768 = vsyncadd (!%p7515_p2), %s6004_s29, 4294963200  ;;  %p16_p3 = scmp.ge.s32.totalorder %s7851_s27, 4   ;;  %s11056_s21 = smov %s7775_s22 }
 0x9d4   : > { %s11057_s22 = smov %s7779_s23  ;;  %s11058_s23 = smov %s7862_s30 }
 0x9d5   : > { %s11059_s24 = smov %s7851_s27  ;;  %18 = sbr.rel (!%p16_p3) target bundleno = 3 (0x3), region = 86 }
 0x9dc   :  { %6009 = vsyncpa [#allocation3], 1 }
 0x9dd   :  { %6011 = vsyncpa [#allocation3 + $0x1], 1 }

</bundles_post_ra>
